<compile_context>
chip_gen: v7x
topology: tpu7x:2x2x1
jax: 0.10.0
libtpu: 0.0.40
codegen_flags: <defaults>
</compile_context>

<pallas_src>
import jax
import jax.numpy as jnp
from jax.experimental import pallas as pl
from jax.experimental.pallas import tpu as pltpu

EPS = 1e-5
LANE = 128
ROW_TILE = 1024     # pass-B row tile (512-2048 rows ~ HBM-roofline sweet spot)
PAD_COL = 8         # sublane-aligned column offset of the image interior inside the
                    # in-kernel halo scratch (keeps the interior store unmasked)


def _round_up(x, m):
    return (x + m - 1) // m * m


def _row_tile(m, target=ROW_TILE):
    t = (min(target, m) // 8) * 8
    while t >= 8:
        if m % t == 0:
            return t
        t -= 8
    return m                                     # block == full dim is always legal


def _pick_vmem_limit():
    """Per-generation scoped-VMEM budget (v5e/v6e: 128 MiB physical, v7x: 64 MiB)."""
    try:
        cap = int(getattr(pltpu.get_tpu_info(), "vmem_capacity_bytes", 0) or 0)
        if cap > 0:
            return max(32 * 1024 * 1024, min(cap * 3 // 4, 100 * 1024 * 1024))
    except Exception:
        pass
    return 48 * 1024 * 1024                      # safe default for every generation


VMEM_LIMIT = _pick_vmem_limit()


# ------------- pass A: 3x3 conv (+ fused input BN/ReLU) + per-image BN partials ---------
def _make_conv_kernel(fuse_affine):
    def kernel(*refs):
        if fuse_affine:
            x_ref, w_ref, scale_ref, shift_ref, y_ref, sum_ref, sq_ref, xpad_ref = refs
        else:
            x_ref, w_ref, y_ref, sum_ref, sq_ref, xpad_ref = refs

        h, w, cp = x_ref.shape[1], x_ref.shape[2], x_ref.shape[3]
        cop = y_ref.shape[3]

        # Build the zero halo in VMEM (no jnp.pad HBM round trip).  Re-zero every step so
        # the kernel stays correct when the grid axis is sharded across cores.
        xpad_ref[...] = jnp.zeros(xpad_ref.shape, xpad_ref.dtype)

        if fuse_affine:
            # Fused BN1 + ReLU on the raw conv1 output (f32 math -> v5e-safe), cast to bf16
            # only for the MXU operands.
            v = x_ref[0].astype(jnp.float32)
            v = jnp.maximum(v * scale_ref[...] + shift_ref[...], 0.0)
            interior = v.astype(jnp.bfloat16)
        else:
            interior = x_ref[0].astype(jnp.bfloat16)
        xpad_ref[1:h + 1, PAD_COL:PAD_COL + w, :] = interior

        # 3 MXU matmuls (one per kernel row); the 3 column taps are stacked into K = 3*Cp.
        acc = jnp.zeros((h * w, cop), jnp.float32)
        for ky in range(3):
            row = xpad_ref[ky:ky + h, :, :]                              # (h, w+16, cp) bf16
            patch = jnp.concatenate(
                [row[:, PAD_COL - 1:PAD_COL - 1 + w, :],                 # kx = 0
                 row[:, PAD_COL:PAD_COL + w, :],                         # kx = 1
                 row[:, PAD_COL + 1:PAD_COL + 1 + w, :]], axis=-1)       # kx = 2
            acc = acc + jnp.dot(patch.reshape(h * w, 3 * cp), w_ref[ky],
                                preferred_element_type=jnp.float32)

        y_ref[0] = acc.reshape(h, w, cop).astype(y_ref.dtype)
        # Per-image BN partial stats (f32), reduced across images in the JAX glue.
        sum_ref[0] = jnp.broadcast_to(jnp.sum(acc, axis=0, keepdims=True), (8, cop))
        sq_ref[0] = jnp.broadcast_to(jnp.sum(acc * acc, axis=0, keepdims=True), (8, cop))

    return kernel


def _conv3x3_bn_stats(x_nhwc, w3, scale=None, shift=None):
    """3x3 conv (stride 1, pad 1) per image + per-image BN partial stats.

    x_nhwc : (N, H, W, Cp)   f32 or bf16
    w3     : (3, 3*Cp, Cop)  bf16 tap matrices (column taps stacked into K)
    scale, shift : optional (1, Cp) f32 -> fused affine + ReLU on the input (BN1+ReLU).
    """
    n, h, w, cp = x_nhwc.shape
    cop = w3.shape[-1]
    fuse = scale is not None

    in_specs = [pl.BlockSpec((1, h, w, cp), lambda i: (i, 0, 0, 0)),
                pl.BlockSpec((3, 3 * cp, cop), lambda i: (0, 0, 0))]    # resident weights
    args = [x_nhwc, w3]
    if fuse:
        in_specs += [pl.BlockSpec((1, cp), lambda i: (0, 0)),
                     pl.BlockSpec((1, cp), lambda i: (0, 0))]
        args += [scale, shift]

    return pl.pallas_call(
        _make_conv_kernel(fuse),
        out_shape=(jax.ShapeDtypeStruct((n, h, w, cop), jnp.bfloat16),   # raw conv output
                   jax.ShapeDtypeStruct((n, 8, cop), jnp.float32),       # per-image sum
                   jax.ShapeDtypeStruct((n, 8, cop), jnp.float32)),      # per-image sum sq
        grid_spec=pltpu.PrefetchScalarGridSpec(
            num_scalar_prefetch=0,
            grid=(n,),
            in_specs=in_specs,
            out_specs=[pl.BlockSpec((1, h, w, cop), lambda i: (i, 0, 0, 0)),
                       pl.BlockSpec((1, 8, cop), lambda i: (i, 0, 0)),
                       pl.BlockSpec((1, 8, cop), lambda i: (i, 0, 0))],
            scratch_shapes=[pltpu.VMEM((h + 2, w + 2 * PAD_COL, cp), jnp.bfloat16)]),
        compiler_params=pltpu.CompilerParams(
            dimension_semantics=("parallel",),      # per-image partials -> v7x megacore OK
            vmem_limit_bytes=VMEM_LIMIT),
    )(*args)


# ---------------- pass B: BN2 + identity residual + ReLU epilogue -----------------------
def _bn_res_relu_kernel(y_ref, scale_ref, shift_ref, res_ref, o_ref):
    # bf16 loads are upcast before any VPU math (v5e has no bf16 VALU).
    v = y_ref[...].astype(jnp.float32) * scale_ref[...] + shift_ref[...]
    o_ref[...] = jnp.maximum(v + res_ref[...].astype(jnp.float32), 0.0)


def _bn_res_relu(y2d, scale, shift, res2d):
    m, cop = y2d.shape
    tm = _row_tile(m)
    row = pl.BlockSpec((tm, cop), lambda i: (i, 0))
    vec = pl.BlockSpec((1, cop), lambda i: (0, 0))          # resident scale / shift
    return pl.pallas_call(
        _bn_res_relu_kernel,
        out_shape=jax.ShapeDtypeStruct((m, cop), jnp.float32),
        grid_spec=pltpu.PrefetchScalarGridSpec(
            num_scalar_prefetch=0,
            grid=(m // tm,),
            in_specs=[row, vec, vec, row],
            out_specs=row),
        compiler_params=pltpu.CompilerParams(
            dimension_semantics=("parallel",),
            vmem_limit_bytes=VMEM_LIMIT),
    )(y2d, scale, shift, res2d)


# ------------------------------------ JAX glue ------------------------------------------
def _fold_bn(sum_part, sq_part, gamma, beta, count):
    s = jnp.sum(sum_part[:, 0, :], axis=0, keepdims=True)          # (1, Cp)
    q = jnp.sum(sq_part[:, 0, :], axis=0, keepdims=True)
    mean = s / count
    var = jnp.maximum(q / count - mean * mean, 0.0)                 # biased var (BN fwd)
    scale = gamma * jax.lax.rsqrt(var + EPS)
    shift = beta - mean * scale
    return scale, shift


def _prep_conv_weight(w_oihw, cp, cop):
    cout, cin, kh, kw = w_oihw.shape
    wt = jnp.transpose(w_oihw.astype(jnp.float32), (2, 3, 1, 0))    # (ky, kx, cin, cout)
    wt = jnp.pad(wt, ((0, 0), (0, 0), (0, cp - cin), (0, cop - cout)))
    return wt.reshape(kh, kw * cp, cop).astype(jnp.bfloat16)        # (3, 3*Cp, Cop)


def _prep_bn_param(p, cp):
    p = p.astype(jnp.float32).reshape(1, -1)
    return jnp.pad(p, ((0, 0), (0, cp - p.shape[1])))


def basic_block_forward(x_nchw, params):
    """BasicBlock_18_34 forward (stride=1, downsample=None) with training-mode BN."""
    # TODO(synk): stride=2 / projection-downsample variant is not instantiated
    # (module defaults: stride=1, downsample=None).
    x = jnp.transpose(x_nchw, (0, 2, 3, 1)).astype(jnp.float32)     # NCHW -> NHWC
    n, h, w, c = x.shape
    cp = _round_up(c, LANE)
    m = n * h * w

    # TODO(synk): for C << 128 (like this C=8 smoke test) a space-to-depth packing would
    # make the 128-lane tiles dense; the kernel is sized for real ResNet blocks (C >= 64).
    x_p = jnp.pad(x, ((0, 0), (0, 0), (0, 0), (0, cp - c)))          # lane-dense channels
    w1 = _prep_conv_weight(params["conv1_w"], cp, cp)
    w2 = _prep_conv_weight(params["conv2_w"], cp, cp)
    g1 = _prep_bn_param(params["bn1_g"], cp)
    b1 = _prep_bn_param(params["bn1_b"], cp)
    g2 = _prep_bn_param(params["bn2_g"], cp)
    b2 = _prep_bn_param(params["bn2_b"], cp)

    # Stage 1: conv1 (+ BN1 batch partial stats); raw conv output stored bf16.
    y1, s1, q1 = _conv3x3_bn_stats(x_p, w1)
    scale1, shift1 = _fold_bn(s1, q1, g1, b1, float(m))

    # Stage 2: BN1 + ReLU fused into conv2's input path (halo built in VMEM, no HBM pad).
    y2, s2, q2 = _conv3x3_bn_stats(y1, w2, scale1, shift1)
    scale2, shift2 = _fold_bn(s2, q2, g2, b2, float(m))

    # Epilogue: BN2 + identity residual + ReLU.
    out = _bn_res_relu(y2.reshape(m, cp), scale2, shift2, x_p.reshape(m, cp))
    out = out.reshape(n, h, w, cp)[..., :c]
    return jnp.transpose(out, (0, 3, 1, 2))                          # NHWC -> NCHW


# ------------------------------- pure-JAX reference -------------------------------------
def reference_forward(x_nchw, params, matmul_dtype=jnp.float32, act_dtype=jnp.float32):
    """Reference.  matmul_dtype / act_dtype let it mirror the kernel's bf16 MXU operands
    and bf16 inter-stage activation storage for a tight structural check."""
    x = jnp.transpose(x_nchw, (0, 2, 3, 1)).astype(jnp.float32)
    dn = ("NHWC", "HWIO", "NHWC")

    def conv(inp, w_oihw):
        w_hwio = jnp.transpose(w_oihw, (2, 3, 1, 0))
        return jax.lax.conv_general_dilated(
            inp.astype(matmul_dtype), w_hwio.astype(matmul_dtype), (1, 1), "SAME",
            dimension_numbers=dn, preferred_element_type=jnp.float32)

    def fold(v, g, b):
        mean = jnp.mean(v, axis=(0, 1, 2))
        var = jnp.maximum(jnp.mean(v * v, axis=(0, 1, 2)) - mean * mean, 0.0)
        scale = g * jax.lax.rsqrt(var + EPS)
        shift = b - mean * scale
        return scale.reshape(1, 1, 1, -1), shift.reshape(1, 1, 1, -1)

    def q(v):                                   # mimic bf16 activation storage
        return v.astype(act_dtype).astype(jnp.float32)

    y1 = conv(x, params["conv1_w"])
    s1, t1 = fold(y1, params["bn1_g"], params["bn1_b"])
    a1 = q(jnp.maximum(q(y1) * s1 + t1, 0.0))
    y2 = conv(a1, params["conv2_w"])
    s2, t2 = fold(y2, params["bn2_g"], params["bn2_b"])
    out = jnp.maximum(q(y2) * s2 + t2 + x, 0.0)
    return jnp.transpose(out, (0, 3, 1, 2))


# --------------------------------------- main -------------------------------------------
if __name__ == "__main__":
    N, C, H, W = 2, 8, 16, 16                   # input_channel == output_channel, stride=1
    key = jax.random.PRNGKey(0)
    kx, kw1, kw2, kg1, kb1, kg2, kb2 = jax.random.split(key, 7)

    x = jax.random.normal(kx, (N, C, H, W), jnp.float32)
    params = {
        "conv1_w": 0.1 * jax.random.normal(kw1, (C, C, 3, 3), jnp.float32),
        "conv2_w": 0.1 * jax.random.normal(kw2, (C, C, 3, 3), jnp.float32),
        "bn1_g": 1.0 + 0.1 * jax.random.normal(kg1, (C,), jnp.float32),
        "bn1_b": 0.1 * jax.random.normal(kb1, (C,), jnp.float32),
        "bn2_g": 1.0 + 0.1 * jax.random.normal(kg2, (C,), jnp.float32),
        "bn2_b": 0.1 * jax.random.normal(kb2, (C,), jnp.float32),
    }

    out = jax.block_until_ready(jax.jit(basic_block_forward)(x, params))
    assert out.shape == (N, C, H, W)

    # Structural check: reference mirrors the kernel's bf16 quantization points -> tight.
    ref_bf16 = reference_forward(x, params, matmul_dtype=jnp.bfloat16,
                                 act_dtype=jnp.bfloat16)
    err_b = float(jnp.max(jnp.abs(out - ref_bf16)))
    assert jnp.allclose(out, ref_bf16, rtol=5e-3, atol=5e-3), \
        f"bf16-matched max abs err {err_b}"

    # Module-semantics check vs pure-f32 reference (bf16 MXU quantization drift allowed).
    ref_f32 = reference_forward(x, params)
    err_f = float(jnp.max(jnp.abs(out - ref_f32)))
    assert jnp.allclose(out, ref_f32, rtol=5e-2, atol=5e-2), f"f32 max abs err {err_f}"

    print("KERNEL_OK")
</pallas_src>

<mosaic_0001>
module attributes {stable_mosaic.version = 11 : i64} {
  func.func @kernel(%arg0: i32, %arg1: memref<1x16x16x128xf32, #tpu.memory_space<vmem>>, %arg2: memref<3x384x128xbf16, #tpu.memory_space<vmem>>, %arg3: memref<1x16x16x128xbf16, #tpu.memory_space<vmem>>, %arg4: memref<1x8x128xf32, #tpu.memory_space<vmem>>, %arg5: memref<1x8x128xf32, #tpu.memory_space<vmem>>, %arg6: memref<18x32x128xbf16, #tpu.memory_space<vmem>>) attributes {dimension_semantics = [#tpu.dimension_semantics<parallel>], iteration_bounds = array<i64: 2>, scalar_prefetch = 0 : i64, scratch_operands = 1 : i64, tpu.core_type = #tpu.core_type<tc>, window_params = [{transform_indices = @transform_0, window_bounds = array<i64: 1, 16, 16, 128>}, {pipeline_mode = #tpu.pipeline_mode<synchronous>, transform_indices = @transform_1, window_bounds = array<i64: 3, 384, 128>}, {transform_indices = @transform_2, window_bounds = array<i64: 1, 16, 16, 128>}, {transform_indices = @transform_3, window_bounds = array<i64: 1, 8, 128>}, {transform_indices = @transform_4, window_bounds = array<i64: 1, 8, 128>}]} {
    %cst = arith.constant 0.000000e+00 : bf16
    %0 = vector.broadcast %cst : bf16 to vector<18x32x128xbf16>
    %c0 = arith.constant 0 : index
    %c0_0 = arith.constant 0 : index
    %c0_1 = arith.constant 0 : index
    %1 = vector.load %arg6[%c0, %c0_0, %c0_1] : memref<18x32x128xbf16, #tpu.memory_space<vmem>>, vector<18x32x128xbf16>
    tpu.vector_store %arg6[%c0, %c0_0, %c0_1], %0 {strides = array<i32>} : memref<18x32x128xbf16, #tpu.memory_space<vmem>>, vector<18x32x128xbf16>,
    %c0_2 = arith.constant 0 : index
    %c0_3 = arith.constant 0 : index
    %c0_4 = arith.constant 0 : index
    %c0_5 = arith.constant 0 : index
    %2 = vector.load %arg1[%c0_2, %c0_3, %c0_4, %c0_5] : memref<1x16x16x128xf32, #tpu.memory_space<vmem>>, vector<1x16x16x128xf32>
    %3 = vector.shape_cast %2 : vector<1x16x16x128xf32> to vector<16x16x128xf32>
    %4 = arith.truncf %3 : vector<16x16x128xf32> to vector<16x16x128xbf16>
    %c1 = arith.constant 1 : index
    %c8 = arith.constant 8 : index
    %c0_6 = arith.constant 0 : index
    %5 = vector.load %arg6[%c1, %c8, %c0_6] : memref<18x32x128xbf16, #tpu.memory_space<vmem>>, vector<16x16x128xbf16>
    tpu.vector_store %arg6[%c1, %c8, %c0_6], %4 {strides = array<i32>} : memref<18x32x128xbf16, #tpu.memory_space<vmem>>, vector<16x16x128xbf16>,
    %cst_7 = arith.constant 0.000000e+00 : f32
    %6 = vector.broadcast %cst_7 : f32 to vector<256x128xf32>
    %c0_8 = arith.constant 0 : index
    %c0_9 = arith.constant 0 : index
    %c0_10 = arith.constant 0 : index
    %7 = vector.load %arg6[%c0_8, %c0_9, %c0_10] : memref<18x32x128xbf16, #tpu.memory_space<vmem>>, vector<16x32x128xbf16>
    %8 = vector.extract_strided_slice %7 {offsets = [0, 7, 0], sizes = [16, 16, 128], strides = [1, 1, 1]} : vector<16x32x128xbf16> to vector<16x16x128xbf16>
    %9 = vector.extract_strided_slice %7 {offsets = [0, 8, 0], sizes = [16, 16, 128], strides = [1, 1, 1]} : vector<16x32x128xbf16> to vector<16x16x128xbf16>
    %10 = vector.extract_strided_slice %7 {offsets = [0, 9, 0], sizes = [16, 16, 128], strides = [1, 1, 1]} : vector<16x32x128xbf16> to vector<16x16x128xbf16>
    %11 = tpu.concatenate %8, %9, %10 in 2 : vector<16x16x128xbf16>, vector<16x16x128xbf16>, vector<16x16x128xbf16> -> vector<16x16x384xbf16>
    %12 = vector.shape_cast %11 : vector<16x16x384xbf16> to vector<256x384xbf16>
    %c0_11 = arith.constant 0 : index
    %c0_12 = arith.constant 0 : index
    %c0_13 = arith.constant 0 : index
    %13 = vector.load %arg2[%c0_11, %c0_12, %c0_13] : memref<3x384x128xbf16, #tpu.memory_space<vmem>>, vector<1x384x128xbf16>
    %14 = vector.shape_cast %13 : vector<1x384x128xbf16> to vector<384x128xbf16>
    %cst_14 = arith.constant dense<0.000000e+00> : vector<256x128xf32>
    %15 = tpu.matmul %12, %14, %cst_14 {dimension_numbers = #tpu.dot_dimension_numbers<[1], [0], [0], [1], [0, 0, 1, 1], [], []>} : vector<256x384xbf16>, vector<384x128xbf16>, vector<256x128xf32> -> vector<256x128xf32>
    %16 = arith.addf %6, %15 : vector<256x128xf32>
    %c1_15 = arith.constant 1 : index
    %c0_16 = arith.constant 0 : index
    %c0_17 = arith.constant 0 : index
    %17 = vector.load %arg6[%c1_15, %c0_16, %c0_17] : memref<18x32x128xbf16, #tpu.memory_space<vmem>>, vector<16x32x128xbf16>
    %18 = vector.extract_strided_slice %17 {offsets = [0, 7, 0], sizes = [16, 16, 128], strides = [1, 1, 1]} : vector<16x32x128xbf16> to vector<16x16x128xbf16>
    %19 = vector.extract_strided_slice %17 {offsets = [0, 8, 0], sizes = [16, 16, 128], strides = [1, 1, 1]} : vector<16x32x128xbf16> to vector<16x16x128xbf16>
    %20 = vector.extract_strided_slice %17 {offsets = [0, 9, 0], sizes = [16, 16, 128], strides = [1, 1, 1]} : vector<16x32x128xbf16> to vector<16x16x128xbf16>
    %21 = tpu.concatenate %18, %19, %20 in 2 : vector<16x16x128xbf16>, vector<16x16x128xbf16>, vector<16x16x128xbf16> -> vector<16x16x384xbf16>
    %22 = vector.shape_cast %21 : vector<16x16x384xbf16> to vector<256x384xbf16>
    %c1_18 = arith.constant 1 : index
    %c0_19 = arith.constant 0 : index
    %c0_20 = arith.constant 0 : index
    %23 = vector.load %arg2[%c1_18, %c0_19, %c0_20] : memref<3x384x128xbf16, #tpu.memory_space<vmem>>, vector<1x384x128xbf16>
    %24 = vector.shape_cast %23 : vector<1x384x128xbf16> to vector<384x128xbf16>
    %cst_21 = arith.constant dense<0.000000e+00> : vector<256x128xf32>
    %25 = tpu.matmul %22, %24, %cst_21 {dimension_numbers = #tpu.dot_dimension_numbers<[1], [0], [0], [1], [0, 0, 1, 1], [], []>} : vector<256x384xbf16>, vector<384x128xbf16>, vector<256x128xf32> -> vector<256x128xf32>
    %26 = arith.addf %16, %25 : vector<256x128xf32>
    %c2 = arith.constant 2 : index
    %c0_22 = arith.constant 0 : index
    %c0_23 = arith.constant 0 : index
    %27 = vector.load %arg6[%c2, %c0_22, %c0_23] : memref<18x32x128xbf16, #tpu.memory_space<vmem>>, vector<16x32x128xbf16>
    %28 = vector.extract_strided_slice %27 {offsets = [0, 7, 0], sizes = [16, 16, 128], strides = [1, 1, 1]} : vector<16x32x128xbf16> to vector<16x16x128xbf16>
    %29 = vector.extract_strided_slice %27 {offsets = [0, 8, 0], sizes = [16, 16, 128], strides = [1, 1, 1]} : vector<16x32x128xbf16> to vector<16x16x128xbf16>
    %30 = vector.extract_strided_slice %27 {offsets = [0, 9, 0], sizes = [16, 16, 128], strides = [1, 1, 1]} : vector<16x32x128xbf16> to vector<16x16x128xbf16>
    %31 = tpu.concatenate %28, %29, %30 in 2 : vector<16x16x128xbf16>, vector<16x16x128xbf16>, vector<16x16x128xbf16> -> vector<16x16x384xbf16>
    %32 = vector.shape_cast %31 : vector<16x16x384xbf16> to vector<256x384xbf16>
    %c2_24 = arith.constant 2 : index
    %c0_25 = arith.constant 0 : index
    %c0_26 = arith.constant 0 : index
    %33 = vector.load %arg2[%c2_24, %c0_25, %c0_26] : memref<3x384x128xbf16, #tpu.memory_space<vmem>>, vector<1x384x128xbf16>
    %34 = vector.shape_cast %33 : vector<1x384x128xbf16> to vector<384x128xbf16>
    %cst_27 = arith.constant dense<0.000000e+00> : vector<256x128xf32>
    %35 = tpu.matmul %32, %34, %cst_27 {dimension_numbers = #tpu.dot_dimension_numbers<[1], [0], [0], [1], [0, 0, 1, 1], [], []>} : vector<256x384xbf16>, vector<384x128xbf16>, vector<256x128xf32> -> vector<256x128xf32>
    %36 = arith.addf %26, %35 : vector<256x128xf32>
    %37 = vector.shape_cast %36 : vector<256x128xf32> to vector<16x16x128xf32>
    %38 = arith.truncf %37 : vector<16x16x128xf32> to vector<16x16x128xbf16>
    %c0_28 = arith.constant 0 : index
    %c0_29 = arith.constant 0 : index
    %c0_30 = arith.constant 0 : index
    %c0_31 = arith.constant 0 : index
    %39 = vector.load %arg3[%c0_28, %c0_29, %c0_30, %c0_31] : memref<1x16x16x128xbf16, #tpu.memory_space<vmem>>, vector<1x16x16x128xbf16>
    %40 = vector.shape_cast %39 : vector<1x16x16x128xbf16> to vector<16x16x128xbf16>
    %41 = vector.shape_cast %38 : vector<16x16x128xbf16> to vector<1x16x16x128xbf16>
    tpu.vector_store %arg3[%c0_28, %c0_29, %c0_30, %c0_31], %41 {strides = array<i32>} : memref<1x16x16x128xbf16, #tpu.memory_space<vmem>>, vector<1x16x16x128xbf16>,
    %cst_32 = arith.constant dense<0.000000e+00> : vector<128xf32>
    %42 = vector.multi_reduction <add>, %36, %cst_32 [0] : vector<256x128xf32> to vector<128xf32>
    %43 = vector.shape_cast %42 : vector<128xf32> to vector<1x128xf32>
    %44 = vector.shape_cast %43 : vector<1x128xf32> to vector<1x128xf32>
    %45 = vector.broadcast %44 : vector<1x128xf32> to vector<8x128xf32>
    %c0_33 = arith.constant 0 : index
    %c0_34 = arith.constant 0 : index
    %c0_35 = arith.constant 0 : index
    %46 = vector.load %arg4[%c0_33, %c0_34, %c0_35] : memref<1x8x128xf32, #tpu.memory_space<vmem>>, vector<1x8x128xf32>
    %47 = vector.shape_cast %46 : vector<1x8x128xf32> to vector<8x128xf32>
    %48 = vector.shape_cast %45 : vector<8x128xf32> to vector<1x8x128xf32>
    tpu.vector_store %arg4[%c0_33, %c0_34, %c0_35], %48 {strides = array<i32>} : memref<1x8x128xf32, #tpu.memory_space<vmem>>, vector<1x8x128xf32>,
    %49 = arith.mulf %36, %36 : vector<256x128xf32>
    %cst_36 = arith.constant dense<0.000000e+00> : vector<128xf32>
    %50 = vector.multi_reduction <add>, %49, %cst_36 [0] : vector<256x128xf32> to vector<128xf32>
    %51 = vector.shape_cast %50 : vector<128xf32> to vector<1x128xf32>
    %52 = vector.shape_cast %51 : vector<1x128xf32> to vector<1x128xf32>
    %53 = vector.broadcast %52 : vector<1x128xf32> to vector<8x128xf32>
    %c0_37 = arith.constant 0 : index
    %c0_38 = arith.constant 0 : index
    %c0_39 = arith.constant 0 : index
    %54 = vector.load %arg5[%c0_37, %c0_38, %c0_39] : memref<1x8x128xf32, #tpu.memory_space<vmem>>, vector<1x8x128xf32>
    %55 = vector.shape_cast %54 : vector<1x8x128xf32> to vector<8x128xf32>
    %56 = vector.shape_cast %53 : vector<8x128xf32> to vector<1x8x128xf32>
    tpu.vector_store %arg5[%c0_37, %c0_38, %c0_39], %56 {strides = array<i32>} : memref<1x8x128xf32, #tpu.memory_space<vmem>>, vector<1x8x128xf32>,
    return
  }
  func.func @transform_0(%arg0: i32) -> (i32, i32, i32, i32) {
    %c0_i32 = arith.constant 0 : i32
    %c0_i32_0 = arith.constant 0 : i32
    %c0_i32_1 = arith.constant 0 : i32
    %c0_i32_2 = arith.constant 0 : i32
    return %arg0, %c0_i32, %c0_i32_0, %c0_i32_1 : i32, i32, i32, i32
  }
  func.func @transform_1(%arg0: i32) -> (i32, i32, i32) {
    %c0_i32 = arith.constant 0 : i32
    %c0_i32_0 = arith.constant 0 : i32
    %c0_i32_1 = arith.constant 0 : i32
    %c0_i32_2 = arith.constant 0 : i32
    return %c0_i32, %c0_i32_0, %c0_i32_1 : i32, i32, i32
  }
  func.func @transform_2(%arg0: i32) -> (i32, i32, i32, i32) {
    %c0_i32 = arith.constant 0 : i32
    %c0_i32_0 = arith.constant 0 : i32
    %c0_i32_1 = arith.constant 0 : i32
    %c0_i32_2 = arith.constant 0 : i32
    return %arg0, %c0_i32, %c0_i32_0, %c0_i32_1 : i32, i32, i32, i32
  }
  func.func @transform_3(%arg0: i32) -> (i32, i32, i32) {
    %c0_i32 = arith.constant 0 : i32
    %c0_i32_0 = arith.constant 0 : i32
    %c0_i32_1 = arith.constant 0 : i32
    return %arg0, %c0_i32, %c0_i32_0 : i32, i32, i32
  }
  func.func @transform_4(%arg0: i32) -> (i32, i32, i32) {
    %c0_i32 = arith.constant 0 : i32
    %c0_i32_0 = arith.constant 0 : i32
    %c0_i32_1 = arith.constant 0 : i32
    return %arg0, %c0_i32, %c0_i32_0 : i32, i32, i32
  }
}

module attributes {stable_mosaic.version = 11 : i64} {
  func.func @_bn_res_relu_kernel(%arg0: i32, %arg1: memref<512x128xbf16, #tpu.memory_space<vmem>>, %arg2: memref<1x128xf32, #tpu.memory_space<vmem>>, %arg3: memref<1x128xf32, #tpu.memory_space<vmem>>, %arg4: memref<512x128xf32, #tpu.memory_space<vmem>>, %arg5: memref<512x128xf32, #tpu.memory_space<vmem>>) attributes {dimension_semantics = [#tpu.dimension_semantics<parallel>], iteration_bounds = array<i64: 1>, scalar_prefetch = 0 : i64, scratch_operands = 0 : i64, tpu.core_type = #tpu.core_type<tc>, window_params = [{transform_indices = @transform_0, window_bounds = array<i64: 512, 128>}, {pipeline_mode = #tpu.pipeline_mode<synchronous>, transform_indices = @transform_1, window_bounds = array<i64: 1, 128>}, {pipeline_mode = #tpu.pipeline_mode<synchronous>, transform_indices = @transform_2, window_bounds = array<i64: 1, 128>}, {transform_indices = @transform_3, window_bounds = array<i64: 512, 128>}, {transform_indices = @transform_4, window_bounds = array<i64: 512, 128>}]} {
    %c0 = arith.constant 0 : index
    %c0_0 = arith.constant 0 : index
    %0 = vector.load %arg1[%c0, %c0_0] : memref<512x128xbf16, #tpu.memory_space<vmem>>, vector<512x128xbf16>
    %1 = arith.extf %0 : vector<512x128xbf16> to vector<512x128xf32>
    %c0_1 = arith.constant 0 : index
    %c0_2 = arith.constant 0 : index
    %2 = vector.load %arg2[%c0_1, %c0_2] : memref<1x128xf32, #tpu.memory_space<vmem>>, vector<1x128xf32>
    %3 = vector.broadcast %2 : vector<1x128xf32> to vector<512x128xf32>
    %4 = arith.mulf %1, %3 : vector<512x128xf32>
    %c0_3 = arith.constant 0 : index
    %c0_4 = arith.constant 0 : index
    %5 = vector.load %arg3[%c0_3, %c0_4] : memref<1x128xf32, #tpu.memory_space<vmem>>, vector<1x128xf32>
    %6 = vector.broadcast %5 : vector<1x128xf32> to vector<512x128xf32>
    %7 = arith.addf %4, %6 : vector<512x128xf32>
    %c0_5 = arith.constant 0 : index
    %c0_6 = arith.constant 0 : index
    %8 = vector.load %arg4[%c0_5, %c0_6] : memref<512x128xf32, #tpu.memory_space<vmem>>, vector<512x128xf32>
    %9 = arith.addf %7, %8 : vector<512x128xf32>
    %cst = arith.constant 0.000000e+00 : f32
    %10 = vector.broadcast %cst : f32 to vector<512x128xf32>
    %11 = arith.maximumf %9, %10 : vector<512x128xf32>
    %c0_7 = arith.constant 0 : index
    %c0_8 = arith.constant 0 : index
    %12 = vector.load %arg5[%c0_7, %c0_8] : memref<512x128xf32, #tpu.memory_space<vmem>>, vector<512x128xf32>
    tpu.vector_store %arg5[%c0_7, %c0_8], %11 {strides = array<i32>} : memref<512x128xf32, #tpu.memory_space<vmem>>, vector<512x128xf32>,
    return
  }
  func.func @transform_0(%arg0: i32) -> (i32, i32) {
    %c0_i32 = arith.constant 0 : i32
    %c0_i32_0 = arith.constant 0 : i32
    return %arg0, %c0_i32 : i32, i32
  }
  func.func @transform_1(%arg0: i32) -> (i32, i32) {
    %c0_i32 = arith.constant 0 : i32
    %c0_i32_0 = arith.constant 0 : i32
    %c0_i32_1 = arith.constant 0 : i32
    return %c0_i32, %c0_i32_0 : i32, i32
  }
  func.func @transform_2(%arg0: i32) -> (i32, i32) {
    %c0_i32 = arith.constant 0 : i32
    %c0_i32_0 = arith.constant 0 : i32
    %c0_i32_1 = arith.constant 0 : i32
    return %c0_i32, %c0_i32_0 : i32, i32
  }
  func.func @transform_3(%arg0: i32) -> (i32, i32) {
    %c0_i32 = arith.constant 0 : i32
    %c0_i32_0 = arith.constant 0 : i32
    return %arg0, %c0_i32 : i32, i32
  }
  func.func @transform_4(%arg0: i32) -> (i32, i32) {
    %c0_i32 = arith.constant 0 : i32
    %c0_i32_0 = arith.constant 0 : i32
    return %arg0, %c0_i32 : i32, i32
  }
}

module attributes {stable_mosaic.version = 11 : i64} {
  func.func @kernel(%arg0: i32, %arg1: memref<1x16x16x128xbf16, #tpu.memory_space<vmem>>, %arg2: memref<3x384x128xbf16, #tpu.memory_space<vmem>>, %arg3: memref<1x128xf32, #tpu.memory_space<vmem>>, %arg4: memref<1x128xf32, #tpu.memory_space<vmem>>, %arg5: memref<1x16x16x128xbf16, #tpu.memory_space<vmem>>, %arg6: memref<1x8x128xf32, #tpu.memory_space<vmem>>, %arg7: memref<1x8x128xf32, #tpu.memory_space<vmem>>, %arg8: memref<18x32x128xbf16, #tpu.memory_space<vmem>>) attributes {dimension_semantics = [#tpu.dimension_semantics<parallel>], iteration_bounds = array<i64: 2>, scalar_prefetch = 0 : i64, scratch_operands = 1 : i64, tpu.core_type = #tpu.core_type<tc>, window_params = [{transform_indices = @transform_0, window_bounds = array<i64: 1, 16, 16, 128>}, {pipeline_mode = #tpu.pipeline_mode<synchronous>, transform_indices = @transform_1, window_bounds = array<i64: 3, 384, 128>}, {pipeline_mode = #tpu.pipeline_mode<synchronous>, transform_indices = @transform_2, window_bounds = array<i64: 1, 128>}, {pipeline_mode = #tpu.pipeline_mode<synchronous>, transform_indices = @transform_3, window_bounds = array<i64: 1, 128>}, {transform_indices = @transform_4, window_bounds = array<i64: 1, 16, 16, 128>}, {transform_indices = @transform_5, window_bounds = array<i64: 1, 8, 128>}, {transform_indices = @transform_6, window_bounds = array<i64: 1, 8, 128>}]} {
    %cst = arith.constant 0.000000e+00 : bf16
    %0 = vector.broadcast %cst : bf16 to vector<18x32x128xbf16>
    %c0 = arith.constant 0 : index
    %c0_0 = arith.constant 0 : index
    %c0_1 = arith.constant 0 : index
    %1 = vector.load %arg8[%c0, %c0_0, %c0_1] : memref<18x32x128xbf16, #tpu.memory_space<vmem>>, vector<18x32x128xbf16>
    tpu.vector_store %arg8[%c0, %c0_0, %c0_1], %0 {strides = array<i32>} : memref<18x32x128xbf16, #tpu.memory_space<vmem>>, vector<18x32x128xbf16>,
    %c0_2 = arith.constant 0 : index
    %c0_3 = arith.constant 0 : index
    %c0_4 = arith.constant 0 : index
    %c0_5 = arith.constant 0 : index
    %2 = vector.load %arg1[%c0_2, %c0_3, %c0_4, %c0_5] : memref<1x16x16x128xbf16, #tpu.memory_space<vmem>>, vector<1x16x16x128xbf16>
    %3 = vector.shape_cast %2 : vector<1x16x16x128xbf16> to vector<16x16x128xbf16>
    %4 = arith.extf %3 : vector<16x16x128xbf16> to vector<16x16x128xf32>
    %c0_6 = arith.constant 0 : index
    %c0_7 = arith.constant 0 : index
    %5 = vector.load %arg3[%c0_6, %c0_7] : memref<1x128xf32, #tpu.memory_space<vmem>>, vector<1x128xf32>
    %6 = vector.shape_cast %5 : vector<1x128xf32> to vector<1x1x128xf32>
    %7 = vector.broadcast %6 : vector<1x1x128xf32> to vector<16x16x128xf32>
    %8 = arith.mulf %4, %7 : vector<16x16x128xf32>
    %c0_8 = arith.constant 0 : index
    %c0_9 = arith.constant 0 : index
    %9 = vector.load %arg4[%c0_8, %c0_9] : memref<1x128xf32, #tpu.memory_space<vmem>>, vector<1x128xf32>
    %10 = vector.shape_cast %9 : vector<1x128xf32> to vector<1x1x128xf32>
    %11 = vector.broadcast %10 : vector<1x1x128xf32> to vector<16x16x128xf32>
    %12 = arith.addf %8, %11 : vector<16x16x128xf32>
    %cst_10 = arith.constant 0.000000e+00 : f32
    %13 = vector.broadcast %cst_10 : f32 to vector<16x16x128xf32>
    %14 = arith.maximumf %12, %13 : vector<16x16x128xf32>
    %15 = arith.truncf %14 : vector<16x16x128xf32> to vector<16x16x128xbf16>
    %c1 = arith.constant 1 : index
    %c8 = arith.constant 8 : index
    %c0_11 = arith.constant 0 : index
    %16 = vector.load %arg8[%c1, %c8, %c0_11] : memref<18x32x128xbf16, #tpu.memory_space<vmem>>, vector<16x16x128xbf16>
    tpu.vector_store %arg8[%c1, %c8, %c0_11], %15 {strides = array<i32>} : memref<18x32x128xbf16, #tpu.memory_space<vmem>>, vector<16x16x128xbf16>,
    %cst_12 = arith.constant 0.000000e+00 : f32
    %17 = vector.broadcast %cst_12 : f32 to vector<256x128xf32>
    %c0_13 = arith.constant 0 : index
    %c0_14 = arith.constant 0 : index
    %c0_15 = arith.constant 0 : index
    %18 = vector.load %arg8[%c0_13, %c0_14, %c0_15] : memref<18x32x128xbf16, #tpu.memory_space<vmem>>, vector<16x32x128xbf16>
    %19 = vector.extract_strided_slice %18 {offsets = [0, 7, 0], sizes = [16, 16, 128], strides = [1, 1, 1]} : vector<16x32x128xbf16> to vector<16x16x128xbf16>
    %20 = vector.extract_strided_slice %18 {offsets = [0, 8, 0], sizes = [16, 16, 128], strides = [1, 1, 1]} : vector<16x32x128xbf16> to vector<16x16x128xbf16>
    %21 = vector.extract_strided_slice %18 {offsets = [0, 9, 0], sizes = [16, 16, 128], strides = [1, 1, 1]} : vector<16x32x128xbf16> to vector<16x16x128xbf16>
    %22 = tpu.concatenate %19, %20, %21 in 2 : vector<16x16x128xbf16>, vector<16x16x128xbf16>, vector<16x16x128xbf16> -> vector<16x16x384xbf16>
    %23 = vector.shape_cast %22 : vector<16x16x384xbf16> to vector<256x384xbf16>
    %c0_16 = arith.constant 0 : index
    %c0_17 = arith.constant 0 : index
    %c0_18 = arith.constant 0 : index
    %24 = vector.load %arg2[%c0_16, %c0_17, %c0_18] : memref<3x384x128xbf16, #tpu.memory_space<vmem>>, vector<1x384x128xbf16>
    %25 = vector.shape_cast %24 : vector<1x384x128xbf16> to vector<384x128xbf16>
    %cst_19 = arith.constant dense<0.000000e+00> : vector<256x128xf32>
    %26 = tpu.matmul %23, %25, %cst_19 {dimension_numbers = #tpu.dot_dimension_numbers<[1], [0], [0], [1], [0, 0, 1, 1], [], []>} : vector<256x384xbf16>, vector<384x128xbf16>, vector<256x128xf32> -> vector<256x128xf32>
    %27 = arith.addf %17, %26 : vector<256x128xf32>
    %c1_20 = arith.constant 1 : index
    %c0_21 = arith.constant 0 : index
    %c0_22 = arith.constant 0 : index
    %28 = vector.load %arg8[%c1_20, %c0_21, %c0_22] : memref<18x32x128xbf16, #tpu.memory_space<vmem>>, vector<16x32x128xbf16>
    %29 = vector.extract_strided_slice %28 {offsets = [0, 7, 0], sizes = [16, 16, 128], strides = [1, 1, 1]} : vector<16x32x128xbf16> to vector<16x16x128xbf16>
    %30 = vector.extract_strided_slice %28 {offsets = [0, 8, 0], sizes = [16, 16, 128], strides = [1, 1, 1]} : vector<16x32x128xbf16> to vector<16x16x128xbf16>
    %31 = vector.extract_strided_slice %28 {offsets = [0, 9, 0], sizes = [16, 16, 128], strides = [1, 1, 1]} : vector<16x32x128xbf16> to vector<16x16x128xbf16>
    %32 = tpu.concatenate %29, %30, %31 in 2 : vector<16x16x128xbf16>, vector<16x16x128xbf16>, vector<16x16x128xbf16> -> vector<16x16x384xbf16>
    %33 = vector.shape_cast %32 : vector<16x16x384xbf16> to vector<256x384xbf16>
    %c1_23 = arith.constant 1 : index
    %c0_24 = arith.constant 0 : index
    %c0_25 = arith.constant 0 : index
    %34 = vector.load %arg2[%c1_23, %c0_24, %c0_25] : memref<3x384x128xbf16, #tpu.memory_space<vmem>>, vector<1x384x128xbf16>
    %35 = vector.shape_cast %34 : vector<1x384x128xbf16> to vector<384x128xbf16>
    %cst_26 = arith.constant dense<0.000000e+00> : vector<256x128xf32>
    %36 = tpu.matmul %33, %35, %cst_26 {dimension_numbers = #tpu.dot_dimension_numbers<[1], [0], [0], [1], [0, 0, 1, 1], [], []>} : vector<256x384xbf16>, vector<384x128xbf16>, vector<256x128xf32> -> vector<256x128xf32>
    %37 = arith.addf %27, %36 : vector<256x128xf32>
    %c2 = arith.constant 2 : index
    %c0_27 = arith.constant 0 : index
    %c0_28 = arith.constant 0 : index
    %38 = vector.load %arg8[%c2, %c0_27, %c0_28] : memref<18x32x128xbf16, #tpu.memory_space<vmem>>, vector<16x32x128xbf16>
    %39 = vector.extract_strided_slice %38 {offsets = [0, 7, 0], sizes = [16, 16, 128], strides = [1, 1, 1]} : vector<16x32x128xbf16> to vector<16x16x128xbf16>
    %40 = vector.extract_strided_slice %38 {offsets = [0, 8, 0], sizes = [16, 16, 128], strides = [1, 1, 1]} : vector<16x32x128xbf16> to vector<16x16x128xbf16>
    %41 = vector.extract_strided_slice %38 {offsets = [0, 9, 0], sizes = [16, 16, 128], strides = [1, 1, 1]} : vector<16x32x128xbf16> to vector<16x16x128xbf16>
    %42 = tpu.concatenate %39, %40, %41 in 2 : vector<16x16x128xbf16>, vector<16x16x128xbf16>, vector<16x16x128xbf16> -> vector<16x16x384xbf16>
    %43 = vector.shape_cast %42 : vector<16x16x384xbf16> to vector<256x384xbf16>
    %c2_29 = arith.constant 2 : index
    %c0_30 = arith.constant 0 : index
    %c0_31 = arith.constant 0 : index
    %44 = vector.load %arg2[%c2_29, %c0_30, %c0_31] : memref<3x384x128xbf16, #tpu.memory_space<vmem>>, vector<1x384x128xbf16>
    %45 = vector.shape_cast %44 : vector<1x384x128xbf16> to vector<384x128xbf16>
    %cst_32 = arith.constant dense<0.000000e+00> : vector<256x128xf32>
    %46 = tpu.matmul %43, %45, %cst_32 {dimension_numbers = #tpu.dot_dimension_numbers<[1], [0], [0], [1], [0, 0, 1, 1], [], []>} : vector<256x384xbf16>, vector<384x128xbf16>, vector<256x128xf32> -> vector<256x128xf32>
    %47 = arith.addf %37, %46 : vector<256x128xf32>
    %48 = vector.shape_cast %47 : vector<256x128xf32> to vector<16x16x128xf32>
    %49 = arith.truncf %48 : vector<16x16x128xf32> to vector<16x16x128xbf16>
    %c0_33 = arith.constant 0 : index
    %c0_34 = arith.constant 0 : index
    %c0_35 = arith.constant 0 : index
    %c0_36 = arith.constant 0 : index
    %50 = vector.load %arg5[%c0_33, %c0_34, %c0_35, %c0_36] : memref<1x16x16x128xbf16, #tpu.memory_space<vmem>>, vector<1x16x16x128xbf16>
    %51 = vector.shape_cast %50 : vector<1x16x16x128xbf16> to vector<16x16x128xbf16>
    %52 = vector.shape_cast %49 : vector<16x16x128xbf16> to vector<1x16x16x128xbf16>
    tpu.vector_store %arg5[%c0_33, %c0_34, %c0_35, %c0_36], %52 {strides = array<i32>} : memref<1x16x16x128xbf16, #tpu.memory_space<vmem>>, vector<1x16x16x128xbf16>,
    %cst_37 = arith.constant dense<0.000000e+00> : vector<128xf32>
    %53 = vector.multi_reduction <add>, %47, %cst_37 [0] : vector<256x128xf32> to vector<128xf32>
    %54 = vector.shape_cast %53 : vector<128xf32> to vector<1x128xf32>
    %55 = vector.shape_cast %54 : vector<1x128xf32> to vector<1x128xf32>
    %56 = vector.broadcast %55 : vector<1x128xf32> to vector<8x128xf32>
    %c0_38 = arith.constant 0 : index
    %c0_39 = arith.constant 0 : index
    %c0_40 = arith.constant 0 : index
    %57 = vector.load %arg6[%c0_38, %c0_39, %c0_40] : memref<1x8x128xf32, #tpu.memory_space<vmem>>, vector<1x8x128xf32>
    %58 = vector.shape_cast %57 : vector<1x8x128xf32> to vector<8x128xf32>
    %59 = vector.shape_cast %56 : vector<8x128xf32> to vector<1x8x128xf32>
    tpu.vector_store %arg6[%c0_38, %c0_39, %c0_40], %59 {strides = array<i32>} : memref<1x8x128xf32, #tpu.memory_space<vmem>>, vector<1x8x128xf32>,
    %60 = arith.mulf %47, %47 : vector<256x128xf32>
    %cst_41 = arith.constant dense<0.000000e+00> : vector<128xf32>
    %61 = vector.multi_reduction <add>, %60, %cst_41 [0] : vector<256x128xf32> to vector<128xf32>
    %62 = vector.shape_cast %61 : vector<128xf32> to vector<1x128xf32>
    %63 = vector.shape_cast %62 : vector<1x128xf32> to vector<1x128xf32>
    %64 = vector.broadcast %63 : vector<1x128xf32> to vector<8x128xf32>
    %c0_42 = arith.constant 0 : index
    %c0_43 = arith.constant 0 : index
    %c0_44 = arith.constant 0 : index
    %65 = vector.load %arg7[%c0_42, %c0_43, %c0_44] : memref<1x8x128xf32, #tpu.memory_space<vmem>>, vector<1x8x128xf32>
    %66 = vector.shape_cast %65 : vector<1x8x128xf32> to vector<8x128xf32>
    %67 = vector.shape_cast %64 : vector<8x128xf32> to vector<1x8x128xf32>
    tpu.vector_store %arg7[%c0_42, %c0_43, %c0_44], %67 {strides = array<i32>} : memref<1x8x128xf32, #tpu.memory_space<vmem>>, vector<1x8x128xf32>,
    return
  }
  func.func @transform_0(%arg0: i32) -> (i32, i32, i32, i32) {
    %c0_i32 = arith.constant 0 : i32
    %c0_i32_0 = arith.constant 0 : i32
    %c0_i32_1 = arith.constant 0 : i32
    %c0_i32_2 = arith.constant 0 : i32
    return %arg0, %c0_i32, %c0_i32_0, %c0_i32_1 : i32, i32, i32, i32
  }
  func.func @transform_1(%arg0: i32) -> (i32, i32, i32) {
    %c0_i32 = arith.constant 0 : i32
    %c0_i32_0 = arith.constant 0 : i32
    %c0_i32_1 = arith.constant 0 : i32
    %c0_i32_2 = arith.constant 0 : i32
    return %c0_i32, %c0_i32_0, %c0_i32_1 : i32, i32, i32
  }
  func.func @transform_2(%arg0: i32) -> (i32, i32) {
    %c0_i32 = arith.constant 0 : i32
    %c0_i32_0 = arith.constant 0 : i32
    %c0_i32_1 = arith.constant 0 : i32
    return %c0_i32, %c0_i32_0 : i32, i32
  }
  func.func @transform_3(%arg0: i32) -> (i32, i32) {
    %c0_i32 = arith.constant 0 : i32
    %c0_i32_0 = arith.constant 0 : i32
    %c0_i32_1 = arith.constant 0 : i32
    return %c0_i32, %c0_i32_0 : i32, i32
  }
  func.func @transform_4(%arg0: i32) -> (i32, i32, i32, i32) {
    %c0_i32 = arith.constant 0 : i32
    %c0_i32_0 = arith.constant 0 : i32
    %c0_i32_1 = arith.constant 0 : i32
    %c0_i32_2 = arith.constant 0 : i32
    return %arg0, %c0_i32, %c0_i32_0, %c0_i32_1 : i32, i32, i32, i32
  }
  func.func @transform_5(%arg0: i32) -> (i32, i32, i32) {
    %c0_i32 = arith.constant 0 : i32
    %c0_i32_0 = arith.constant 0 : i32
    %c0_i32_1 = arith.constant 0 : i32
    return %arg0, %c0_i32, %c0_i32_0 : i32, i32, i32
  }
  func.func @transform_6(%arg0: i32) -> (i32, i32, i32) {
    %c0_i32 = arith.constant 0 : i32
    %c0_i32_0 = arith.constant 0 : i32
    %c0_i32_1 = arith.constant 0 : i32
    return %arg0, %c0_i32, %c0_i32_0 : i32, i32, i32
  }
}

</mosaic_0001>

<bundles_post_ra>
// kernel: basic_block_forward.5
= control target key start
LH: loop header
LB: loop body
LE: loop exit
PB: predicated region body
PF: predicated region fallthrough
CT: control target
= control target key end

     0   :  { %s1351_s0 = inlined_call_operand.vmem [shape: bf16[512,128], index: 0, kind: input, shape index: {}]   ;;  %s1352_s1 = inlined_call_operand.vmem [shape: f32[1,128], index: 1, kind: input, shape index: {}]   ;;  %s1353_s2 = inlined_call_operand.vmem [shape: f32[1,128], index: 2, kind: input, shape index: {}]   ;;  %s1354_s3 = inlined_call_operand.vmem [shape: f32[512,128], index: 3, kind: input, shape index: {}]   ;;  %s1355_s4 = inlined_call_operand.vmem [shape: f32[512,128], index: 4, kind: output, shape index: {}]  }
   0x1   :  { %v550_v0 = vld [vmem:[%s1351_s0] sm:$0xff]   ;;  %v677_v4 = vld [vmem:[%s1351_s0 + $0x8] sm:$0xff]   ;;  %v678_v8 = vld [vmem:[%s1351_s0 + $0x10] sm:$0xff]  }
   0x2   :  { %v739_v1 = vld [vmem:[%s1352_s1] ss:$0 sm:$0xff]  ;;  %v551_v2 = vunpack.c.l.bf16 %v550_v0  ;;  %v552_v3 = vunpack.c.h.bf16 %v550_v0  ;;  %v555_v6 = vunpack.c.l.bf16 %v677_v4  ;;  %v556_v7 = vunpack.c.h.bf16 %v677_v4  ;;  %v679_v13 = vld [vmem:[%s1351_s0 + $0x18] sm:$0xff]   ;;  %v288_v15 = vld [vmem:[%s1354_s3 + $0x8] sm:$0xff] }
   0x3   :  { %v747_v5 = vld [vmem:[%s1353_s2] ss:$0 sm:$0xff]  ;;  %v559_v11 = vunpack.c.l.bf16 %v678_v8  ;;  %v560_v12 = vunpack.c.h.bf16 %v678_v8  ;;  %v563_v18 = vunpack.c.l.bf16 %v679_v13  ;;  %v564_v19 = vunpack.c.h.bf16 %v679_v13  ;;  %v289_v22 = vld [vmem:[%s1354_s3 + $0x10] sm:$0xff]  ;;  %v290_v23 = vld [vmem:[%s1354_s3 + $0x18] sm:$0xff] }
   0x4   :  { %v152_v9 = vmul.f32 %v551_v2, %v739_v1  ;;  %v153_v10 = vmul.f32 %v552_v3, %v739_v1  ;;  %v287_v14 = vld [vmem:[%s1354_s3] sm:$0xff]  ;;  %v154_v16 = vmul.f32 %v555_v6, %v739_v1  ;;  %v155_v17 = vmul.f32 %v556_v7, %v739_v1  ;;  %v292_v29 = vld [vmem:[%s1354_s3 + $0x28] sm:$0xff]  ;;  %v293_v36 = vld [vmem:[%s1354_s3 + $0x30] sm:$0xff] }
   0x5   :  { %v156_v24 = vmul.f32 %v559_v11, %v739_v1  ;;  %v157_v25 = vmul.f32 %v560_v12, %v739_v1  ;;  %v291_v28 = vld [vmem:[%s1354_s3 + $0x20] sm:$0xff]  ;;  %v158_v30 = vmul.f32 %v563_v18, %v739_v1  ;;  %v159_v31 = vmul.f32 %v564_v19, %v739_v1  ;;  %v294_v37 = vld [vmem:[%s1354_s3 + $0x38] sm:$0xff]  ;;  %v681_v47 = vld [vmem:[%s1351_s0 + $0x28] sm:$0xff]  }
   0x6   :  { %v223_v20 = vadd.f32 %v747_v5, %v152_v9  ;;  %v224_v21 = vadd.f32 %v747_v5, %v153_v10  ;;  %v225_v26 = vadd.f32 %v747_v5, %v154_v16  ;;  %v226_v27 = vadd.f32 %v747_v5, %v155_v17  ;;  %v680_v42 = vld [vmem:[%s1351_s0 + $0x20] sm:$0xff]   ;;  %v682_v52 = vld [vmem:[%s1351_s0 + $0x30] sm:$0xff]   ;;  %v683_v57 = vld [vmem:[%s1351_s0 + $0x38] sm:$0xff]  }
   0x7   :  { %v227_v34 = vadd.f32 %v747_v5, %v156_v24  ;;  %v228_v35 = vadd.f32 %v747_v5, %v157_v25  ;;  %v229_v40 = vadd.f32 %v747_v5, %v158_v30  ;;  %v230_v41 = vadd.f32 %v747_v5, %v159_v31  ;;  %v295_v3 = vld [vmem:[%s1354_s3 + $0x40] sm:$0xff]  ;;  %v296_v4 = vld [vmem:[%s1354_s3 + $0x48] sm:$0xff]  ;;  %v297_v12 = vld [vmem:[%s1354_s3 + $0x50] sm:$0xff] }
   0x8   :  { %v351_v32 = vadd.f32 %v287_v14, %v223_v20  ;;  %v352_v33 = vadd.f32 %v288_v15, %v224_v21  ;;  %v353_v38 = vadd.f32 %v289_v22, %v225_v26  ;;  %v354_v39 = vadd.f32 %v290_v23, %v226_v27  ;;  %v298_v13 = vld [vmem:[%s1354_s3 + $0x58] sm:$0xff]  ;;  %v299_v18 = vld [vmem:[%s1354_s3 + $0x60] sm:$0xff]  ;;  %v300_v19 = vld [vmem:[%s1354_s3 + $0x68] sm:$0xff] }
   0x9   :  { %v355_v45 = vadd.f32 %v291_v28, %v227_v34  ;;  %v356_v46 = vadd.f32 %v292_v29, %v228_v35  ;;  %v357_v50 = vadd.f32 %v293_v36, %v229_v40  ;;  %v358_v51 = vadd.f32 %v294_v37, %v230_v41  ;;  %v301_v26 = vld [vmem:[%s1354_s3 + $0x70] sm:$0xff]  ;;  %v302_v27 = vld [vmem:[%s1354_s3 + $0x78] sm:$0xff]  ;;  %v685_v37 = vld [vmem:[%s1351_s0 + $0x48] sm:$0xff]  }
   0xa   :  { %v415_v43 = vmax.f32 %v351_v32, 0.0  ;;  %v416_v44 = vmax.f32 %v352_v33, 0.0  ;;  %v417_v48 = vmax.f32 %v353_v38, 0.0  ;;  %v418_v49 = vmax.f32 %v354_v39, 0.0  ;;  %v684_v32 = vld [vmem:[%s1351_s0 + $0x40] sm:$0xff]  }
   0xb   :  { %v419_v53 = vmax.f32 %v355_v45, 0.0  ;;  %v420_v54 = vmax.f32 %v356_v46, 0.0  ;;  %v567_v55 = vunpack.c.l.bf16 %v680_v42  ;;  %v568_v56 = vunpack.c.h.bf16 %v680_v42  ;;  %v686_v42 = vld [vmem:[%s1351_s0 + $0x50] sm:$0xff]  }
   0xc   :  { %479 = vst [vmem:[%s1355_s4] sm:$0xff] %v415_v43  ;;  %480 = vst [vmem:[%s1355_s4 + $0x8] sm:$0xff] %v416_v44  ;;  %v421_v58 = vmax.f32 %v357_v50, 0.0  ;;  %v422_v59 = vmax.f32 %v358_v51, 0.0  ;;  %v571_v60 = vunpack.c.l.bf16 %v681_v47  ;;  %v572_v61 = vunpack.c.h.bf16 %v681_v47  ;;  %v687_v47 = vld [vmem:[%s1351_s0 + $0x58] sm:$0xff]  }
   0xd   :  { %481 = vst [vmem:[%s1355_s4 + $0x10] sm:$0xff] %v417_v48  ;;  %482 = vst [vmem:[%s1355_s4 + $0x18] sm:$0xff] %v418_v49  ;;  %v160_v62 = vmul.f32 %v567_v55, %v739_v1  ;;  %v161_v63 = vmul.f32 %v568_v56, %v739_v1  ;;  %v575_v0 = vunpack.c.l.bf16 %v682_v52  ;;  %v576_v2 = vunpack.c.h.bf16 %v682_v52  ;;  %v303_v56 = vld [vmem:[%s1354_s3 + $0x80] sm:$0xff] }
   0xe   :  { %483 = vst [vmem:[%s1355_s4 + $0x20] sm:$0xff] %v419_v53  ;;  %484 = vst [vmem:[%s1355_s4 + $0x28] sm:$0xff] %v420_v54  ;;  %v162_v6 = vmul.f32 %v571_v60, %v739_v1  ;;  %v163_v7 = vmul.f32 %v572_v61, %v739_v1  ;;  %v579_v8 = vunpack.c.l.bf16 %v683_v57  ;;  %v580_v9 = vunpack.c.h.bf16 %v683_v57  ;;  %v304_v57 = vld [vmem:[%s1354_s3 + $0x88] sm:$0xff] }
   0xf   :  { %485 = vst [vmem:[%s1355_s4 + $0x30] sm:$0xff] %v421_v58  ;;  %486 = vst [vmem:[%s1355_s4 + $0x38] sm:$0xff] %v422_v59  ;;  %v231_v10 = vadd.f32 %v747_v5, %v160_v62  ;;  %v232_v11 = vadd.f32 %v747_v5, %v161_v63  ;;  %v164_v14 = vmul.f32 %v575_v0, %v739_v1  ;;  %v583_v45 = vunpack.c.l.bf16 %v684_v32  ;;  %v305_v0 = vld [vmem:[%s1354_s3 + $0x90] sm:$0xff] }
  0x10   :  { %v165_v15 = vmul.f32 %v576_v2, %v739_v1  ;;  %v233_v16 = vadd.f32 %v747_v5, %v162_v6  ;;  %v234_v17 = vadd.f32 %v747_v5, %v163_v7  ;;  %v166_v20 = vmul.f32 %v579_v8, %v739_v1  ;;  %v306_v2 = vld [vmem:[%s1354_s3 + $0x98] sm:$0xff]  ;;  %v307_v8 = vld [vmem:[%s1354_s3 + $0xa0] sm:$0xff] }
  0x11   :  { %v167_v21 = vmul.f32 %v580_v9, %v739_v1  ;;  %v359_v22 = vadd.f32 %v295_v3, %v231_v10  ;;  %v360_v23 = vadd.f32 %v296_v4, %v232_v11  ;;  %v235_v24 = vadd.f32 %v747_v5, %v164_v14  ;;  %v308_v9 = vld [vmem:[%s1354_s3 + $0xa8] sm:$0xff] }
  0x12   :  { %v236_v25 = vadd.f32 %v747_v5, %v165_v15  ;;  %v361_v28 = vadd.f32 %v297_v12, %v233_v16  ;;  %v362_v29 = vadd.f32 %v298_v13, %v234_v17  ;;  %v237_v30 = vadd.f32 %v747_v5, %v166_v20  ;;  %v309_v16 = vld [vmem:[%s1354_s3 + $0xb0] sm:$0xff]  ;;  %v310_v17 = vld [vmem:[%s1354_s3 + $0xb8] sm:$0xff] }
  0x13   :  { %v238_v31 = vadd.f32 %v747_v5, %v167_v21  ;;  %v423_v33 = vmax.f32 %v359_v22, 0.0  ;;  %v424_v34 = vmax.f32 %v360_v23, 0.0  ;;  %v363_v35 = vadd.f32 %v299_v18, %v235_v24  ;;  %v688_v22 = vld [vmem:[%s1351_s0 + $0x60] sm:$0xff]  }
  0x14   :  { %v364_v36 = vadd.f32 %v300_v19, %v236_v25  ;;  %v425_v38 = vmax.f32 %v361_v28, 0.0  ;;  %v426_v39 = vmax.f32 %v362_v29, 0.0  ;;  %v365_v40 = vadd.f32 %v301_v26, %v237_v30 }
  0x15   :  { %v366_v41 = vadd.f32 %v302_v27, %v238_v31  ;;  %487 = vst [vmem:[%s1355_s4 + $0x40] sm:$0xff] %v423_v33  ;;  %488 = vst [vmem:[%s1355_s4 + $0x48] sm:$0xff] %v424_v34  ;;  %v427_v43 = vmax.f32 %v363_v35, 0.0  ;;  %v584_v46 = vunpack.c.h.bf16 %v684_v32  ;;  %v587_v50 = vunpack.c.l.bf16 %v685_v37  ;;  %v689_v27 = vld [vmem:[%s1351_s0 + $0x68] sm:$0xff]   ;;  %v690_v32 = vld [vmem:[%s1351_s0 + $0x70] sm:$0xff]  }
  0x16   :  { %v428_v44 = vmax.f32 %v364_v36, 0.0  ;;  %489 = vst [vmem:[%s1355_s4 + $0x50] sm:$0xff] %v425_v38  ;;  %490 = vst [vmem:[%s1355_s4 + $0x58] sm:$0xff] %v426_v39  ;;  %v429_v48 = vmax.f32 %v365_v40, 0.0  ;;  %v588_v51 = vunpack.c.h.bf16 %v685_v37  ;;  %v168_v52 = vmul.f32 %v583_v45, %v739_v1  ;;  %v691_v37 = vld [vmem:[%s1351_s0 + $0x78] sm:$0xff]  }
  0x17   :  { %v430_v49 = vmax.f32 %v366_v41, 0.0  ;;  %491 = vst [vmem:[%s1355_s4 + $0x60] sm:$0xff] %v427_v43  ;;  %v169_v53 = vmul.f32 %v584_v46, %v739_v1  ;;  %v591_v54 = vunpack.c.l.bf16 %v686_v42  ;;  %v592_v55 = vunpack.c.h.bf16 %v686_v42  ;;  %v311_v46 = vld [vmem:[%s1354_s3 + $0xc0] sm:$0xff] }
  0x18   :  { %492 = vst [vmem:[%s1355_s4 + $0x68] sm:$0xff] %v428_v44  ;;  %493 = vst [vmem:[%s1355_s4 + $0x70] sm:$0xff] %v429_v48  ;;  %v170_v58 = vmul.f32 %v587_v50, %v739_v1  ;;  %v171_v59 = vmul.f32 %v588_v51, %v739_v1  ;;  %v595_v60 = vunpack.c.l.bf16 %v687_v47  ;;  %v596_v61 = vunpack.c.h.bf16 %v687_v47  ;;  %v312_v47 = vld [vmem:[%s1354_s3 + $0xc8] sm:$0xff] }
  0x19   :  { %494 = vst [vmem:[%s1355_s4 + $0x78] sm:$0xff] %v430_v49  ;;  %v239_v62 = vadd.f32 %v747_v5, %v168_v52  ;;  %v240_v63 = vadd.f32 %v747_v5, %v169_v53  ;;  %v172_v3 = vmul.f32 %v591_v54, %v739_v1  ;;  %v173_v4 = vmul.f32 %v592_v55, %v739_v1  ;;  %v313_v54 = vld [vmem:[%s1354_s3 + $0xd0] sm:$0xff]  ;;  %v314_v55 = vld [vmem:[%s1354_s3 + $0xd8] sm:$0xff] }
  0x1a   :  { %v241_v6 = vadd.f32 %v747_v5, %v170_v58  ;;  %v242_v7 = vadd.f32 %v747_v5, %v171_v59  ;;  %v174_v10 = vmul.f32 %v595_v60, %v739_v1  ;;  %v175_v11 = vmul.f32 %v596_v61, %v739_v1  ;;  %v315_v60 = vld [vmem:[%s1354_s3 + $0xe0] sm:$0xff]  ;;  %v316_v61 = vld [vmem:[%s1354_s3 + $0xe8] sm:$0xff] }
  0x1b   :  { %v367_v12 = vadd.f32 %v303_v56, %v239_v62  ;;  %v368_v13 = vadd.f32 %v304_v57, %v240_v63  ;;  %v243_v14 = vadd.f32 %v747_v5, %v172_v3  ;;  %v244_v15 = vadd.f32 %v747_v5, %v173_v4 }
  0x1c   :  { %v369_v18 = vadd.f32 %v305_v0, %v241_v6  ;;  %v370_v19 = vadd.f32 %v306_v2, %v242_v7  ;;  %v245_v20 = vadd.f32 %v747_v5, %v174_v10  ;;  %v246_v21 = vadd.f32 %v747_v5, %v175_v11  ;;  %v317_v6 = vld [vmem:[%s1354_s3 + $0xf0] sm:$0xff]  ;;  %v318_v7 = vld [vmem:[%s1354_s3 + $0xf8] sm:$0xff] }
  0x1d   :  { %v431_v23 = vmax.f32 %v367_v12, 0.0  ;;  %v432_v24 = vmax.f32 %v368_v13, 0.0  ;;  %v371_v25 = vadd.f32 %v307_v8, %v243_v14  ;;  %v372_v26 = vadd.f32 %v308_v9, %v244_v15  ;;  %v692_v12 = vld [vmem:[%s1351_s0 + $0x80] sm:$0xff]  }
  0x1e   :  { %v433_v28 = vmax.f32 %v369_v18, 0.0  ;;  %v434_v29 = vmax.f32 %v370_v19, 0.0  ;;  %v373_v30 = vadd.f32 %v309_v16, %v245_v20  ;;  %v374_v31 = vadd.f32 %v310_v17, %v246_v21  ;;  %v693_v17 = vld [vmem:[%s1351_s0 + $0x88] sm:$0xff]  }
  0x1f   :  { %495 = vst [vmem:[%s1355_s4 + $0x80] sm:$0xff] %v431_v23  ;;  %496 = vst [vmem:[%s1355_s4 + $0x88] sm:$0xff] %v432_v24  ;;  %v435_v33 = vmax.f32 %v371_v25, 0.0  ;;  %v436_v34 = vmax.f32 %v372_v26, 0.0  ;;  %v599_v35 = vunpack.c.l.bf16 %v688_v22  ;;  %v600_v36 = vunpack.c.h.bf16 %v688_v22  ;;  %v694_v22 = vld [vmem:[%s1351_s0 + $0x90] sm:$0xff]  }
  0x20   :  { %497 = vst [vmem:[%s1355_s4 + $0x90] sm:$0xff] %v433_v28  ;;  %498 = vst [vmem:[%s1355_s4 + $0x98] sm:$0xff] %v434_v29  ;;  %v437_v38 = vmax.f32 %v373_v30, 0.0  ;;  %v438_v39 = vmax.f32 %v374_v31, 0.0  ;;  %v603_v40 = vunpack.c.l.bf16 %v689_v27  ;;  %v604_v41 = vunpack.c.h.bf16 %v689_v27  ;;  %v695_v27 = vld [vmem:[%s1351_s0 + $0x98] sm:$0xff]  }
  0x21   :  { %499 = vst [vmem:[%s1355_s4 + $0xa0] sm:$0xff] %v435_v33  ;;  %500 = vst [vmem:[%s1355_s4 + $0xa8] sm:$0xff] %v436_v34  ;;  %v176_v42 = vmul.f32 %v599_v35, %v739_v1  ;;  %v177_v43 = vmul.f32 %v600_v36, %v739_v1  ;;  %v607_v44 = vunpack.c.l.bf16 %v690_v32  ;;  %v608_v45 = vunpack.c.h.bf16 %v690_v32  ;;  %v319_v36 = vld [vmem:[%s1354_s3 + $0x100] sm:$0xff] }
  0x22   :  { %501 = vst [vmem:[%s1355_s4 + $0xb0] sm:$0xff] %v437_v38  ;;  %502 = vst [vmem:[%s1355_s4 + $0xb8] sm:$0xff] %v438_v39  ;;  %v178_v48 = vmul.f32 %v603_v40, %v739_v1  ;;  %v179_v49 = vmul.f32 %v604_v41, %v739_v1  ;;  %v611_v50 = vunpack.c.l.bf16 %v691_v37  ;;  %v612_v51 = vunpack.c.h.bf16 %v691_v37  ;;  %v320_v37 = vld [vmem:[%s1354_s3 + $0x108] sm:$0xff] }
  0x23   :  { %v247_v52 = vadd.f32 %v747_v5, %v176_v42  ;;  %v248_v53 = vadd.f32 %v747_v5, %v177_v43  ;;  %v180_v56 = vmul.f32 %v607_v44, %v739_v1  ;;  %v181_v57 = vmul.f32 %v608_v45, %v739_v1  ;;  %v321_v44 = vld [vmem:[%s1354_s3 + $0x110] sm:$0xff]  ;;  %v322_v45 = vld [vmem:[%s1354_s3 + $0x118] sm:$0xff] }
  0x24   :  { %v249_v58 = vadd.f32 %v747_v5, %v178_v48  ;;  %v250_v59 = vadd.f32 %v747_v5, %v179_v49  ;;  %v182_v62 = vmul.f32 %v611_v50, %v739_v1  ;;  %v183_v63 = vmul.f32 %v612_v51, %v739_v1  ;;  %v323_v50 = vld [vmem:[%s1354_s3 + $0x120] sm:$0xff]  ;;  %v324_v51 = vld [vmem:[%s1354_s3 + $0x128] sm:$0xff] }
  0x25   :  { %v375_v0 = vadd.f32 %v311_v46, %v247_v52  ;;  %v376_v2 = vadd.f32 %v312_v47, %v248_v53  ;;  %v251_v3 = vadd.f32 %v747_v5, %v180_v56  ;;  %v252_v4 = vadd.f32 %v747_v5, %v181_v57 }
  0x26   :  { %v377_v8 = vadd.f32 %v313_v54, %v249_v58  ;;  %v378_v9 = vadd.f32 %v314_v55, %v250_v59  ;;  %v253_v10 = vadd.f32 %v747_v5, %v182_v62  ;;  %v254_v11 = vadd.f32 %v747_v5, %v183_v63  ;;  %v325_v58 = vld [vmem:[%s1354_s3 + $0x130] sm:$0xff]  ;;  %v326_v59 = vld [vmem:[%s1354_s3 + $0x138] sm:$0xff] }
  0x27   :  { %v439_v13 = vmax.f32 %v375_v0, 0.0  ;;  %v440_v14 = vmax.f32 %v376_v2, 0.0  ;;  %v379_v15 = vadd.f32 %v315_v60, %v251_v3  ;;  %v380_v16 = vadd.f32 %v316_v61, %v252_v4  ;;  %v696_v0 = vld [vmem:[%s1351_s0 + $0xa0] sm:$0xff]  }
  0x28   :  { %v441_v18 = vmax.f32 %v377_v8, 0.0  ;;  %v442_v19 = vmax.f32 %v378_v9, 0.0  ;;  %v381_v20 = vadd.f32 %v317_v6, %v253_v10  ;;  %v382_v21 = vadd.f32 %v318_v7, %v254_v11  ;;  %v697_v7 = vld [vmem:[%s1351_s0 + $0xa8] sm:$0xff]  }
  0x29   :  { %503 = vst [vmem:[%s1355_s4 + $0xc0] sm:$0xff] %v439_v13  ;;  %504 = vst [vmem:[%s1355_s4 + $0xc8] sm:$0xff] %v440_v14  ;;  %v443_v23 = vmax.f32 %v379_v15, 0.0  ;;  %v444_v24 = vmax.f32 %v380_v16, 0.0  ;;  %v615_v25 = vunpack.c.l.bf16 %v692_v12  ;;  %v616_v26 = vunpack.c.h.bf16 %v692_v12  ;;  %v698_v12 = vld [vmem:[%s1351_s0 + $0xb0] sm:$0xff]  }
  0x2a   :  { %505 = vst [vmem:[%s1355_s4 + $0xd0] sm:$0xff] %v441_v18  ;;  %506 = vst [vmem:[%s1355_s4 + $0xd8] sm:$0xff] %v442_v19  ;;  %v445_v28 = vmax.f32 %v381_v20, 0.0  ;;  %v446_v29 = vmax.f32 %v382_v21, 0.0  ;;  %v619_v30 = vunpack.c.l.bf16 %v693_v17  ;;  %v620_v31 = vunpack.c.h.bf16 %v693_v17  ;;  %v699_v17 = vld [vmem:[%s1351_s0 + $0xb8] sm:$0xff]  }
  0x2b   :  { %507 = vst [vmem:[%s1355_s4 + $0xe0] sm:$0xff] %v443_v23  ;;  %508 = vst [vmem:[%s1355_s4 + $0xe8] sm:$0xff] %v444_v24  ;;  %v184_v32 = vmul.f32 %v615_v25, %v739_v1  ;;  %v185_v33 = vmul.f32 %v616_v26, %v739_v1  ;;  %v623_v34 = vunpack.c.l.bf16 %v694_v22  ;;  %v624_v35 = vunpack.c.h.bf16 %v694_v22  ;;  %v327_v26 = vld [vmem:[%s1354_s3 + $0x140] sm:$0xff] }
  0x2c   :  { %509 = vst [vmem:[%s1355_s4 + $0xf0] sm:$0xff] %v445_v28  ;;  %510 = vst [vmem:[%s1355_s4 + $0xf8] sm:$0xff] %v446_v29  ;;  %v186_v38 = vmul.f32 %v619_v30, %v739_v1  ;;  %v187_v39 = vmul.f32 %v620_v31, %v739_v1  ;;  %v627_v40 = vunpack.c.l.bf16 %v695_v27  ;;  %v628_v41 = vunpack.c.h.bf16 %v695_v27  ;;  %v328_v27 = vld [vmem:[%s1354_s3 + $0x148] sm:$0xff] }
  0x2d   :  { %v255_v42 = vadd.f32 %v747_v5, %v184_v32  ;;  %v256_v43 = vadd.f32 %v747_v5, %v185_v33  ;;  %v188_v46 = vmul.f32 %v623_v34, %v739_v1  ;;  %v189_v47 = vmul.f32 %v624_v35, %v739_v1  ;;  %v329_v34 = vld [vmem:[%s1354_s3 + $0x150] sm:$0xff]  ;;  %v330_v35 = vld [vmem:[%s1354_s3 + $0x158] sm:$0xff] }
  0x2e   :  { %v257_v48 = vadd.f32 %v747_v5, %v186_v38  ;;  %v258_v49 = vadd.f32 %v747_v5, %v187_v39  ;;  %v190_v52 = vmul.f32 %v627_v40, %v739_v1  ;;  %v191_v53 = vmul.f32 %v628_v41, %v739_v1  ;;  %v331_v40 = vld [vmem:[%s1354_s3 + $0x160] sm:$0xff]  ;;  %v332_v41 = vld [vmem:[%s1354_s3 + $0x168] sm:$0xff] }
  0x2f   :  { %v383_v54 = vadd.f32 %v319_v36, %v255_v42  ;;  %v384_v55 = vadd.f32 %v320_v37, %v256_v43  ;;  %v259_v56 = vadd.f32 %v747_v5, %v188_v46  ;;  %v260_v57 = vadd.f32 %v747_v5, %v189_v47 }
  0x30   :  { %v385_v60 = vadd.f32 %v321_v44, %v257_v48  ;;  %v386_v61 = vadd.f32 %v322_v45, %v258_v49  ;;  %v261_v62 = vadd.f32 %v747_v5, %v190_v52  ;;  %v262_v63 = vadd.f32 %v747_v5, %v191_v53  ;;  %v333_v48 = vld [vmem:[%s1354_s3 + $0x170] sm:$0xff]  ;;  %v334_v49 = vld [vmem:[%s1354_s3 + $0x178] sm:$0xff] }
  0x31   :  { %v447_v2 = vmax.f32 %v383_v54, 0.0  ;;  %v448_v3 = vmax.f32 %v384_v55, 0.0  ;;  %v387_v4 = vadd.f32 %v323_v50, %v259_v56  ;;  %v388_v6 = vadd.f32 %v324_v51, %v260_v57  ;;  %v700_v54 = vld [vmem:[%s1351_s0 + $0xc0] sm:$0xff]  }
  0x32   :  { %v449_v8 = vmax.f32 %v385_v60, 0.0  ;;  %v450_v9 = vmax.f32 %v386_v61, 0.0  ;;  %v389_v10 = vadd.f32 %v325_v58, %v261_v62  ;;  %v390_v11 = vadd.f32 %v326_v59, %v262_v63  ;;  %v701_v59 = vld [vmem:[%s1351_s0 + $0xc8] sm:$0xff]  }
  0x33   :  { %511 = vst [vmem:[%s1355_s4 + $0x100] sm:$0xff] %v447_v2  ;;  %512 = vst [vmem:[%s1355_s4 + $0x108] sm:$0xff] %v448_v3  ;;  %v451_v13 = vmax.f32 %v387_v4, 0.0  ;;  %v452_v14 = vmax.f32 %v388_v6, 0.0  ;;  %v631_v15 = vunpack.c.l.bf16 %v696_v0  ;;  %v632_v16 = vunpack.c.h.bf16 %v696_v0  ;;  %v702_v0 = vld [vmem:[%s1351_s0 + $0xd0] sm:$0xff]  }
  0x34   :  { %513 = vst [vmem:[%s1355_s4 + $0x110] sm:$0xff] %v449_v8  ;;  %514 = vst [vmem:[%s1355_s4 + $0x118] sm:$0xff] %v450_v9  ;;  %v453_v18 = vmax.f32 %v389_v10, 0.0  ;;  %v454_v19 = vmax.f32 %v390_v11, 0.0  ;;  %v635_v20 = vunpack.c.l.bf16 %v697_v7  ;;  %v636_v21 = vunpack.c.h.bf16 %v697_v7  ;;  %v703_v7 = vld [vmem:[%s1351_s0 + $0xd8] sm:$0xff]  }
  0x35   :  { %515 = vst [vmem:[%s1355_s4 + $0x120] sm:$0xff] %v451_v13  ;;  %516 = vst [vmem:[%s1355_s4 + $0x128] sm:$0xff] %v452_v14  ;;  %v192_v22 = vmul.f32 %v631_v15, %v739_v1  ;;  %v193_v23 = vmul.f32 %v632_v16, %v739_v1  ;;  %v639_v24 = vunpack.c.l.bf16 %v698_v12  ;;  %v640_v25 = vunpack.c.h.bf16 %v698_v12  ;;  %v335_v16 = vld [vmem:[%s1354_s3 + $0x180] sm:$0xff] }
  0x36   :  { %517 = vst [vmem:[%s1355_s4 + $0x130] sm:$0xff] %v453_v18  ;;  %518 = vst [vmem:[%s1355_s4 + $0x138] sm:$0xff] %v454_v19  ;;  %v194_v28 = vmul.f32 %v635_v20, %v739_v1  ;;  %v195_v29 = vmul.f32 %v636_v21, %v739_v1  ;;  %v643_v30 = vunpack.c.l.bf16 %v699_v17  ;;  %v644_v31 = vunpack.c.h.bf16 %v699_v17  ;;  %v336_v17 = vld [vmem:[%s1354_s3 + $0x188] sm:$0xff] }
  0x37   :  { %v263_v32 = vadd.f32 %v747_v5, %v192_v22  ;;  %v264_v33 = vadd.f32 %v747_v5, %v193_v23  ;;  %v196_v36 = vmul.f32 %v639_v24, %v739_v1  ;;  %v197_v37 = vmul.f32 %v640_v25, %v739_v1  ;;  %v337_v24 = vld [vmem:[%s1354_s3 + $0x190] sm:$0xff]  ;;  %v338_v25 = vld [vmem:[%s1354_s3 + $0x198] sm:$0xff] }
  0x38   :  { %v265_v38 = vadd.f32 %v747_v5, %v194_v28  ;;  %v266_v39 = vadd.f32 %v747_v5, %v195_v29  ;;  %v198_v42 = vmul.f32 %v643_v30, %v739_v1  ;;  %v199_v43 = vmul.f32 %v644_v31, %v739_v1  ;;  %v339_v30 = vld [vmem:[%s1354_s3 + $0x1a0] sm:$0xff]  ;;  %v340_v31 = vld [vmem:[%s1354_s3 + $0x1a8] sm:$0xff] }
  0x39   :  { %v391_v44 = vadd.f32 %v327_v26, %v263_v32  ;;  %v392_v45 = vadd.f32 %v328_v27, %v264_v33  ;;  %v267_v46 = vadd.f32 %v747_v5, %v196_v36  ;;  %v268_v47 = vadd.f32 %v747_v5, %v197_v37 }
  0x3a   :  { %v393_v50 = vadd.f32 %v329_v34, %v265_v38  ;;  %v394_v51 = vadd.f32 %v330_v35, %v266_v39  ;;  %v269_v52 = vadd.f32 %v747_v5, %v198_v42  ;;  %v270_v53 = vadd.f32 %v747_v5, %v199_v43  ;;  %v341_v38 = vld [vmem:[%s1354_s3 + $0x1b0] sm:$0xff]  ;;  %v342_v39 = vld [vmem:[%s1354_s3 + $0x1b8] sm:$0xff] }
  0x3b   :  { %v455_v55 = vmax.f32 %v391_v44, 0.0  ;;  %v456_v56 = vmax.f32 %v392_v45, 0.0  ;;  %v395_v57 = vadd.f32 %v331_v40, %v267_v46  ;;  %v396_v58 = vadd.f32 %v332_v41, %v268_v47  ;;  %v704_v44 = vld [vmem:[%s1351_s0 + $0xe0] sm:$0xff]  }
  0x3c   :  { %v457_v60 = vmax.f32 %v393_v50, 0.0  ;;  %v458_v61 = vmax.f32 %v394_v51, 0.0  ;;  %v397_v62 = vadd.f32 %v333_v48, %v269_v52  ;;  %v398_v63 = vadd.f32 %v334_v49, %v270_v53  ;;  %v705_v49 = vld [vmem:[%s1351_s0 + $0xe8] sm:$0xff]  }
  0x3d   :  { %519 = vst [vmem:[%s1355_s4 + $0x140] sm:$0xff] %v455_v55  ;;  %520 = vst [vmem:[%s1355_s4 + $0x148] sm:$0xff] %v456_v56  ;;  %v459_v2 = vmax.f32 %v395_v57, 0.0  ;;  %v460_v3 = vmax.f32 %v396_v58, 0.0  ;;  %v647_v4 = vunpack.c.l.bf16 %v700_v54  ;;  %v648_v6 = vunpack.c.h.bf16 %v700_v54  ;;  %v706_v54 = vld [vmem:[%s1351_s0 + $0xf0] sm:$0xff]  }
  0x3e   :  { %521 = vst [vmem:[%s1355_s4 + $0x150] sm:$0xff] %v457_v60  ;;  %522 = vst [vmem:[%s1355_s4 + $0x158] sm:$0xff] %v458_v61  ;;  %v461_v8 = vmax.f32 %v397_v62, 0.0  ;;  %v462_v9 = vmax.f32 %v398_v63, 0.0  ;;  %v651_v10 = vunpack.c.l.bf16 %v701_v59  ;;  %v652_v11 = vunpack.c.h.bf16 %v701_v59  ;;  %v707_v59 = vld [vmem:[%s1351_s0 + $0xf8] sm:$0xff]  }
  0x3f   :  { %523 = vst [vmem:[%s1355_s4 + $0x160] sm:$0xff] %v459_v2  ;;  %524 = vst [vmem:[%s1355_s4 + $0x168] sm:$0xff] %v460_v3  ;;  %v200_v12 = vmul.f32 %v647_v4, %v739_v1  ;;  %v201_v13 = vmul.f32 %v648_v6, %v739_v1  ;;  %v655_v14 = vunpack.c.l.bf16 %v702_v0  ;;  %v656_v15 = vunpack.c.h.bf16 %v702_v0  ;;  %v343_v6 = vld [vmem:[%s1354_s3 + $0x1c0] sm:$0xff] }
  0x40   :  { %525 = vst [vmem:[%s1355_s4 + $0x170] sm:$0xff] %v461_v8  ;;  %526 = vst [vmem:[%s1355_s4 + $0x178] sm:$0xff] %v462_v9  ;;  %v202_v18 = vmul.f32 %v651_v10, %v739_v1  ;;  %v203_v19 = vmul.f32 %v652_v11, %v739_v1  ;;  %v659_v20 = vunpack.c.l.bf16 %v703_v7  ;;  %v660_v21 = vunpack.c.h.bf16 %v703_v7  ;;  %v344_v7 = vld [vmem:[%s1354_s3 + $0x1c8] sm:$0xff] }
  0x41   :  { %v271_v22 = vadd.f32 %v747_v5, %v200_v12  ;;  %v272_v23 = vadd.f32 %v747_v5, %v201_v13  ;;  %v204_v26 = vmul.f32 %v655_v14, %v739_v1  ;;  %v205_v27 = vmul.f32 %v656_v15, %v739_v1  ;;  %v345_v14 = vld [vmem:[%s1354_s3 + $0x1d0] sm:$0xff]  ;;  %v346_v15 = vld [vmem:[%s1354_s3 + $0x1d8] sm:$0xff] }
  0x42   :  { %v273_v28 = vadd.f32 %v747_v5, %v202_v18  ;;  %v274_v29 = vadd.f32 %v747_v5, %v203_v19  ;;  %v206_v32 = vmul.f32 %v659_v20, %v739_v1  ;;  %v207_v33 = vmul.f32 %v660_v21, %v739_v1  ;;  %v347_v20 = vld [vmem:[%s1354_s3 + $0x1e0] sm:$0xff]  ;;  %v348_v21 = vld [vmem:[%s1354_s3 + $0x1e8] sm:$0xff] }
  0x43   :  { %v399_v34 = vadd.f32 %v335_v16, %v271_v22  ;;  %v400_v35 = vadd.f32 %v336_v17, %v272_v23  ;;  %v275_v36 = vadd.f32 %v747_v5, %v204_v26  ;;  %v276_v37 = vadd.f32 %v747_v5, %v205_v27 }
  0x44   :  { %v401_v40 = vadd.f32 %v337_v24, %v273_v28  ;;  %v402_v41 = vadd.f32 %v338_v25, %v274_v29  ;;  %v277_v42 = vadd.f32 %v747_v5, %v206_v32  ;;  %v278_v43 = vadd.f32 %v747_v5, %v207_v33  ;;  %v349_v28 = vld [vmem:[%s1354_s3 + $0x1f0] sm:$0xff]  ;;  %v350_v29 = vld [vmem:[%s1354_s3 + $0x1f8] sm:$0xff] }
  0x45   :  { %v463_v45 = vmax.f32 %v399_v34, 0.0  ;;  %v464_v46 = vmax.f32 %v400_v35, 0.0  ;;  %v403_v47 = vadd.f32 %v339_v30, %v275_v36  ;;  %v404_v48 = vadd.f32 %v340_v31, %v276_v37 }
  0x46   :  { %v465_v50 = vmax.f32 %v401_v40, 0.0  ;;  %v466_v51 = vmax.f32 %v402_v41, 0.0  ;;  %v405_v52 = vadd.f32 %v341_v38, %v277_v42  ;;  %v406_v53 = vadd.f32 %v342_v39, %v278_v43 }
  0x47   :  { %527 = vst [vmem:[%s1355_s4 + $0x180] sm:$0xff] %v463_v45  ;;  %528 = vst [vmem:[%s1355_s4 + $0x188] sm:$0xff] %v464_v46  ;;  %v467_v55 = vmax.f32 %v403_v47, 0.0  ;;  %v468_v56 = vmax.f32 %v404_v48, 0.0  ;;  %v663_v57 = vunpack.c.l.bf16 %v704_v44  ;;  %v664_v58 = vunpack.c.h.bf16 %v704_v44 }
  0x48   :  { %529 = vst [vmem:[%s1355_s4 + $0x190] sm:$0xff] %v465_v50  ;;  %530 = vst [vmem:[%s1355_s4 + $0x198] sm:$0xff] %v466_v51  ;;  %v469_v60 = vmax.f32 %v405_v52, 0.0  ;;  %v470_v61 = vmax.f32 %v406_v53, 0.0  ;;  %v667_v62 = vunpack.c.l.bf16 %v705_v49  ;;  %v668_v63 = vunpack.c.h.bf16 %v705_v49 }
  0x49   :  { %531 = vst [vmem:[%s1355_s4 + $0x1a0] sm:$0xff] %v467_v55  ;;  %532 = vst [vmem:[%s1355_s4 + $0x1a8] sm:$0xff] %v468_v56  ;;  %v208_v0 = vmul.f32 %v663_v57, %v739_v1  ;;  %v209_v2 = vmul.f32 %v664_v58, %v739_v1  ;;  %v671_v3 = vunpack.c.l.bf16 %v706_v54  ;;  %v672_v4 = vunpack.c.h.bf16 %v706_v54 }
  0x4a   :  { %533 = vst [vmem:[%s1355_s4 + $0x1b0] sm:$0xff] %v469_v60  ;;  %534 = vst [vmem:[%s1355_s4 + $0x1b8] sm:$0xff] %v470_v61  ;;  %v210_v8 = vmul.f32 %v667_v62, %v739_v1  ;;  %v211_v9 = vmul.f32 %v668_v63, %v739_v1  ;;  %v675_v10 = vunpack.c.l.bf16 %v707_v59  ;;  %v676_v11 = vunpack.c.h.bf16 %v707_v59 }
  0x4b   :  { %v279_v12 = vadd.f32 %v747_v5, %v208_v0  ;;  %v280_v13 = vadd.f32 %v747_v5, %v209_v2  ;;  %v212_v16 = vmul.f32 %v671_v3, %v739_v1  ;;  %v213_v17 = vmul.f32 %v672_v4, %v739_v1 }
  0x4c   :  { %v281_v18 = vadd.f32 %v747_v5, %v210_v8  ;;  %v282_v19 = vadd.f32 %v747_v5, %v211_v9  ;;  %v214_v22 = vmul.f32 %v675_v10, %v739_v1  ;;  %v215_v23 = vmul.f32 %v676_v11, %v739_v1 }
  0x4d   :  { %v407_v24 = vadd.f32 %v343_v6, %v279_v12  ;;  %v408_v25 = vadd.f32 %v344_v7, %v280_v13  ;;  %v283_v26 = vadd.f32 %v747_v5, %v212_v16  ;;  %v284_v27 = vadd.f32 %v747_v5, %v213_v17 }
  0x4e   :  { %v409_v30 = vadd.f32 %v345_v14, %v281_v18  ;;  %v410_v31 = vadd.f32 %v346_v15, %v282_v19  ;;  %v285_v32 = vadd.f32 %v747_v5, %v214_v22  ;;  %v286_v1 = vadd.f32 %v747_v5, %v215_v23 }
  0x4f   :  { %v471_v33 = vmax.f32 %v407_v24, 0.0  ;;  %v472_v34 = vmax.f32 %v408_v25, 0.0  ;;  %v411_v35 = vadd.f32 %v347_v20, %v283_v26  ;;  %v412_v36 = vadd.f32 %v348_v21, %v284_v27 }
  0x50   :  { %v473_v37 = vmax.f32 %v409_v30, 0.0  ;;  %v474_v38 = vmax.f32 %v410_v31, 0.0  ;;  %v413_v39 = vadd.f32 %v349_v28, %v285_v32  ;;  %v414_v40 = vadd.f32 %v350_v29, %v286_v1 }
  0x51   :  { %535 = vst [vmem:[%s1355_s4 + $0x1c0] sm:$0xff] %v471_v33  ;;  %536 = vst [vmem:[%s1355_s4 + $0x1c8] sm:$0xff] %v472_v34  ;;  %v475_v41 = vmax.f32 %v411_v35, 0.0  ;;  %v476_v42 = vmax.f32 %v412_v36, 0.0 }
  0x52   :  { %537 = vst [vmem:[%s1355_s4 + $0x1d0] sm:$0xff] %v473_v37  ;;  %538 = vst [vmem:[%s1355_s4 + $0x1d8] sm:$0xff] %v474_v38  ;;  %v477_v5 = vmax.f32 %v413_v39, 0.0  ;;  %v478_v43 = vmax.f32 %v414_v40, 0.0 }
  0x53   :  { %539 = vst [vmem:[%s1355_s4 + $0x1e0] sm:$0xff] %v475_v41  ;;  %540 = vst [vmem:[%s1355_s4 + $0x1e8] sm:$0xff] %v476_v42 }
  0x54   :  { %541 = vst [vmem:[%s1355_s4 + $0x1f0] sm:$0xff] %v477_v5  ;;  %542 = vst [vmem:[%s1355_s4 + $0x1f8] sm:$0xff] %v478_v43 }

// kernel: basic_block_forward.3
= control target key start
LH: loop header
LB: loop body
LE: loop exit
PB: predicated region body
PF: predicated region fallthrough
CT: control target
= control target key end

     0   :  { %s6743_s15 = smov 0   ;;  %s8378_s0 = inlined_call_operand.vmem [shape: f32[2,16,16,128], index: 0, kind: input, shape index: {}]   ;;  %s8379_s1 = inlined_call_operand.vmem [shape: bf16[3,384,128], index: 1, kind: input, shape index: {}]   ;;  %s8380_s2 = inlined_call_operand.vmem [shape: bf16[2,16,16,128], index: 2, kind: output, shape index: {0}]   ;;  %s8381_s3 = inlined_call_operand.vmem [shape: f32[2,8,128], index: 3, kind: output, shape index: {1}]   ;;  %s8382_s4 = inlined_call_operand.vmem [shape: f32[2,8,128], index: 4, kind: output, shape index: {2}]  }
   0x1 LB: > { %s5518_s16 = sadd.s32 4294967295, %s6715_s15   ;;  %p5522_p0 = scmp.ge.s32.totalorder %s6715_s15, 1  ;;  %s6715_s15 = sphi %s6743_s15, %s15_s15  }
   0x2   : > { %p167_p1 = scmp.lt.s32.totalorder %s6715_s15, 3 }
   0x4   : > { %p168_p2 = pnand %p5522_p0, %p167_p1 }
   0x6   : > { %171 = sbr.rel (%p168_p2) target bundleno = 705 (0x2c1), region = 28 }
   0xd   : > { %v6597_v0 = vld [vmem:[%s8379_s1 + $0x100] sm:$0xff]   ;;  %v6717_v3 = vmov 0   ;;  %v6600_v4 = vld [vmem:[%s8379_s1 + $0x108] sm:$0xff]   ;;  %v6603_v7 = vld [vmem:[%s8379_s1 + $0x110] sm:$0xff]   ;;  %p201_p3 = scmp.lt.s32.totalorder %s5518_s16, 1  ;;  %vm690_vm2 = vcmask 1046528  }
   0xe   : > { %v6757_v1 = vld [vmem:[%s8379_s1 + $0x140] sm:$0xff]   ;;  %5860 = vmatprep.subr.bf16.mxu0 %v6597_v0  ;;  %222 = vst [vmem:[#allocation2 + $0x10] sm:$0xff] %v6717_v3  ;;  %223 = vst [vmem:[#allocation2 + $0x18] sm:$0xff] %v6717_v3  ;;  %v6803_v5 = vld [vmem:[%s8379_s1 + $0x148] sm:$0xff]   ;;  %v423_v18 = vrot.slane %v6717_v3, 1  ;;  %v6897_v27 = vrot.slane %v6717_v3, 3 }
   0xf   : > { %v6599_v2 = vld [vmem:[%s8379_s1 + $0xc0] sm:$0xff]   ;;  %220 = vst [vmem:[#allocation2] sm:$0xff] %v6717_v3  ;;  %224 = vst [vmem:[#allocation2 + $0x20] sm:$0xff] %v6717_v3  ;;  %6412 = vmatprep.subr.bf16.mxu1 %v6757_v1  ;;  %v6602_v6 = vld [vmem:[%s8379_s1 + $0xc8] sm:$0xff]   ;;  %s8561_s16 = smov (!%p201_p3, %s5518_s16), 1  ;;  %v6905_v38 = vrot.slane %v6717_v3, 4 }
  0x10   : > { %225 = vst [vmem:[#allocation2 + $0x28] sm:$0xff] %v6717_v3  ;;  %226 = vst [vmem:[#allocation2 + $0x30] sm:$0xff] %v6717_v3  ;;  %5861 = vmatpush3.bf16.msra.mxu0 %v6599_v2  ;;  %6420 = vmatpush3.bf16.msra.mxu1 %v6757_v1  ;;  %v6815_v8 = vld [vmem:[%s8379_s1 + $0x150] sm:$0xff]   ;;  %v6606_v10 = vld [vmem:[%s8379_s1 + $0x118] sm:$0xff]   ;;  %s5731_s27 = sshll.u32 %s8561_s16, 8  ;;  %v756_v32 = vshrl.u32 %v423_v18, 16 }
  0x11   : > { %227 = vst [vmem:[#allocation2 + $0x38] sm:$0xff] %v6717_v3  ;;  %228 = vst [vmem:[#allocation2 + $0x40] sm:$0xff] %v6717_v3  ;;  %5862 = vmatprep.subr.bf16.mxu0 %v6600_v4  ;;  %6413 = vmatprep.subr.bf16.mxu1 %v6803_v5  ;;  %v6605_v9 = vld [vmem:[%s8379_s1 + $0xd0] sm:$0xff]   ;;  %v6828_v11 = vld [vmem:[%s8379_s1 + $0x158] sm:$0xff]   ;;  %s6880_s10 = scalar_lea.vmem %s8378_s0, %s5731_s27  ;;  %vm417_vm0 = vsmask.f32 7424  ;;  %v742_v53 = vor.u32 %v6905_v38, %v6897_v27 }
  0x12   : > { %229 = vst [vmem:[#allocation2 + $0x48] sm:$0xff] %v6717_v3  ;;  %230 = vst [vmem:[#allocation2 + $0x50] sm:$0xff] %v6717_v3  ;;  %v6608_v12 = vld [vmem:[%s8379_s1 + $0xd8] sm:$0xff]   ;;  %v6609_v13 = vld [vmem:[%s8379_s1 + $0x120] sm:$0xff]   ;;  %v759_v33 = vshll.u32 %v423_v18, 16  ;;  %v750_v45 = vrot.slane %v756_v32, 3 }
  0x13   : > { %231 = vst [vmem:[#allocation2 + $0x58] sm:$0xff] %v6717_v3  ;;  %232 = vst [vmem:[#allocation2 + $0x60] sm:$0xff] %v6717_v3  ;;  %v6843_v14 = vld [vmem:[%s8379_s1 + $0x160] sm:$0xff]   ;;  %v6612_v16 = vld [vmem:[%s8379_s1 + $0x128] sm:$0xff]   ;;  %vm739_vm1 = vsmask.f32 4352 }
  0x14   : > { %233 = vst [vmem:[#allocation2 + $0x68] sm:$0xff] %v6717_v3  ;;  %234 = vst [vmem:[#allocation2 + $0x70] sm:$0xff] %v6717_v3  ;;  %5863 = vmatpush3.bf16.msra.mxu0 %v6602_v6  ;;  %6421 = vmatpush3.bf16.msra.mxu1 %v6803_v5  ;;  %v6611_v15 = vld [vmem:[%s8379_s1 + $0xe0] sm:$0xff]   ;;  %v6860_v17 = vld [vmem:[%s8379_s1 + $0x168] sm:$0xff]   ;;  %v761_v46 = vrot.slane %v759_v33, 4  ;;  %s5732_s23 = sshll.u32 %s8561_s16, 7 }
  0x15   : > { %235 = vst [vmem:[#allocation2 + $0x78] sm:$0xff] %v6717_v3  ;;  %236 = vst [vmem:[#allocation2 + $0x80] sm:$0xff] %v6717_v3  ;;  %5864 = vmatprep.subr.bf16.mxu0 %v6603_v7  ;;  %6414 = vmatprep.subr.bf16.mxu1 %v6815_v8  ;;  %v6614_v19 = vld [vmem:[%s8379_s1 + $0xe8] sm:$0xff]   ;;  %v6615_v20 = vld [vmem:[%s8379_s1 + $0x130] sm:$0xff]   ;;  %s8297_s26 = scalar_lea.vmem %s8380_s2, %s5732_s23  ;;  %s5527_s27 = sshll.u32 %s8561_s16, 3 }
  0x16   : > { %237 = vst [vmem:[#allocation2 + $0x88] sm:$0xff] %v6717_v3  ;;  %238 = vst [vmem:[#allocation2 + $0x90] sm:$0xff] %v6717_v3  ;;  %v6875_v21 = vld [vmem:[%s8379_s1 + $0x170] sm:$0xff]   ;;  %v6618_v23 = vld [vmem:[%s8379_s1 + $0x138] sm:$0xff]   ;;  %v754_v57 = vor.u32 %v761_v46, %v750_v45  ;;  %s214_s30 = scalar_lea.vmem %s8381_s3, %s5527_s27  ;;  %s218_s7 = scalar_lea.vmem %s8382_s4, %s5527_s27 }
  0x17   : > { %239 = vst [vmem:[#allocation2 + $0x98] sm:$0xff] %v6717_v3  ;;  %240 = vst [vmem:[#allocation2 + $0xa0] sm:$0xff] %v6717_v3  ;;  %v6617_v22 = vld [vmem:[%s8379_s1 + $0xf0] sm:$0xff]   ;;  %v6892_v24 = vld [vmem:[%s8379_s1 + $0x178] sm:$0xff]  }
  0x18   : > { %241 = vst [vmem:[#allocation2 + $0xa8] sm:$0xff] %v6717_v3  ;;  %242 = vst [vmem:[#allocation2 + $0xb0] sm:$0xff] %v6717_v3  ;;  %5865 = vmatpush3.bf16.msra.mxu0 %v6605_v9  ;;  %6422 = vmatpush3.bf16.msra.mxu1 %v6815_v8  ;;  %v256_v25 = vld [vmem:[%s6880_s10] sm:$0xff]  ;;  %v257_v26 = vld [vmem:[%s6880_s10 + $0x8] sm:$0xff]  ;;  %v6930_v9 = vsel %vm739_vm1, %v754_v57, %v754_v57 }
  0x19   : > { %243 = vst [vmem:[#allocation2 + $0xb8] sm:$0xff] %v6717_v3  ;;  %244 = vst [vmem:[#allocation2 + $0xc0] sm:$0xff] %v6717_v3  ;;  %5866 = vmatprep.subr.bf16.mxu0 %v6606_v10  ;;  %6415 = vmatprep.subr.bf16.mxu1 %v6828_v11  ;;  %v288_v28 = vpack.c.bf16 %v257_v26, %v256_v25  ;;  %v272_v29 = vld [vmem:[%s6880_s10 + $0x80] sm:$0xff]  ;;  %v273_v30 = vld [vmem:[%s6880_s10 + $0x88] sm:$0xff] }
  0x1a   : > { %245 = vst [vmem:[#allocation2 + $0xc8] sm:$0xff] %v6717_v3  ;;  %246 = vst [vmem:[#allocation2 + $0xd0] sm:$0xff] %v6717_v3  ;;  %v274_v31 = vld [vmem:[%s6880_s10 + $0x90] sm:$0xff]  ;;  %v296_v34 = vpack.c.bf16 %v273_v30, %v272_v29  ;;  %v275_v35 = vld [vmem:[%s6880_s10 + $0x98] sm:$0xff] }
  0x1b   : > { %247 = vst [vmem:[#allocation2 + $0xd8] sm:$0xff] %v6717_v3  ;;  %248 = vst [vmem:[#allocation2 + $0xe0] sm:$0xff] %v6717_v3  ;;  %v320_v36 = vrot.slane %v288_v28, 4  ;;  %v297_v37 = vpack.c.bf16 %v275_v35, %v274_v31  ;;  %v6620_v39 = vld [vmem:[%s8379_s1 + $0xf8] sm:$0xff]   ;;  %v6621_v42 = vld [vmem:[%s8379_s1 + $0x40] sm:$0xff]  }
  0x1c   : > { %249 = vst [vmem:[#allocation2 + $0xe8] sm:$0xff] %v6717_v3  ;;  %250 = vst [vmem:[#allocation2 + $0xf0] sm:$0xff] %v6717_v3  ;;  %5867 = vmatpush3.bf16.msra.mxu0 %v6608_v12  ;;  %6423 = vmatpush3.bf16.msra.mxu1 %v6828_v11  ;;  %v328_v40 = vrot.slane %v296_v34, 4  ;;  %v258_v43 = vld [vmem:[%s6880_s10 + $0x10] sm:$0xff]  ;;  %v259_v44 = vld [vmem:[%s6880_s10 + $0x18] sm:$0xff] }
  0x1d   : > { %251 = vst [vmem:[#allocation2 + $0xf8] sm:$0xff] %v6717_v3  ;;  %252 = vst [vmem:[#allocation2 + $0x100] sm:$0xff] %v6717_v3  ;;  %5868 = vmatprep.subr.bf16.mxu0 %v6609_v13  ;;  %6416 = vmatprep.subr.bf16.mxu1 %v6843_v14  ;;  %v329_v41 = vrot.slane %v297_v37, 4  ;;  %v289_v47 = vpack.c.bf16 %v259_v44, %v258_v43  ;;  %v276_v48 = vld [vmem:[%s6880_s10 + $0xa0] sm:$0xff]  ;;  %v277_v49 = vld [vmem:[%s6880_s10 + $0xa8] sm:$0xff] }
  0x1e   : > { %253 = vst [vmem:[#allocation2 + $0x108] sm:$0xff] %v6717_v3  ;;  %353 = vst [vmem:[#allocation2 + $0x18] ss:$-4 sps:$4 sm:$0xff] %v320_v36   ;;  %v278_v50 = vld [vmem:[%s6880_s10 + $0xb0] sm:$0xff]  ;;  %v298_v51 = vpack.c.bf16 %v277_v49, %v276_v48  ;;  %v279_v52 = vld [vmem:[%s6880_s10 + $0xb8] sm:$0xff] }
  0x1f   : > { %369 = vst [vmem:[#allocation2 + $0x98] ss:$-4 sps:$4 sm:$0xff] %v328_v40   ;;  %371 = vst [vmem:[#allocation2 + $0xa8] ss:$-4 sps:$4 sm:$0xff] %v329_v41   ;;  %v321_v54 = vrot.slane %v289_v47, 4  ;;  %v299_v55 = vpack.c.bf16 %v279_v52, %v278_v50 }
  0x20   : > { %5869 = vmatpush3.bf16.msra.mxu0 %v6611_v15  ;;  %6424 = vmatpush3.bf16.msra.mxu1 %v6843_v14  ;;  %v330_v56 = vrot.slane %v298_v51, 4 }
  0x21   : > { %5870 = vmatprep.subr.bf16.mxu0 %v6612_v16  ;;  %6417 = vmatprep.subr.bf16.mxu1 %v6860_v17  ;;  %355 = vst [vmem:[#allocation2 + $0x28] ss:$-4 sps:$4 sm:$0xff] %v321_v54   ;;  %v331_v58 = vrot.slane %v299_v55, 4 }
  0x22   : > { %373 = vst [vmem:[#allocation2 + $0xb8] ss:$-4 sps:$4 sm:$0xff] %v330_v56  }
  0x23   : > { %375 = vst [vmem:[#allocation2 + $0xc8] ss:$-4 sps:$4 sm:$0xff] %v331_v58  }
  0x24   : > { %5871 = vmatpush3.bf16.msra.mxu0 %v6614_v19  ;;  %6425 = vmatpush3.bf16.msra.mxu1 %v6860_v17 }
  0x25   : > { %5872 = vmatprep.subr.bf16.mxu0 %v6615_v20  ;;  %6418 = vmatprep.subr.bf16.mxu1 %v6875_v21  ;;  %v1492_v59 = vld [vmem:[#allocation2 + $0x10] sm:$0xff]  ;;  %v1493_v60 = vld [vmem:[#allocation2 + $0x18] sm:$0xff] }
  0x26   : > { %v1525_v61 = vshrl.u32 %v1492_v59, 16  ;;  %v1527_v62 = vshll.u32 %v1492_v59, 16  ;;  %v1532_v63 = vshll.u32 %v1493_v60, 16  ;;  %v1536_v0 = vshrl.u32 %v1493_v60, 16  ;;  %v6925_v2 = vld [vmem:[#allocation2 + $0x90] sm:$0xff]  ;;  %v1509_v3 = vld [vmem:[#allocation2 + $0x98] sm:$0xff] }
  0x27   : > { %v1647_v4 = vshll.u32 %v6925_v2, 16  ;;  %v1820_v6 = vrot.slane %v6925_v2, 1  ;;  %v1821_v7 = vrot.slane %v1509_v3, 1  ;;  %v1510_v32 = vld [vmem:[#allocation2 + $0xa0] sm:$0xff]  ;;  %v1511_v37 = vld [vmem:[#allocation2 + $0xa8] sm:$0xff] }
  0x28   : > { %5873 = vmatpush3.bf16.msra.mxu0 %v6617_v22  ;;  %6426 = vmatpush3.bf16.msra.mxu1 %v6875_v21  ;;  %v1529_v10 = vrot.slane %v1527_v62, 1  ;;  %v1534_v12 = vrot.slane %v1532_v63, 1  ;;  %v1844_v13 = vrot.slane %v1525_v61, 3  ;;  %v1845_v15 = vrot.slane %v1527_v62, 4  ;;  %v1494_v43 = vld [vmem:[#allocation2 + $0x20] sm:$0xff]  ;;  %v6934_v52 = vld [vmem:[#allocation2 + $0x28] sm:$0xff] }
  0x29   : > { %5874 = vmatprep.subr.bf16.mxu0 %v6618_v23  ;;  %6419 = vmatprep.subr.bf16.mxu1 %v6892_v24  ;;  %v1822_v16 = vsel %vm690_vm2, %v1820_v6, %v1821_v7  ;;  %v2205_v18 = vshrl.u32 %v1821_v7, 16  ;;  %v2208_v19 = vshll.u32 %v1821_v7, 16  ;;  %v1847_v20 = vrot.slane %v1536_v0, 3  ;;  %v1512_v6 = vld [vmem:[#allocation2 + $0xb0] sm:$0xff]  ;;  %v1513_v7 = vld [vmem:[#allocation2 + $0xb8] sm:$0xff] }
  0x2a   : > { %v1530_v22 = vor.u32 %v1529_v10, %v1525_v61  ;;  %v1538_v23 = vor.u32 %v1536_v0, %v1534_v12  ;;  %v2197_v25 = vshrl.u32 %v1822_v16, 16  ;;  %v2200_v26 = vshll.u32 %v1822_v16, 16 }
  0x2b   : > { %v2207_v28 = vrot.slane %v2205_v18, 3  ;;  %v2210_v29 = vrot.slane %v2208_v19, 4  ;;  %v1846_v30 = vor.u32 %v1845_v15, %v1844_v13  ;;  %v1848_v31 = vrot.slane %v1532_v63, 4 }
  0x2c   : > { %5875 = vmatpush3.bf16.msra.mxu0 %v6620_v39  ;;  %6427 = vmatpush3.bf16.msra.mxu1 %v6892_v24  ;;  %v1535_v33 = vsel %vm417_vm0, %v1530_v22, %v1534_v12  ;;  %v1860_v34 = vshrl.u32 %v1538_v23, 16  ;;  %v1863_v35 = vshll.u32 %v1538_v23, 16  ;;  %v2199_v36 = vrot.slane %v2197_v25, 3 }
  0x2d   : > { %6268 = vmatprep.subr.bf16.mxu0 %v6757_v1  ;;  %5996 = vmatprep.subr.bf16.mxu1 %v6621_v42  ;;  %v1852_v39 = vshrl.u32 %v1535_v33, 16  ;;  %v1855_v40 = vshll.u32 %v1535_v33, 16  ;;  %v2202_v41 = vrot.slane %v2200_v26, 4  ;;  %v2211_v42 = vor.u32 %v2210_v29, %v2207_v28  ;;  %v6623_v33 = vld [vmem:[%s8379_s1 + $0x48] sm:$0xff]  }
  0x2e   : > { %v1862_v44 = vrot.slane %v1860_v34, 3  ;;  %v1865_v45 = vrot.slane %v1863_v35, 4  ;;  %v1849_v46 = vor.u32 %v1848_v31, %v1847_v20  ;;  %v1823_v47 = vrot.slane %v1510_v32, 1  ;;  %v6622_v20 = vld [vmem:[%s8379_s1] sm:$0xff]  }
  0x2f   : > { %v1854_v48 = vrot.slane %v1852_v39, 3  ;;  %v1857_v49 = vrot.slane %v1855_v40, 4  ;;  %v2203_v50 = vor.u32 %v2202_v41, %v2199_v36  ;;  %v1824_v51 = vrot.slane %v1511_v37, 1  ;;  %v6624_v39 = vld [vmem:[%s8379_s1 + $0x8] sm:$0xff]  }
  0x30   : > { %v1866_v54 = vor.u32 %v1865_v45, %v1862_v44  ;;  %v1850_v55 = vsel %vm739_vm1, %v1846_v30, %v1849_v46  ;;  %v1540_v56 = vshrl.u32 %v1494_v43, 16  ;;  %v1542_v57 = vshll.u32 %v1494_v43, 16  ;;  %v1514_v43 = vld [vmem:[#allocation2 + $0xc0] sm:$0xff]  ;;  %v6966_v45 = vld [vmem:[%s6880_s10 + $0x28] sm:$0xff] }
  0x31   : > { %v1858_v58 = vor.u32 %v1857_v49, %v1854_v48  ;;  %v2212_v59 = vsel %vm739_vm1, %v2203_v50, %v2211_v42  ;;  %v1825_v60 = vsel %vm690_vm2, %v1823_v47, %v1824_v51  ;;  %v2246_v61 = vshrl.u32 %v1824_v51, 16  ;;  %v6963_v44 = vld [vmem:[%s6880_s10 + $0x20] sm:$0xff]  ;;  %v6625_v50 = vld [vmem:[%s8379_s1 + $0x50] sm:$0xff]  }
  0x32   : > { %6300 = vmatprep.mubr.bf16.mxu1 %v2212_v59  ;;  %v2238_v62 = vshrl.u32 %v1825_v60, 16  ;;  %v2241_v63 = vshll.u32 %v1825_v60, 16  ;;  %v2249_v0 = vshll.u32 %v1824_v51, 16  ;;  %v1544_v3 = vrot.slane %v1542_v57, 1  ;;  %v280_v51 = vld [vmem:[%s6880_s10 + $0xc0] sm:$0xff]  ;;  %v282_v59 = vld [vmem:[%s6880_s10 + $0xd0] sm:$0xff] }
  0x33   : > { %v1867_v10 = vsel %vm739_vm1, %v1858_v58, %v1866_v54  ;;  %v2248_v12 = vrot.slane %v2246_v61, 3  ;;  %v1547_v13 = vshll.u32 %v6934_v52, 16  ;;  %v1551_v15 = vshrl.u32 %v6934_v52, 16  ;;  %v281_v52 = vld [vmem:[%s6880_s10 + $0xc8] sm:$0xff] }
  0x34   : > { %2773 = vmatprep.mubr.bf16.mxu0 %v1867_v10  ;;  %v2240_v16 = vrot.slane %v2238_v62, 3  ;;  %v2243_v18 = vrot.slane %v2241_v63, 4  ;;  %v2251_v19 = vrot.slane %v2249_v0, 4  ;;  %v1545_v22 = vor.u32 %v1544_v3, %v1540_v56  ;;  %v1515_v58 = vld [vmem:[#allocation2 + $0xc8] sm:$0xff]  ;;  %v283_v0 = vld [vmem:[%s6880_s10 + $0xd8] sm:$0xff] }
  0x35   : > { %2774 = vmatmul.mubr.bf16.vlgmr.msra.gmra.mrb[0].mxu0 %v1850_v55  ;;  %v1549_v23 = vrot.slane %v1547_v13, 1  ;;  %v1826_v25 = vrot.slane %v1512_v6, 1  ;;  %v1827_v26 = vrot.slane %v1513_v7, 1  ;;  %v6945_v28 = vrot.slane %v1540_v56, 3 }
  0x36   : > { %v2244_v29 = vor.u32 %v2243_v18, %v2240_v16  ;;  %v2252_v30 = vor.u32 %v2251_v19, %v2248_v12  ;;  %6269 = vmatpush3.bf16.msra.mxu0 %v6757_v1  ;;  %v6948_v31 = vrot.slane %v1542_v57, 4  ;;  %v6950_v32 = vrot.slane %v1551_v15, 3  ;;  %v6627_v18 = vld [vmem:[%s8379_s1 + $0x58] sm:$0xff]  }
  0x37   : > { %v1550_v34 = vsel %vm417_vm0, %v1545_v22, %v1549_v23  ;;  %v1553_v35 = vor.u32 %v1551_v15, %v1549_v23  ;;  %v1828_v36 = vsel %vm690_vm2, %v1826_v25, %v1827_v26  ;;  %v2287_v37 = vshrl.u32 %v1827_v26, 16  ;;  %6270 = vmatprep.subr.bf16.mxu0 %v6803_v5 }
  0x38   : > { %v2253_v1 = vsel %vm739_vm1, %v2244_v29, %v2252_v30  ;;  %v1893_v40 = vshrl.u32 %v1550_v34, 16  ;;  %v1896_v41 = vshll.u32 %v1550_v34, 16  ;;  %v2279_v42 = vshrl.u32 %v1828_v36, 16  ;;  %v285_v29 = vld [vmem:[%s6880_s10 + $0xe8] sm:$0xff]  ;;  %v286_v30 = vld [vmem:[%s6880_s10 + $0xf0] sm:$0xff] }
  0x39   : > { %6301 = vmatmul.mubr.bf16.vlgmr.msra.gmra.mrb[0].mxu1 %v2253_v1  ;;  %v1901_v46 = vshrl.u32 %v1553_v35, 16  ;;  %v1904_v47 = vshll.u32 %v1553_v35, 16  ;;  %v2282_v48 = vshll.u32 %v1828_v36, 16  ;;  %v2289_v49 = vrot.slane %v2287_v37, 3  ;;  %v265_v1 = vld [vmem:[%s6880_s10 + $0x48] sm:$0xff] }
  0x3a   : > { %5997 = vmatpush3.bf16.msra.mxu1 %v6622_v20  ;;  %v1895_v54 = vrot.slane %v1893_v40, 3  ;;  %v1898_v55 = vrot.slane %v1896_v41, 4  ;;  %v2281_v56 = vrot.slane %v2279_v42, 3  ;;  %v2290_v57 = vshll.u32 %v1827_v26, 16  ;;  %6271 = vmatpush3.bf16.msra.mxu0 %v6803_v5  ;;  %v6626_v5 = vld [vmem:[%s8379_s1 + $0x10] sm:$0xff]   ;;  %v263_v20 = vld [vmem:[%s6880_s10 + $0x38] sm:$0xff] }
  0x3b   : > { %5998 = vmatprep.subr.bf16.mxu1 %v6623_v33  ;;  %v1903_v60 = vrot.slane %v1901_v46, 3  ;;  %v1906_v61 = vrot.slane %v1904_v47, 4  ;;  %v2284_v62 = vrot.slane %v2282_v48, 4  ;;  %v1887_v63 = vor.u32 %v6948_v31, %v6945_v28  ;;  %6272 = vmatprep.subr.bf16.mxu0 %v6815_v8  ;;  %v284_v28 = vld [vmem:[%s6880_s10 + $0xe0] sm:$0xff]  ;;  %v287_v31 = vld [vmem:[%s6880_s10 + $0xf8] sm:$0xff] }
  0x3c   : > { %v1899_v3 = vor.u32 %v1898_v55, %v1895_v54  ;;  %v2292_v6 = vrot.slane %v2290_v57, 4  ;;  %v1889_v7 = vrot.slane %v1547_v13, 4  ;;  %v1829_v10 = vrot.slane %v1514_v43, 1  ;;  %v262_v13 = vld [vmem:[%s6880_s10 + $0x30] sm:$0xff]  ;;  %v264_v33 = vld [vmem:[%s6880_s10 + $0x40] sm:$0xff]  ;;  %v6628_v43 = vld [vmem:[%s8379_s1 + $0x18] sm:$0xff]  }
  0x3d   : > { %v1907_v12 = vor.u32 %v1906_v61, %v1903_v60  ;;  %v2285_v15 = vor.u32 %v2284_v62, %v2281_v56  ;;  %v1830_v16 = vrot.slane %v1515_v58, 1  ;;  %v290_v19 = vpack.c.bf16 %v6966_v45, %v6963_v44  ;;  %v267_v44 = vld [vmem:[%s6880_s10 + $0x58] sm:$0xff]  ;;  %v7011_v45 = vld [vmem:[#allocation2 + $0x10] sm:$0xff] }
  0x3e   : > { %5999 = vmatpush3.bf16.msra.mxu1 %v6624_v39  ;;  %v2293_v22 = vor.u32 %v2292_v6, %v2289_v49  ;;  %v1890_v23 = vor.u32 %v1889_v7, %v6950_v32  ;;  %v300_v25 = vpack.c.bf16 %v281_v52, %v280_v51  ;;  %v301_v26 = vpack.c.bf16 %v283_v0, %v282_v59  ;;  %v266_v32 = vld [vmem:[%s6880_s10 + $0x50] sm:$0xff]  ;;  %v6629_v49 = vld [vmem:[%s8379_s1 + $0x60] sm:$0xff]   ;;  %v388_v55 = vld [vmem:[#allocation2 + $0x18] sm:$0xff] }
  0x3f   : > { %v6996_v34 = vsel %vm739_vm1, %v1899_v3, %v1907_v12  ;;  %v1831_v35 = vsel %vm690_vm2, %v1829_v10, %v1830_v16  ;;  %v2328_v36 = vshrl.u32 %v1830_v16, 16  ;;  %v2331_v37 = vshll.u32 %v1830_v16, 16  ;;  %6000 = vmatprep.subr.bf16.mxu1 %v6625_v50  ;;  %6273 = vmatpush3.bf16.msra.mxu0 %v6815_v8  ;;  %v268_v0 = vld [vmem:[%s6880_s10 + $0x60] sm:$0xff]  ;;  %v269_v3 = vld [vmem:[%s6880_s10 + $0x68] sm:$0xff]  ;;  %v270_v12 = vld [vmem:[%s6880_s10 + $0x70] sm:$0xff] }
  0x40   : > { %2781 = vmatprep.mubr.bf16.mxu0 %v6996_v34  ;;  %v2294_v39 = vsel %vm739_vm1, %v2285_v15, %v2293_v22  ;;  %v7005_v40 = vsel %vm739_vm1, %v1887_v63, %v1890_v23  ;;  %v2320_v41 = vshrl.u32 %v1831_v35, 16  ;;  %v2323_v42 = vshll.u32 %v1831_v35, 16  ;;  %6274 = vmatprep.subr.bf16.mxu0 %v6828_v11  ;;  %v271_v15 = vld [vmem:[%s6880_s10 + $0x78] sm:$0xff]  ;;  %v6633_v35 = vld [vmem:[%s8379_s1 + $0x70] sm:$0xff]  }
  0x41   : > { %6304 = vmatprep.mubr.bf16.mxu1 %v2294_v39  ;;  %2782 = vmatmul.mubr.bf16.gmra.mrb[4].mxu0 %v7005_v40  ;;  %v2330_v8 = vrot.slane %v2328_v36, 3  ;;  %v2333_v46 = vrot.slane %v2331_v37, 4  ;;  %v322_v47 = vrot.slane %v290_v19, 4  ;;  %v332_v48 = vrot.slane %v300_v25, 4 }
  0x42   : > { %v2322_v50 = vrot.slane %v2320_v41, 3  ;;  %v2325_v51 = vrot.slane %v2323_v42, 4  ;;  %6001 = vmatpush3.bf16.msra.mxu1 %v6626_v5  ;;  %v333_v52 = vrot.slane %v301_v26, 4  ;;  %v291_v54 = vpack.c.bf16 %v263_v20, %v262_v13  ;;  %v6631_v20 = vld [vmem:[%s8379_s1 + $0x68] sm:$0xff]  }
  0x43   : > { %v2334_v56 = vor.u32 %v2333_v46, %v2330_v8  ;;  %6002 = vmatprep.subr.bf16.mxu1 %v6627_v18  ;;  %357 = vst [vmem:[#allocation2 + $0x38] ss:$-4 sps:$4 sm:$0xff] %v322_v47   ;;  %377 = vst [vmem:[#allocation2 + $0xd8] ss:$-4 sps:$4 sm:$0xff] %v332_v48   ;;  %v302_v57 = vpack.c.bf16 %v285_v29, %v284_v28  ;;  %v303_v58 = vpack.c.bf16 %v287_v31, %v286_v30  ;;  %v6630_v18 = vld [vmem:[%s8379_s1 + $0x20] sm:$0xff]  }
  0x44   : > { %v292_v59 = vpack.c.bf16 %v265_v1, %v264_v33  ;;  %v2326_v60 = vor.u32 %v2325_v51, %v2322_v50  ;;  %379 = vst [vmem:[#allocation2 + $0xe8] ss:$-4 sps:$4 sm:$0xff] %v333_v52   ;;  %v323_v61 = vrot.slane %v291_v54, 4  ;;  %v293_v62 = vpack.c.bf16 %v267_v44, %v266_v32  ;;  %6275 = vmatpush3.bf16.msra.mxu0 %v6828_v11  ;;  %v6632_v33 = vld [vmem:[%s8379_s1 + $0x28] sm:$0xff]  }
  0x45   : > { %v434_v63 = vshrl.u32 %v7011_v45, 16  ;;  %v334_v6 = vrot.slane %v302_v57, 4  ;;  %v335_v7 = vrot.slane %v303_v58, 4  ;;  %v436_v5 = vshll.u32 %v7011_v45, 16  ;;  %6276 = vmatprep.subr.bf16.mxu0 %v6843_v14 }
  0x46   : > { %v324_v10 = vrot.slane %v292_v59, 4  ;;  %v2335_v16 = vsel %vm739_vm1, %v2326_v60, %v2334_v56  ;;  %6003 = vmatpush3.bf16.msra.mxu1 %v6628_v43  ;;  %359 = vst [vmem:[#allocation2 + $0x48] ss:$-4 sps:$4 sm:$0xff] %v323_v61   ;;  %v325_v19 = vrot.slane %v293_v62, 4  ;;  %v441_v13 = vshll.u32 %v388_v55, 16 }
  0x47   : > { %v445_v11 = vshrl.u32 %v388_v55, 16  ;;  %6305 = vmatmul.mubr.bf16.gmra.mrb[4].mxu1 %v2335_v16  ;;  %6004 = vmatprep.subr.bf16.mxu1 %v6629_v49  ;;  %381 = vst [vmem:[#allocation2 + $0xf8] ss:$-4 sps:$4 sm:$0xff] %v334_v6   ;;  %383 = vst [vmem:[#allocation2 + $0x108] ss:$-4 sps:$4 sm:$0xff] %v335_v7   ;;  %v438_v22 = vrot.slane %v436_v5, 1  ;;  %v294_v26 = vpack.c.bf16 %v269_v3, %v268_v0 }
  0x48   : > { %361 = vst [vmem:[#allocation2 + $0x58] ss:$-4 sps:$4 sm:$0xff] %v324_v10   ;;  %v7033_v23 = vrot.slane %v434_v63, 3  ;;  %v7035_v25 = vrot.slane %v436_v5, 4  ;;  %363 = vst [vmem:[#allocation2 + $0x68] ss:$-4 sps:$4 sm:$0xff] %v325_v19   ;;  %v295_v31 = vpack.c.bf16 %v271_v15, %v270_v12  ;;  %6277 = vmatpush3.bf16.msra.mxu0 %v6843_v14 }
  0x49   : > { %v443_v28 = vrot.slane %v441_v13, 1  ;;  %v7037_v29 = vrot.slane %v445_v11, 3  ;;  %v7039_v30 = vrot.slane %v441_v13, 4  ;;  %v439_v36 = vor.u32 %v438_v22, %v434_v63  ;;  %6278 = vmatprep.subr.bf16.mxu0 %v6860_v17  ;;  %v6634_v0 = vld [vmem:[%s8379_s1 + $0x30] sm:$0xff]   ;;  %v6635_v10 = vld [vmem:[%s8379_s1 + $0x78] sm:$0xff]  }
  0x4a   : > { %v783_v37 = vor.u32 %v7035_v25, %v7033_v23  ;;  %v326_v1 = vrot.slane %v294_v26, 4  ;;  %v1645_v32 = vshrl.u32 %v6925_v2, 16  ;;  %v1496_v39 = vld [vmem:[#allocation2 + $0x30] sm:$0xff]  ;;  %v1497_v41 = vld [vmem:[#allocation2 + $0x38] sm:$0xff]  ;;  %6005 = vmatpush3.bf16.msra.mxu1 %v6630_v18  ;;  %v327_v44 = vrot.slane %v295_v31, 4 }
  0x4b   : > { %v7052_v14 = vld [vmem:[#allocation2 + $0xd0] sm:$0xff]  ;;  %v7054_v42 = vor.u32 %v445_v11, %v443_v28  ;;  %v786_v43 = vor.u32 %v7039_v30, %v7037_v29  ;;  %v7060_v45 = vrot.slane %v1647_v4, 1  ;;  %v1555_v8 = vshrl.u32 %v1496_v39, 16  ;;  %v7062_v49 = vld [vmem:[#allocation2 + $0xd8] sm:$0xff]  ;;  %v7064_v50 = vld [vmem:[#allocation2 + $0xe0] sm:$0xff]  ;;  %6006 = vmatprep.subr.bf16.mxu1 %v6631_v20 }
  0x4c   : > { %v1557_v46 = vshll.u32 %v1496_v39, 16  ;;  %v1562_v47 = vshll.u32 %v1497_v41, 16  ;;  %v1566_v48 = vshrl.u32 %v1497_v41, 16  ;;  %365 = vst [vmem:[#allocation2 + $0x78] ss:$-4 sps:$4 sm:$0xff] %v326_v1   ;;  %v1832_v51 = vrot.slane %v7052_v14, 1  ;;  %6279 = vmatpush3.bf16.msra.mxu0 %v6860_v17 }
  0x4d   : > { %v1833_v52 = vrot.slane %v7062_v49, 1  ;;  %v1835_v54 = vrot.slane %v7064_v50, 1  ;;  %v7070_v55 = vsel %vm417_vm0, %v439_v36, %v443_v28  ;;  %367 = vst [vmem:[#allocation2 + $0x88] ss:$-4 sps:$4 sm:$0xff] %v327_v44   ;;  %v1926_v58 = vrot.slane %v1555_v8, 3  ;;  %6280 = vmatprep.subr.bf16.mxu0 %v6875_v21  ;;  %v7081_v18 = vld [vmem:[#allocation2 + $0xe8] sm:$0xff] }
  0x4e   : > { %v1559_v56 = vrot.slane %v1557_v46, 1  ;;  %v1564_v57 = vrot.slane %v1562_v47, 1  ;;  %v1927_v59 = vrot.slane %v1557_v46, 4  ;;  %v1929_v63 = vrot.slane %v1566_v48, 3  ;;  %6007 = vmatpush3.bf16.msra.mxu1 %v6632_v33  ;;  %v6636_v33 = vld [vmem:[%s8379_s1 + $0x38] sm:$0xff]   ;;  %v1498_v39 = vld [vmem:[#allocation2 + $0x40] sm:$0xff] }
  0x4f   : > { %v1834_v60 = vsel %vm690_vm2, %v1832_v51, %v1833_v52  ;;  %v2369_v61 = vshrl.u32 %v1833_v52, 16  ;;  %v2372_v62 = vshll.u32 %v1833_v52, 16  ;;  %6008 = vmatprep.subr.bf16.mxu1 %v6633_v35  ;;  %v1930_v16 = vrot.slane %v1562_v47, 4  ;;  %v7090_v41 = vld [vmem:[#allocation2 + $0x48] sm:$0xff]  ;;  %v7095_v44 = vld [vmem:[%s8379_s1 + $0x80] sm:$0xff]   ;;  %v7097_v51 = vld [vmem:[#allocation2 + $0xf0] sm:$0xff] }
  0x50   : > { %v1560_v3 = vor.u32 %v1559_v56, %v1555_v8  ;;  %v1568_v6 = vor.u32 %v1566_v48, %v1564_v57  ;;  %v2361_v7 = vshrl.u32 %v1834_v60, 16  ;;  %v2364_v17 = vshll.u32 %v1834_v60, 16  ;;  %6281 = vmatpush3.bf16.msra.mxu0 %v6875_v21  ;;  %v6643_v2 = vld [vmem:[%s8379_s1 + $0xb0] sm:$0xff]  }
  0x51   : > { %v2371_v5 = vrot.slane %v2369_v61, 3  ;;  %v2374_v12 = vrot.slane %v2372_v62, 4  ;;  %v1928_v15 = vor.u32 %v1927_v59, %v1926_v58  ;;  %6282 = vmatprep.subr.bf16.mxu0 %v6892_v24  ;;  %v1931_v1 = vor.u32 %v1930_v16, %v1929_v63  ;;  %v7104_v59 = vld [vmem:[#allocation2 + $0xf8] sm:$0xff] }
  0x52   : > { %v1565_v19 = vsel %vm417_vm0, %v1560_v3, %v1564_v57  ;;  %v1942_v13 = vshrl.u32 %v1568_v6, 16  ;;  %v1945_v11 = vshll.u32 %v1568_v6, 16  ;;  %v2363_v20 = vrot.slane %v2361_v7, 3  ;;  %6009 = vmatpush3.bf16.msra.mxu1 %v6634_v0 }
  0x53   : > { %v1934_v22 = vshrl.u32 %v1565_v19, 16  ;;  %v1937_v26 = vshll.u32 %v1565_v19, 16  ;;  %v2366_v28 = vrot.slane %v2364_v17, 4  ;;  %v2375_v31 = vor.u32 %v2374_v12, %v2371_v5  ;;  %6010 = vmatprep.subr.bf16.mxu1 %v6635_v10 }
  0x54   : > { %v1944_v35 = vrot.slane %v1942_v13, 3  ;;  %v1947_v36 = vrot.slane %v1945_v11, 4  ;;  %v1836_v21 = vrot.slane %v7081_v18, 1  ;;  %v1570_v48 = vshrl.u32 %v1498_v39, 16  ;;  %6283 = vmatpush3.bf16.msra.mxu0 %v6892_v24  ;;  %v1506_v38 = vld [vmem:[#allocation2 + $0x80] sm:$0xff] }
  0x55   : > { %v1936_v8 = vrot.slane %v1934_v22, 3  ;;  %v1939_v46 = vrot.slane %v1937_v26, 4  ;;  %v2367_v47 = vor.u32 %v2366_v28, %v2363_v20  ;;  %v7101_v56 = vsel %vm739_vm1, %v1928_v15, %v1931_v1 }
  0x56   : > { %v1948_v52 = vor.u32 %v1947_v36, %v1944_v35  ;;  %v1837_v57 = vsel %vm690_vm2, %v1835_v54, %v1836_v21  ;;  %v2410_v58 = vshrl.u32 %v1836_v21, 16  ;;  %6011 = vmatpush3.bf16.msra.mxu1 %v6636_v33  ;;  %v2413_v3 = vshll.u32 %v1836_v21, 16 }
  0x57   : > { %v1940_v60 = vor.u32 %v1939_v46, %v1936_v8  ;;  %v2376_v61 = vsel %vm739_vm1, %v2367_v47, %v2375_v31  ;;  %v2402_v62 = vshrl.u32 %v1837_v57, 16  ;;  %v2405_v63 = vshll.u32 %v1837_v57, 16  ;;  %6316 = vmatprep.subr.bf16.mxu1 %v7095_v44  ;;  %v6644_v46 = vld [vmem:[%s8379_s1 + $0x1c0] sm:$0xff]  }
  0x58   : > { %6308 = vmatprep.mubr.bf16.mxu1 %v2376_v61  ;;  %v2412_v0 = vrot.slane %v2410_v58, 3  ;;  %v1572_v6 = vshll.u32 %v1498_v39, 16  ;;  %v1577_v24 = vshll.u32 %v7090_v41, 16  ;;  %v1581_v10 = vshrl.u32 %v7090_v41, 16  ;;  %v7123_v58 = vld [vmem:[#allocation2 + $0x100] sm:$0xff]  ;;  %6132 = vmatprep.subr.bf16.mxu0 %v6644_v46 }
  0x59   : > { %v7110_v7 = vsel %vm739_vm1, %v1940_v60, %v1948_v52  ;;  %v2404_v54 = vrot.slane %v2402_v62, 3  ;;  %v2407_v17 = vrot.slane %v2405_v63, 4  ;;  %v2415_v5 = vrot.slane %v2413_v3, 4 }
  0x5a   : > { %2789 = vmatprep.mubr.bf16.mxu0 %v7110_v7  ;;  %v1574_v12 = vrot.slane %v1572_v6, 1  ;;  %v1579_v15 = vrot.slane %v1577_v24, 1  ;;  %v1838_v16 = vrot.slane %v7097_v51, 1  ;;  %v1839_v13 = vrot.slane %v7104_v59, 1 }
  0x5b   : > { %2790 = vmatmul.mubr.bf16.gmra.mrb[8].mxu0 %v7101_v56  ;;  %v2408_v19 = vor.u32 %v2407_v17, %v2404_v54  ;;  %v1967_v11 = vrot.slane %v1570_v48, 3  ;;  %v1968_v20 = vrot.slane %v1572_v6, 4  ;;  %v2416_v22 = vor.u32 %v2415_v5, %v2412_v0  ;;  %v7125_v0 = vld [vmem:[#allocation2 + $0x108] sm:$0xff]  ;;  %v1501_v5 = vld [vmem:[#allocation2 + $0x58] sm:$0xff] }
  0x5c   : > { %v1575_v26 = vor.u32 %v1574_v12, %v1570_v48  ;;  %v1583_v28 = vor.u32 %v1581_v10, %v1579_v15  ;;  %v1970_v31 = vrot.slane %v1581_v10, 3  ;;  %v1840_v33 = vsel %vm690_vm2, %v1838_v16, %v1839_v13  ;;  %v1500_v10 = vld [vmem:[#allocation2 + $0x50] sm:$0xff] }
  0x5d   : > { %v2451_v35 = vshrl.u32 %v1839_v13, 16  ;;  %v2454_v36 = vshll.u32 %v1839_v13, 16  ;;  %v1969_v1 = vor.u32 %v1968_v20, %v1967_v11  ;;  %v2417_v21 = vsel %vm739_vm1, %v2408_v19, %v2416_v22 }
  0x5e   : > { %v1580_v39 = vsel %vm417_vm0, %v1575_v26, %v1579_v15  ;;  %v1983_v41 = vshrl.u32 %v1583_v28, 16  ;;  %v1986_v8 = vshll.u32 %v1583_v28, 16  ;;  %6309 = vmatmul.mubr.bf16.gmra.mrb[8].mxu1 %v2417_v21  ;;  %v2443_v52 = vshrl.u32 %v1840_v33, 16 }
  0x5f   : > { %v1975_v47 = vshrl.u32 %v1580_v39, 16  ;;  %v1978_v48 = vshll.u32 %v1580_v39, 16  ;;  %v2446_v57 = vshll.u32 %v1840_v33, 16  ;;  %v2453_v62 = vrot.slane %v2451_v35, 3 }
  0x60   : > { %v1985_v60 = vrot.slane %v1983_v41, 3  ;;  %v1988_v61 = vrot.slane %v1986_v8, 4  ;;  %v2456_v63 = vrot.slane %v2454_v36, 4  ;;  %v2445_v54 = vrot.slane %v2443_v52, 3 }
  0x61   : > { %v1977_v3 = vrot.slane %v1975_v47, 3  ;;  %v1980_v6 = vrot.slane %v1978_v48, 4  ;;  %v2448_v17 = vrot.slane %v2446_v57, 4  ;;  %v1971_v16 = vrot.slane %v1577_v24, 4 }
  0x62   : > { %v1989_v12 = vor.u32 %v1988_v61, %v1985_v60  ;;  %v2457_v15 = vor.u32 %v2456_v63, %v2453_v62  ;;  %v1841_v19 = vrot.slane %v7123_v58, 1  ;;  %v1842_v20 = vrot.slane %v7125_v0, 1  ;;  %v1502_v60 = vld [vmem:[#allocation2 + $0x60] sm:$0xff] }
  0x63   : > { %v1981_v13 = vor.u32 %v1980_v6, %v1977_v3  ;;  %v2449_v11 = vor.u32 %v2448_v17, %v2445_v54  ;;  %v1585_v22 = vshrl.u32 %v1500_v10, 16  ;;  %v1972_v26 = vor.u32 %v1971_v16, %v1970_v31 }
  0x64   : > { %v1587_v28 = vshll.u32 %v1500_v10, 16  ;;  %v1592_v33 = vshll.u32 %v1501_v5, 16  ;;  %v1596_v35 = vshrl.u32 %v1501_v5, 16  ;;  %v1843_v39 = vsel %vm690_vm2, %v1841_v19, %v1842_v20 }
  0x65   : > { %v7130_v36 = vsel %vm739_vm1, %v1981_v13, %v1989_v12  ;;  %v2458_v21 = vsel %vm739_vm1, %v2449_v11, %v2457_v15  ;;  %v2492_v41 = vshrl.u32 %v1842_v20, 16  ;;  %v7136_v24 = vsel %vm739_vm1, %v1969_v1, %v1972_v26  ;;  %v1503_v15 = vld [vmem:[#allocation2 + $0x68] sm:$0xff] }
  0x66   : > { %2797 = vmatprep.mubr.bf16.mxu0 %v7130_v36  ;;  %6312 = vmatprep.mubr.bf16.mxu1 %v2458_v21  ;;  %v2484_v8 = vshrl.u32 %v1843_v39, 16  ;;  %v2487_v46 = vshll.u32 %v1843_v39, 16  ;;  %v2495_v31 = vshll.u32 %v1842_v20, 16  ;;  %v1589_v48 = vrot.slane %v1587_v28, 1 }
  0x67   : > { %2798 = vmatmul.mubr.bf16.gmra.mrb[12].mxu0 %v7136_v24  ;;  %v2494_v47 = vrot.slane %v2492_v41, 3  ;;  %v1594_v52 = vrot.slane %v1592_v33, 1  ;;  %v2008_v57 = vrot.slane %v1585_v22, 3  ;;  %v2009_v3 = vrot.slane %v1587_v28, 4 }
  0x68   : > { %v2486_v61 = vrot.slane %v2484_v8, 3  ;;  %v2489_v62 = vrot.slane %v2487_v46, 4  ;;  %v2497_v63 = vrot.slane %v2495_v31, 4  ;;  %v1590_v6 = vor.u32 %v1589_v48, %v1585_v22 }
  0x69   : > { %v1598_v54 = vor.u32 %v1596_v35, %v1594_v52  ;;  %v2011_v17 = vrot.slane %v1596_v35, 3  ;;  %v2012_v10 = vrot.slane %v1592_v33, 4  ;;  %v2010_v12 = vor.u32 %v2009_v3, %v2008_v57 }
  0x6a   : > { %v2490_v1 = vor.u32 %v2489_v62, %v2486_v61  ;;  %v2498_v5 = vor.u32 %v2497_v63, %v2494_v47  ;;  %v1600_v16 = vshrl.u32 %v1502_v60, 16  ;;  %v1595_v19 = vsel %vm417_vm0, %v1590_v6, %v1594_v52 }
  0x6b   : > { %v2024_v13 = vshrl.u32 %v1598_v54, 16  ;;  %v2027_v11 = vshll.u32 %v1598_v54, 16  ;;  %v2013_v20 = vor.u32 %v2012_v10, %v2011_v17  ;;  %v2016_v21 = vshrl.u32 %v1595_v19, 16 }
  0x6c   : > { %v2499_v26 = vsel %vm739_vm1, %v2490_v1, %v2498_v5  ;;  %v2019_v39 = vshll.u32 %v1595_v19, 16  ;;  %v1602_v41 = vshll.u32 %v1502_v60, 16  ;;  %v1607_v35 = vshll.u32 %v1503_v15, 16 }
  0x6d   : > { %6313 = vmatmul.mubr.bf16.gmra.mrb[12].mxu1 %v2499_v26  ;;  %v2026_v22 = vrot.slane %v2024_v13, 3  ;;  %v2029_v28 = vrot.slane %v2027_v11, 4  ;;  %v7142_v33 = vsel %vm739_vm1, %v2010_v12, %v2013_v20  ;;  %v2018_v8 = vrot.slane %v2016_v21, 3  ;;  %v1504_v21 = vld [vmem:[#allocation2 + $0x70] sm:$0xff] }
  0x6e   : > { %v2021_v46 = vrot.slane %v2019_v39, 4  ;;  %3239 = vmatprep.mubr.bf16.mxu1 %v6930_v9  ;;  %v1604_v31 = vrot.slane %v1602_v41, 1  ;;  %v1611_v47 = vshrl.u32 %v1503_v15, 16  ;;  %v1609_v52 = vrot.slane %v1607_v35, 1  ;;  %v1505_v39 = vld [vmem:[#allocation2 + $0x78] sm:$0xff] }
  0x6f   : > { %v2030_v48 = vor.u32 %v2029_v28, %v2026_v22  ;;  %v789_v57 = vshrl.u32 %v7070_v55, 16  ;;  %v792_v61 = vshll.u32 %v7070_v55, 16  ;;  %v797_v63 = vshrl.u32 %v7054_v42, 16 }
  0x70   : > { %v2022_v60 = vor.u32 %v2021_v46, %v2018_v8  ;;  %v1605_v62 = vor.u32 %v1604_v31, %v1600_v16  ;;  %v800_v3 = vshll.u32 %v7054_v42, 16  ;;  %v1613_v6 = vor.u32 %v1611_v47, %v1609_v52  ;;  %v6638_v42 = vld [vmem:[%s8379_s1 + $0x88] sm:$0xff]   ;;  %v6639_v31 = vld [vmem:[%s8379_s1 + $0x90] sm:$0xff]  }
  0x71   : > { %v791_v54 = vrot.slane %v789_v57, 3  ;;  %v794_v17 = vrot.slane %v792_v61, 4  ;;  %v2049_v10 = vrot.slane %v1600_v16, 3  ;;  %v799_v5 = vrot.slane %v797_v63, 3  ;;  %v1507_v63 = vld [vmem:[#allocation2 + $0x88] sm:$0xff] }
  0x72   : > { %v7150_v9 = vsel %vm739_vm1, %v2022_v60, %v2030_v48  ;;  %v1610_v1 = vsel %vm417_vm0, %v1605_v62, %v1609_v52  ;;  %v802_v12 = vrot.slane %v800_v3, 4  ;;  %v2065_v19 = vshrl.u32 %v1613_v6, 16 }
  0x73   : > { %2805 = vmatprep.mubr.bf16.mxu0 %v7150_v9  ;;  %v2057_v55 = vshrl.u32 %v1610_v1, 16  ;;  %v2060_v15 = vshll.u32 %v1610_v1, 16  ;;  %v2068_v13 = vshll.u32 %v1613_v6, 16  ;;  %v795_v16 = vor.u32 %v794_v17, %v791_v54 }
  0x74   : > { %2806 = vmatmul.mubr.bf16.gmra.mrb[16].mxu0 %v7142_v33  ;;  %v803_v11 = vor.u32 %v802_v12, %v799_v5  ;;  %v2050_v20 = vrot.slane %v1602_v41, 4  ;;  %v2052_v26 = vrot.slane %v1611_v47, 3  ;;  %v2067_v8 = vrot.slane %v2065_v19, 3  ;;  %v6640_v5 = vld [vmem:[%s8379_s1 + $0x98] sm:$0xff]  }
  0x75   : > { %3240 = vmatmul.mubr.bf16.vlgmr.msra.gmra.mrb[16].mxu1 %v742_v53  ;;  %v2059_v22 = vrot.slane %v2057_v55, 3  ;;  %v2062_v28 = vrot.slane %v2060_v15, 4  ;;  %v2070_v46 = vrot.slane %v2068_v13, 4  ;;  %v2053_v47 = vrot.slane %v1607_v35, 4 }
  0x76   : > { %6317 = vmatpush3.bf16.msra.mxu1 %v7095_v44  ;;  %v804_v48 = vsel %vm739_vm1, %v795_v16, %v803_v11  ;;  %v2051_v41 = vor.u32 %v2050_v20, %v2049_v10  ;;  %v787_v27 = vsel %vm739_vm1, %v783_v37, %v786_v43  ;;  %v1615_v57 = vshrl.u32 %v1504_v21, 16 }
  0x77   : > { %v2063_v53 = vor.u32 %v2062_v28, %v2059_v22  ;;  %v2071_v52 = vor.u32 %v2070_v46, %v2067_v8  ;;  %3247 = vmatprep.mubr.bf16.mxu1 %v804_v48  ;;  %v1617_v61 = vshll.u32 %v1504_v21, 16  ;;  %6318 = vmatprep.subr.bf16.mxu1 %v6638_v42  ;;  %v2054_v44 = vor.u32 %v2053_v47, %v2052_v26  ;;  %v6641_v48 = vld [vmem:[%s8379_s1 + $0xa0] sm:$0xff]  }
  0x78   : > { %v1622_v60 = vshll.u32 %v1505_v39, 16  ;;  %v1626_v62 = vshrl.u32 %v1505_v39, 16  ;;  %v1630_v35 = vshrl.u32 %v1506_v38, 16  ;;  %v2090_v30 = vrot.slane %v1615_v57, 3 }
  0x79   : > { %v7174_v3 = vsel %vm739_vm1, %v2063_v53, %v2071_v52  ;;  %v1619_v29 = vrot.slane %v1617_v61, 1  ;;  %v2091_v23 = vrot.slane %v1617_v61, 4  ;;  %v7178_v25 = vsel %vm739_vm1, %v2051_v41, %v2054_v44 }
  0x7a   : > { %2813 = vmatprep.mubr.bf16.mxu0 %v7174_v3  ;;  %v1624_v37 = vrot.slane %v1622_v60, 1  ;;  %v2093_v43 = vrot.slane %v1626_v62, 3  ;;  %v2094_v6 = vrot.slane %v1622_v60, 4  ;;  %6319 = vmatpush3.bf16.msra.mxu1 %v6638_v42  ;;  %v1632_v10 = vshll.u32 %v1506_v38, 16 }
  0x7b   : > { %v1620_v54 = vor.u32 %v1619_v29, %v1615_v57  ;;  %v2092_v17 = vor.u32 %v2091_v23, %v2090_v30  ;;  %v1637_v1 = vshll.u32 %v1507_v63, 16  ;;  %6320 = vmatprep.subr.bf16.mxu1 %v6639_v31  ;;  %v1641_v15 = vshrl.u32 %v1507_v63, 16 }
  0x7c   : > { %2814 = vmatmul.mubr.bf16.gmra.mrb[20].mxu0 %v7178_v25  ;;  %v1628_v12 = vor.u32 %v1626_v62, %v1624_v37  ;;  %v2095_v55 = vor.u32 %v2094_v6, %v2093_v43  ;;  %v2131_v19 = vrot.slane %v1630_v35, 3  ;;  %v1634_v16 = vrot.slane %v1632_v10, 1  ;;  %v6669_v43 = vld [vmem:[#allocation2 + $0x98] sm:$0xff] }
  0x7d   : > { %3248 = vmatmul.mubr.bf16.gmra.mrb[20].mxu1 %v787_v27  ;;  %v1625_v13 = vsel %vm417_vm0, %v1620_v54, %v1624_v37  ;;  %v1639_v42 = vrot.slane %v1637_v1, 1  ;;  %v2132_v11 = vrot.slane %v1632_v10, 4  ;;  %v1650_v29 = vor.u32 %v7060_v45, %v1645_v32  ;;  %v6642_v54 = vld [vmem:[%s8379_s1 + $0xa8] sm:$0xff]  }
  0x7e   : > { %v2098_v20 = vshrl.u32 %v1625_v13, 16  ;;  %v2101_v26 = vshll.u32 %v1625_v13, 16  ;;  %v2106_v21 = vshrl.u32 %v1628_v12, 16  ;;  %v2109_v39 = vshll.u32 %v1628_v12, 16  ;;  %3255 = vmatprep.mubr.bf16.mxu1 %v6996_v34  ;;  %6321 = vmatpush3.bf16.msra.mxu1 %v6639_v31  ;;  %v6670_v13 = vld [vmem:[#allocation2 + $0xa0] sm:$0xff] }
  0x7f   : > { %v7187_v22 = vsel %vm739_vm1, %v2092_v17, %v2095_v55  ;;  %v1635_v28 = vor.u32 %v1634_v16, %v1630_v35  ;;  %v1643_v8 = vor.u32 %v1641_v15, %v1639_v42  ;;  %v2133_v46 = vor.u32 %v2132_v11, %v2131_v19  ;;  %6322 = vmatprep.subr.bf16.mxu1 %v6640_v5 }
  0x80   : > { %v2100_v41 = vrot.slane %v2098_v20, 3  ;;  %v2103_v47 = vrot.slane %v2101_v26, 4  ;;  %v2108_v27 = vrot.slane %v2106_v21, 3  ;;  %v2111_v38 = vrot.slane %v2109_v39, 4 }
  0x81   : > { %v1640_v53 = vsel %vm417_vm0, %v1635_v28, %v1639_v42  ;;  %v2147_v52 = vshrl.u32 %v1643_v8, 16  ;;  %v2150_v34 = vshll.u32 %v1643_v8, 16  ;;  %v2134_v31 = vrot.slane %v1641_v15, 3 }
  0x82   : > { %v2104_v57 = vor.u32 %v2103_v47, %v2100_v41  ;;  %v2112_v61 = vor.u32 %v2111_v38, %v2108_v27  ;;  %v2139_v44 = vshrl.u32 %v1640_v53, 16  ;;  %v2142_v60 = vshll.u32 %v1640_v53, 16  ;;  %6323 = vmatpush3.bf16.msra.mxu1 %v6640_v5 }
  0x83   : > { %v2149_v62 = vrot.slane %v2147_v52, 3  ;;  %v2152_v63 = vrot.slane %v2150_v34, 4  ;;  %v2135_v35 = vrot.slane %v1637_v1, 4  ;;  %6324 = vmatprep.subr.bf16.mxu1 %v6641_v48  ;;  %v1652_v6 = vshll.u32 %v6669_v43, 16 }
  0x84   : > { %v7197_v30 = vsel %vm739_vm1, %v2104_v57, %v2112_v61  ;;  %v2141_v23 = vrot.slane %v2139_v44, 3  ;;  %v2144_v37 = vrot.slane %v2142_v60, 4  ;;  %v1656_v1 = vshrl.u32 %v6669_v43, 16  ;;  %v6652_v61 = vld [vmem:[%s8379_s1 + $0xb8] sm:$0xff]  }
  0x85   : > { %2821 = vmatprep.mubr.bf16.mxu0 %v7197_v30  ;;  %3256 = vmatmul.mubr.bf16.gmra.mrb[24].mxu1 %v7005_v40  ;;  %v2153_v17 = vor.u32 %v2152_v63, %v2149_v62  ;;  %v2136_v10 = vor.u32 %v2135_v35, %v2134_v31  ;;  %v2172_v45 = vrot.slane %v1645_v32, 3  ;;  %v1654_v12 = vrot.slane %v1652_v6, 1 }
  0x86   : > { %2822 = vmatmul.mubr.bf16.gmra.mrb[24].mxu0 %v7187_v22  ;;  %v2145_v5 = vor.u32 %v2144_v37, %v2141_v23  ;;  %3263 = vmatprep.mubr.bf16.mxu1 %v7110_v7  ;;  %v2173_v55 = vrot.slane %v1647_v4, 4  ;;  %v2176_v15 = vrot.slane %v1652_v6, 4  ;;  %v2175_v40 = vrot.slane %v1656_v1, 3  ;;  %v6672_v37 = vld [vmem:[#allocation2 + $0xb0] sm:$0xff] }
  0x87   : > { %v7211_v19 = vsel %vm739_vm1, %v2133_v46, %v2136_v10  ;;  %v1660_v16 = vshrl.u32 %v6670_v13, 16  ;;  %v1662_v42 = vshll.u32 %v6670_v13, 16  ;;  %6325 = vmatpush3.bf16.msra.mxu1 %v6641_v48  ;;  %v1655_v11 = vsel %vm417_vm0, %v1650_v29, %v1654_v12  ;;  %v6671_v46 = vld [vmem:[#allocation2 + $0xa8] sm:$0xff] }
  0x88   : > { %v7214_v32 = vsel %vm739_vm1, %v2145_v5, %v2153_v17  ;;  %v1658_v20 = vor.u32 %v1656_v1, %v1654_v12  ;;  %v2174_v7 = vor.u32 %v2173_v55, %v2172_v45  ;;  %6326 = vmatprep.subr.bf16.mxu1 %v6642_v54  ;;  %v2180_v4 = vshrl.u32 %v1655_v11, 16 }
  0x89   : > { %2829 = vmatprep.mubr.bf16.mxu0 %v7214_v32  ;;  %v2183_v26 = vshll.u32 %v1655_v11, 16  ;;  %v2177_v21 = vor.u32 %v2176_v15, %v2175_v40  ;;  %v1664_v39 = vrot.slane %v1662_v42, 1  ;;  %v1667_v48 = vshll.u32 %v6671_v46, 16  ;;  %v6673_v15 = vld [vmem:[#allocation2 + $0xb8] sm:$0xff] }
  0x8a   : > { %v2188_v28 = vshrl.u32 %v1658_v20, 16  ;;  %v2191_v8 = vshll.u32 %v1658_v20, 16  ;;  %v1671_v41 = vshrl.u32 %v6671_v46, 16  ;;  %v2182_v47 = vrot.slane %v2180_v4, 3 }
  0x8b   : > { %v2185_v27 = vrot.slane %v2183_v26, 4  ;;  %v2178_v38 = vsel %vm739_vm1, %v2174_v7, %v2177_v21  ;;  %v1665_v53 = vor.u32 %v1664_v39, %v1660_v16  ;;  %6327 = vmatpush3.bf16.msra.mxu1 %v6642_v54  ;;  %v1669_v31 = vrot.slane %v1667_v48, 1 }
  0x8c   : > { %v2190_v52 = vrot.slane %v2188_v28, 3  ;;  %v2193_v34 = vrot.slane %v2191_v8, 4  ;;  %v2213_v57 = vrot.slane %v1660_v16, 3  ;;  %6328 = vmatprep.subr.bf16.mxu1 %v6643_v2  ;;  %v2214_v60 = vrot.slane %v1662_v42, 4 }
  0x8d   : > { %3264 = vmatmul.mubr.bf16.gmra.mrb[28].mxu1 %v7101_v56  ;;  %v2186_v44 = vor.u32 %v2185_v27, %v2182_v47  ;;  %v2216_v62 = vrot.slane %v1671_v41, 3  ;;  %v2217_v63 = vrot.slane %v1667_v48, 4  ;;  %v1670_v29 = vsel %vm417_vm0, %v1665_v53, %v1669_v31  ;;  %v6674_v48 = vld [vmem:[#allocation2 + $0xc0] sm:$0xff] }
  0x8e   : > { %2830 = vmatmul.mubr.bf16.gmra.mrb[28].mxu0 %v7211_v19  ;;  %v2194_v35 = vor.u32 %v2193_v34, %v2190_v52  ;;  %3271 = vmatprep.mubr.bf16.mxu1 %v7130_v36  ;;  %v1673_v23 = vor.u32 %v1671_v41, %v1669_v31  ;;  %v1675_v43 = vshrl.u32 %v6672_v37, 16  ;;  %v2221_v6 = vshrl.u32 %v1670_v29, 16  ;;  %v6675_v34 = vld [vmem:[#allocation2 + $0xc8] sm:$0xff] }
  0x8f   : > { %v2224_v54 = vshll.u32 %v1670_v29, 16  ;;  %v2215_v17 = vor.u32 %v2214_v60, %v2213_v57  ;;  %v2218_v10 = vor.u32 %v2217_v63, %v2216_v62  ;;  %6329 = vmatpush3.bf16.msra.mxu1 %v6643_v2  ;;  %v1677_v5 = vshll.u32 %v6672_v37, 16  ;;  %v6661_v60 = vld [vmem:[%s8379_s1 + $0x200] sm:$0xff]  }
  0x90   : > { %v2195_v56 = vsel %vm739_vm1, %v2186_v44, %v2194_v35  ;;  %v2229_v1 = vshrl.u32 %v1673_v23, 16  ;;  %v2232_v45 = vshll.u32 %v1673_v23, 16  ;;  %6330 = vmatprep.subr.bf16.mxu1 %v6652_v61  ;;  %v2223_v12 = vrot.slane %v2221_v6, 3 }
  0x91   : > { %2837 = vmatprep.mubr.bf16.mxu0 %v2195_v56  ;;  %v2226_v55 = vrot.slane %v2224_v54, 4  ;;  %v2219_v36 = vsel %vm739_vm1, %v2215_v17, %v2218_v10  ;;  %v1682_v40 = vshll.u32 %v6673_v15, 16  ;;  %v1679_v42 = vrot.slane %v1677_v5, 1 }
  0x92   : > { %v2231_v13 = vrot.slane %v2229_v1, 3  ;;  %v2234_v16 = vrot.slane %v2232_v45, 4  ;;  %v1686_v11 = vshrl.u32 %v6673_v15, 16  ;;  %v2254_v2 = vrot.slane %v1675_v43, 3 }
  0x93   : > { %v2227_v20 = vor.u32 %v2226_v55, %v2223_v12  ;;  %v1684_v7 = vrot.slane %v1682_v40, 1  ;;  %v2255_v4 = vrot.slane %v1677_v5, 4  ;;  %6331 = vmatpush3.bf16.msra.mxu1 %v6652_v61  ;;  %v1680_v21 = vor.u32 %v1679_v42, %v1675_v43 }
  0x94   : > { %v2235_v26 = vor.u32 %v2234_v16, %v2231_v13  ;;  %v2257_v39 = vrot.slane %v1686_v11, 3  ;;  %v2258_v28 = vrot.slane %v1682_v40, 4  ;;  %v1690_v41 = vshrl.u32 %v6674_v48, 16  ;;  %6364 = vmatprep.subr.bf16.mxu1 %v6661_v60 }
  0x95   : > { %3272 = vmatmul.mubr.bf16.gmra.mrb[32].mxu1 %v7136_v24  ;;  %v1688_v8 = vor.u32 %v1686_v11, %v1684_v7  ;;  %v2256_v46 = vor.u32 %v2255_v4, %v2254_v2  ;;  %v1692_v47 = vshll.u32 %v6674_v48, 16  ;;  %v1685_v53 = vsel %vm417_vm0, %v1680_v21, %v1684_v7 }
  0x96   : > { %2838 = vmatmul.mubr.bf16.gmra.mrb[32].mxu0 %v2178_v38  ;;  %v2236_v27 = vsel %vm739_vm1, %v2227_v20, %v2235_v26  ;;  %3279 = vmatprep.mubr.bf16.mxu1 %v7150_v9  ;;  %v2259_v52 = vor.u32 %v2258_v28, %v2257_v39  ;;  %v1697_v31 = vshll.u32 %v6675_v34, 16  ;;  %v2262_v57 = vshrl.u32 %v1685_v53, 16 }
  0x97   : > { %2845 = vmatprep.mubr.bf16.mxu0 %v2236_v27  ;;  %v2265_v61 = vshll.u32 %v1685_v53, 16  ;;  %v2270_v44 = vshrl.u32 %v1688_v8, 16  ;;  %v2273_v24 = vshll.u32 %v1688_v8, 16  ;;  %v1694_v62 = vrot.slane %v1692_v47, 1 }
  0x98   : > { %v7239_v38 = vsel %vm739_vm1, %v2256_v46, %v2259_v52  ;;  %v1699_v63 = vrot.slane %v1697_v31, 1  ;;  %v1701_v9 = vshrl.u32 %v6675_v34, 16  ;;  %v2264_v35 = vrot.slane %v2262_v57, 3 }
  0x99   : > { %v2267_v29 = vrot.slane %v2265_v61, 4  ;;  %v2272_v23 = vrot.slane %v2270_v44, 3  ;;  %v2275_v37 = vrot.slane %v2273_v24, 4  ;;  %v1695_v43 = vor.u32 %v1694_v62, %v1690_v41 }
  0x9a   : > { %v1703_v6 = vor.u32 %v1701_v9, %v1699_v63  ;;  %v2295_v54 = vrot.slane %v1690_v41, 3  ;;  %v2296_v17 = vrot.slane %v1692_v47, 4  ;;  %v2298_v1 = vrot.slane %v1701_v9, 3 }
  0x9b   : > { %v2268_v10 = vor.u32 %v2267_v29, %v2264_v35  ;;  %v2276_v56 = vor.u32 %v2275_v37, %v2272_v23  ;;  %v2299_v45 = vrot.slane %v1697_v31, 4  ;;  %v1700_v5 = vsel %vm417_vm0, %v1695_v43, %v1699_v63  ;;  %v403_v35 = vld [vmem:[#allocation2 + $0x90] sm:$0xff] }
  0x9c   : > { %v2311_v12 = vshrl.u32 %v1703_v6, 16  ;;  %v2314_v55 = vshll.u32 %v1703_v6, 16  ;;  %v2297_v15 = vor.u32 %v2296_v17, %v2295_v54  ;;  %v2303_v13 = vshrl.u32 %v1700_v5, 16 }
  0x9d   : > { %3280 = vmatmul.mubr.bf16.gmra.mrb[36].mxu1 %v7142_v33  ;;  %v2277_v40 = vsel %vm739_vm1, %v2268_v10, %v2276_v56  ;;  %v2306_v16 = vshll.u32 %v1700_v5, 16  ;;  %v2300_v42 = vor.u32 %v2299_v45, %v2298_v1  ;;  %v1705_v7 = vshrl.u32 %v7052_v14, 16 }
  0x9e   : > { %2846 = vmatmul.mubr.bf16.gmra.mrb[36].mxu0 %v2219_v36  ;;  %3287 = vmatprep.mubr.bf16.mxu1 %v7174_v3  ;;  %v2313_v11 = vrot.slane %v2311_v12, 3  ;;  %v2316_v20 = vrot.slane %v2314_v55, 4  ;;  %v1707_v2 = vshll.u32 %v7052_v14, 16  ;;  %v2305_v4 = vrot.slane %v2303_v13, 3 }
  0x9f   : > { %2853 = vmatprep.mubr.bf16.mxu0 %v2277_v40  ;;  %v2308_v26 = vrot.slane %v2306_v16, 4  ;;  %v7248_v21 = vsel %vm739_vm1, %v2297_v15, %v2300_v42  ;;  %v1712_v33 = vshll.u32 %v7062_v49, 16  ;;  %v1716_v36 = vshrl.u32 %v7062_v49, 16 }
  0xa0   : > { %v2317_v39 = vor.u32 %v2316_v20, %v2313_v11  ;;  %v1709_v28 = vrot.slane %v1707_v2, 1  ;;  %v2336_v8 = vrot.slane %v1705_v7, 3  ;;  %v2337_v48 = vrot.slane %v1707_v2, 4 }
  0xa1   : > { %v2309_v3 = vor.u32 %v2308_v26, %v2305_v4  ;;  %v1714_v46 = vrot.slane %v1712_v33, 1  ;;  %v2340_v41 = vrot.slane %v1712_v33, 4  ;;  %v2339_v27 = vrot.slane %v1716_v36, 3 }
  0xa2   : > { %v1710_v47 = vor.u32 %v1709_v28, %v1705_v7  ;;  %v1720_v14 = vshrl.u32 %v7064_v50, 16  ;;  %v1722_v53 = vshll.u32 %v7064_v50, 16  ;;  %v2338_v31 = vor.u32 %v2337_v48, %v2336_v8  ;;  %v404_v50 = vld [vmem:[#allocation2 + $0x98] sm:$0xff] }
  0xa3   : > { %v2318_v52 = vsel %vm739_vm1, %v2309_v3, %v2317_v39  ;;  %v1718_v34 = vor.u32 %v1716_v36, %v1714_v46  ;;  %v1727_v57 = vshll.u32 %v7081_v18, 16  ;;  %v2341_v49 = vor.u32 %v2340_v41, %v2339_v27 }
  0xa4   : > { %v1715_v61 = vsel %vm417_vm0, %v1710_v47, %v1714_v46  ;;  %v1724_v44 = vrot.slane %v1722_v53, 1  ;;  %v1731_v24 = vshrl.u32 %v7081_v18, 16  ;;  %v554_v43 = vshrl.u32 %v403_v35, 16 }
  0xa5   : > { %3288 = vmatmul.mubr.bf16.gmra.mrb[40].mxu1 %v7178_v25  ;;  %v2344_v60 = vshrl.u32 %v1715_v61, 16  ;;  %v2347_v62 = vshll.u32 %v1715_v61, 16  ;;  %v2352_v63 = vshrl.u32 %v1718_v34, 16  ;;  %v2355_v9 = vshll.u32 %v1718_v34, 16 }
  0xa6   : > { %2854 = vmatmul.mubr.bf16.gmra.mrb[40].mxu0 %v7239_v38  ;;  %3295 = vmatprep.mubr.bf16.mxu1 %v7197_v30  ;;  %v7262_v29 = vsel %vm739_vm1, %v2338_v31, %v2341_v49  ;;  %v1725_v23 = vor.u32 %v1724_v44, %v1720_v14  ;;  %v1729_v37 = vrot.slane %v1727_v57, 1  ;;  %v556_v56 = vshll.u32 %v403_v35, 16 }
  0xa7   : > { %2861 = vmatprep.mubr.bf16.mxu0 %v2318_v52  ;;  %v2346_v18 = vrot.slane %v2344_v60, 3  ;;  %v2349_v6 = vrot.slane %v2347_v62, 4  ;;  %v2354_v25 = vrot.slane %v2352_v63, 3  ;;  %v2357_v54 = vrot.slane %v2355_v9, 4  ;;  %v7272_v60 = vld [vmem:[#allocation2 + $0xa8] sm:$0xff] }
  0xa8   : > { %v1730_v17 = vsel %vm417_vm0, %v1725_v23, %v1729_v37  ;;  %v1733_v10 = vor.u32 %v1731_v24, %v1729_v37  ;;  %v561_v1 = vshll.u32 %v404_v50, 16  ;;  %v558_v15 = vrot.slane %v556_v56, 1 }
  0xa9   : > { %v2350_v45 = vor.u32 %v2349_v6, %v2346_v18  ;;  %v2358_v38 = vor.u32 %v2357_v54, %v2354_v25  ;;  %v2385_v5 = vshrl.u32 %v1730_v17, 16  ;;  %v2388_v30 = vshll.u32 %v1730_v17, 16 }
  0xaa   : > { %v2393_v12 = vshrl.u32 %v1733_v10, 16  ;;  %v2396_v55 = vshll.u32 %v1733_v10, 16  ;;  %v563_v40 = vrot.slane %v561_v1, 1  ;;  %v565_v11 = vshrl.u32 %v404_v50, 16 }
  0xab   : > { %v2359_v13 = vsel %vm739_vm1, %v2350_v45, %v2358_v38  ;;  %v2387_v16 = vrot.slane %v2385_v5, 3  ;;  %v2390_v42 = vrot.slane %v2388_v30, 4  ;;  %v559_v2 = vor.u32 %v558_v15, %v554_v43 }
  0xac   : > { %v2395_v20 = vrot.slane %v2393_v12, 3  ;;  %v2398_v7 = vrot.slane %v2396_v55, 4  ;;  %v2377_v4 = vrot.slane %v1720_v14, 3  ;;  %v567_v33 = vor.u32 %v565_v11, %v563_v40 }
  0xad   : > { %3296 = vmatmul.mubr.bf16.gmra.mrb[44].mxu1 %v7187_v22  ;;  %v2391_v26 = vor.u32 %v2390_v42, %v2387_v16  ;;  %v2378_v39 = vrot.slane %v1722_v53, 4  ;;  %v2380_v28 = vrot.slane %v1731_v24, 3  ;;  %v564_v8 = vsel %vm417_vm0, %v559_v2, %v563_v40  ;;  %v405_v24 = vld [vmem:[#allocation2 + $0xa0] sm:$0xff] }
  0xae   : > { %2862 = vmatmul.mubr.bf16.gmra.mrb[44].mxu0 %v7248_v21  ;;  %3303 = vmatprep.mubr.bf16.mxu1 %v7214_v32  ;;  %v2399_v36 = vor.u32 %v2398_v7, %v2395_v20  ;;  %v2381_v3 = vrot.slane %v1727_v57, 4  ;;  %v1109_v46 = vrot.slane %v554_v43, 3  ;;  %v1117_v48 = vshrl.u32 %v564_v8, 16 }
  0xaf   : > { %2869 = vmatprep.mubr.bf16.mxu0 %v2359_v13  ;;  %v1120_v41 = vshll.u32 %v564_v8, 16  ;;  %v1125_v47 = vshrl.u32 %v567_v33, 16  ;;  %v1128_v27 = vshll.u32 %v567_v33, 16  ;;  %v2379_v14 = vor.u32 %v2378_v39, %v2377_v4 }
  0xb0   : > { %v2400_v22 = vsel %vm739_vm1, %v2391_v26, %v2399_v36  ;;  %v2382_v52 = vor.u32 %v2381_v3, %v2380_v28  ;;  %v1110_v53 = vrot.slane %v556_v56, 4  ;;  %v1119_v34 = vrot.slane %v1117_v48, 3 }
  0xb1   : > { %v1122_v31 = vrot.slane %v1120_v41, 4  ;;  %v1127_v21 = vrot.slane %v1125_v47, 3  ;;  %v1130_v61 = vrot.slane %v1128_v27, 4  ;;  %v1112_v44 = vrot.slane %v565_v11, 3 }
  0xb2   : > { %v2383_v32 = vsel %vm739_vm1, %v2379_v14, %v2382_v52  ;;  %v1111_v49 = vor.u32 %v1110_v53, %v1109_v46  ;;  %v1113_v57 = vrot.slane %v561_v1, 4  ;;  %v1735_v9 = vshrl.u32 %v7097_v51, 16 }
  0xb3   : > { %v1123_v62 = vor.u32 %v1122_v31, %v1119_v34  ;;  %v1131_v63 = vor.u32 %v1130_v61, %v1127_v21  ;;  %v1737_v35 = vshll.u32 %v7097_v51, 16  ;;  %v1742_v23 = vshll.u32 %v7104_v59, 16  ;;  %v407_v34 = vld [vmem:[#allocation2 + $0xb0] sm:$0xff]  ;;  %v408_v31 = vld [vmem:[#allocation2 + $0xb8] sm:$0xff] }
  0xb4   : > { %v1114_v50 = vor.u32 %v1113_v57, %v1112_v44  ;;  %v1746_v37 = vshrl.u32 %v7104_v59, 16  ;;  %v569_v43 = vshrl.u32 %v405_v24, 16  ;;  %v571_v25 = vshll.u32 %v405_v24, 16 }
  0xb5   : > { %3304 = vmatmul.mubr.bf16.gmra.mrb[48].mxu1 %v7211_v19  ;;  %v1132_v18 = vsel %vm739_vm1, %v1123_v62, %v1131_v63  ;;  %v1739_v6 = vrot.slane %v1737_v35, 1  ;;  %v576_v54 = vshll.u32 %v7272_v60, 16  ;;  %v1744_v51 = vrot.slane %v1742_v23, 1 }
  0xb6   : > { %2870 = vmatmul.mubr.bf16.gmra.mrb[48].mxu0 %v7262_v29  ;;  %3311 = vmatprep.mubr.bf16.mxu1 %v1132_v18  ;;  %v1115_v17 = vsel %vm739_vm1, %v1111_v49, %v1114_v50  ;;  %v580_v10 = vshrl.u32 %v7272_v60, 16  ;;  %v2418_v56 = vrot.slane %v1735_v9, 3  ;;  %v573_v1 = vrot.slane %v571_v25, 1 }
  0xb7   : > { %2877 = vmatprep.mubr.bf16.mxu0 %v2400_v22  ;;  %v1740_v59 = vor.u32 %v1739_v6, %v1735_v9  ;;  %v578_v45 = vrot.slane %v576_v54, 1  ;;  %v2419_v19 = vrot.slane %v1737_v35, 4  ;;  %v1748_v38 = vor.u32 %v1746_v37, %v1744_v51 }
  0xb8   : > { %v2421_v5 = vrot.slane %v1746_v37, 3  ;;  %v2422_v30 = vrot.slane %v1742_v23, 4  ;;  %v1150_v12 = vrot.slane %v569_v43, 3  ;;  %v574_v15 = vor.u32 %v573_v1, %v569_v43 }
  0xb9   : > { %v1745_v55 = vsel %vm417_vm0, %v1740_v59, %v1744_v51  ;;  %v582_v29 = vor.u32 %v580_v10, %v578_v45  ;;  %v2420_v40 = vor.u32 %v2419_v19, %v2418_v56  ;;  %v2434_v42 = vshrl.u32 %v1748_v38, 16 }
  0xba   : > { %v2426_v13 = vshrl.u32 %v1745_v55, 16  ;;  %v2429_v16 = vshll.u32 %v1745_v55, 16  ;;  %v2437_v11 = vshll.u32 %v1748_v38, 16  ;;  %v579_v20 = vsel %vm417_vm0, %v574_v15, %v578_v45 }
  0xbb   : > { %v1166_v7 = vshrl.u32 %v582_v29, 16  ;;  %v1169_v2 = vshll.u32 %v582_v29, 16  ;;  %v2423_v4 = vor.u32 %v2422_v30, %v2421_v5  ;;  %v2436_v39 = vrot.slane %v2434_v42, 3 }
  0xbc   : > { %v2428_v26 = vrot.slane %v2426_v13, 3  ;;  %v2431_v33 = vrot.slane %v2429_v16, 4  ;;  %v2439_v28 = vrot.slane %v2437_v11, 4  ;;  %v1158_v36 = vshrl.u32 %v579_v20, 16 }
  0xbd   : > { %3312 = vmatmul.mubr.bf16.gmra.mrb[52].mxu1 %v1115_v17  ;;  %v1161_v8 = vshll.u32 %v579_v20, 16  ;;  %v1168_v3 = vrot.slane %v1166_v7, 3  ;;  %v1171_v46 = vrot.slane %v1169_v2, 4  ;;  %v2424_v47 = vsel %vm739_vm1, %v2420_v40, %v2423_v4 }
  0xbe   : > { %2878 = vmatmul.mubr.bf16.gmra.mrb[52].mxu0 %v2383_v32  ;;  %v2432_v48 = vor.u32 %v2431_v33, %v2428_v26  ;;  %v2440_v41 = vor.u32 %v2439_v28, %v2436_v39  ;;  %v1151_v27 = vrot.slane %v571_v25, 4  ;;  %v1160_v22 = vrot.slane %v1158_v36, 3 }
  0xbf   : > { %v1163_v14 = vrot.slane %v1161_v8, 4  ;;  %v1172_v52 = vor.u32 %v1171_v46, %v1168_v3  ;;  %v1153_v53 = vrot.slane %v580_v10, 3  ;;  %v1154_v49 = vrot.slane %v576_v54, 4  ;;  %v409_v3 = vld [vmem:[#allocation2 + $0xc0] sm:$0xff]  ;;  %v7296_v46 = vld [vmem:[#allocation2 + $0xc8] sm:$0xff] }
  0xc0   : > { %v2441_v21 = vsel %vm739_vm1, %v2432_v48, %v2440_v41  ;;  %v1152_v61 = vor.u32 %v1151_v27, %v1150_v12  ;;  %v1750_v44 = vshrl.u32 %v7123_v58, 16  ;;  %v1752_v32 = vshll.u32 %v7123_v58, 16  ;;  %v6676_v27 = vld [vmem:[#allocation2 + $0x10] sm:$0xff] }
  0xc1   : > { %2885 = vmatprep.mubr.bf16.mxu0 %v2441_v21  ;;  %v1164_v57 = vor.u32 %v1163_v14, %v1160_v22  ;;  %v1757_v24 = vshll.u32 %v7125_v0, 16  ;;  %v1761_v60 = vshrl.u32 %v7125_v0, 16  ;;  %v1155_v62 = vor.u32 %v1154_v49, %v1153_v53 }
  0xc2   : > { %v584_v63 = vshrl.u32 %v407_v34, 16  ;;  %v586_v9 = vshll.u32 %v407_v34, 16  ;;  %v591_v35 = vshll.u32 %v408_v31, 16  ;;  %v1754_v23 = vrot.slane %v1752_v32, 1  ;;  %v6677_v34 = vld [vmem:[#allocation2 + $0x18] sm:$0xff] }
  0xc3   : > { %v1173_v50 = vsel %vm739_vm1, %v1164_v57, %v1172_v52  ;;  %v1759_v37 = vrot.slane %v1757_v24, 1  ;;  %v595_v43 = vshrl.u32 %v408_v31, 16  ;;  %v1156_v18 = vsel %vm739_vm1, %v1152_v61, %v1155_v62 }
  0xc4   : > { %3319 = vmatprep.mubr.bf16.mxu1 %v1173_v50  ;;  %v588_v6 = vrot.slane %v586_v9, 1  ;;  %v593_v25 = vrot.slane %v591_v35, 1  ;;  %v2459_v54 = vrot.slane %v1750_v44, 3  ;;  %v1755_v58 = vor.u32 %v1754_v23, %v1750_v44 }
  0xc5   : > { %3320 = vmatmul.mubr.bf16.gmra.mrb[56].mxu1 %v1156_v18  ;;  %v1763_v17 = vor.u32 %v1761_v60, %v1759_v37  ;;  %v2460_v51 = vrot.slane %v1752_v32, 4  ;;  %v2462_v0 = vrot.slane %v1761_v60, 3  ;;  %v2463_v59 = vrot.slane %v1757_v24, 4 }
  0xc6   : > { %2886 = vmatmul.mubr.bf16.gmra.mrb[56].mxu0 %v2424_v47  ;;  %v589_v10 = vor.u32 %v588_v6, %v584_v63  ;;  %v597_v56 = vor.u32 %v595_v43, %v593_v25  ;;  %v1191_v1 = vrot.slane %v584_v63, 3  ;;  %v1760_v45 = vsel %vm417_vm0, %v1755_v58, %v1759_v37 }
  0xc7   : > { %v2475_v19 = vshrl.u32 %v1763_v17, 16  ;;  %v2478_v38 = vshll.u32 %v1763_v17, 16  ;;  %v2461_v5 = vor.u32 %v2460_v51, %v2459_v54  ;;  %v2467_v30 = vshrl.u32 %v1760_v45, 16  ;;  %v6678_v54 = vld [vmem:[#allocation2 + $0x20] sm:$0xff] }
  0xc8   : > { %v2470_v12 = vshll.u32 %v1760_v45, 16  ;;  %v594_v55 = vsel %vm417_vm0, %v589_v10, %v593_v25  ;;  %v1207_v15 = vshrl.u32 %v597_v56, 16  ;;  %v1210_v7 = vshll.u32 %v597_v56, 16 }
  0xc9   : > { %v2477_v29 = vrot.slane %v2475_v19, 3  ;;  %v2480_v40 = vrot.slane %v2478_v38, 4  ;;  %v1199_v13 = vshrl.u32 %v594_v55, 16  ;;  %v1202_v16 = vshll.u32 %v594_v55, 16 }
  0xca   : > { %v2469_v42 = vrot.slane %v2467_v30, 3  ;;  %v2472_v11 = vrot.slane %v2470_v12, 4  ;;  %v1209_v20 = vrot.slane %v1207_v15, 3  ;;  %v2464_v33 = vor.u32 %v2463_v59, %v2462_v0  ;;  %v6679_v0 = vld [vmem:[#allocation2 + $0x28] sm:$0xff] }
  0xcb   : > { %v2481_v2 = vor.u32 %v2480_v40, %v2477_v29  ;;  %v1201_v4 = vrot.slane %v1199_v13, 3  ;;  %v1204_v26 = vrot.slane %v1202_v16, 4  ;;  %v1212_v28 = vrot.slane %v1210_v7, 4 }
  0xcc   : > { %v2473_v39 = vor.u32 %v2472_v11, %v2469_v42  ;;  %v1192_v36 = vrot.slane %v586_v9, 4  ;;  %v1194_v8 = vrot.slane %v595_v43, 3  ;;  %v2465_v41 = vsel %vm739_vm1, %v2461_v5, %v2464_v33 }
  0xcd   : > { %v1205_v48 = vor.u32 %v1204_v26, %v1201_v4  ;;  %v1195_v47 = vrot.slane %v591_v35, 4  ;;  %v1796_v22 = vrot.slane %v6676_v27, 1  ;;  %v1213_v52 = vor.u32 %v1212_v28, %v1209_v20 }
  0xce   : > { %v2482_v14 = vsel %vm739_vm1, %v2473_v39, %v2481_v2  ;;  %v1193_v53 = vor.u32 %v1192_v36, %v1191_v1  ;;  %v1797_v31 = vrot.slane %v6677_v34, 1  ;;  %v599_v61 = vshrl.u32 %v409_v3, 16  ;;  %v411_v36 = vld [vmem:[#allocation2 + $0xd0] sm:$0xff] }
  0xcf   : > { %2893 = vmatprep.mubr.bf16.mxu0 %v2482_v14  ;;  %v1196_v21 = vor.u32 %v1195_v47, %v1194_v8  ;;  %v601_v49 = vshll.u32 %v409_v3, 16  ;;  %v606_v44 = vshll.u32 %v7296_v46, 16  ;;  %v1214_v57 = vsel %vm739_vm1, %v1205_v48, %v1213_v52  ;;  %v7308_v8 = vld [vmem:[#allocation2 + $0xd8] sm:$0xff] }
  0xd0   : > { %2894 = vmatmul.mubr.bf16.gmra.mrb[60].mxu0 %v2465_v41  ;;  %v1798_v32 = vsel %vm690_vm2, %v1796_v22, %v1797_v31  ;;  %v1877_v24 = vshrl.u32 %v1797_v31, 16  ;;  %v1880_v60 = vshll.u32 %v1797_v31, 16  ;;  %3327 = vmatprep.mubr.bf16.mxu1 %v1214_v57  ;;  %v610_v43 = vshrl.u32 %v7296_v46, 16  ;;  %v6680_v41 = vld [vmem:[#allocation2 + $0x30] sm:$0xff]  ;;  %v6681_v14 = vld [vmem:[#allocation2 + $0x38] sm:$0xff]  ;;  %v6645_v31 = vld [vmem:[%s8379_s1 + $0x180] sm:$0xff]  }
  0xd1   : > { %v1197_v62 = vsel %vm739_vm1, %v1193_v53, %v1196_v21  ;;  %v1869_v63 = vshrl.u32 %v1798_v32, 16  ;;  %v1872_v9 = vshll.u32 %v1798_v32, 16  ;;  %v603_v35 = vrot.slane %v601_v49, 1  ;;  %v6646_v57 = vld [vmem:[%s8379_s1 + $0x1c8] sm:$0xff]  }
  0xd2   : > { %3328 = vmatmul.mubr.bf16.gmra.mrb[60].mxu1 %v1197_v62  ;;  %v1879_v50 = vrot.slane %v1877_v24, 3  ;;  %v1882_v23 = vrot.slane %v1880_v60, 4  ;;  %v608_v37 = vrot.slane %v606_v44, 1  ;;  %v1799_v58 = vrot.slane %v6678_v54, 1 }
  0xd3   : > { %v1871_v18 = vrot.slane %v1869_v63, 3  ;;  %v1874_v6 = vrot.slane %v1872_v9, 4  ;;  %v604_v25 = vor.u32 %v603_v35, %v599_v61  ;;  %v1800_v10 = vrot.slane %v6679_v0, 1 }
  0xd4   : > { %v1883_v17 = vor.u32 %v1882_v23, %v1879_v50  ;;  %v612_v51 = vor.u32 %v610_v43, %v608_v37  ;;  %v1232_v56 = vrot.slane %v599_v61, 3  ;;  %v1233_v45 = vrot.slane %v601_v49, 4 }
  0xd5   : > { %v1875_v59 = vor.u32 %v1874_v6, %v1871_v18  ;;  %v609_v1 = vsel %vm417_vm0, %v604_v25, %v608_v37  ;;  %v1235_v19 = vrot.slane %v610_v43, 3  ;;  %v1801_v15 = vsel %vm690_vm2, %v1799_v58, %v1800_v10  ;;  %v6682_v43 = vld [vmem:[#allocation2 + $0x40] sm:$0xff]  ;;  %v6647_v6 = vld [vmem:[%s8379_s1 + $0x188] sm:$0xff]  }
  0xd6   : > { %v1240_v38 = vshrl.u32 %v609_v1, 16  ;;  %v1243_v5 = vshll.u32 %v609_v1, 16  ;;  %v1248_v30 = vshrl.u32 %v612_v51, 16  ;;  %v1251_v12 = vshll.u32 %v612_v51, 16  ;;  %v6648_v1 = vld [vmem:[%s8379_s1 + $0x1d0] sm:$0xff]  }
  0xd7   : > { %v1884_v55 = vsel %vm739_vm1, %v1875_v59, %v1883_v17  ;;  %v1918_v29 = vshrl.u32 %v1800_v10, 16  ;;  %v1921_v40 = vshll.u32 %v1800_v10, 16  ;;  %v1910_v20 = vshrl.u32 %v1801_v15, 16  ;;  %v6683_v17 = vld [vmem:[#allocation2 + $0x48] sm:$0xff] }
  0xd8   : > { %6284 = vmatprep.mubr.bf16.mxu0 %v1884_v55  ;;  %v1242_v13 = vrot.slane %v1240_v38, 3  ;;  %v1245_v16 = vrot.slane %v1243_v5, 4  ;;  %v1250_v42 = vrot.slane %v1248_v30, 3  ;;  %v1253_v11 = vrot.slane %v1251_v12, 4 }
  0xd9   : > { %v1913_v7 = vshll.u32 %v1801_v15, 16  ;;  %v1920_v2 = vrot.slane %v1918_v29, 3  ;;  %v1923_v4 = vrot.slane %v1921_v40, 4  ;;  %v1234_v39 = vor.u32 %v1233_v45, %v1232_v56 }
  0xda   : > { %v1246_v26 = vor.u32 %v1245_v16, %v1242_v13  ;;  %v1254_v33 = vor.u32 %v1253_v11, %v1250_v42  ;;  %v1236_v28 = vrot.slane %v606_v44, 4  ;;  %v1912_v3 = vrot.slane %v1910_v20, 3  ;;  %v6649_v42 = vld [vmem:[%s8379_s1 + $0x190] sm:$0xff]  }
  0xdb   : > { %v1915_v46 = vrot.slane %v1913_v7, 4  ;;  %v1924_v48 = vor.u32 %v1923_v4, %v1920_v2  ;;  %v1802_v47 = vrot.slane %v6680_v41, 1  ;;  %v1803_v52 = vrot.slane %v6681_v14, 1  ;;  %v6650_v4 = vld [vmem:[%s8379_s1 + $0x1d8] sm:$0xff]  }
  0xdc   : > { %v1255_v27 = vsel %vm739_vm1, %v1246_v26, %v1254_v33  ;;  %v1237_v22 = vor.u32 %v1236_v28, %v1235_v19  ;;  %v614_v53 = vshrl.u32 %v411_v36, 16  ;;  %v616_v21 = vshll.u32 %v411_v36, 16  ;;  %v413_v36 = vld [vmem:[#allocation2 + $0xe0] sm:$0xff] }
  0xdd   : > { %3335 = vmatprep.mubr.bf16.mxu1 %v1255_v27  ;;  %v1916_v34 = vor.u32 %v1915_v46, %v1912_v3  ;;  %v621_v61 = vshll.u32 %v7308_v8, 16  ;;  %v625_v49 = vshrl.u32 %v7308_v8, 16  ;;  %v1804_v32 = vsel %vm690_vm2, %v1802_v47, %v1803_v52  ;;  %v6651_v27 = vld [vmem:[%s8379_s1 + $0x198] sm:$0xff]  }
  0xde   : > { %v1238_v44 = vsel %vm739_vm1, %v1234_v39, %v1237_v22  ;;  %v1959_v24 = vshrl.u32 %v1803_v52, 16  ;;  %v1962_v60 = vshll.u32 %v1803_v52, 16  ;;  %v1951_v63 = vshrl.u32 %v1804_v32, 16  ;;  %v6684_v22 = vld [vmem:[#allocation2 + $0x50] sm:$0xff]  ;;  %v6685_v52 = vld [vmem:[#allocation2 + $0x58] sm:$0xff] }
  0xdf   : > { %v7322_v62 = vsel %vm739_vm1, %v1916_v34, %v1924_v48  ;;  %3336 = vmatmul.mubr.bf16.gmra.mrb[64].mxu1 %v1238_v44  ;;  %v1954_v9 = vshll.u32 %v1804_v32, 16  ;;  %v618_v35 = vrot.slane %v616_v21, 1  ;;  %v623_v37 = vrot.slane %v621_v61, 1 }
  0xe0   : > { %6285 = vmatmul.mubr.bf16.vlgmr.msra.gmra.mrb[64].mxu0 %v7322_v62  ;;  %v1961_v50 = vrot.slane %v1959_v24, 3  ;;  %v1964_v23 = vrot.slane %v1962_v60, 4  ;;  %v1805_v18 = vrot.slane %v6682_v43, 1  ;;  %v1953_v25 = vrot.slane %v1951_v63, 3 }
  0xe1   : > { %6133 = vmatpush3.bf16.msra.mxu0 %v6645_v31  ;;  %v1956_v54 = vrot.slane %v1954_v9, 4  ;;  %v619_v58 = vor.u32 %v618_v35, %v614_v53  ;;  %v1806_v51 = vrot.slane %v6683_v17, 1  ;;  %v627_v10 = vor.u32 %v625_v49, %v623_v37 }
  0xe2   : > { %6134 = vmatprep.subr.bf16.mxu0 %v6646_v57  ;;  %v1965_v0 = vor.u32 %v1964_v23, %v1961_v50  ;;  %v1273_v56 = vrot.slane %v614_v53, 3  ;;  %v1274_v59 = vrot.slane %v616_v21, 4  ;;  %v1276_v46 = vrot.slane %v625_v49, 3  ;;  %v7347_v21 = vld [vmem:[#allocation2 + $0xe8] sm:$0xff] }
  0xe3   : > { %v1957_v45 = vor.u32 %v1956_v54, %v1953_v25  ;;  %v624_v19 = vsel %vm417_vm0, %v619_v58, %v623_v37  ;;  %v1807_v38 = vsel %vm690_vm2, %v1805_v18, %v1806_v51  ;;  %v2000_v5 = vshrl.u32 %v1806_v51, 16 }
  0xe4   : > { %v1281_v30 = vshrl.u32 %v624_v19, 16  ;;  %v1284_v12 = vshll.u32 %v624_v19, 16  ;;  %v1289_v55 = vshrl.u32 %v627_v10, 16  ;;  %v1292_v15 = vshll.u32 %v627_v10, 16 }
  0xe5   : > { %6135 = vmatpush3.bf16.msra.mxu0 %v6647_v6  ;;  %v7334_v29 = vsel %vm739_vm1, %v1957_v45, %v1965_v0  ;;  %v1992_v40 = vshrl.u32 %v1807_v38, 16  ;;  %v1995_v13 = vshll.u32 %v1807_v38, 16  ;;  %v2002_v16 = vrot.slane %v2000_v5, 3  ;;  %v6654_v6 = vld [vmem:[%s8379_s1 + $0x1a0] sm:$0xff]  }
  0xe6   : > { %6288 = vmatprep.mubr.bf16.mxu0 %v7334_v29  ;;  %v1283_v11 = vrot.slane %v1281_v30, 3  ;;  %v1286_v20 = vrot.slane %v1284_v12, 4  ;;  %v1291_v7 = vrot.slane %v1289_v55, 3  ;;  %v1294_v2 = vrot.slane %v1292_v15, 4  ;;  %6136 = vmatprep.subr.bf16.mxu0 %v6648_v1  ;;  %v6687_v1 = vld [vmem:[#allocation2 + $0x68] sm:$0xff] }
  0xe7   : > { %v1994_v26 = vrot.slane %v1992_v40, 3  ;;  %v1997_v33 = vrot.slane %v1995_v13, 4  ;;  %v2003_v39 = vshll.u32 %v1806_v51, 16  ;;  %v1275_v28 = vor.u32 %v1274_v59, %v1273_v56  ;;  %v6655_v51 = vld [vmem:[%s8379_s1 + $0x1e8] sm:$0xff]   ;;  %v6686_v56 = vld [vmem:[#allocation2 + $0x60] sm:$0xff] }
  0xe8   : > { %v1287_v8 = vor.u32 %v1286_v20, %v1283_v11  ;;  %v1295_v3 = vor.u32 %v1294_v2, %v1291_v7  ;;  %v1277_v48 = vrot.slane %v621_v61, 4  ;;  %v1808_v14 = vrot.slane %v6684_v22, 1  ;;  %v6653_v61 = vld [vmem:[%s8379_s1 + $0x1e0] sm:$0xff]   ;;  %v6656_v13 = vld [vmem:[%s8379_s1 + $0x1a8] sm:$0xff]   ;;  %v6657_v7 = vld [vmem:[%s8379_s1 + $0x1f0] sm:$0xff]  }
  0xe9   : > { %v1998_v41 = vor.u32 %v1997_v33, %v1994_v26  ;;  %v2005_v47 = vrot.slane %v2003_v39, 4  ;;  %6137 = vmatpush3.bf16.msra.mxu0 %v6649_v42  ;;  %v1809_v53 = vrot.slane %v6685_v52, 1  ;;  %v629_v44 = vshrl.u32 %v413_v36, 16  ;;  %v6658_v22 = vld [vmem:[%s8379_s1 + $0x1b0] sm:$0xff]  }
  0xea   : > { %v1296_v34 = vsel %vm739_vm1, %v1287_v8, %v1295_v3  ;;  %v1278_v31 = vor.u32 %v1277_v48, %v1276_v46  ;;  %6138 = vmatprep.subr.bf16.mxu0 %v6650_v4  ;;  %v631_v49 = vshll.u32 %v413_v36, 16  ;;  %v636_v18 = vshll.u32 %v7347_v21, 16 }
  0xeb   : > { %3343 = vmatprep.mubr.bf16.mxu1 %v1296_v34  ;;  %v2006_v57 = vor.u32 %v2005_v47, %v2002_v16  ;;  %v1810_v32 = vsel %vm690_vm2, %v1808_v14, %v1809_v53  ;;  %v2041_v24 = vshrl.u32 %v1809_v53, 16  ;;  %v2044_v60 = vshll.u32 %v1809_v53, 16  ;;  %v7378_v47 = vld [vmem:[#allocation2 + $0xf0] sm:$0xff] }
  0xec   : > { %v1279_v63 = vsel %vm739_vm1, %v1275_v28, %v1278_v31  ;;  %v2033_v9 = vshrl.u32 %v1810_v32, 16  ;;  %v2036_v35 = vshll.u32 %v1810_v32, 16  ;;  %v633_v50 = vrot.slane %v631_v49, 1  ;;  %v6688_v34 = vld [vmem:[#allocation2 + $0x70] sm:$0xff] }
  0xed   : > { %v7355_v23 = vsel %vm739_vm1, %v1998_v41, %v2006_v57  ;;  %3344 = vmatmul.mubr.bf16.gmra.mrb[68].mxu1 %v1279_v63  ;;  %6139 = vmatpush3.bf16.msra.mxu0 %v6651_v27  ;;  %v2043_v37 = vrot.slane %v2041_v24, 3  ;;  %v2046_v43 = vrot.slane %v2044_v60, 4  ;;  %v640_v17 = vshrl.u32 %v7347_v21, 16  ;;  %v7380_v27 = vld [vmem:[#allocation2 + $0xf8] sm:$0xff] }
  0xee   : > { %6289 = vmatmul.mubr.bf16.gmra.mrb[68].mxu0 %v7355_v23  ;;  %v2035_v25 = vrot.slane %v2033_v9, 3  ;;  %v2038_v54 = vrot.slane %v2036_v35, 4  ;;  %v634_v58 = vor.u32 %v633_v50, %v629_v44  ;;  %6140 = vmatprep.subr.bf16.mxu0 %v6653_v61  ;;  %v638_v10 = vrot.slane %v636_v18, 1  ;;  %v6659_v21 = vld [vmem:[%s8379_s1 + $0x1f8] sm:$0xff]  }
  0xef   : > { %v2047_v0 = vor.u32 %v2046_v43, %v2043_v37  ;;  %v1811_v59 = vrot.slane %v6686_v56, 1  ;;  %v1812_v45 = vrot.slane %v6687_v1, 1  ;;  %v1314_v38 = vrot.slane %v629_v44, 3  ;;  %v6689_v61 = vld [vmem:[#allocation2 + $0x78] sm:$0xff] }
  0xf0   : > { %v2039_v19 = vor.u32 %v2038_v54, %v2035_v25  ;;  %v1315_v5 = vrot.slane %v631_v49, 4  ;;  %v1317_v30 = vrot.slane %v640_v17, 3  ;;  %v639_v12 = vsel %vm417_vm0, %v634_v58, %v638_v10 }
  0xf1   : > { %v642_v55 = vor.u32 %v640_v17, %v638_v10  ;;  %v1813_v15 = vsel %vm690_vm2, %v1811_v59, %v1812_v45  ;;  %v2082_v40 = vshrl.u32 %v1812_v45, 16  ;;  %6141 = vmatpush3.bf16.msra.mxu0 %v6654_v6  ;;  %v1322_v42 = vshrl.u32 %v639_v12, 16 }
  0xf2   : > { %v7372_v16 = vsel %vm739_vm1, %v2039_v19, %v2047_v0  ;;  %v1325_v11 = vshll.u32 %v639_v12, 16  ;;  %v2074_v20 = vshrl.u32 %v1813_v15, 16  ;;  %6142 = vmatprep.subr.bf16.mxu0 %v6655_v51  ;;  %v2077_v26 = vshll.u32 %v1813_v15, 16 }
  0xf3   : > { %6292 = vmatprep.mubr.bf16.mxu0 %v7372_v16  ;;  %v1330_v2 = vshrl.u32 %v642_v55, 16  ;;  %v1333_v4 = vshll.u32 %v642_v55, 16  ;;  %v2084_v33 = vrot.slane %v2082_v40, 3  ;;  %v1324_v39 = vrot.slane %v1322_v42, 3 }
  0xf4   : > { %v1327_v28 = vrot.slane %v1325_v11, 4  ;;  %v2076_v36 = vrot.slane %v2074_v20, 3  ;;  %v2085_v8 = vshll.u32 %v1812_v45, 16  ;;  %v2079_v48 = vrot.slane %v2077_v26, 4  ;;  %v6690_v45 = vld [vmem:[#allocation2 + $0x80] sm:$0xff] }
  0xf5   : > { %v1332_v3 = vrot.slane %v1330_v2, 3  ;;  %v1335_v46 = vrot.slane %v1333_v4, 4  ;;  %v1316_v41 = vor.u32 %v1315_v5, %v1314_v38  ;;  %6143 = vmatpush3.bf16.msra.mxu0 %v6656_v13  ;;  %v1318_v53 = vrot.slane %v636_v18, 4  ;;  %v6660_v18 = vld [vmem:[%s8379_s1 + $0x1b8] sm:$0xff]  }
  0xf6   : > { %v1328_v14 = vor.u32 %v1327_v28, %v1324_v39  ;;  %v2087_v52 = vrot.slane %v2085_v8, 4  ;;  %v1814_v31 = vrot.slane %v6688_v34, 1  ;;  %6144 = vmatprep.subr.bf16.mxu0 %v6657_v7  ;;  %v2080_v49 = vor.u32 %v2079_v48, %v2076_v36 }
  0xf7   : > { %v1336_v44 = vor.u32 %v1335_v46, %v1332_v3  ;;  %v1815_v57 = vrot.slane %v6689_v61, 1  ;;  %v644_v32 = vshrl.u32 %v7378_v47, 16  ;;  %v1319_v60 = vor.u32 %v1318_v53, %v1317_v30  ;;  %v6691_v30 = vld [vmem:[#allocation2 + $0x88] sm:$0xff]  ;;  %v6692_v61 = vld [vmem:[#allocation2] sm:$0xff] }
  0xf8   : > { %v2088_v24 = vor.u32 %v2087_v52, %v2084_v33  ;;  %v646_v63 = vshll.u32 %v7378_v47, 16  ;;  %v651_v9 = vshll.u32 %v7380_v27, 16  ;;  %v655_v1 = vshrl.u32 %v7380_v27, 16 }
  0xf9   : > { %v1337_v35 = vsel %vm739_vm1, %v1328_v14, %v1336_v44  ;;  %v1816_v50 = vsel %vm690_vm2, %v1814_v31, %v1815_v57  ;;  %v2123_v37 = vshrl.u32 %v1815_v57, 16  ;;  %v2126_v43 = vshll.u32 %v1815_v57, 16  ;;  %6145 = vmatpush3.bf16.msra.mxu0 %v6658_v22  ;;  %v7408_v14 = vld [vmem:[#allocation2 + $0x20] sm:$0xff] }
  0xfa   : > { %3351 = vmatprep.mubr.bf16.mxu1 %v1337_v35  ;;  %v7397_v6 = vsel %vm739_vm1, %v2080_v49, %v2088_v24  ;;  %v1320_v25 = vsel %vm739_vm1, %v1316_v41, %v1319_v60  ;;  %v2115_v54 = vshrl.u32 %v1816_v50, 16  ;;  %v2118_v58 = vshll.u32 %v1816_v50, 16  ;;  %6146 = vmatprep.subr.bf16.mxu0 %v6659_v21 }
  0xfb   : > { %6293 = vmatmul.mubr.bf16.gmra.mrb[72].mxu0 %v7397_v6  ;;  %3352 = vmatmul.mubr.bf16.gmra.mrb[72].mxu1 %v1320_v25  ;;  %v2125_v17 = vrot.slane %v2123_v37, 3  ;;  %v2128_v51 = vrot.slane %v2126_v43, 4  ;;  %v648_v0 = vrot.slane %v646_v63, 1  ;;  %v653_v10 = vrot.slane %v651_v9, 1  ;;  %v7412_v43 = vld [vmem:[#allocation2 + $0x28] sm:$0xff] }
  0xfc   : > { %v2117_v56 = vrot.slane %v2115_v54, 3  ;;  %v2120_v59 = vrot.slane %v2118_v58, 4  ;;  %v1817_v19 = vrot.slane %v6690_v45, 1  ;;  %v1818_v12 = vrot.slane %v6691_v30, 1 }
  0xfd   : > { %v2129_v38 = vor.u32 %v2128_v51, %v2125_v17  ;;  %v649_v5 = vor.u32 %v648_v0, %v644_v32  ;;  %v1355_v55 = vrot.slane %v644_v32, 3  ;;  %6147 = vmatpush3.bf16.msra.mxu0 %v6660_v18  ;;  %v657_v40 = vor.u32 %v655_v1, %v653_v10 }
  0xfe   : > { %v2121_v15 = vor.u32 %v2120_v59, %v2117_v56  ;;  %v1356_v13 = vrot.slane %v646_v63, 4  ;;  %v1358_v42 = vrot.slane %v655_v1, 3  ;;  %v1819_v20 = vsel %vm690_vm2, %v1817_v19, %v1818_v12  ;;  %v6693_v1 = vld [vmem:[#allocation2 + $0x10] sm:$0xff]  ;;  %v6694_v19 = vld [vmem:[#allocation2 + $0x18] sm:$0xff] }
  0xff   : > { %v654_v11 = vsel %vm417_vm0, %v649_v5, %v653_v10  ;;  %v2164_v7 = vshrl.u32 %v1818_v12, 16  ;;  %v2167_v2 = vshll.u32 %v1818_v12, 16  ;;  %v1371_v39 = vshrl.u32 %v657_v40, 16 }
 0x100   : > { %v7405_v4 = vsel %vm739_vm1, %v2121_v15, %v2129_v38  ;;  %v1363_v26 = vshrl.u32 %v654_v11, 16  ;;  %v1366_v33 = vshll.u32 %v654_v11, 16  ;;  %v1374_v28 = vshll.u32 %v657_v40, 16 }
 0x101   : > { %6296 = vmatprep.mubr.bf16.mxu0 %v7405_v4  ;;  %v2156_v36 = vshrl.u32 %v1819_v20, 16  ;;  %v2159_v8 = vshll.u32 %v1819_v20, 16  ;;  %v2166_v3 = vrot.slane %v2164_v7, 3  ;;  %v1373_v41 = vrot.slane %v1371_v39, 3 }
 0x102   : > { %v1365_v46 = vrot.slane %v1363_v26, 3  ;;  %v1368_v48 = vrot.slane %v1366_v33, 4  ;;  %v2169_v22 = vrot.slane %v2167_v2, 4  ;;  %v1376_v52 = vrot.slane %v1374_v28, 4 }
 0x103   : > { %v2158_v53 = vrot.slane %v2156_v36, 3  ;;  %v2161_v34 = vrot.slane %v2159_v8, 4  ;;  %v1357_v31 = vor.u32 %v1356_v13, %v1355_v55  ;;  %v1359_v49 = vrot.slane %v651_v9, 4 }
 0x104   : > { %v1369_v21 = vor.u32 %v1368_v48, %v1365_v46  ;;  %v2170_v44 = vor.u32 %v2169_v22, %v2166_v3  ;;  %v691_v57 = vrot.slane %v6692_v61, 1  ;;  %v1377_v32 = vor.u32 %v1376_v52, %v1373_v41  ;;  %v7433_v22 = vld [vmem:[#allocation2 + $0x30] sm:$0xff] }
 0x105   : > { %v2162_v24 = vor.u32 %v2161_v34, %v2158_v53  ;;  %v3563_v60 = vshrl.u32 %v7408_v14, 16  ;;  %v3565_v63 = vshll.u32 %v7408_v14, 16  ;;  %v1360_v35 = vor.u32 %v1359_v49, %v1358_v42 }
 0x106   : > { %v773_v50 = vshrl.u32 %v691_v57, 16  ;;  %v776_v37 = vshll.u32 %v691_v57, 16  ;;  %v1378_v18 = vsel %vm739_vm1, %v1369_v21, %v1377_v32  ;;  %v3570_v51 = vshll.u32 %v7412_v43, 16  ;;  %v7435_v21 = vld [vmem:[#allocation2 + $0x38] sm:$0xff] }
 0x107   : > { %v7416_v25 = vsel %vm739_vm1, %v2162_v24, %v2170_v44  ;;  %3359 = vmatprep.mubr.bf16.mxu1 %v1378_v18  ;;  %v1361_v9 = vsel %vm739_vm1, %v1357_v31, %v1360_v35  ;;  %v3567_v17 = vrot.slane %v3565_v63, 1  ;;  %v3574_v0 = vshrl.u32 %v7412_v43, 16 }
 0x108   : > { %6297 = vmatmul.mubr.bf16.gmra.mrb[76].mxu0 %v7416_v25  ;;  %v775_v54 = vrot.slane %v773_v50, 3  ;;  %v778_v58 = vrot.slane %v776_v37, 4  ;;  %3360 = vmatmul.mubr.bf16.gmra.mrb[76].mxu1 %v1361_v9  ;;  %v7422_v10 = vpop.f32.mrb[0].mxu0  ;;  %v694_v45 = vrot.slane %v6693_v1, 1  ;;  %v695_v38 = vrot.slane %v6694_v19, 1 }
 0x109   : > { %v3568_v59 = vor.u32 %v3567_v17, %v3563_v60  ;;  %v7424_v5 = vpop.f32.mrb[1].mxu0  ;;  %v3572_v30 = vrot.slane %v3570_v51, 1  ;;  %v3882_v12 = vrot.slane %v3563_v60, 3  ;;  %v3883_v55 = vrot.slane %v3565_v63, 4 }
 0x10a   : > { %v779_v56 = vor.u32 %v778_v58, %v775_v54  ;;  %v7426_v15 = vpop.f32.mrb[2].mxu0  ;;  %v696_v40 = vsel %vm690_vm2, %v694_v45, %v695_v38  ;;  %v814_v13 = vshrl.u32 %v695_v38, 16  ;;  %v817_v42 = vshll.u32 %v695_v38, 16 }
 0x10b   : > { %v3885_v11 = vrot.slane %v3574_v0, 3  ;;  %v7429_v20 = vpop.f32.mrb[3].mxu0  ;;  %v3573_v2 = vsel %vm417_vm0, %v3568_v59, %v3572_v30  ;;  %v3576_v26 = vor.u32 %v3574_v0, %v3572_v30  ;;  %v806_v33 = vshrl.u32 %v696_v40, 16  ;;  %v7445_v0 = vld [vmem:[#allocation2 + $0x40] sm:$0xff] }
 0x10c   : > { %v780_v7 = vsel %vm739_vm1, %v779_v56, %v779_v56  ;;  %v3890_v39 = vshrl.u32 %v3573_v2, 16  ;;  %v3893_v28 = vshll.u32 %v3573_v2, 16  ;;  %v809_v36 = vshll.u32 %v696_v40, 16  ;;  %v7447_v56 = vld [vmem:[#allocation2 + $0x48] sm:$0xff]  ;;  %v6695_v30 = vld [vmem:[%s8379_s1 + $0x200] sm:$0xff]  }
 0x10d   : > { %6332 = vmatprep.mubr.bf16.mxu1 %v780_v7  ;;  %v816_v8 = vrot.slane %v814_v13, 3  ;;  %v3898_v3 = vshrl.u32 %v3576_v26, 16  ;;  %v3901_v46 = vshll.u32 %v3576_v26, 16  ;;  %v808_v48 = vrot.slane %v806_v33, 3  ;;  %v6663_v33 = vld [vmem:[%s8379_s1 + $0x210] sm:$0xff]  }
 0x10e   : > { %v819_v41 = vrot.slane %v817_v42, 4  ;;  %v3892_v52 = vrot.slane %v3890_v39, 3  ;;  %v3895_v53 = vrot.slane %v3893_v28, 4  ;;  %v811_v34 = vrot.slane %v809_v36, 4  ;;  %v7466_v39 = vld [vmem:[#allocation2 + $0x50] sm:$0xff] }
 0x10f   : > { %v3884_v31 = vor.u32 %v3883_v55, %v3882_v12  ;;  %v3900_v44 = vrot.slane %v3898_v3, 3  ;;  %v3903_v49 = vrot.slane %v3901_v46, 4  ;;  %v3886_v57 = vrot.slane %v3570_v51, 4  ;;  %v6662_v51 = vld [vmem:[%s8379_s1 + $0x208] sm:$0xff]  }
 0x110   : > { %v820_v61 = vor.u32 %v819_v41, %v816_v8  ;;  %v3896_v32 = vor.u32 %v3895_v53, %v3892_v52  ;;  %v812_v24 = vor.u32 %v811_v34, %v808_v48  ;;  %v3578_v60 = vshrl.u32 %v7433_v22, 16 }
 0x111   : > { %v3580_v63 = vshll.u32 %v7433_v22, 16  ;;  %v3904_v35 = vor.u32 %v3903_v49, %v3900_v44  ;;  %v3887_v50 = vor.u32 %v3886_v57, %v3885_v11  ;;  %v3585_v37 = vshll.u32 %v7435_v21, 16 }
 0x112   : > { %v3589_v18 = vshrl.u32 %v7435_v21, 16  ;;  %v821_v9 = vsel %vm739_vm1, %v812_v24, %v820_v61  ;;  %v3923_v58 = vrot.slane %v3578_v60, 3  ;;  %v3593_v13 = vshrl.u32 %v7445_v0, 16 }
 0x113   : > { %v3582_v54 = vrot.slane %v3580_v63, 1  ;;  %v3924_v17 = vrot.slane %v3580_v63, 4  ;;  %v3905_v59 = vsel %vm739_vm1, %v3896_v32, %v3904_v35  ;;  %6333 = vmatmul.mubr.bf16.vlgmr.msra.gmra.mrb[80].mxu1 %v821_v9  ;;  %v3888_v1 = vsel %vm739_vm1, %v3884_v31, %v3887_v50  ;;  %v6664_v63 = vld [vmem:[%s8379_s1 + $0x218] sm:$0xff]  }
 0x114   : > { %v3587_v45 = vrot.slane %v3585_v37, 1  ;;  %v3926_v19 = vrot.slane %v3589_v18, 3  ;;  %v7451_v38 = vpop.f32.mrb[4].mxu0  ;;  %4811 = vmatprep.mubr.bf16.mxu0 %v3905_v59  ;;  %6365 = vmatpush3.bf16.msra.mxu1 %v6695_v30  ;;  %v3927_v40 = vrot.slane %v3585_v37, 4  ;;  %v3595_v7 = vshll.u32 %v7445_v0, 16 }
 0x115   : > { %v3583_v12 = vor.u32 %v3582_v54, %v3578_v60  ;;  %v3925_v55 = vor.u32 %v3924_v17, %v3923_v58  ;;  %v7457_v42 = vpop.f32.mrb[5].mxu0  ;;  %4812 = vmatmul.mubr.bf16.vlgmr.msra.gmra.mrb[80].mxu0 %v3888_v1  ;;  %6336 = vmatprep.mubr.bf16.mxu1 %v7322_v62  ;;  %v3600_v2 = vshll.u32 %v7447_v56, 16  ;;  %v3604_v26 = vshrl.u32 %v7447_v56, 16  ;;  %v7475_v60 = vld [vmem:[#allocation2 + $0x58] sm:$0xff] }
 0x116   : > { %v3591_v11 = vor.u32 %v3589_v18, %v3587_v45  ;;  %v7468_v28 = vpop.f32.mrb[6].mxu0  ;;  %v3928_v8 = vor.u32 %v3927_v40, %v3926_v19  ;;  %6366 = vmatprep.subr.bf16.mxu1 %v6662_v51  ;;  %v3964_v62 = vrot.slane %v3593_v13, 3  ;;  %v3608_v3 = vshrl.u32 %v7466_v39, 16 }
 0x117   : > { %v3588_v36 = vsel %vm417_vm0, %v3583_v12, %v3587_v45  ;;  %v7472_v46 = vpop.f32.mrb[7].mxu0  ;;  %v3597_v31 = vrot.slane %v3595_v7, 1  ;;  %v3602_v44 = vrot.slane %v3600_v2, 1  ;;  %v3965_v49 = vrot.slane %v3595_v7, 4 }
 0x118   : > { %v3931_v48 = vshrl.u32 %v3588_v36, 16  ;;  %v3934_v41 = vshll.u32 %v3588_v36, 16  ;;  %v3939_v52 = vshrl.u32 %v3591_v11, 16  ;;  %v3942_v53 = vshll.u32 %v3591_v11, 16  ;;  %6367 = vmatpush3.bf16.msra.mxu1 %v6662_v51  ;;  %v7491_v36 = vld [vmem:[#allocation2 + $0x60] sm:$0xff] }
 0x119   : > { %v3929_v34 = vsel %vm739_vm1, %v3925_v55, %v3928_v8  ;;  %6368 = vmatprep.subr.bf16.mxu1 %v6663_v33  ;;  %v3598_v35 = vor.u32 %v3597_v31, %v3593_v13  ;;  %v3606_v50 = vor.u32 %v3604_v26, %v3602_v44  ;;  %v3966_v37 = vor.u32 %v3965_v49, %v3964_v62  ;;  %v7493_v49 = vld [vmem:[#allocation2 + $0x68] sm:$0xff] }
 0x11a   : > { %v3933_v61 = vrot.slane %v3931_v48, 3  ;;  %v3936_v57 = vrot.slane %v3934_v41, 4  ;;  %v3941_v32 = vrot.slane %v3939_v52, 3  ;;  %v3944_v24 = vrot.slane %v3942_v53, 4 }
 0x11b   : > { %v3967_v18 = vrot.slane %v3604_v26, 3  ;;  %6337 = vmatmul.mubr.bf16.gmra.mrb[84].mxu1 %v7334_v29  ;;  %v3968_v58 = vrot.slane %v3600_v2, 4  ;;  %v3610_v17 = vshll.u32 %v7466_v39, 16  ;;  %v3603_v51 = vsel %vm417_vm0, %v3598_v35, %v3602_v44  ;;  %v6665_v29 = vld [vmem:[%s8379_s1 + $0x220] sm:$0xff]  }
 0x11c   : > { %v3937_v9 = vor.u32 %v3936_v57, %v3933_v61  ;;  %v3945_v54 = vor.u32 %v3944_v24, %v3941_v32  ;;  %6340 = vmatprep.mubr.bf16.mxu1 %v7355_v23  ;;  %v3980_v59 = vshrl.u32 %v3606_v50, 16  ;;  %v3983_v1 = vshll.u32 %v3606_v50, 16  ;;  %6369 = vmatpush3.bf16.msra.mxu1 %v6663_v33 }
 0x11d   : > { %v3615_v45 = vshll.u32 %v7475_v60, 16  ;;  %v3972_v30 = vshrl.u32 %v3603_v51, 16  ;;  %v3975_v12 = vshll.u32 %v3603_v51, 16  ;;  %v3969_v55 = vor.u32 %v3968_v58, %v3967_v18  ;;  %6370 = vmatprep.subr.bf16.mxu1 %v6664_v63 }
 0x11e   : > { %v3946_v19 = vsel %vm739_vm1, %v3937_v9, %v3945_v54  ;;  %v3982_v40 = vrot.slane %v3980_v59, 3  ;;  %v3985_v23 = vrot.slane %v3983_v1, 4  ;;  %v3612_v13 = vrot.slane %v3610_v17, 1 }
 0x11f   : > { %4819 = vmatprep.mubr.bf16.mxu0 %v3946_v19  ;;  %v3617_v11 = vrot.slane %v3615_v45, 1  ;;  %v3974_v7 = vrot.slane %v3972_v30, 3  ;;  %v3977_v2 = vrot.slane %v3975_v12, 4  ;;  %v3970_v26 = vsel %vm739_vm1, %v3966_v37, %v3969_v55  ;;  %v6696_v12 = vld [vmem:[#allocation2 + $0x90] sm:$0xff] }
 0x120   : > { %4820 = vmatmul.mubr.bf16.gmra.mrb[84].mxu0 %v3929_v34  ;;  %v3619_v33 = vshrl.u32 %v7475_v60, 16  ;;  %v3986_v8 = vor.u32 %v3985_v23, %v3982_v40  ;;  %v3613_v62 = vor.u32 %v3612_v13, %v3608_v3  ;;  %v4005_v48 = vrot.slane %v3608_v3, 3  ;;  %6371 = vmatpush3.bf16.msra.mxu1 %v6664_v63  ;;  %v6666_v3 = vld [vmem:[%s8379_s1 + $0x228] sm:$0xff]   ;;  %v6697_v40 = vld [vmem:[#allocation2 + $0x98] sm:$0xff] }
 0x121   : > { %v4006_v41 = vrot.slane %v3610_v17, 4  ;;  %v3978_v52 = vor.u32 %v3977_v2, %v3974_v7  ;;  %v4009_v44 = vrot.slane %v3615_v45, 4  ;;  %6372 = vmatprep.subr.bf16.mxu1 %v6665_v29  ;;  %v3623_v57 = vshrl.u32 %v7491_v36, 16 }
 0x122   : > { %v3621_v53 = vor.u32 %v3619_v33, %v3617_v11  ;;  %v4008_v31 = vrot.slane %v3619_v33, 3  ;;  %v3618_v34 = vsel %vm417_vm0, %v3613_v62, %v3617_v11  ;;  %v3625_v32 = vshll.u32 %v7491_v36, 16 }
 0x123   : > { %v4007_v61 = vor.u32 %v4006_v41, %v4005_v48  ;;  %v3987_v24 = vsel %vm739_vm1, %v3978_v52, %v3986_v8  ;;  %6341 = vmatmul.mubr.bf16.gmra.mrb[88].mxu1 %v7372_v16  ;;  %v4013_v63 = vshrl.u32 %v3618_v34, 16  ;;  %v4016_v35 = vshll.u32 %v3618_v34, 16 }
 0x124   : > { %v4021_v50 = vshrl.u32 %v3621_v53, 16  ;;  %4827 = vmatprep.mubr.bf16.mxu0 %v3987_v24  ;;  %6344 = vmatprep.mubr.bf16.mxu1 %v7397_v6  ;;  %v4024_v37 = vshll.u32 %v3621_v53, 16  ;;  %v4010_v18 = vor.u32 %v4009_v44, %v4008_v31  ;;  %v3627_v9 = vrot.slane %v3625_v32, 1  ;;  %v6667_v6 = vld [vmem:[%s8379_s1 + $0x230] sm:$0xff]   ;;  %v6668_v31 = vld [vmem:[%s8379_s1 + $0x238] sm:$0xff]  }
 0x125   : > { %v3630_v54 = vshll.u32 %v7493_v49, 16  ;;  %v4015_v58 = vrot.slane %v4013_v63, 3  ;;  %v4018_v17 = vrot.slane %v4016_v35, 4  ;;  %v3634_v59 = vshrl.u32 %v7493_v49, 16  ;;  %6373 = vmatpush3.bf16.msra.mxu1 %v6665_v29  ;;  %v7520_v35 = vld [vmem:[#allocation2 + $0x70] sm:$0xff] }
 0x126   : > { %v4023_v51 = vrot.slane %v4021_v50, 3  ;;  %v4026_v1 = vrot.slane %v4024_v37, 4  ;;  %v4011_v16 = vsel %vm739_vm1, %v4007_v61, %v4010_v18  ;;  %v3628_v45 = vor.u32 %v3627_v9, %v3623_v57  ;;  %6374 = vmatprep.subr.bf16.mxu1 %v6666_v3 }
 0x127   : > { %v3632_v19 = vrot.slane %v3630_v54, 1  ;;  %v4019_v30 = vor.u32 %v4018_v17, %v4015_v58  ;;  %v718_v55 = vrot.slane %v6696_v12, 1  ;;  %v719_v23 = vrot.slane %v6697_v40, 1 }
 0x128   : > { %4828 = vmatmul.mubr.bf16.gmra.mrb[88].mxu0 %v3970_v26  ;;  %v7510_v13 = vrot.slane %v3623_v57, 3  ;;  %v4027_v11 = vor.u32 %v4026_v1, %v4023_v51  ;;  %v4047_v2 = vrot.slane %v3625_v32, 4  ;;  %v4049_v58 = vrot.slane %v3634_v59, 3 }
 0x129   : > { %v3633_v29 = vsel %vm417_vm0, %v3628_v45, %v3632_v19  ;;  %v3636_v7 = vor.u32 %v3634_v59, %v3632_v19  ;;  %v720_v62 = vsel %vm690_vm2, %v718_v55, %v719_v23  ;;  %v1142_v48 = vshrl.u32 %v719_v23, 16  ;;  %6375 = vmatpush3.bf16.msra.mxu1 %v6666_v3  ;;  %v6698_v45 = vld [vmem:[#allocation2 + $0xa0] sm:$0xff]  ;;  %v6699_v55 = vld [vmem:[#allocation2 + $0xa8] sm:$0xff] }
 0x12a   : > { %v4054_v33 = vshrl.u32 %v3633_v29, 16  ;;  %v4057_v8 = vshll.u32 %v3633_v29, 16  ;;  %v4028_v26 = vsel %vm739_vm1, %v4019_v30, %v4027_v11  ;;  %v1134_v53 = vshrl.u32 %v720_v62, 16  ;;  %6376 = vmatprep.subr.bf16.mxu1 %v6667_v6 }
 0x12b   : > { %v4062_v41 = vshrl.u32 %v3636_v7, 16  ;;  %v4065_v52 = vshll.u32 %v3636_v7, 16  ;;  %4835 = vmatprep.mubr.bf16.mxu0 %v4028_v26  ;;  %6345 = vmatmul.mubr.bf16.gmra.mrb[92].mxu1 %v7405_v4  ;;  %v1137_v61 = vshll.u32 %v720_v62, 16  ;;  %v1144_v57 = vrot.slane %v1142_v48, 3  ;;  %v7525_v4 = vld [vmem:[#allocation2 + $0x78] sm:$0xff] }
 0x12c   : > { %v4056_v44 = vrot.slane %v4054_v33, 3  ;;  %v4059_v34 = vrot.slane %v4057_v8, 4  ;;  %6348 = vmatprep.mubr.bf16.mxu1 %v7416_v25  ;;  %v1136_v24 = vrot.slane %v1134_v53, 3  ;;  %v1145_v63 = vshll.u32 %v719_v23, 16 }
 0x12d   : > { %v4064_v32 = vrot.slane %v4062_v41, 3  ;;  %v4067_v3 = vrot.slane %v4065_v52, 4  ;;  %v1139_v18 = vrot.slane %v1137_v61, 4  ;;  %v4048_v9 = vor.u32 %v4047_v2, %v7510_v13  ;;  %6377 = vmatpush3.bf16.msra.mxu1 %v6667_v6 }
 0x12e   : > { %v7522_v50 = vpop.f32.mrb[8].mxu0  ;;  %v4060_v37 = vor.u32 %v4059_v34, %v4056_v44  ;;  %v1147_v25 = vrot.slane %v1145_v63, 4  ;;  %v4050_v1 = vrot.slane %v3630_v54, 4  ;;  %v721_v19 = vrot.slane %v6698_v45, 1  ;;  %6378 = vmatprep.subr.bf16.mxu1 %v6668_v31  ;;  %v6701_v63 = vld [vmem:[#allocation2 + $0xb8] sm:$0xff] }
 0x12f   : > { %v7527_v17 = vpop.f32.mrb[9].mxu0  ;;  %v4068_v51 = vor.u32 %v4067_v3, %v4064_v32  ;;  %v1140_v12 = vor.u32 %v1139_v18, %v1136_v24  ;;  %v722_v40 = vrot.slane %v6699_v55, 1  ;;  %v3638_v23 = vshrl.u32 %v7520_v35, 16  ;;  %v6700_v32 = vld [vmem:[#allocation2 + $0xb0] sm:$0xff] }
 0x130   : > { %v7529_v30 = vpop.f32.mrb[10].mxu0  ;;  %4836 = vmatmul.mubr.bf16.gmra.mrb[92].mxu0 %v4011_v16  ;;  %v3640_v59 = vshll.u32 %v7520_v35, 16  ;;  %v1148_v11 = vor.u32 %v1147_v25, %v1144_v57  ;;  %v4051_v29 = vor.u32 %v4050_v1, %v4049_v58  ;;  %v3645_v54 = vshll.u32 %v7525_v4, 16 }
 0x131   : > { %v7533_v13 = vpop.f32.mrb[11].mxu0  ;;  %v4069_v6 = vsel %vm739_vm1, %v4060_v37, %v4068_v51  ;;  %v723_v7 = vsel %vm690_vm2, %v721_v19, %v722_v40  ;;  %v1183_v2 = vshrl.u32 %v722_v40, 16  ;;  %v1186_v16 = vshll.u32 %v722_v40, 16  ;;  %6379 = vmatpush3.bf16.msra.mxu1 %v6668_v31 }
 0x132   : > { %4843 = vmatprep.mubr.bf16.mxu0 %v4069_v6  ;;  %v3642_v33 = vrot.slane %v3640_v59, 1  ;;  %v1149_v8 = vsel %vm739_vm1, %v1140_v12, %v1148_v11  ;;  %v4052_v62 = vsel %vm739_vm1, %v4048_v9, %v4051_v29  ;;  %v1175_v48 = vshrl.u32 %v723_v7, 16 }
 0x133   : > { %v1178_v26 = vshll.u32 %v723_v7, 16  ;;  %6349 = vmatmul.mubr.bf16.gmra.mrb[0].mxu1 %v1149_v8  ;;  %v1185_v41 = vrot.slane %v1183_v2, 3  ;;  %v1188_v52 = vrot.slane %v1186_v16, 4  ;;  %v3647_v44 = vrot.slane %v3645_v54, 1 }
 0x134   : > { %v3643_v53 = vor.u32 %v3642_v33, %v3638_v23  ;;  %v1177_v34 = vrot.slane %v1175_v48, 3  ;;  %v3649_v57 = vshrl.u32 %v7525_v4, 16  ;;  %v724_v3 = vrot.slane %v6700_v32, 1 }
 0x135   : > { %v1180_v61 = vrot.slane %v1178_v26, 4  ;;  %v1189_v24 = vor.u32 %v1188_v52, %v1185_v41  ;;  %v725_v37 = vrot.slane %v6701_v63, 1  ;;  %v4087_v18 = vrot.slane %v3638_v23, 3  ;;  %v7548_v41 = vld [vmem:[#allocation2 + $0x80] sm:$0xff]  ;;  %v6703_v63 = vld [vmem:[#allocation2 + $0xc8] sm:$0xff] }
 0x136   : > { %v3648_v31 = vsel %vm417_vm0, %v3643_v53, %v3647_v44  ;;  %v3651_v58 = vor.u32 %v3649_v57, %v3647_v44  ;;  %v4088_v12 = vrot.slane %v3640_v59, 4 }
 0x137   : > { %v1181_v9 = vor.u32 %v1180_v61, %v1177_v34  ;;  %v4095_v51 = vshrl.u32 %v3648_v31, 16  ;;  %v4098_v25 = vshll.u32 %v3648_v31, 16  ;;  %v726_v1 = vsel %vm690_vm2, %v724_v3, %v725_v37 }
 0x138   : > { %4844 = vmatmul.mubr.bf16.gmra.mrb[96].mxu0 %v4052_v62  ;;  %v1224_v45 = vshrl.u32 %v725_v37, 16  ;;  %v1227_v19 = vshll.u32 %v725_v37, 16  ;;  %v4103_v11 = vshrl.u32 %v3651_v58, 16  ;;  %v4106_v7 = vshll.u32 %v3651_v58, 16 }
 0x139   : > { %v1190_v55 = vsel %vm739_vm1, %v1181_v9, %v1189_v24  ;;  %v4097_v40 = vrot.slane %v4095_v51, 3  ;;  %v4100_v6 = vrot.slane %v4098_v25, 4  ;;  %v1216_v23 = vshrl.u32 %v726_v1, 16  ;;  %v6702_v24 = vld [vmem:[#allocation2 + $0xc0] sm:$0xff] }
 0x13a   : > { %v7544_v29 = vpop.f32.mrb[12].mxu0  ;;  %6352 = vmatprep.mubr.bf16.mxu1 %v1190_v55  ;;  %v1219_v2 = vshll.u32 %v726_v1, 16  ;;  %v1226_v16 = vrot.slane %v1224_v45, 3  ;;  %v4105_v62 = vrot.slane %v4103_v11, 3  ;;  %v1229_v48 = vrot.slane %v1227_v19, 4 }
 0x13b   : > { %v7546_v33 = vpop.f32.mrb[13].mxu0  ;;  %v4101_v8 = vor.u32 %v4100_v6, %v4097_v40  ;;  %v4089_v26 = vor.u32 %v4088_v12, %v4087_v18  ;;  %v4108_v52 = vrot.slane %v4106_v7, 4  ;;  %v1218_v53 = vrot.slane %v1216_v23, 3 }
 0x13c   : > { %v7550_v59 = vpop.f32.mrb[14].mxu0  ;;  %v1221_v44 = vrot.slane %v1219_v2, 4  ;;  %v4090_v34 = vrot.slane %v3649_v57, 3  ;;  %v1230_v32 = vor.u32 %v1229_v48, %v1226_v16  ;;  %v4091_v3 = vrot.slane %v3645_v54, 4  ;;  %v7557_v57 = vld [vmem:[#allocation2 + $0x88] sm:$0xff] }
 0x13d   : > { %v7552_v61 = vpop.f32.mrb[15].mxu0  ;;  %v727_v31 = vrot.slane %v6702_v24, 1  ;;  %v728_v37 = vrot.slane %v6703_v63, 1  ;;  %v4109_v9 = vor.u32 %v4108_v52, %v4105_v62  ;;  %v3653_v18 = vshrl.u32 %v7548_v41, 16 }
 0x13e   : > { %v1222_v58 = vor.u32 %v1221_v44, %v1218_v53  ;;  %v3655_v51 = vshll.u32 %v7548_v41, 16  ;;  %v4092_v25 = vor.u32 %v4091_v3, %v4090_v34  ;;  %v3660_v62 = vshll.u32 %v7557_v57, 16  ;;  %v6704_v53 = vld [vmem:[#allocation2 + $0xd0] sm:$0xff]  ;;  %v6705_v34 = vld [vmem:[#allocation2 + $0xd8] sm:$0xff] }
 0x13f   : > { %v729_v1 = vsel %vm690_vm2, %v727_v31, %v728_v37  ;;  %v1265_v45 = vshrl.u32 %v728_v37, 16  ;;  %v1268_v19 = vshll.u32 %v728_v37, 16  ;;  %v4110_v12 = vsel %vm739_vm1, %v4101_v8, %v4109_v9 }
 0x140   : > { %v1231_v54 = vsel %vm739_vm1, %v1222_v58, %v1230_v32  ;;  %v1257_v55 = vshrl.u32 %v729_v1, 16  ;;  %v1260_v40 = vshll.u32 %v729_v1, 16  ;;  %4851 = vmatprep.mubr.bf16.mxu0 %v4110_v12  ;;  %v4093_v6 = vsel %vm739_vm1, %v4089_v26, %v4092_v25 }
 0x141   : > { %6353 = vmatmul.mubr.bf16.gmra.mrb[4].mxu1 %v1231_v54  ;;  %v1267_v11 = vrot.slane %v1265_v45, 3  ;;  %v1270_v7 = vrot.slane %v1268_v19, 4  ;;  %v3657_v23 = vrot.slane %v3655_v51, 1  ;;  %4852 = vmatmul.mubr.bf16.gmra.mrb[100].mxu0 %v4093_v6  ;;  %v3664_v48 = vshrl.u32 %v7557_v57, 16 }
 0x142   : > { %v1259_v2 = vrot.slane %v1257_v55, 3  ;;  %v1262_v16 = vrot.slane %v1260_v40, 4  ;;  %v730_v44 = vrot.slane %v6704_v53, 1  ;;  %v731_v32 = vrot.slane %v6705_v34, 1 }
 0x143   : > { %v1271_v52 = vor.u32 %v1270_v7, %v1267_v11  ;;  %v3658_v8 = vor.u32 %v3657_v23, %v3653_v18  ;;  %v3662_v24 = vrot.slane %v3660_v62, 1  ;;  %v4128_v31 = vrot.slane %v3653_v18, 3 }
 0x144   : > { %v1263_v3 = vor.u32 %v1262_v16, %v1259_v2  ;;  %v4129_v26 = vrot.slane %v3655_v51, 4  ;;  %v732_v63 = vsel %vm690_vm2, %v730_v44, %v731_v32  ;;  %v1306_v37 = vshrl.u32 %v731_v32, 16 }
 0x145   : > { %v1309_v9 = vshll.u32 %v731_v32, 16  ;;  %v4131_v58 = vrot.slane %v3664_v48, 3  ;;  %v3663_v1 = vsel %vm417_vm0, %v3658_v8, %v3662_v24  ;;  %v3666_v45 = vor.u32 %v3664_v48, %v3662_v24 }
 0x146   : > { %v1272_v25 = vsel %vm739_vm1, %v1263_v3, %v1271_v52  ;;  %v1298_v19 = vshrl.u32 %v732_v63, 16  ;;  %v4136_v54 = vshrl.u32 %v3663_v1, 16  ;;  %v4139_v55 = vshll.u32 %v3663_v1, 16  ;;  %v7583_v1 = vld [vmem:[#allocation2 + $0x98] sm:$0xff] }
 0x147   : > { %v7567_v12 = vpop.f32.mrb[16].mxu0  ;;  %6356 = vmatprep.mubr.bf16.mxu1 %v1272_v25  ;;  %v1301_v40 = vshll.u32 %v732_v63, 16  ;;  %v1308_v6 = vrot.slane %v1306_v37, 3  ;;  %v4144_v11 = vshrl.u32 %v3666_v45, 16  ;;  %v4147_v7 = vshll.u32 %v3666_v45, 16  ;;  %v7581_v25 = vld [vmem:[#allocation2 + $0x90] sm:$0xff] }
 0x148   : > { %v7569_v18 = vpop.f32.mrb[16].mxu1  ;;  %v7571_v51 = vpop.f32.mrb[17].mxu0  ;;  %v1300_v23 = vrot.slane %v1298_v19, 3  ;;  %v1311_v2 = vrot.slane %v1309_v9, 4  ;;  %v4138_v48 = vrot.slane %v4136_v54, 3  ;;  %v4141_v8 = vrot.slane %v4139_v55, 4 }
 0x149   : > { %v7573_v16 = vpop.f32.mrb[17].mxu1  ;;  %v7575_v52 = vpop.f32.mrb[18].mxu0  ;;  %v1303_v53 = vrot.slane %v1301_v40, 4  ;;  %v4130_v44 = vor.u32 %v4129_v26, %v4128_v31  ;;  %v4146_v3 = vrot.slane %v4144_v11, 3  ;;  %v4149_v24 = vrot.slane %v4147_v7, 4  ;;  %8384 = vst [vmem:[#allocation3_spill] sm:$0xff] %v7583_v1 }
 0x14a   : > { %v7577_v34 = vpop.f32.mrb[18].mxu1  ;;  %v7579_v32 = vpop.f32.mrb[19].mxu0  ;;  %v1312_v63 = vor.u32 %v1311_v2, %v1308_v6  ;;  %v4132_v37 = vrot.slane %v3660_v62, 4  ;;  %v4142_v45 = vor.u32 %v4141_v8, %v4138_v48  ;;  %v7589_v54 = vadd.f32 %v7424_v5, %v7422_v10  ;;  %v6706_v40 = vld [vmem:[#allocation2 + $0xe0] sm:$0xff]  ;;  %v6707_v6 = vld [vmem:[#allocation2 + $0xe8] sm:$0xff] }
 0x14b   : > { %v7585_v9 = vpop.f32.mrb[19].mxu1  ;;  %v1304_v19 = vor.u32 %v1303_v53, %v1300_v23  ;;  %v7593_v31 = vadd.f32 %v7429_v20, %v7426_v15  ;;  %v4150_v26 = vor.u32 %v4149_v24, %v4146_v3  ;;  %v733_v62 = vrot.slane %v6706_v40, 1 }
 0x14c   : > { %8385 = vst [vmem:[#allocation4_spill] sm:$0xff] %v7589_v54  ;;  %v4133_v55 = vor.u32 %v4132_v37, %v4131_v58  ;;  %v734_v11 = vrot.slane %v6707_v6, 1  ;;  %v3668_v2 = vshrl.u32 %v7581_v25, 16  ;;  %v3670_v23 = vshll.u32 %v7581_v25, 16 }
 0x14d   : > { %8386 = vst [vmem:[#allocation5_spill] sm:$0xff] %v7593_v31  ;;  %v1313_v7 = vsel %vm739_vm1, %v1304_v19, %v1312_v63  ;;  %v3675_v48 = vshll.u32 %v7583_v1, 16  ;;  %v4151_v10 = vsel %vm739_vm1, %v4142_v45, %v4150_v26  ;;  %v3679_v26 = vshrl.u32 %v7583_v1, 16 }
 0x14e   : > { %6357 = vmatmul.mubr.bf16.gmra.mrb[8].mxu1 %v1313_v7  ;;  %v4134_v5 = vsel %vm739_vm1, %v4130_v44, %v4133_v55  ;;  %v735_v15 = vsel %vm690_vm2, %v733_v62, %v734_v11  ;;  %v1347_v20 = vshrl.u32 %v734_v11, 16  ;;  %4859 = vmatprep.mubr.bf16.mxu0 %v4151_v10  ;;  %v1350_v3 = vshll.u32 %v734_v11, 16 }
 0x14f   : > { %v7602_v58 = vpop.f32.mrb[20].mxu0  ;;  %v1339_v8 = vshrl.u32 %v735_v15, 16  ;;  %v1342_v53 = vshll.u32 %v735_v15, 16  ;;  %v3672_v24 = vrot.slane %v3670_v23, 1  ;;  %4860 = vmatmul.mubr.bf16.gmra.mrb[104].mxu0 %v4134_v5  ;;  %v3677_v45 = vrot.slane %v3675_v48, 1 }
 0x150   : > { %8387 = vst [vmem:[#allocation6_spill] sm:$0xff] %v7602_v58  ;;  %v7604_v63 = vpop.f32.mrb[20].mxu1  ;;  %v7606_v37 = vpop.f32.mrb[21].mxu0  ;;  %v1349_v19 = vrot.slane %v1347_v20, 3  ;;  %v736_v44 = vrot.slane %v7378_v47, 1  ;;  %v1352_v7 = vrot.slane %v1350_v3, 4 }
 0x151   : > { %8388 = vst [vmem:[#allocation7_spill] sm:$0xff] %v7604_v63  ;;  %8389 = vst [vmem:[#allocation8_spill] sm:$0xff] %v7606_v37  ;;  %v7610_v55 = vpop.f32.mrb[21].mxu1  ;;  %v7612_v40 = vpop.f32.mrb[22].mxu0  ;;  %v1341_v62 = vrot.slane %v1339_v8, 3  ;;  %v1344_v6 = vrot.slane %v1342_v53, 4  ;;  %v3673_v11 = vor.u32 %v3672_v24, %v3668_v2  ;;  %v3681_v31 = vor.u32 %v3679_v26, %v3677_v45 }
 0x152   : > { %8390 = vst [vmem:[#allocation9_spill] sm:$0xff] %v7610_v55  ;;  %8391 = vst [vmem:[#allocation10_spill] sm:$0xff] %v7612_v40  ;;  %v7614_v10 = vpop.f32.mrb[22].mxu1  ;;  %v7616_v15 = vpop.f32.mrb[23].mxu0  ;;  %v737_v5 = vrot.slane %v7380_v27, 1  ;;  %v4169_v20 = vrot.slane %v3668_v2, 3  ;;  %v1353_v37 = vor.u32 %v1352_v7, %v1349_v19 }
 0x153   : > { %8392 = vst [vmem:[#allocation11_spill] sm:$0xff] %v7614_v10  ;;  %8393 = vst [vmem:[#allocation12_spill] sm:$0xff] %v7616_v15  ;;  %v4170_v54 = vrot.slane %v3670_v23, 4  ;;  %v7619_v63 = vpop.f32.mrb[23].mxu1  ;;  %v1345_v47 = vor.u32 %v1344_v6, %v1341_v62  ;;  %v3678_v55 = vsel %vm417_vm0, %v3673_v11, %v3677_v45  ;;  %v4172_v40 = vrot.slane %v3679_v26, 3 }
 0x154   : > { %8394 = vst [vmem:[#allocation13_spill] sm:$0xff] %v7619_v63  ;;  %v4177_v8 = vshrl.u32 %v3678_v55, 16  ;;  %v4180_v53 = vshll.u32 %v3678_v55, 16  ;;  %v4185_v3 = vshrl.u32 %v3681_v31, 16  ;;  %v4188_v24 = vshll.u32 %v3681_v31, 16 }
 0x155   : > { %v1354_v10 = vsel %vm739_vm1, %v1345_v47, %v1353_v37  ;;  %v738_v15 = vsel %vm690_vm2, %v736_v44, %v737_v5  ;;  %v1388_v58 = vshrl.u32 %v737_v5, 16  ;;  %v1391_v1 = vshll.u32 %v737_v5, 16  ;;  %v7626_v37 = vld [vmem:[#allocation2 + $0xa0] sm:$0xff]  ;;  %v7628_v44 = vld [vmem:[#allocation2 + $0xa8] sm:$0xff] }
 0x156   : > { %6360 = vmatprep.mubr.bf16.mxu1 %v1354_v10  ;;  %v4179_v27 = vrot.slane %v4177_v8, 3  ;;  %v4182_v2 = vrot.slane %v4180_v53, 4  ;;  %v4187_v23 = vrot.slane %v4185_v3, 3  ;;  %v4190_v63 = vrot.slane %v4188_v24, 4 }
 0x157   : > { %v1380_v62 = vshrl.u32 %v738_v15, 16  ;;  %v1383_v19 = vshll.u32 %v738_v15, 16  ;;  %v1390_v6 = vrot.slane %v1388_v58, 3  ;;  %v1393_v45 = vrot.slane %v1391_v1, 4 }
 0x158   : > { %v7624_v26 = vpop.f32.mrb[24].mxu1  ;;  %v4183_v55 = vor.u32 %v4182_v2, %v4179_v27  ;;  %v4191_v7 = vor.u32 %v4190_v63, %v4187_v23  ;;  %v4171_v31 = vor.u32 %v4170_v54, %v4169_v20  ;;  %v4173_v11 = vrot.slane %v3675_v48, 4 }
 0x159   : > { %v7630_v5 = vpop.f32.mrb[24].mxu0  ;;  %v7632_v10 = vpop.f32.mrb[25].mxu1  ;;  %v1382_v47 = vrot.slane %v1380_v62, 3  ;;  %v1385_v8 = vrot.slane %v1383_v19, 4  ;;  %v1394_v53 = vor.u32 %v1393_v45, %v1390_v6  ;;  %v7636_v1 = vadd.f32 %v7457_v42, %v7451_v38 }
 0x15a   : > { %v7638_v58 = vpop.f32.mrb[25].mxu0  ;;  %v7640_v63 = vpop.f32.mrb[26].mxu1  ;;  %v4192_v54 = vsel %vm739_vm1, %v4183_v55, %v4191_v7  ;;  %v4174_v48 = vor.u32 %v4173_v11, %v4172_v40  ;;  %v7645_v15 = vadd.f32 %v7472_v46, %v7468_v28  ;;  %v3683_v20 = vshrl.u32 %v7626_v37, 16 }
 0x15b   : > { %8395 = vst [vmem:[#allocation14_spill] sm:$0xff] %v7636_v1  ;;  %8396 = vst [vmem:[#allocation15_spill] sm:$0xff] %v7640_v63  ;;  %v7648_v3 = vpop.f32.mrb[26].mxu0  ;;  %v7650_v24 = vpop.f32.mrb[27].mxu1  ;;  %4867 = vmatprep.mubr.bf16.mxu0 %v4192_v54  ;;  %v1386_v38 = vor.u32 %v1385_v8, %v1382_v47  ;;  %v3685_v42 = vshll.u32 %v7626_v37, 16  ;;  %v3690_v27 = vshll.u32 %v7628_v44, 16 }
 0x15c   : > { %8397 = vst [vmem:[#allocation16_spill] sm:$0xff] %v7645_v15  ;;  %8398 = vst [vmem:[#allocation17_spill] sm:$0xff] %v7650_v24  ;;  %v3694_v2 = vshrl.u32 %v7628_v44, 16  ;;  %v7655_v23 = vpop.f32.mrb[27].mxu0  ;;  %v4175_v40 = vsel %vm739_vm1, %v4171_v31, %v4174_v48  ;;  %v3834_v28 = vrot.slane %v7408_v14, 1  ;;  %v3835_v46 = vrot.slane %v7412_v43, 1 }
 0x15d   : > { %v4210_v62 = vrot.slane %v3683_v20, 3  ;;  %v1395_v19 = vsel %vm739_vm1, %v1386_v38, %v1394_v53  ;;  %4868 = vmatmul.mubr.bf16.gmra.mrb[108].mxu0 %v4175_v40  ;;  %v3687_v6 = vrot.slane %v3685_v42, 1  ;;  %v3692_v45 = vrot.slane %v3690_v27, 1 }
 0x15e   : > { %v4211_v55 = vrot.slane %v3685_v42, 4  ;;  %6361 = vmatmul.mubr.bf16.gmra.mrb[12].mxu1 %v1395_v19  ;;  %v3836_v7 = vsel %vm690_vm2, %v3834_v28, %v3835_v46  ;;  %v3915_v11 = vshrl.u32 %v3835_v46, 16  ;;  %v3918_v47 = vshll.u32 %v3835_v46, 16 }
 0x15f   : > { %v4213_v8 = vrot.slane %v3694_v2, 3  ;;  %v3688_v54 = vor.u32 %v3687_v6, %v3683_v20  ;;  %v3696_v15 = vor.u32 %v3694_v2, %v3692_v45  ;;  %v3907_v31 = vshrl.u32 %v3836_v7, 16 }
 0x160   : > { %v3910_v48 = vshll.u32 %v3836_v7, 16  ;;  %v7662_v14 = vpop.f32.mrb[28].mxu1  ;;  %v3917_v43 = vrot.slane %v3915_v11, 3  ;;  %v3920_v1 = vrot.slane %v3918_v47, 4  ;;  %v4212_v24 = vor.u32 %v4211_v55, %v4210_v62 }
 0x161   : > { %8399 = vst [vmem:[#allocation18_spill] sm:$0xff] %v7662_v14  ;;  %v4214_v53 = vrot.slane %v3690_v27, 4  ;;  %v7664_v38 = vpop.f32.mrb[28].mxu0  ;;  %v7666_v40 = vpop.f32.mrb[29].mxu1  ;;  %v3693_v42 = vsel %vm417_vm0, %v3688_v54, %v3692_v45  ;;  %v4226_v28 = vshrl.u32 %v3696_v15, 16  ;;  %v4229_v19 = vshll.u32 %v3696_v15, 16 }
 0x162   : > { %8400 = vst [vmem:[#allocation19_spill] sm:$0xff] %v7666_v40  ;;  %v3909_v46 = vrot.slane %v3907_v31, 3  ;;  %v7669_v63 = vpop.f32.mrb[29].mxu0  ;;  %v7671_v20 = vpop.f32.mrb[30].mxu1  ;;  %v4218_v2 = vshrl.u32 %v3693_v42, 16  ;;  %v4221_v6 = vshll.u32 %v3693_v42, 16  ;;  %v3921_v11 = vor.u32 %v3920_v1, %v3917_v43 }
 0x163   : > { %8401 = vst [vmem:[#allocation20_spill] sm:$0xff] %v7669_v63  ;;  %8402 = vst [vmem:[#allocation21_spill] sm:$0xff] %v7671_v20  ;;  %v3912_v7 = vrot.slane %v3910_v48, 4  ;;  %v7673_v47 = vpop.f32.mrb[30].mxu0  ;;  %v7675_v27 = vpop.f32.mrb[31].mxu1  ;;  %v4228_v62 = vrot.slane %v4226_v28, 3  ;;  %v4215_v40 = vor.u32 %v4214_v53, %v4213_v8  ;;  %v7684_v1 = vadd.f32 %v7527_v17, %v7522_v50 }
 0x164   : > { %v4231_v55 = vrot.slane %v4229_v19, 4  ;;  %v3837_v45 = vrot.slane %v7433_v22, 1  ;;  %v7678_v54 = vpop.f32.mrb[31].mxu0  ;;  %v4220_v15 = vrot.slane %v4218_v2, 3  ;;  %v4223_v31 = vrot.slane %v4221_v6, 4  ;;  %v7690_v8 = vld [vmem:[#allocation2 + $0xb0] sm:$0xff] }
 0x165   : > { %v3913_v14 = vor.u32 %v3912_v7, %v3909_v46  ;;  %v3838_v20 = vrot.slane %v7435_v21, 1  ;;  %v4216_v48 = vsel %vm739_vm1, %v4212_v24, %v4215_v40  ;;  %8403 = vst [vmem:[#allocation22_spill] sm:$0xff] %v7684_v1  ;;  %v7688_v43 = vadd.f32 %v7533_v13, %v7529_v30  ;;  %v7692_v22 = vld [vmem:[#allocation2 + $0xb8] sm:$0xff] }
 0x166   : > { %v4232_v63 = vor.u32 %v4231_v55, %v4228_v62  ;;  %v4224_v53 = vor.u32 %v4223_v31, %v4220_v15  ;;  %v3698_v50 = vshrl.u32 %v7690_v8, 16  ;;  %v3700_v46 = vshll.u32 %v7690_v8, 16 }
 0x167   : > { %8404 = vst [vmem:[#allocation23_spill] sm:$0xff] %v7688_v43  ;;  %v3922_v42 = vsel %vm739_vm1, %v3913_v14, %v3921_v11  ;;  %v3839_v21 = vsel %vm690_vm2, %v3837_v45, %v3838_v20  ;;  %v3956_v28 = vshrl.u32 %v3838_v20, 16  ;;  %v3959_v19 = vshll.u32 %v3838_v20, 16 }
 0x168   : > { %6380 = vmatprep.mubr.bf16.mxu1 %v3922_v42  ;;  %v3948_v24 = vshrl.u32 %v3839_v21, 16  ;;  %v3951_v40 = vshll.u32 %v3839_v21, 16  ;;  %v7697_v17 = vpop.f32.mrb[32].mxu1  ;;  %v4233_v30 = vsel %vm739_vm1, %v4224_v53, %v4232_v63  ;;  %v3705_v2 = vshll.u32 %v7692_v22, 16 }
 0x169   : > { %8405 = vst [vmem:[#allocation24_spill] sm:$0xff] %v7697_v17  ;;  %v3958_v13 = vrot.slane %v3956_v28, 3  ;;  %v7702_v6 = vpop.f32.mrb[32].mxu0  ;;  %v7704_v14 = vpop.f32.mrb[33].mxu1  ;;  %4875 = vmatprep.mubr.bf16.mxu0 %v4233_v30  ;;  %v3961_v62 = vrot.slane %v3959_v19, 4  ;;  %v3709_v20 = vshrl.u32 %v7692_v22, 16 }
 0x16a   : > { %8406 = vst [vmem:[#allocation25_spill] sm:$0xff] %v7702_v6  ;;  %8407 = vst [vmem:[#allocation26_spill] sm:$0xff] %v7704_v14  ;;  %v3950_v7 = vrot.slane %v3948_v24, 3  ;;  %v3953_v11 = vrot.slane %v3951_v40, 4  ;;  %v7707_v55 = vpop.f32.mrb[33].mxu0  ;;  %v7709_v45 = vpop.f32.mrb[34].mxu1  ;;  %4876 = vmatmul.mubr.bf16.gmra.mrb[112].mxu0 %v4216_v48 }
 0x16b   : > { %8408 = vst [vmem:[#allocation27_spill] sm:$0xff] %v7707_v55  ;;  %8409 = vst [vmem:[#allocation28_spill] sm:$0xff] %v7709_v45  ;;  %v3702_v63 = vrot.slane %v3700_v46, 1  ;;  %v3707_v15 = vrot.slane %v3705_v2, 1  ;;  %v3840_v31 = vrot.slane %v7445_v0, 1  ;;  %v3841_v53 = vrot.slane %v7447_v56, 1 }
 0x16c   : > { %v7713_v42 = vpop.f32.mrb[34].mxu0  ;;  %v7715_v21 = vpop.f32.mrb[35].mxu1  ;;  %v3954_v28 = vor.u32 %v3953_v11, %v3950_v7  ;;  %v3962_v24 = vor.u32 %v3961_v62, %v3958_v13  ;;  %v4251_v40 = vrot.slane %v3698_v50, 3  ;;  %v4252_v19 = vrot.slane %v3700_v46, 4 }
 0x16d   : > { %8410 = vst [vmem:[#allocation29_spill] sm:$0xff] %v7713_v42  ;;  %8411 = vst [vmem:[#allocation30_spill] sm:$0xff] %v7715_v21  ;;  %v7717_v30 = vpop.f32.mrb[35].mxu0  ;;  %v3703_v43 = vor.u32 %v3702_v63, %v3698_v50  ;;  %v3711_v1 = vor.u32 %v3709_v20, %v3707_v15  ;;  %v3842_v48 = vsel %vm690_vm2, %v3840_v31, %v3841_v53  ;;  %v3997_v45 = vshrl.u32 %v3841_v53, 16 }
 0x16e   : > { %8412 = vst [vmem:[#allocation31_spill] sm:$0xff] %v7717_v30  ;;  %v3963_v14 = vsel %vm739_vm1, %v3954_v28, %v3962_v24  ;;  %v3989_v0 = vshrl.u32 %v3842_v48, 16  ;;  %v3992_v17 = vshll.u32 %v3842_v48, 16  ;;  %v4000_v56 = vshll.u32 %v3841_v53, 16 }
 0x16f   : > { %6381 = vmatmul.mubr.bf16.vlgmr.msra.gmra.mrb[80].mxu1 %v3963_v14  ;;  %v3708_v42 = vsel %vm417_vm0, %v3703_v43, %v3707_v15  ;;  %v4267_v21 = vshrl.u32 %v3711_v1, 16  ;;  %v4270_v7 = vshll.u32 %v3711_v1, 16  ;;  %v3999_v13 = vrot.slane %v3997_v45, 3  ;;  %v7728_v1 = vld [vmem:[#allocation2 + $0xc0] sm:$0xff] }
 0x170   : > { %v4259_v11 = vshrl.u32 %v3708_v42, 16  ;;  %v4262_v46 = vshll.u32 %v3708_v42, 16  ;;  %v3991_v62 = vrot.slane %v3989_v0, 3  ;;  %v3994_v30 = vrot.slane %v3992_v17, 4  ;;  %v7722_v50 = vpop.f32.mrb[36].mxu1 }
 0x171   : > { %v4269_v63 = vrot.slane %v4267_v21, 3  ;;  %v4272_v31 = vrot.slane %v4270_v7, 4  ;;  %v4002_v55 = vrot.slane %v4000_v56, 4  ;;  %v4253_v6 = vor.u32 %v4252_v19, %v4251_v40  ;;  %v7724_v28 = vpop.f32.mrb[36].mxu0  ;;  %v7726_v24 = vpop.f32.mrb[37].mxu1 }
 0x172   : > { %v4261_v14 = vrot.slane %v4259_v11, 3  ;;  %v4264_v53 = vrot.slane %v4262_v46, 4  ;;  %v3995_v43 = vor.u32 %v3994_v30, %v3991_v62  ;;  %v4254_v15 = vrot.slane %v3709_v20, 3  ;;  %v7730_v45 = vpop.f32.mrb[37].mxu0  ;;  %v7732_v42 = vpop.f32.mrb[38].mxu1 }
 0x173   : > { %8413 = vst [vmem:[#allocation32_spill] sm:$0xff] %v7732_v42  ;;  %v4273_v17 = vor.u32 %v4272_v31, %v4269_v63  ;;  %v4003_v48 = vor.u32 %v4002_v55, %v3999_v13  ;;  %v4255_v21 = vrot.slane %v3705_v2, 4  ;;  %v3843_v0 = vrot.slane %v7466_v39, 1  ;;  %v7735_v40 = vpop.f32.mrb[38].mxu0  ;;  %v7737_v19 = vpop.f32.mrb[39].mxu1  ;;  %v7751_v55 = vld [vmem:[#allocation2 + $0xc8] sm:$0xff] }
 0x174   : > { %8414 = vst [vmem:[#allocation33_spill] sm:$0xff] %v7737_v19  ;;  %v4265_v56 = vor.u32 %v4264_v53, %v4261_v14  ;;  %v3844_v7 = vrot.slane %v7475_v60, 1  ;;  %v7742_v20 = vadd.f32 %v7546_v33, %v7544_v29  ;;  %v7746_v30 = vadd.f32 %v7552_v61, %v7550_v59  ;;  %v7748_v11 = vpop.f32.mrb[39].mxu0 }
 0x175   : > { %v4004_v2 = vsel %vm739_vm1, %v3995_v43, %v4003_v48  ;;  %v4256_v39 = vor.u32 %v4255_v21, %v4254_v15  ;;  %v3713_v13 = vshrl.u32 %v7728_v1, 16  ;;  %v3715_v46 = vshll.u32 %v7728_v1, 16 }
 0x176   : > { %8415 = vst [vmem:[#allocation34_spill] sm:$0xff] %v7742_v20  ;;  %8416 = vst [vmem:[#allocation35_spill] sm:$0xff] %v7746_v30  ;;  %v4274_v60 = vsel %vm739_vm1, %v4265_v56, %v4273_v17  ;;  %6384 = vmatprep.mubr.bf16.mxu1 %v4004_v2  ;;  %v3845_v29 = vsel %vm690_vm2, %v3843_v0, %v3844_v7  ;;  %v4038_v33 = vshrl.u32 %v3844_v7, 16  ;;  %v4041_v62 = vshll.u32 %v3844_v7, 16 }
 0x177   : > { %4883 = vmatprep.mubr.bf16.mxu0 %v4274_v60  ;;  %v4257_v59 = vsel %vm739_vm1, %v4253_v6, %v4256_v39  ;;  %v4030_v61 = vshrl.u32 %v3845_v29, 16  ;;  %v4033_v63 = vshll.u32 %v3845_v29, 16  ;;  %v3717_v31 = vrot.slane %v3715_v46, 1 }
 0x178   : > { %4884 = vmatmul.mubr.bf16.gmra.mrb[116].mxu0 %v4257_v59  ;;  %v4040_v14 = vrot.slane %v4038_v33, 3  ;;  %v4043_v53 = vrot.slane %v4041_v62, 4  ;;  %v3720_v43 = vshll.u32 %v7751_v55, 16  ;;  %v3724_v15 = vshrl.u32 %v7751_v55, 16  ;;  %v7760_v48 = vpop.f32.mrb[40].mxu1 }
 0x179   : > { %8417 = vst [vmem:[#allocation36_spill] sm:$0xff] %v7760_v48  ;;  %v4032_v17 = vrot.slane %v4030_v61, 3  ;;  %v4035_v21 = vrot.slane %v4033_v63, 4  ;;  %v3718_v0 = vor.u32 %v3717_v31, %v3713_v13  ;;  %v3846_v56 = vrot.slane %v7491_v36, 1  ;;  %v7763_v7 = vpop.f32.mrb[40].mxu0  ;;  %v7765_v6 = vpop.f32.mrb[41].mxu1 }
 0x17a   : > { %8418 = vst [vmem:[#allocation37_spill] sm:$0xff] %v7763_v7  ;;  %8419 = vst [vmem:[#allocation38_spill] sm:$0xff] %v7765_v6  ;;  %v4044_v2 = vor.u32 %v4043_v53, %v4040_v14  ;;  %v3722_v39 = vrot.slane %v3720_v43, 1  ;;  %v3847_v60 = vrot.slane %v7493_v49, 1  ;;  %v4292_v29 = vrot.slane %v3713_v13, 3  ;;  %v7768_v33 = vpop.f32.mrb[41].mxu0 }
 0x17b   : > { %8420 = vst [vmem:[#allocation39_spill] sm:$0xff] %v7768_v33  ;;  %v7770_v62 = vpop.f32.mrb[42].mxu1  ;;  %v4036_v59 = vor.u32 %v4035_v21, %v4032_v17  ;;  %v4293_v30 = vrot.slane %v3715_v46, 4  ;;  %v4295_v61 = vrot.slane %v3724_v15, 3  ;;  %v4296_v63 = vrot.slane %v3720_v43, 4  ;;  %v7772_v31 = vpop.f32.mrb[42].mxu0 }
 0x17c   : > { %8421 = vst [vmem:[#allocation40_spill] sm:$0xff] %v7770_v62  ;;  %8422 = vst [vmem:[#allocation41_spill] sm:$0xff] %v7772_v31  ;;  %v7774_v36 = vpop.f32.mrb[43].mxu1  ;;  %v3723_v20 = vsel %vm417_vm0, %v3718_v0, %v3722_v39  ;;  %v3726_v6 = vor.u32 %v3724_v15, %v3722_v39  ;;  %v3848_v14 = vsel %vm690_vm2, %v3846_v56, %v3847_v60  ;;  %v4079_v53 = vshrl.u32 %v3847_v60, 16  ;;  %v7778_v49 = vpop.f32.mrb[43].mxu0 }
 0x17d   : > { %8423 = vst [vmem:[#allocation42_spill] sm:$0xff] %v7774_v36  ;;  %8424 = vst [vmem:[#allocation43_spill] sm:$0xff] %v7778_v49  ;;  %v4045_v13 = vsel %vm739_vm1, %v4036_v59, %v4044_v2  ;;  %v4300_v48 = vshrl.u32 %v3723_v20, 16  ;;  %v4303_v62 = vshll.u32 %v3723_v20, 16  ;;  %v4071_v17 = vshrl.u32 %v3848_v14, 16 }
 0x17e   : > { %6385 = vmatmul.mubr.bf16.gmra.mrb[84].mxu1 %v4045_v13  ;;  %v4308_v46 = vshrl.u32 %v3726_v6, 16  ;;  %v4311_v43 = vshll.u32 %v3726_v6, 16  ;;  %v4074_v21 = vshll.u32 %v3848_v14, 16  ;;  %v4081_v31 = vrot.slane %v4079_v53, 3  ;;  %v7814_v53 = vld [vmem:[#allocation2 + $0xd8] sm:$0xff] }
 0x17f   : > { %v4302_v33 = vrot.slane %v4300_v48, 3  ;;  %v4305_v36 = vrot.slane %v4303_v62, 4  ;;  %v4073_v7 = vrot.slane %v4071_v17, 3  ;;  %v4082_v0 = vshll.u32 %v3847_v60, 16 }
 0x180   : > { %v4310_v15 = vrot.slane %v4308_v46, 3  ;;  %v4313_v39 = vrot.slane %v4311_v43, 4  ;;  %v4076_v56 = vrot.slane %v4074_v21, 4  ;;  %v4294_v19 = vor.u32 %v4293_v30, %v4292_v29  ;;  %v7781_v42 = vpop.f32.mrb[44].mxu1 }
 0x181   : > { %v4306_v49 = vor.u32 %v4305_v36, %v4302_v33  ;;  %v4084_v2 = vrot.slane %v4082_v0, 4  ;;  %v4297_v59 = vor.u32 %v4296_v63, %v4295_v61  ;;  %v3849_v20 = vrot.slane %v7520_v35, 1  ;;  %v7784_v13 = vpop.f32.mrb[44].mxu0  ;;  %v7786_v6 = vpop.f32.mrb[45].mxu1 }
 0x182   : > { %v4314_v14 = vor.u32 %v4313_v39, %v4310_v15  ;;  %v4077_v48 = vor.u32 %v4076_v56, %v4073_v7  ;;  %v3850_v62 = vrot.slane %v7525_v4, 1  ;;  %v7791_v60 = vadd.f32 %v7571_v51, %v7567_v12  ;;  %v7793_v30 = vpop.f32.mrb[45].mxu0  ;;  %v7795_v29 = vpop.f32.mrb[46].mxu1  ;;  %v7806_v4 = vld [vmem:[#allocation2 + $0xd0] sm:$0xff] }
 0x183   : > { %v4085_v33 = vor.u32 %v4084_v2, %v4081_v31  ;;  %v4298_v61 = vsel %vm739_vm1, %v4294_v19, %v4297_v59  ;;  %v7800_v35 = vadd.f32 %v7573_v16, %v7569_v18  ;;  %v7804_v7 = vadd.f32 %v7579_v32, %v7575_v52  ;;  %v7808_v63 = vpop.f32.mrb[46].mxu0  ;;  %v7810_v12 = vpop.f32.mrb[47].mxu1 }
 0x184   : > { %8425 = vst [vmem:[#allocation44_spill] sm:$0xff] %v7791_v60  ;;  %v4315_v51 = vsel %vm739_vm1, %v4306_v49, %v4314_v14  ;;  %v3851_v31 = vsel %vm690_vm2, %v3849_v20, %v3850_v62  ;;  %v4120_v36 = vshrl.u32 %v3850_v62, 16  ;;  %v4123_v19 = vshll.u32 %v3850_v62, 16  ;;  %v7816_v18 = vpop.f32.mrb[47].mxu0 }
 0x185   : > { %8426 = vst [vmem:[#allocation45_spill] sm:$0xff] %v7800_v35  ;;  %8427 = vst [vmem:[#allocation46_spill] sm:$0xff] %v7804_v7  ;;  %4891 = vmatprep.mubr.bf16.mxu0 %v4315_v51  ;;  %v4086_v16 = vsel %vm739_vm1, %v4077_v48, %v4085_v33  ;;  %v4112_v52 = vshrl.u32 %v3851_v31, 16  ;;  %v4115_v32 = vshll.u32 %v3851_v31, 16  ;;  %v7821_v17 = vadd.f32 %v7585_v9, %v7577_v34 }
 0x186   : > { %6388 = vmatprep.mubr.bf16.mxu1 %v4086_v16  ;;  %4892 = vmatmul.mubr.bf16.gmra.mrb[120].mxu0 %v4298_v61  ;;  %v4122_v49 = vrot.slane %v4120_v36, 3  ;;  %v4125_v46 = vrot.slane %v4123_v19, 4  ;;  %v3728_v43 = vshrl.u32 %v7806_v4, 16  ;;  %v3730_v21 = vshll.u32 %v7806_v4, 16 }
 0x187   : > { %8428 = vst [vmem:[#allocation47_spill] sm:$0xff] %v7821_v17  ;;  %v4114_v0 = vrot.slane %v4112_v52, 3  ;;  %v4117_v15 = vrot.slane %v4115_v32, 4  ;;  %v3735_v39 = vshll.u32 %v7814_v53, 16  ;;  %v3739_v56 = vshrl.u32 %v7814_v53, 16 }
 0x188   : > { %v4126_v2 = vor.u32 %v4125_v46, %v4122_v49  ;;  %v3732_v59 = vrot.slane %v3730_v21, 1  ;;  %v3852_v20 = vrot.slane %v7548_v41, 1  ;;  %v3853_v34 = vrot.slane %v7557_v57, 1  ;;  %v7829_v9 = vpop.f32.mrb[48].mxu1 }
 0x189   : > { %8429 = vst [vmem:[#allocation48_spill] sm:$0xff] %v7829_v9  ;;  %v4118_v14 = vor.u32 %v4117_v15, %v4114_v0  ;;  %v3737_v48 = vrot.slane %v3735_v39, 1  ;;  %v7831_v62 = vrot.slane %v3728_v43, 3  ;;  %v4334_v33 = vrot.slane %v3730_v21, 4  ;;  %v7833_v61 = vpop.f32.mrb[48].mxu0  ;;  %v7835_v51 = vpop.f32.mrb[49].mxu1 }
 0x18a   : > { %8430 = vst [vmem:[#allocation49_spill] sm:$0xff] %v7835_v51  ;;  %v3733_v31 = vor.u32 %v3732_v59, %v3728_v43  ;;  %v3854_v36 = vsel %vm690_vm2, %v3852_v20, %v3853_v34  ;;  %v4161_v19 = vshrl.u32 %v3853_v34, 16  ;;  %v4164_v16 = vshll.u32 %v3853_v34, 16  ;;  %v7838_v52 = vpop.f32.mrb[49].mxu0  ;;  %v7840_v41 = vpop.f32.mrb[50].mxu1 }
 0x18b   : > { %8431 = vst [vmem:[#allocation50_spill] sm:$0xff] %v7840_v41  ;;  %v4127_v57 = vsel %vm739_vm1, %v4118_v14, %v4126_v2  ;;  %v3741_v32 = vor.u32 %v3739_v56, %v3737_v48  ;;  %v4153_v49 = vshrl.u32 %v3854_v36, 16  ;;  %v4156_v46 = vshll.u32 %v3854_v36, 16  ;;  %v7843_v0 = vpop.f32.mrb[50].mxu0  ;;  %v7845_v21 = vpop.f32.mrb[51].mxu1 }
 0x18c   : > { %8432 = vst [vmem:[#allocation51_spill] sm:$0xff] %v7843_v0  ;;  %8433 = vst [vmem:[#allocation52_spill] sm:$0xff] %v7845_v21  ;;  %6389 = vmatmul.mubr.bf16.gmra.mrb[88].mxu1 %v4127_v57  ;;  %v3738_v43 = vsel %vm417_vm0, %v3733_v31, %v3737_v48  ;;  %v4163_v15 = vrot.slane %v4161_v19, 3  ;;  %v4166_v59 = vrot.slane %v4164_v16, 4  ;;  %v4335_v20 = vor.u32 %v4334_v33, %v7831_v62  ;;  %v7849_v34 = vpop.f32.mrb[51].mxu0  ;;  %v8435_v19 = vld [vmem:[#allocation3_spill] sm:$0xff] }
 0x18d   : > { %8434 = vst [vmem:[#allocation53_spill] sm:$0xff] %v7849_v34  ;;  %v4341_v7 = vshrl.u32 %v3738_v43, 16  ;;  %v4344_v60 = vshll.u32 %v3738_v43, 16  ;;  %v4349_v17 = vshrl.u32 %v3741_v32, 16  ;;  %v4352_v2 = vshll.u32 %v3741_v32, 16  ;;  %v8436_v34 = vld [vmem:[#allocation6_spill] sm:$0xff] }
 0x18e   : > { %v4155_v14 = vrot.slane %v4153_v49, 3  ;;  %v4158_v35 = vrot.slane %v4156_v46, 4  ;;  %v4167_v36 = vor.u32 %v4166_v59, %v4163_v15  ;;  %v4336_v41 = vrot.slane %v3739_v56, 3  ;;  %v8437_v32 = vld [vmem:[#allocation8_spill] sm:$0xff]  ;;  %v8439_v46 = vld [vmem:[#allocation7_spill] sm:$0xff]  ;;  %v8440_v56 = vld [vmem:[#allocation9_spill] sm:$0xff] }
 0x18f   : > { %v4343_v0 = vrot.slane %v4341_v7, 3  ;;  %v4346_v51 = vrot.slane %v4344_v60, 4  ;;  %v4351_v21 = vrot.slane %v4349_v17, 3  ;;  %v4354_v57 = vrot.slane %v4352_v2, 4 }
 0x190   : > { %v4159_v9 = vor.u32 %v4158_v35, %v4155_v14  ;;  %v4337_v48 = vrot.slane %v3735_v39, 4  ;;  %v3855_v31 = vrot.slane %v7581_v25, 1  ;;  %v3856_v62 = vrot.slane %v8435_v19, 1  ;;  %v7853_v33 = vpop.f32.mrb[52].mxu1 }
 0x191   : > { %v4347_v16 = vor.u32 %v4346_v51, %v4343_v0  ;;  %v4355_v43 = vor.u32 %v4354_v57, %v4351_v21  ;;  %v7857_v49 = vadd.f32 %v8437_v32, %v8436_v34  ;;  %v7861_v7 = vadd.f32 %v8440_v56, %v8439_v46  ;;  %v7863_v60 = vpop.f32.mrb[52].mxu0  ;;  %v7865_v35 = vpop.f32.mrb[53].mxu1  ;;  %v7869_v51 = vld [vmem:[#allocation2 + $0xe0] sm:$0xff]  ;;  %v7876_v57 = vld [vmem:[#allocation2 + $0xe8] sm:$0xff] }
 0x192   : > { %8442 = vst [vmem:[#allocation8_spill] sm:$0xff] %v7865_v35  ;;  %v4168_v25 = vsel %vm739_vm1, %v4159_v9, %v4167_v36  ;;  %v4338_v17 = vor.u32 %v4337_v48, %v4336_v41  ;;  %v3857_v39 = vsel %vm690_vm2, %v3855_v31, %v3856_v62  ;;  %v4202_v15 = vshrl.u32 %v3856_v62, 16  ;;  %v7871_v0 = vpop.f32.mrb[53].mxu0  ;;  %v7873_v21 = vpop.f32.mrb[54].mxu1  ;;  %v8446_v48 = vld [vmem:[#allocation10_spill] sm:$0xff]  ;;  %v8447_v31 = vld [vmem:[#allocation12_spill] sm:$0xff] }
 0x193   : > { %8438 = vst [vmem:[#allocation3_spill] sm:$0xff] %v7857_v49  ;;  %8441 = vst [vmem:[#allocation6_spill] sm:$0xff] %v7861_v7  ;;  %v4356_v59 = vsel %vm739_vm1, %v4347_v16, %v4355_v43  ;;  %6392 = vmatprep.mubr.bf16.mxu1 %v4168_v25  ;;  %v4194_v34 = vshrl.u32 %v3857_v39, 16  ;;  %v4197_v2 = vshll.u32 %v3857_v39, 16  ;;  %v4205_v14 = vshll.u32 %v3856_v62, 16  ;;  %v7878_v19 = vpop.f32.mrb[54].mxu0 }
 0x194   : > { %8443 = vst [vmem:[#allocation7_spill] sm:$0xff] %v7873_v21  ;;  %8444 = vst [vmem:[#allocation9_spill] sm:$0xff] %v7878_v19  ;;  %v7880_v9 = vpop.f32.mrb[55].mxu1  ;;  %4899 = vmatprep.mubr.bf16.mxu0 %v4356_v59  ;;  %v4339_v41 = vsel %vm739_vm1, %v4335_v20, %v4338_v17  ;;  %v4204_v36 = vrot.slane %v4202_v15, 3  ;;  %v7885_v32 = vadd.f32 %v8447_v31, %v8446_v48  ;;  %v8449_v46 = vld [vmem:[#allocation11_spill] sm:$0xff]  ;;  %v8450_v16 = vld [vmem:[#allocation13_spill] sm:$0xff] }
 0x195   : > { %8445 = vst [vmem:[#allocation54_spill] sm:$0xff] %v7880_v9  ;;  %v7889_v43 = vadd.f32 %v8450_v16, %v8449_v46  ;;  %v7891_v56 = vpop.f32.mrb[55].mxu0  ;;  %4900 = vmatmul.mubr.bf16.gmra.mrb[124].mxu0 %v4339_v41  ;;  %v4196_v62 = vrot.slane %v4194_v34, 3  ;;  %v4199_v25 = vrot.slane %v4197_v2, 4  ;;  %v4207_v39 = vrot.slane %v4205_v14, 4 }
 0x196   : > { %8448 = vst [vmem:[#allocation10_spill] sm:$0xff] %v7885_v32  ;;  %8452 = vst [vmem:[#allocation11_spill] sm:$0xff] %v7891_v56  ;;  %v3743_v49 = vshrl.u32 %v7869_v51, 16  ;;  %v3745_v59 = vshll.u32 %v7869_v51, 16  ;;  %v3750_v20 = vshll.u32 %v7876_v57, 16  ;;  %v3754_v17 = vshrl.u32 %v7876_v57, 16 }
 0x197   : > { %8451 = vst [vmem:[#allocation12_spill] sm:$0xff] %v7889_v43  ;;  %v3858_v15 = vrot.slane %v7626_v37, 1  ;;  %v4200_v48 = vor.u32 %v4199_v25, %v4196_v62  ;;  %v4208_v31 = vor.u32 %v4207_v39, %v4204_v36  ;;  %v3859_v46 = vrot.slane %v7628_v44, 1 }
 0x198   : > { %v4374_v16 = vrot.slane %v3743_v49, 3  ;;  %v3747_v32 = vrot.slane %v3745_v59, 1  ;;  %v3752_v41 = vrot.slane %v3750_v20, 1  ;;  %v4375_v34 = vrot.slane %v3745_v59, 4  ;;  %v7899_v14 = vpop.f32.mrb[56].mxu1 }
 0x199   : > { %v4377_v2 = vrot.slane %v3754_v17, 3  ;;  %8453 = vst [vmem:[#allocation13_spill] sm:$0xff] %v7899_v14  ;;  %v4209_v43 = vsel %vm739_vm1, %v4200_v48, %v4208_v31  ;;  %v3860_v7 = vsel %vm690_vm2, %v3858_v15, %v3859_v46  ;;  %v4243_v9 = vshrl.u32 %v3859_v46, 16  ;;  %v7903_v56 = vpop.f32.mrb[56].mxu0  ;;  %v7905_v37 = vpop.f32.mrb[57].mxu1 }
 0x19a   : > { %v4246_v21 = vshll.u32 %v3859_v46, 16  ;;  %8454 = vst [vmem:[#allocation55_spill] sm:$0xff] %v7903_v56  ;;  %8455 = vst [vmem:[#allocation56_spill] sm:$0xff] %v7905_v37  ;;  %6393 = vmatmul.mubr.bf16.gmra.mrb[92].mxu1 %v4209_v43  ;;  %v3748_v36 = vor.u32 %v3747_v32, %v3743_v49  ;;  %v3756_v44 = vor.u32 %v3754_v17, %v3752_v41  ;;  %v4235_v62 = vshrl.u32 %v3860_v7, 16  ;;  %v7907_v39 = vpop.f32.mrb[57].mxu0  ;;  %v7909_v59 = vpop.f32.mrb[58].mxu1 }
 0x19b   : > { %v4238_v25 = vshll.u32 %v3860_v7, 16  ;;  %8456 = vst [vmem:[#allocation57_spill] sm:$0xff] %v7907_v39  ;;  %8457 = vst [vmem:[#allocation58_spill] sm:$0xff] %v7909_v59  ;;  %v4245_v14 = vrot.slane %v4243_v9, 3  ;;  %v4376_v48 = vor.u32 %v4375_v34, %v4374_v16  ;;  %v4378_v31 = vrot.slane %v3750_v20, 4  ;;  %v7911_v15 = vpop.f32.mrb[58].mxu0 }
 0x19c   : > { %v4248_v19 = vrot.slane %v4246_v21, 4  ;;  %8458 = vst [vmem:[#allocation59_spill] sm:$0xff] %v7911_v15  ;;  %v7913_v46 = vpop.f32.mrb[59].mxu1  ;;  %v3753_v56 = vsel %vm417_vm0, %v3748_v36, %v3752_v41  ;;  %v4390_v37 = vshrl.u32 %v3756_v44, 16  ;;  %v4393_v43 = vshll.u32 %v3756_v44, 16  ;;  %v7916_v32 = vpop.f32.mrb[59].mxu0 }
 0x19d   : > { %8459 = vst [vmem:[#allocation60_spill] sm:$0xff] %v7913_v46  ;;  %v4237_v49 = vrot.slane %v4235_v62, 3  ;;  %v4382_v7 = vshrl.u32 %v3753_v56, 16  ;;  %v4385_v17 = vshll.u32 %v3753_v56, 16  ;;  %v4240_v39 = vrot.slane %v4238_v25, 4 }
 0x19e   : > { %v4249_v35 = vor.u32 %v4248_v19, %v4245_v14  ;;  %v4392_v59 = vrot.slane %v4390_v37, 3  ;;  %v4395_v9 = vrot.slane %v4393_v43, 4  ;;  %v4379_v21 = vor.u32 %v4378_v31, %v4377_v2  ;;  %v7931_v37 = vld [vmem:[#allocation2 + $0xf0] sm:$0xff] }
 0x19f   : > { %v3861_v20 = vrot.slane %v7690_v8, 1  ;;  %v4384_v16 = vrot.slane %v4382_v7, 3  ;;  %v4387_v34 = vrot.slane %v4385_v17, 4  ;;  %v4241_v15 = vor.u32 %v4240_v39, %v4237_v49  ;;  %v8463_v39 = vld [vmem:[#allocation15_spill] sm:$0xff] }
 0x1a0   : > { %v3862_v46 = vrot.slane %v7692_v22, 1  ;;  %v4396_v41 = vor.u32 %v4395_v9, %v4392_v59  ;;  %v4380_v36 = vsel %vm739_vm1, %v4376_v48, %v4379_v21  ;;  %v7923_v44 = vadd.f32 %v7638_v58, %v7630_v5  ;;  %v7937_v58 = vld [vmem:[#allocation2 + $0xf8] sm:$0xff] }
 0x1a1   : > { %v7927_v19 = vadd.f32 %v7632_v10, %v7624_v26  ;;  %v4388_v56 = vor.u32 %v4387_v34, %v4384_v16  ;;  %v4250_v2 = vsel %vm739_vm1, %v4241_v15, %v4249_v35  ;;  %v7935_v5 = vadd.f32 %v7655_v23, %v7648_v3  ;;  %v8464_v35 = vld [vmem:[#allocation17_spill] sm:$0xff] }
 0x1a2   : > { %8460 = vst [vmem:[#allocation61_spill] sm:$0xff] %v7923_v44  ;;  %v3863_v8 = vsel %vm690_vm2, %v3861_v20, %v3862_v46  ;;  %v4284_v14 = vshrl.u32 %v3862_v46, 16  ;;  %6396 = vmatprep.mubr.bf16.mxu1 %v4250_v2  ;;  %v4287_v25 = vshll.u32 %v3862_v46, 16  ;;  %v7942_v59 = vadd.f32 %v8464_v35, %v8463_v39 }
 0x1a3   : > { %8461 = vst [vmem:[#allocation62_spill] sm:$0xff] %v7927_v19  ;;  %v4276_v22 = vshrl.u32 %v3863_v8, 16  ;;  %v4279_v62 = vshll.u32 %v3863_v8, 16  ;;  %8462 = vst [vmem:[#allocation63_spill] sm:$0xff] %v7935_v5  ;;  %v4397_v26 = vsel %vm739_vm1, %v4388_v56, %v4396_v41  ;;  %v3758_v48 = vshrl.u32 %v7931_v37, 16  ;;  %v7945_v31 = vpop.f32.mrb[60].mxu0 }
 0x1a4   : > { %v4286_v10 = vrot.slane %v4284_v14, 3  ;;  %8465 = vst [vmem:[#allocation15_spill] sm:$0xff] %v7942_v59  ;;  %4907 = vmatprep.mubr.bf16.mxu0 %v4397_v26  ;;  %v4289_v43 = vrot.slane %v4287_v25, 4  ;;  %v3760_v3 = vshll.u32 %v7931_v37, 16  ;;  %v7948_v23 = vpop.f32.mrb[61].mxu0  ;;  %v3765_v49 = vshll.u32 %v7937_v58, 16 }
 0x1a5   : > { %v4278_v15 = vrot.slane %v4276_v22, 3  ;;  %v4281_v46 = vrot.slane %v4279_v62, 4  ;;  %4908 = vmatmul.mubr.bf16.gmra.mrb[128].mxu0 %v4380_v36  ;;  %v3769_v7 = vshrl.u32 %v7937_v58, 16  ;;  %v3864_v17 = vrot.slane %v7728_v1, 1  ;;  %v7954_v21 = vpop.f32.mrb[60].mxu1  ;;  %v7956_v20 = vpop.f32.mrb[62].mxu0 }
 0x1a6   : > { %v3865_v9 = vrot.slane %v7751_v55, 1  ;;  %8466 = vst [vmem:[#allocation17_spill] sm:$0xff] %v7956_v20  ;;  %v4290_v34 = vor.u32 %v4289_v43, %v4286_v10  ;;  %v3762_v41 = vrot.slane %v3760_v3, 1  ;;  %v4415_v56 = vrot.slane %v3758_v48, 3  ;;  %v7958_v2 = vpop.f32.mrb[61].mxu1  ;;  %v7960_v8 = vpop.f32.mrb[63].mxu0 }
 0x1a7   : > { %v4282_v16 = vor.u32 %v4281_v46, %v4278_v15  ;;  %8467 = vst [vmem:[#allocation64_spill] sm:$0xff] %v7960_v8  ;;  %v3767_v36 = vrot.slane %v3765_v49, 1  ;;  %v7963_v1 = vpop.f32.mrb[62].mxu1  ;;  %v4416_v43 = vrot.slane %v3760_v3, 4  ;;  %v4418_v59 = vrot.slane %v3769_v7, 3 }
 0x1a8   : > { %v3866_v14 = vsel %vm690_vm2, %v3864_v17, %v3865_v9  ;;  %v4325_v22 = vshrl.u32 %v3865_v9, 16  ;;  %v4328_v62 = vshll.u32 %v3865_v9, 16  ;;  %8468 = vst [vmem:[#allocation65_spill] sm:$0xff] %v7963_v1  ;;  %v3763_v25 = vor.u32 %v3762_v41, %v3758_v48  ;;  %v7966_v35 = vpop.f32.mrb[63].mxu1 }
 0x1a9   : > { %v4291_v55 = vsel %vm739_vm1, %v4282_v16, %v4290_v34  ;;  %v4317_v26 = vshrl.u32 %v3866_v14, 16  ;;  %v4320_v39 = vshll.u32 %v3866_v14, 16  ;;  %8469 = vst [vmem:[#allocation66_spill] sm:$0xff] %v7966_v35  ;;  %v3771_v10 = vor.u32 %v3769_v7, %v3767_v36 }
 0x1aa   : > { %6397 = vmatmul.mubr.bf16.gmra.mrb[0].mxu1 %v4291_v55  ;;  %v4327_v15 = vrot.slane %v4325_v22, 3  ;;  %v4330_v46 = vrot.slane %v4328_v62, 4  ;;  %v3768_v5 = vsel %vm417_vm0, %v3763_v25, %v3767_v36  ;;  %v4417_v34 = vor.u32 %v4416_v43, %v4415_v56  ;;  %v8472_v56 = vld [vmem:[#allocation18_spill] sm:$0xff] }
 0x1ab   : > { %v4319_v44 = vrot.slane %v4317_v26, 3  ;;  %v4322_v17 = vrot.slane %v4320_v39, 4  ;;  %v4423_v9 = vshrl.u32 %v3768_v5, 16  ;;  %v4426_v19 = vshll.u32 %v3768_v5, 16  ;;  %v8470_v5 = vld [vmem:[#allocation20_spill] sm:$0xff] }
 0x1ac   : > { %v4431_v1 = vshrl.u32 %v3771_v10, 16  ;;  %v4434_v8 = vshll.u32 %v3771_v10, 16  ;;  %v4331_v48 = vor.u32 %v4330_v46, %v4327_v15  ;;  %v4419_v41 = vrot.slane %v3765_v49, 4  ;;  %v8473_v49 = vld [vmem:[#allocation19_spill] sm:$0xff]  ;;  %v8476_v46 = vld [vmem:[#allocation21_spill] sm:$0xff] }
 0x1ad   : > { %v4323_v16 = vor.u32 %v4322_v17, %v4319_v44  ;;  %v4425_v14 = vrot.slane %v4423_v9, 3  ;;  %v4428_v35 = vrot.slane %v4426_v19, 4  ;;  %v3867_v36 = vrot.slane %v7806_v4, 1  ;;  %v7982_v4 = vld [vmem:[#allocation2 + $0x100] sm:$0xff] }
 0x1ae   : > { %v4433_v55 = vrot.slane %v4431_v1, 3  ;;  %v4436_v20 = vrot.slane %v4434_v8, 4  ;;  %v4420_v3 = vor.u32 %v4419_v41, %v4418_v59  ;;  %v3868_v62 = vrot.slane %v7814_v53, 1  ;;  %v7984_v53 = vld [vmem:[#allocation2 + $0x108] sm:$0xff] }
 0x1af   : > { %v4332_v22 = vsel %vm739_vm1, %v4323_v16, %v4331_v48  ;;  %v4429_v7 = vor.u32 %v4428_v35, %v4425_v14  ;;  %v7974_v44 = vadd.f32 %v8470_v5, %v7664_v38  ;;  %v7978_v26 = vadd.f32 %v8473_v49, %v8472_v56 }
 0x1b0   : > { %v4437_v25 = vor.u32 %v4436_v20, %v4433_v55  ;;  %6400 = vmatprep.mubr.bf16.mxu1 %v4332_v22  ;;  %v4421_v19 = vsel %vm739_vm1, %v4417_v34, %v4420_v3  ;;  %v3869_v8 = vsel %vm690_vm2, %v3867_v36, %v3868_v62  ;;  %v4366_v59 = vshrl.u32 %v3868_v62, 16 }
 0x1b1   : > { %8471 = vst [vmem:[#allocation20_spill] sm:$0xff] %v7974_v44  ;;  %8474 = vst [vmem:[#allocation18_spill] sm:$0xff] %v7978_v26  ;;  %v4369_v1 = vshll.u32 %v3868_v62, 16  ;;  %v4358_v39 = vshrl.u32 %v3869_v8, 16  ;;  %v4361_v35 = vshll.u32 %v3869_v8, 16  ;;  %v7989_v38 = vadd.f32 %v7678_v54, %v7673_v47 }
 0x1b2   : > { %v4438_v20 = vsel %vm739_vm1, %v4429_v7, %v4437_v25  ;;  %v4368_v10 = vrot.slane %v4366_v59, 3  ;;  %v7993_v43 = vadd.f32 %v7675_v27, %v8476_v46  ;;  %v3773_v17 = vshrl.u32 %v7982_v4, 16  ;;  %v7996_v9 = vpop.f32.mrb[64].mxu1 }
 0x1b3   : > { %8475 = vst [vmem:[#allocation19_spill] sm:$0xff] %v7989_v38  ;;  %4915 = vmatprep.mubr.bf16.mxu0 %v4438_v20  ;;  %v4371_v15 = vrot.slane %v4369_v1, 4  ;;  %v4360_v16 = vrot.slane %v4358_v39, 3  ;;  %v4363_v48 = vrot.slane %v4361_v35, 4  ;;  %v3775_v34 = vshll.u32 %v7982_v4, 16  ;;  %v8000_v47 = vpop.f32.mrb[64].mxu0 }
 0x1b4   : > { %8477 = vst [vmem:[#allocation21_spill] sm:$0xff] %v7993_v43  ;;  %4916 = vmatmul.mubr.bf16.gmra.mrb[132].mxu0 %v4421_v19  ;;  %v3780_v41 = vshll.u32 %v7984_v53, 16  ;;  %v8002_v54 = vpop.f32.mrb[65].mxu1  ;;  %v3784_v55 = vshrl.u32 %v7984_v53, 16  ;;  %v3870_v27 = vrot.slane %v7869_v51, 1  ;;  %v3871_v22 = vrot.slane %v7876_v57, 1 }
 0x1b5   : > { %v4372_v14 = vor.u32 %v4371_v15, %v4368_v10  ;;  %v8007_v3 = vpop.f32.mrb[65].mxu0  ;;  %v8009_v36 = vpop.f32.mrb[66].mxu1  ;;  %v4364_v62 = vor.u32 %v4363_v48, %v4360_v16  ;;  %v3777_v7 = vrot.slane %v3775_v34, 1  ;;  %v4456_v5 = vrot.slane %v3773_v17, 3 }
 0x1b6   : > { %8478 = vst [vmem:[#allocation67_spill] sm:$0xff] %v8009_v36  ;;  %v3782_v25 = vrot.slane %v3780_v41, 1  ;;  %v8011_v56 = vpop.f32.mrb[66].mxu0  ;;  %v8013_v49 = vpop.f32.mrb[67].mxu1  ;;  %v3872_v19 = vsel %vm690_vm2, %v3870_v27, %v3871_v22  ;;  %v4407_v8 = vshrl.u32 %v3871_v22, 16  ;;  %v4410_v59 = vshll.u32 %v3871_v22, 16 }
 0x1b7   : > { %8479 = vst [vmem:[#allocation68_spill] sm:$0xff] %v8013_v49  ;;  %v4457_v1 = vrot.slane %v3775_v34, 4  ;;  %v8016_v51 = vpop.f32.mrb[67].mxu0  ;;  %v4373_v57 = vsel %vm739_vm1, %v4364_v62, %v4372_v14  ;;  %v3778_v20 = vor.u32 %v3777_v7, %v3773_v17  ;;  %v4399_v35 = vshrl.u32 %v3872_v19, 16 }
 0x1b8   : > { %v3786_v39 = vor.u32 %v3784_v55, %v3782_v25  ;;  %6401 = vmatmul.mubr.bf16.gmra.mrb[4].mxu1 %v4373_v57  ;;  %v4402_v10 = vshll.u32 %v3872_v19, 16  ;;  %v4409_v15 = vrot.slane %v4407_v8, 3  ;;  %v4412_v46 = vrot.slane %v4410_v59, 4  ;;  %v8480_v59 = vld [vmem:[#allocation25_spill] sm:$0xff] }
 0x1b9   : > { %v4458_v16 = vor.u32 %v4457_v1, %v4456_v5  ;;  %v3783_v48 = vsel %vm417_vm0, %v3778_v20, %v3782_v25  ;;  %v4401_v27 = vrot.slane %v4399_v35, 3  ;;  %v4459_v14 = vrot.slane %v3784_v55, 3  ;;  %v8481_v1 = vld [vmem:[#allocation27_spill] sm:$0xff] }
 0x1ba   : > { %v4472_v38 = vshrl.u32 %v3786_v39, 16  ;;  %v4475_v44 = vshll.u32 %v3786_v39, 16  ;;  %v4464_v43 = vshrl.u32 %v3783_v48, 16  ;;  %v4467_v22 = vshll.u32 %v3783_v48, 16 }
 0x1bb   : > { %v4404_v34 = vrot.slane %v4402_v10, 4  ;;  %v4413_v26 = vor.u32 %v4412_v46, %v4409_v15  ;;  %v4460_v17 = vrot.slane %v3780_v41, 4  ;;  %v3873_v19 = vrot.slane %v7931_v37, 1  ;;  %v8486_v41 = vld [vmem:[#allocation31_spill] sm:$0xff] }
 0x1bc   : > { %v4474_v49 = vrot.slane %v4472_v38, 3  ;;  %v4477_v36 = vrot.slane %v4475_v44, 4  ;;  %v4466_v62 = vrot.slane %v4464_v43, 3  ;;  %v4469_v7 = vrot.slane %v4467_v22, 4  ;;  %v8482_v38 = vld [vmem:[#allocation24_spill] sm:$0xff]  ;;  %v8483_v44 = vld [vmem:[#allocation26_spill] sm:$0xff] }
 0x1bd   : > { %v4405_v57 = vor.u32 %v4404_v34, %v4401_v27  ;;  %v4461_v5 = vor.u32 %v4460_v17, %v4459_v14  ;;  %v3874_v25 = vrot.slane %v7937_v58, 1  ;;  %v8024_v20 = vadd.f32 %v8481_v1, %v8480_v59  ;;  %v8485_v43 = vld [vmem:[#allocation29_spill] sm:$0xff]  ;;  %v8488_v27 = vld [vmem:[#allocation30_spill] sm:$0xff] }
 0x1be   : > { %v4478_v8 = vor.u32 %v4477_v36, %v4474_v49  ;;  %v4470_v39 = vor.u32 %v4469_v7, %v4466_v62  ;;  %v8029_v55 = vadd.f32 %v8483_v44, %v8482_v38  ;;  %v8033_v10 = vadd.f32 %v8486_v41, %v8485_v43  ;;  %v6708_v62 = vld [vmem:[#allocation2] sm:$0xff] }
 0x1bf   : > { %v4414_v35 = vsel %vm739_vm1, %v4405_v57, %v4413_v26  ;;  %v4462_v37 = vsel %vm739_vm1, %v4458_v16, %v4461_v5  ;;  %v3875_v58 = vsel %vm690_vm2, %v3873_v19, %v3874_v25  ;;  %v4448_v36 = vshrl.u32 %v3874_v25, 16  ;;  %v8487_v26 = vld [vmem:[#allocation28_spill] sm:$0xff] }
 0x1c0   : > { %8484 = vst [vmem:[#allocation25_spill] sm:$0xff] %v8029_v55  ;;  %6404 = vmatprep.mubr.bf16.mxu1 %v4414_v35  ;;  %v4451_v49 = vshll.u32 %v3874_v25, 16  ;;  %v4479_v15 = vsel %vm739_vm1, %v4470_v39, %v4478_v8  ;;  %v4440_v46 = vshrl.u32 %v3875_v58, 16  ;;  %v4443_v48 = vshll.u32 %v3875_v58, 16  ;;  %v8042_v34 = vpop.f32.mrb[68].mxu1 }
 0x1c1   : > { %v8040_v22 = vadd.f32 %v8488_v27, %v8487_v26  ;;  %4923 = vmatprep.mubr.bf16.mxu0 %v4479_v15  ;;  %v4450_v14 = vrot.slane %v4448_v36, 3  ;;  %v3788_v7 = vshrl.u32 %v6708_v62, 16  ;;  %v3790_v16 = vshll.u32 %v6708_v62, 16  ;;  %v8044_v57 = vpop.f32.mrb[68].mxu0  ;;  %v8046_v19 = vpop.f32.mrb[69].mxu1 }
 0x1c2   : > { %v4453_v17 = vrot.slane %v4451_v49, 4  ;;  %8490 = vst [vmem:[#allocation24_spill] sm:$0xff] %v8046_v19  ;;  %4924 = vmatmul.mubr.bf16.gmra.mrb[136].mxu0 %v4462_v37  ;;  %v4442_v8 = vrot.slane %v4440_v46, 3  ;;  %v4445_v5 = vrot.slane %v4443_v48, 4  ;;  %v3876_v25 = vrot.slane %v7982_v4, 1  ;;  %v8050_v1 = vpop.f32.mrb[69].mxu0 }
 0x1c3   : > { %8489 = vst [vmem:[#allocation27_spill] sm:$0xff] %v8040_v22  ;;  %v3877_v59 = vrot.slane %v7984_v53, 1  ;;  %v8052_v39 = vpop.f32.mrb[70].mxu1  ;;  %v3792_v38 = vrot.slane %v3790_v16, 1  ;;  %v4497_v44 = vrot.slane %v3788_v7, 3  ;;  %v4498_v43 = vrot.slane %v3790_v16, 4 }
 0x1c4   : > { %8491 = vst [vmem:[#allocation26_spill] sm:$0xff] %v8052_v39  ;;  %v4454_v35 = vor.u32 %v4453_v17, %v4450_v14  ;;  %v8054_v41 = vpop.f32.mrb[70].mxu0  ;;  %v8056_v58 = vpop.f32.mrb[71].mxu1  ;;  %v4446_v36 = vor.u32 %v4445_v5, %v4442_v8 }
 0x1c5   : > { %8492 = vst [vmem:[#allocation29_spill] sm:$0xff] %v8054_v41  ;;  %8493 = vst [vmem:[#allocation31_spill] sm:$0xff] %v8056_v58  ;;  %v3878_v37 = vsel %vm690_vm2, %v3876_v25, %v3877_v59  ;;  %v4489_v49 = vshrl.u32 %v3877_v59, 16  ;;  %v4492_v15 = vshll.u32 %v3877_v59, 16  ;;  %v8059_v4 = vpop.f32.mrb[71].mxu0  ;;  %v3793_v53 = vor.u32 %v3792_v38, %v3788_v7 }
 0x1c6   : > { %8494 = vst [vmem:[#allocation28_spill] sm:$0xff] %v8059_v4  ;;  %v4481_v46 = vshrl.u32 %v3878_v37, 16  ;;  %v4484_v48 = vshll.u32 %v3878_v37, 16  ;;  %v4455_v26 = vsel %vm739_vm1, %v4446_v36, %v4454_v35  ;;  %v4499_v17 = vor.u32 %v4498_v43, %v4497_v44 }
 0x1c7   : > { %v4491_v27 = vrot.slane %v4489_v49, 3  ;;  %v4494_v14 = vrot.slane %v4492_v15, 4  ;;  %6405 = vmatmul.mubr.bf16.gmra.mrb[8].mxu1 %v4455_v26  ;;  %v3798_v16 = vsel %vm417_vm0, %v3793_v53, %v3792_v38  ;;  %v4513_v22 = vshrl.u32 %v3793_v53, 16 }
 0x1c8   : > { %v4516_v55 = vshll.u32 %v3793_v53, 16  ;;  %v4483_v8 = vrot.slane %v4481_v46, 3  ;;  %v4505_v5 = vshrl.u32 %v3798_v16, 16  ;;  %v4508_v25 = vshll.u32 %v3798_v16, 16  ;;  %v8498_v46 = vld [vmem:[#allocation39_spill] sm:$0xff] }
 0x1c9   : > { %v4486_v58 = vrot.slane %v4484_v48, 4  ;;  %v4495_v59 = vor.u32 %v4494_v14, %v4491_v27  ;;  %v4515_v39 = vrot.slane %v4513_v22, 3  ;;  %v3879_v7 = vrot.slane %v6708_v62, 1 }
 0x1ca   : > { %v4518_v4 = vrot.slane %v4516_v55, 4  ;;  %v4507_v41 = vrot.slane %v4505_v5, 3  ;;  %v4510_v37 = vrot.slane %v4508_v25, 4  ;;  %v5932_v35 = vadd.f32 %v7730_v45, %v7724_v28  ;;  %v8496_v28 = vld [vmem:[#allocation33_spill] sm:$0xff]  ;;  %v8504_v5 = vld [vmem:[#allocation42_spill] sm:$0xff] }
 0x1cb   : > { %v4487_v19 = vor.u32 %v4486_v58, %v4483_v8  ;;  %v4530_v43 = vshrl.u32 %v3879_v7, 16  ;;  %v4533_v36 = vshll.u32 %v3879_v7, 16  ;;  %v8068_v22 = vadd.f32 %v7726_v24, %v7722_v50  ;;  %v8495_v58 = vld [vmem:[#allocation32_spill] sm:$0xff]  ;;  %v8500_v24 = vld [vmem:[#allocation38_spill] sm:$0xff] }
 0x1cc   : > { %v4519_v44 = vor.u32 %v4518_v4, %v4515_v39  ;;  %v4511_v38 = vor.u32 %v4510_v37, %v4507_v41  ;;  %v5935_v55 = vadd.f32 %v7748_v11, %v7735_v40  ;;  %v8075_v45 = vadd.f32 %v8496_v28, %v8495_v58  ;;  %v8497_v4 = vld [vmem:[#allocation37_spill] sm:$0xff]  ;;  %v8499_v50 = vld [vmem:[#allocation36_spill] sm:$0xff]  ;;  %v8502_v11 = vld [vmem:[#allocation43_spill] sm:$0xff] }
 0x1cd   : > { %v4496_v49 = vsel %vm739_vm1, %v4487_v19, %v4495_v59  ;;  %v4532_v15 = vrot.slane %v4530_v43, 3  ;;  %v4535_v53 = vrot.slane %v4533_v36, 4  ;;  %v5938_v48 = vadd.f32 %v8498_v46, %v8497_v4  ;;  %v8501_v40 = vld [vmem:[#allocation41_spill] sm:$0xff]  ;;  %v8503_v8 = vld [vmem:[#allocation40_spill] sm:$0xff]  ;;  %v8513_v4 = vld [vmem:[#allocation11_spill] sm:$0xff] }
 0x1ce   : > { %6408 = vmatprep.mubr.bf16.mxu1 %v4496_v49  ;;  %v4520_v62 = vsel %vm739_vm1, %v4511_v38, %v4519_v44  ;;  %v8077_v39 = vpop.f32.mrb[72].mxu0  ;;  %v8079_v41 = vpop.f32.mrb[72].mxu1  ;;  %v8085_v26 = vadd.f32 %v8500_v24, %v8499_v50  ;;  %v5941_v27 = vadd.f32 %v8502_v11, %v8501_v40  ;;  %v8095_v25 = vadd.f32 %v8504_v5, %v8503_v8  ;;  %v8505_v38 = vld [vmem:[#allocation48_spill] sm:$0xff]  ;;  %v8512_v28 = vld [vmem:[#allocation9_spill] sm:$0xff]  ;;  %v8515_v50 = vld [vmem:[#allocation54_spill] sm:$0xff] }
 0x1cf   : > { %4931 = vmatprep.mubr.bf16.mxu0 %v4520_v62  ;;  %v4536_v19 = vor.u32 %v4535_v53, %v4532_v15  ;;  %v8089_v14 = vpop.f32.mrb[73].mxu0  ;;  %v8091_v16 = vpop.f32.mrb[73].mxu1  ;;  %v5944_v59 = vadd.f32 %v7793_v30, %v7784_v13  ;;  %v8101_v7 = vadd.f32 %v7786_v6, %v7781_v42  ;;  %v5947_v43 = vadd.f32 %v7816_v18, %v7808_v63  ;;  %v8506_v13 = vld [vmem:[#allocation49_spill] sm:$0xff]  ;;  %v8507_v15 = vld [vmem:[#allocation51_spill] sm:$0xff]  ;;  %v8509_v63 = vld [vmem:[#allocation50_spill] sm:$0xff] }
 0x1d0   : > { %4932 = vmatmul.mubr.bf16.gmra.mrb[140].mxu0 %v4499_v17  ;;  %v8103_v37 = vpop.f32.mrb[74].mxu0  ;;  %v8105_v44 = vpop.f32.mrb[74].mxu1  ;;  %v8111_v17 = vadd.f32 %v7810_v12, %v7795_v29  ;;  %v5950_v36 = vadd.f32 %v7838_v52, %v7833_v61  ;;  %v6062_v30 = vadd.f32 %v8506_v13, %v8505_v38  ;;  %v8508_v53 = vld [vmem:[#allocation53_spill] sm:$0xff]  ;;  %v8510_v18 = vld [vmem:[#allocation52_spill] sm:$0xff]  ;;  %v5956_v29 = vadd.f32 %v7871_v0, %v7863_v60  ;;  %v8516_v11 = vld [vmem:[#allocation55_spill] sm:$0xff] }
 0x1d1   : > { %v8117_v49 = vpop.f32.mrb[75].mxu0  ;;  %v8119_v42 = vpop.f32.mrb[75].mxu1  ;;  %v4537_v6 = vsel %vm739_vm1, %v4536_v19, %v4536_v19  ;;  %v5953_v62 = vadd.f32 %v8508_v53, %v8507_v15  ;;  %v6065_v58 = vadd.f32 %v8510_v18, %v8509_v63  ;;  %v8511_v61 = vld [vmem:[#allocation8_spill] sm:$0xff]  ;;  %v5959_v46 = vadd.f32 %v8513_v4, %v8512_v28  ;;  %v8514_v19 = vld [vmem:[#allocation7_spill] sm:$0xff]  ;;  %v8517_v8 = vld [vmem:[#allocation57_spill] sm:$0xff] }
 0x1d2   : > { %6409 = vmatmul.mubr.bf16.gmra.mrb[12].mxu1 %v4537_v6  ;;  %v8129_v12 = vadd.f32 %v6062_v30, %v8024_v20  ;;  %v6068_v52 = vadd.f32 %v8511_v61, %v7853_v33  ;;  %v6071_v24 = vadd.f32 %v8515_v50, %v8514_v19  ;;  %v5962_v5 = vadd.f32 %v8517_v8, %v8516_v11  ;;  %v8518_v60 = vld [vmem:[#allocation13_spill] sm:$0xff]  ;;  %v8519_v0 = vld [vmem:[#allocation56_spill] sm:$0xff]  ;;  %v8520_v20 = vld [vmem:[#allocation59_spill] sm:$0xff] }
 0x1d3   : > { %v8138_v40 = vadd.f32 %v6065_v58, %v8033_v10  ;;  %v6074_v38 = vadd.f32 %v8519_v0, %v8518_v60  ;;  %v5965_v13 = vadd.f32 %v7916_v32, %v8520_v20  ;;  %v8521_v6 = vld [vmem:[#allocation58_spill] sm:$0xff]  ;;  %v8522_v15 = vld [vmem:[#allocation60_spill] sm:$0xff]  ;;  %v5968_v10 = vadd.f32 %v7948_v23, %v7945_v31  ;;  %v8523_v58 = vld [vmem:[#allocation17_spill] sm:$0xff] }
 0x1d4   : > { %v8146_v30 = vadd.f32 %v6068_v52, %v5932_v35  ;;  %v8148_v33 = vadd.f32 %v6071_v24, %v5935_v55  ;;  %v6077_v53 = vadd.f32 %v8522_v15, %v8521_v6  ;;  %v6080_v18 = vadd.f32 %v7958_v2, %v7954_v21  ;;  %v8524_v61 = vld [vmem:[#allocation64_spill] sm:$0xff]  ;;  %v8525_v4 = vld [vmem:[#allocation65_spill] sm:$0xff]  ;;  %v8526_v32 = vld [vmem:[#allocation66_spill] sm:$0xff] }
 0x1d5   : > { %v8154_v63 = vadd.f32 %v6074_v38, %v5938_v48  ;;  %v5971_v28 = vadd.f32 %v8524_v61, %v8523_v58  ;;  %v6083_v35 = vadd.f32 %v8526_v32, %v8525_v4  ;;  %v8527_v55 = vld [vmem:[#allocation14_spill] sm:$0xff]  ;;  %v8528_v50 = vld [vmem:[#allocation4_spill] sm:$0xff]  ;;  %v6086_v31 = vadd.f32 %v8002_v54, %v7996_v9  ;;  %v8530_v11 = vld [vmem:[#allocation5_spill] sm:$0xff] }
 0x1d6   : > { %v8162_v52 = vadd.f32 %v6077_v53, %v5941_v27  ;;  %v2945_v19 = vadd.f32 %v8000_v47, %v8527_v55  ;;  %v2937_v24 = vadd.f32 %v8528_v50, %v8007_v3  ;;  %v8170_v23 = vadd.f32 %v6080_v18, %v5944_v59  ;;  %v8529_v2 = vld [vmem:[#allocation16_spill] sm:$0xff]  ;;  %v8531_v8 = vld [vmem:[#allocation6_spill] sm:$0xff]  ;;  %v8532_v47 = vld [vmem:[#allocation45_spill] sm:$0xff] }
 0x1d7   : > { %v8172_v21 = vadd.f32 %v6083_v35, %v5947_v43  ;;  %v2948_v48 = vadd.f32 %v8011_v56, %v8529_v2  ;;  %v2940_v27 = vadd.f32 %v8530_v11, %v8016_v51  ;;  %v8182_v38 = vadd.f32 %v6086_v31, %v5950_v36  ;;  %v8533_v3 = vld [vmem:[#allocation67_spill] sm:$0xff]  ;;  %v8534_v20 = vld [vmem:[#allocation68_spill] sm:$0xff]  ;;  %v8537_v15 = vld [vmem:[#allocation34_spill] sm:$0xff] }
 0x1d8   : > { %v8179_v60 = vadd.f32 %v8531_v8, %v2945_v19  ;;  %v3242_v0 = vadd.f32 %v8532_v47, %v2937_v24  ;;  %v6089_v9 = vadd.f32 %v8534_v20, %v8533_v3  ;;  %v8535_v54 = vld [vmem:[#allocation12_spill] sm:$0xff]  ;;  %v8536_v43 = vld [vmem:[#allocation47_spill] sm:$0xff]  ;;  %v2961_v56 = vadd.f32 %v8044_v57, %v8537_v15  ;;  %v8538_v53 = vld [vmem:[#allocation22_spill] sm:$0xff] }
 0x1d9   : > { %v3253_v59 = vadd.f32 %v8535_v54, %v2948_v48  ;;  %v3245_v6 = vadd.f32 %v8536_v43, %v2940_v27  ;;  %v2953_v51 = vadd.f32 %v8538_v53, %v8050_v1  ;;  %v8539_v58 = vld [vmem:[#allocation24_spill] sm:$0xff]  ;;  %v8540_v36 = vld [vmem:[#allocation35_spill] sm:$0xff]  ;;  %v8541_v4 = vld [vmem:[#allocation29_spill] sm:$0xff] }
 0x1da   : > { %v8192_v18 = vadd.f32 %v6089_v9, %v5953_v62  ;;  %v6092_v61 = vadd.f32 %v8539_v58, %v8042_v34  ;;  %v2964_v32 = vadd.f32 %v8541_v4, %v8540_v36  ;;  %v8542_v35 = vld [vmem:[#allocation28_spill] sm:$0xff]  ;;  %v8543_v55 = vld [vmem:[#allocation23_spill] sm:$0xff]  ;;  %v8544_v24 = vld [vmem:[#allocation18_spill] sm:$0xff] }
 0x1db   : > { %v2956_v19 = vadd.f32 %v8543_v55, %v8542_v35  ;;  %v6298_v50 = vpop.f32.mrb[76].mxu0  ;;  %v8201_v31 = vadd.f32 %v8544_v24, %v2961_v56  ;;  %v8545_v2 = vld [vmem:[#allocation62_spill] sm:$0xff]  ;;  %v8547_v11 = vld [vmem:[#allocation31_spill] sm:$0xff]  ;;  %v6102_v8 = vpop.f32.mrb[76].mxu1  ;;  %v8549_v3 = vld [vmem:[#allocation21_spill] sm:$0xff] }
 0x1dc   : > { %v3258_v57 = vadd.f32 %v8545_v2, %v2953_v51  ;;  %v8546_v48 = vld [vmem:[#allocation26_spill] sm:$0xff]  ;;  %v8548_v62 = vld [vmem:[#allocation3_spill] sm:$0xff]  ;;  %v2984_v34 = vpop.f32.mrb[77].mxu0  ;;  %v8208_v47 = vadd.f32 %v6092_v61, %v5956_v29  ;;  %v3269_v20 = vadd.f32 %v8549_v3, %v2964_v32  ;;  %v8551_v43 = vld [vmem:[#allocation44_spill] sm:$0xff]  ;;  %v6103_v56 = vpop.f32.mrb[77].mxu1 }
 0x1dd   : > { %v6095_v1 = vadd.f32 %v8547_v11, %v8546_v48  ;;  %v2977_v27 = vadd.f32 %v8077_v39, %v8548_v62  ;;  %v8550_v9 = vld [vmem:[#allocation15_spill] sm:$0xff]  ;;  %v2969_v15 = vadd.f32 %v8551_v43, %v8089_v14  ;;  %v6299_v53 = vpop.f32.mrb[78].mxu0  ;;  %v6098_v39 = vadd.f32 %v8091_v16, %v8079_v41  ;;  %v8552_v36 = vld [vmem:[#allocation10_spill] sm:$0xff]  ;;  %v6105_v61 = vpop.f32.mrb[78].mxu1  ;;  %v8553_v32 = vld [vmem:[#allocation25_spill] sm:$0xff] }
 0x1de   : > { %v3261_v54 = vadd.f32 %v8550_v9, %v2956_v19  ;;  %v2980_v29 = vadd.f32 %v8103_v37, %v8552_v36  ;;  %v2987_v4 = vpop.f32.mrb[79].mxu0  ;;  %v8554_v55 = vld [vmem:[#allocation46_spill] sm:$0xff]  ;;  %v8555_v19 = vld [vmem:[#allocation20_spill] sm:$0xff]  ;;  %v8556_v16 = vld [vmem:[#allocation61_spill] sm:$0xff]  ;;  %v6104_v37 = vadd.f32 %v6103_v56, %v6102_v8 }
 0x1df   : > { %v8214_v51 = vadd.f32 %v6095_v1, %v5959_v46  ;;  %v8217_v58 = vadd.f32 %v8068_v22, %v2977_v27  ;;  %v3274_v35 = vadd.f32 %v8553_v32, %v2969_v15  ;;  %v2972_v14 = vadd.f32 %v8554_v55, %v8117_v49  ;;  %v6106_v22 = vpop.f32.mrb[79].mxu1  ;;  %v8557_v11 = vld [vmem:[#allocation27_spill] sm:$0xff] }
 0x1e0   : > { %v6101_v46 = vadd.f32 %v8119_v42, %v8105_v44  ;;  %v2993_v24 = vadd.f32 %v6298_v50, %v8555_v19  ;;  %v8229_v2 = vadd.f32 %v6098_v39, %v5962_v5  ;;  %v3285_v41 = vadd.f32 %v8075_v45, %v2980_v29  ;;  %v8558_v49 = vld [vmem:[#allocation19_spill] sm:$0xff] }
 0x1e1   : > { %v2985_v48 = vadd.f32 %v8556_v16, %v2984_v34  ;;  %v3277_v1 = vadd.f32 %v8557_v11, %v2972_v14  ;;  %v2996_v3 = vadd.f32 %v6299_v53, %v8558_v49  ;;  %v8241_v42 = vadd.f32 %v6104_v37, %v5968_v10  ;;  %v8559_v5 = vld [vmem:[#allocation63_spill] sm:$0xff] }
 0x1e2   : > { %v8234_v62 = vadd.f32 %v6101_v46, %v5965_v13  ;;  %v8237_v27 = vadd.f32 %v8101_v7, %v2993_v24  ;;  %v2988_v50 = vadd.f32 %v8559_v5, %v2987_v4  ;;  %v6107_v9 = vadd.f32 %v6106_v22, %v6105_v61 }
 0x1e3   : > { %v3290_v44 = vadd.f32 %v8085_v26, %v2985_v48  ;;  %v8245_v45 = vadd.f32 %v8111_v17, %v2996_v3 }
 0x1e4   : > { %v3293_v8 = vadd.f32 %v8095_v25, %v2988_v50  ;;  %v8248_v34 = vadd.f32 %v6107_v9, %v5971_v28 }
 0x1e8   : > { %v6148_v13 = vpop.f32.mrb[80].mxu0 }
 0x1e9   : > { %v6149_v43 = vpop.f32.mrb[81].mxu0 }
 0x1ea   : > { %v6150_v7 = vadd.f32 %v6149_v43, %v6148_v13  ;;  %v6151_v15 = vpop.f32.mrb[82].mxu0 }
 0x1eb   : > { %v6152_v56 = vpop.f32.mrb[83].mxu0 }
 0x1ec   : > { %v6153_v53 = vadd.f32 %v6152_v56, %v6151_v15  ;;  %v8250_v39 = vadd.f32 %v6150_v7, %v3242_v0 }
 0x1ee   : > { %v8252_v26 = vadd.f32 %v6153_v53, %v3245_v6 }
 0x1f3   : > { %v6154_v10 = vpop.f32.mrb[84].mxu0 }
 0x1f4   : > { %v6155_v36 = vpop.f32.mrb[85].mxu0 }
 0x1f5   : > { %v6156_v29 = vadd.f32 %v6155_v36, %v6154_v10  ;;  %v6157_v61 = vpop.f32.mrb[86].mxu0 }
 0x1f6   : > { %v6158_v17 = vpop.f32.mrb[87].mxu0 }
 0x1f7   : > { %v6159_v4 = vadd.f32 %v6158_v17, %v6157_v61  ;;  %v6430_v25 = vadd.f32 %v6156_v29, %v8179_v60 }
 0x1f9   : > { %v8255_v28 = vadd.f32 %v6159_v4, %v3253_v59 }
 0x1fb   : > { %v6160_v32 = vpop.f32.mrb[88].mxu0 }
 0x1fc   : > { %v6161_v55 = vpop.f32.mrb[89].mxu0 }
 0x1fd   : > { %v6162_v14 = vadd.f32 %v6161_v55, %v6160_v32  ;;  %v6163_v46 = vpop.f32.mrb[90].mxu0 }
 0x1fe   : > { %v6164_v19 = vpop.f32.mrb[91].mxu0 }
 0x1ff   : > { %v6165_v24 = vadd.f32 %v6164_v19, %v6163_v46  ;;  %v8257_v0 = vadd.f32 %v6162_v14, %v3258_v57 }
 0x201   : > { %v8259_v6 = vadd.f32 %v6165_v24, %v3261_v54 }
 0x203   : > { %v6166_v22 = vpop.f32.mrb[92].mxu0 }
 0x204   : > { %v6167_v16 = vpop.f32.mrb[93].mxu0 }
 0x205   : > { %v6168_v48 = vadd.f32 %v6167_v16, %v6166_v22  ;;  %v6169_v37 = vpop.f32.mrb[94].mxu0 }
 0x206   : > { %v6170_v11 = vpop.f32.mrb[95].mxu0 }
 0x207   : > { %v6171_v49 = vadd.f32 %v6170_v11, %v6169_v37  ;;  %v8262_v60 = vadd.f32 %v6168_v48, %v8201_v31 }
 0x209   : > { %v8264_v59 = vadd.f32 %v6171_v49, %v3269_v20 }
 0x20b   : > { %v6172_v3 = vpop.f32.mrb[96].mxu0 }
 0x20c   : > { %v6173_v5 = vpop.f32.mrb[97].mxu0 }
 0x20d   : > { %v6174_v50 = vadd.f32 %v6173_v5, %v6172_v3  ;;  %v6175_v9 = vpop.f32.mrb[98].mxu0 }
 0x20e   : > { %v6176_v13 = vpop.f32.mrb[99].mxu0 }
 0x20f   : > { %v6177_v57 = vadd.f32 %v6176_v13, %v6175_v9  ;;  %v8266_v43 = vadd.f32 %v6174_v50, %v3274_v35 }
 0x211   : > { %v8268_v54 = vadd.f32 %v6177_v57, %v3277_v1 }
 0x214   : > { %v6178_v7 = vpop.f32.mrb[100].mxu0 }
 0x215   : > { %v6179_v15 = vpop.f32.mrb[101].mxu0 }
 0x216   : > { %v6180_v56 = vadd.f32 %v6179_v15, %v6178_v7  ;;  %v6181_v53 = vpop.f32.mrb[102].mxu0 }
 0x217   : > { %v6182_v10 = vpop.f32.mrb[103].mxu0 }
 0x218   : > { %v6183_v36 = vadd.f32 %v6182_v10, %v6181_v53  ;;  %v8271_v31 = vadd.f32 %v6180_v56, %v8217_v58 }
 0x21a   : > { %v8273_v20 = vadd.f32 %v6183_v36, %v3285_v41 }
 0x222   : > { %v6184_v29 = vpop.f32.mrb[104].mxu0 }
 0x223   : > { %v6185_v61 = vpop.f32.mrb[105].mxu0 }
 0x224   : > { %v6186_v17 = vadd.f32 %v6185_v61, %v6184_v29  ;;  %v6187_v4 = vpop.f32.mrb[106].mxu0 }
 0x225   : > { %v6188_v32 = vpop.f32.mrb[107].mxu0 }
 0x226   : > { %v6189_v35 = vadd.f32 %v6188_v32, %v6187_v4  ;;  %v8275_v55 = vadd.f32 %v6186_v17, %v3290_v44 }
 0x228   : > { %v8277_v1 = vadd.f32 %v6189_v35, %v3293_v8 }
 0x230   : > { %v6190_v14 = vpop.f32.mrb[108].mxu0 }
 0x231   : > { %v6191_v46 = vpop.f32.mrb[109].mxu0 }
 0x232   : > { %v6192_v19 = vadd.f32 %v6191_v46, %v6190_v14  ;;  %v6193_v24 = vpop.f32.mrb[110].mxu0 }
 0x233   : > { %v6194_v22 = vpop.f32.mrb[111].mxu0 }
 0x234   : > { %v6195_v58 = vadd.f32 %v6194_v22, %v6193_v24  ;;  %v8280_v41 = vadd.f32 %v6192_v19, %v8237_v27 }
 0x236   : > { %v8283_v16 = vadd.f32 %v6195_v58, %v8245_v45 }
 0x23d   : > { %v6196_v48 = vpop.f32.mrb[112].mxu0 }
 0x23e   : > { %v6197_v37 = vpop.f32.mrb[113].mxu0 }
 0x23f   : > { %v6198_v11 = vadd.f32 %v6197_v37, %v6196_v48  ;;  %v6199_v44 = vpop.f32.mrb[114].mxu0 }
 0x240   : > { %v6200_v49 = vpop.f32.mrb[115].mxu0 }
 0x241   : > { %v6201_v3 = vadd.f32 %v6200_v49, %v6199_v44  ;;  %v8286_v5 = vadd.f32 %v8129_v12, %v6198_v11 }
 0x242   : > { %v6382_v8 = vpop.f32.mrb[80].mxu1 }
 0x243   : > { %v6431_v50 = vadd.f32 %v6430_v25, %v6382_v8  ;;  %v4974_v9 = vpop.f32.mrb[81].mxu1  ;;  %v8291_v57 = vadd.f32 %v8138_v40, %v6201_v3 }
 0x244   : > { %v6435_v13 = vadd.f32 %v8250_v39, %v4974_v9  ;;  %v6383_v27 = vpop.f32.mrb[82].mxu1 }
 0x245   : > { %v6439_v45 = vadd.f32 %v8255_v28, %v6383_v27  ;;  %v4977_v7 = vpop.f32.mrb[83].mxu1  ;;  %v5333_v40 = vmul.f32 %v6431_v50, %v6431_v50 }
 0x246   : > { %v6443_v12 = vadd.f32 %v8252_v26, %v4977_v7  ;;  %v5331_v15 = vmul.f32 %v6435_v13, %v6435_v13 }
 0x247   : > { %v5773_v25 = vpack.c.bf16 %v6439_v45, %v6431_v50  ;;  %v5334_v29 = vmul.f32 %v6439_v45, %v6439_v45 }
 0x248   : > { %v5768_v56 = vpack.c.bf16 %v6443_v12, %v6435_v13  ;;  %v5293_v39 = vadd.f32 %v6443_v12, %v6435_v13  ;;  %v5332_v53 = vmul.f32 %v6443_v12, %v6443_v12 }
 0x249   : > { %5845 = vst [vmem:[%s8297_s26 + $0x8] sm:$0xff] %v5773_v25  }
 0x24a   : > { %5769 = vst [vmem:[%s8297_s26] sm:$0xff] %v5768_v56   ;;  %v5294_v10 = vadd.f32 %v6431_v50, %v5293_v39  ;;  %v5363_v28 = vadd.f32 %v5332_v53, %v5331_v15 }
 0x24b   : > { %v6202_v36 = vpop.f32.mrb[116].mxu0 }
 0x24c   : > { %v5364_v61 = vadd.f32 %v5363_v28, %v5333_v40  ;;  %v6203_v17 = vpop.f32.mrb[117].mxu0  ;;  %v5295_v4 = vadd.f32 %v6439_v45, %v5294_v10 }
 0x24d   : > { %v6204_v32 = vadd.f32 %v6203_v17, %v6202_v36  ;;  %v6205_v35 = vpop.f32.mrb[118].mxu0 }
 0x24e   : > { %v5365_v14 = vadd.f32 %v5364_v61, %v5334_v29  ;;  %v6206_v46 = vpop.f32.mrb[119].mxu0 }
 0x24f   : > { %v6207_v26 = vadd.f32 %v6206_v46, %v6205_v35  ;;  %v8303_v19 = vadd.f32 %v8146_v30, %v6204_v32 }
 0x251   : > { %v6386_v24 = vpop.f32.mrb[84].mxu1  ;;  %v8306_v22 = vadd.f32 %v8148_v33, %v6207_v26 }
 0x252   : > { %v6447_v58 = vadd.f32 %v8262_v60, %v6386_v24  ;;  %v4990_v48 = vpop.f32.mrb[85].mxu1 }
 0x253   : > { %v6451_v37 = vadd.f32 %v8257_v0, %v4990_v48  ;;  %v6387_v11 = vpop.f32.mrb[86].mxu1 }
 0x254   : > { %v6455_v44 = vadd.f32 %v8264_v59, %v6387_v11  ;;  %v4993_v49 = vpop.f32.mrb[87].mxu1  ;;  %v5337_v45 = vmul.f32 %v6447_v58, %v6447_v58 }
 0x255   : > { %v5296_v8 = vadd.f32 %v6451_v37, %v5295_v4  ;;  %v5335_v3 = vmul.f32 %v6451_v37, %v6451_v37  ;;  %v6459_v30 = vadd.f32 %v8259_v6, %v4993_v49 }
 0x256   : > { %v5783_v50 = vpack.c.bf16 %v6455_v44, %v6447_v58  ;;  %v5338_v25 = vmul.f32 %v6455_v44, %v6455_v44 }
 0x257   : > { %v5366_v9 = vadd.f32 %v5365_v14, %v5335_v3  ;;  %v5778_v13 = vpack.c.bf16 %v6459_v30, %v6451_v37  ;;  %v5297_v27 = vadd.f32 %v6459_v30, %v5296_v8  ;;  %v5336_v33 = vmul.f32 %v6459_v30, %v6459_v30 }
 0x258   : > { %5847 = vst [vmem:[%s8297_s26 + $0x18] sm:$0xff] %v5783_v50  }
 0x259   : > { %5846 = vst [vmem:[%s8297_s26 + $0x10] sm:$0xff] %v5778_v13   ;;  %v5298_v60 = vadd.f32 %v6447_v58, %v5297_v27  ;;  %v5367_v7 = vadd.f32 %v5366_v9, %v5336_v33  ;;  %v6208_v12 = vpop.f32.mrb[120].mxu0 }
 0x25a   : > { %v6209_v0 = vpop.f32.mrb[121].mxu0 }
 0x25b   : > { %v5368_v15 = vadd.f32 %v5367_v7, %v5337_v45  ;;  %v6210_v59 = vadd.f32 %v6209_v0, %v6208_v12  ;;  %v5299_v56 = vadd.f32 %v6455_v44, %v5298_v60  ;;  %v6211_v39 = vpop.f32.mrb[122].mxu0 }
 0x25c   : > { %v6212_v53 = vpop.f32.mrb[123].mxu0 }
 0x25d   : > { %v5369_v40 = vadd.f32 %v5368_v15, %v5338_v25  ;;  %v6213_v6 = vadd.f32 %v6212_v53, %v6211_v39  ;;  %v8315_v10 = vadd.f32 %v8154_v63, %v6210_v59 }
 0x25f   : > { %v6390_v28 = vpop.f32.mrb[88].mxu1  ;;  %v8318_v36 = vadd.f32 %v8162_v52, %v6213_v6 }
 0x260   : > { %v6463_v29 = vadd.f32 %v8271_v31, %v6390_v28  ;;  %v5006_v61 = vpop.f32.mrb[89].mxu1 }
 0x261   : > { %v6467_v17 = vadd.f32 %v8266_v43, %v5006_v61  ;;  %v6391_v4 = vpop.f32.mrb[90].mxu1 }
 0x262   : > { %v6471_v32 = vadd.f32 %v8273_v20, %v6391_v4  ;;  %v5009_v35 = vpop.f32.mrb[91].mxu1  ;;  %v5341_v37 = vmul.f32 %v6463_v29, %v6463_v29 }
 0x263   : > { %v5300_v14 = vadd.f32 %v6467_v17, %v5299_v56  ;;  %v5339_v46 = vmul.f32 %v6467_v17, %v6467_v17  ;;  %v6475_v63 = vadd.f32 %v8268_v54, %v5009_v35 }
 0x264   : > { %v5793_v26 = vpack.c.bf16 %v6471_v32, %v6463_v29  ;;  %v5342_v43 = vmul.f32 %v6471_v32, %v6471_v32 }
 0x265   : > { %v5370_v24 = vadd.f32 %v5369_v40, %v5339_v46  ;;  %v5788_v58 = vpack.c.bf16 %v6475_v63, %v6467_v17  ;;  %v5301_v48 = vadd.f32 %v6475_v63, %v5300_v14  ;;  %v5340_v52 = vmul.f32 %v6475_v63, %v6475_v63 }
 0x266   : > { %5849 = vst [vmem:[%s8297_s26 + $0x28] sm:$0xff] %v5793_v26  }
 0x267   : > { %5848 = vst [vmem:[%s8297_s26 + $0x20] sm:$0xff] %v5788_v58   ;;  %v5302_v31 = vadd.f32 %v6463_v29, %v5301_v48  ;;  %v5371_v11 = vadd.f32 %v5370_v24, %v5340_v52 }
 0x268   : > { %v6214_v44 = vpop.f32.mrb[124].mxu0 }
 0x269   : > { %v5372_v49 = vadd.f32 %v5371_v11, %v5341_v37  ;;  %v6215_v8 = vpop.f32.mrb[125].mxu0  ;;  %v5303_v20 = vadd.f32 %v6471_v32, %v5302_v31 }
 0x26a   : > { %v6216_v3 = vadd.f32 %v6215_v8, %v6214_v44  ;;  %v6217_v30 = vpop.f32.mrb[126].mxu0 }
 0x26b   : > { %v5373_v50 = vadd.f32 %v5372_v49, %v5342_v43  ;;  %v6218_v9 = vpop.f32.mrb[127].mxu0 }
 0x26c   : > { %v6219_v54 = vadd.f32 %v6218_v9, %v6217_v30  ;;  %v8327_v13 = vadd.f32 %v8170_v23, %v6216_v3 }
 0x26d   : > { %v6394_v27 = vpop.f32.mrb[92].mxu1 }
 0x26e   : > { %v6479_v33 = vadd.f32 %v8280_v41, %v6394_v27  ;;  %v5022_v45 = vpop.f32.mrb[93].mxu1  ;;  %v8331_v60 = vadd.f32 %v8172_v21, %v6219_v54 }
 0x26f   : > { %v6483_v7 = vadd.f32 %v8275_v55, %v5022_v45  ;;  %v6395_v12 = vpop.f32.mrb[94].mxu1 }
 0x270   : > { %v6487_v0 = vadd.f32 %v8283_v16, %v6395_v12  ;;  %v5025_v25 = vpop.f32.mrb[95].mxu1  ;;  %v5345_v6 = vmul.f32 %v6479_v33, %v6479_v33 }
 0x271   : > { %v5304_v15 = vadd.f32 %v6483_v7, %v5303_v20  ;;  %v5343_v59 = vmul.f32 %v6483_v7, %v6483_v7  ;;  %v6491_v23 = vadd.f32 %v8277_v1, %v5025_v25 }
 0x272   : > { %v5803_v56 = vpack.c.bf16 %v6487_v0, %v6479_v33  ;;  %v5346_v29 = vmul.f32 %v6487_v0, %v6487_v0 }
 0x273   : > { %v5374_v39 = vadd.f32 %v5373_v50, %v5343_v59  ;;  %v5798_v53 = vpack.c.bf16 %v6491_v23, %v6483_v7  ;;  %v5305_v40 = vadd.f32 %v6491_v23, %v5304_v15  ;;  %v5344_v41 = vmul.f32 %v6491_v23, %v6491_v23 }
 0x274   : > { %5851 = vst [vmem:[%s8297_s26 + $0x38] sm:$0xff] %v5803_v56  }
 0x275   : > { %5850 = vst [vmem:[%s8297_s26 + $0x30] sm:$0xff] %v5798_v53   ;;  %v5306_v21 = vadd.f32 %v6479_v33, %v5305_v40  ;;  %v5375_v28 = vadd.f32 %v5374_v39, %v5344_v41 }
 0x277   : > { %v5376_v55 = vadd.f32 %v5375_v28, %v5345_v6  ;;  %v5307_v61 = vadd.f32 %v6487_v0, %v5306_v21 }
 0x278   : > { %v6220_v17 = vpop.f32.mrb[128].mxu0 }
 0x279   : > { %v6221_v16 = vpop.f32.mrb[129].mxu0  ;;  %v5377_v4 = vadd.f32 %v5376_v55, %v5346_v29 }
 0x27a   : > { %v6222_v32 = vadd.f32 %v6221_v16, %v6220_v17  ;;  %v6223_v35 = vpop.f32.mrb[130].mxu0 }
 0x27b   : > { %v6224_v14 = vpop.f32.mrb[131].mxu0 }
 0x27c   : > { %v6225_v46 = vadd.f32 %v6224_v14, %v6223_v35  ;;  %v8339_v63 = vadd.f32 %v8182_v38, %v6222_v32 }
 0x27d   : > { %v6398_v1 = vpop.f32.mrb[0].mxu1 }
 0x27e   : > { %v6494_v26 = vadd.f32 %v8303_v19, %v6398_v1  ;;  %v5038_v24 = vpop.f32.mrb[1].mxu1  ;;  %v8344_v52 = vadd.f32 %v8192_v18, %v6225_v46 }
 0x27f   : > { %v6497_v58 = vadd.f32 %v8286_v5, %v5038_v24  ;;  %v6399_v48 = vpop.f32.mrb[2].mxu1 }
 0x280   : > { %v6500_v37 = vadd.f32 %v8306_v22, %v6399_v48  ;;  %v5041_v31 = vpop.f32.mrb[3].mxu1  ;;  %v5349_v3 = vmul.f32 %v6494_v26, %v6494_v26 }
 0x281   : > { %v5308_v11 = vadd.f32 %v6497_v58, %v5307_v61  ;;  %v5347_v44 = vmul.f32 %v6497_v58, %v6497_v58  ;;  %v6503_v43 = vadd.f32 %v8291_v57, %v5041_v31 }
 0x282   : > { %v5813_v38 = vpack.c.bf16 %v6500_v37, %v6494_v26  ;;  %v5350_v50 = vmul.f32 %v6500_v37, %v6500_v37 }
 0x283   : > { %v5378_v49 = vadd.f32 %v5377_v4, %v5347_v44  ;;  %v5808_v8 = vpack.c.bf16 %v6503_v43, %v6497_v58  ;;  %v5309_v20 = vadd.f32 %v6503_v43, %v5308_v11  ;;  %v5348_v19 = vmul.f32 %v6503_v43, %v6503_v43 }
 0x284   : > { %5853 = vst [vmem:[%s8297_s26 + $0x48] sm:$0xff] %v5813_v38  }
 0x285   : > { %5852 = vst [vmem:[%s8297_s26 + $0x40] sm:$0xff] %v5808_v8   ;;  %v5310_v5 = vadd.f32 %v6494_v26, %v5309_v20  ;;  %v5379_v30 = vadd.f32 %v5378_v49, %v5348_v19 }
 0x287   : > { %v5380_v18 = vadd.f32 %v5379_v30, %v5349_v3  ;;  %v6226_v9 = vpop.f32.mrb[132].mxu0  ;;  %v5311_v54 = vadd.f32 %v6500_v37, %v5310_v5 }
 0x288   : > { %v6227_v22 = vpop.f32.mrb[133].mxu0 }
 0x289   : > { %v6228_v27 = vadd.f32 %v6227_v22, %v6226_v9  ;;  %v5381_v33 = vadd.f32 %v5380_v18, %v5350_v50  ;;  %v6229_v45 = vpop.f32.mrb[134].mxu0 }
 0x28a   : > { %v6230_v7 = vpop.f32.mrb[135].mxu0 }
 0x28b   : > { %v6231_v57 = vadd.f32 %v6230_v7, %v6229_v45  ;;  %v6517_v12 = vadd.f32 %v8208_v47, %v6228_v27  ;;  %v6402_v0 = vpop.f32.mrb[4].mxu1 }
 0x28c   : > { %v6506_v25 = vadd.f32 %v8327_v13, %v6402_v0  ;;  %v5054_v15 = vpop.f32.mrb[5].mxu1 }
 0x28d   : > { %v6523_v59 = vadd.f32 %v8214_v51, %v6231_v57  ;;  %v6509_v23 = vadd.f32 %v8315_v10, %v5054_v15  ;;  %v6403_v56 = vpop.f32.mrb[6].mxu1 }
 0x28e   : > { %v6512_v39 = vadd.f32 %v8331_v60, %v6403_v56  ;;  %v5057_v53 = vpop.f32.mrb[7].mxu1  ;;  %v5353_v13 = vmul.f32 %v6506_v25, %v6506_v25 }
 0x28f   : > { %v5312_v40 = vadd.f32 %v6509_v23, %v5311_v54  ;;  %v5351_v41 = vmul.f32 %v6509_v23, %v6509_v23  ;;  %v6515_v6 = vadd.f32 %v8318_v36, %v5057_v53 }
 0x290   : > { %v5823_v21 = vpack.c.bf16 %v6512_v39, %v6506_v25  ;;  %v5354_v17 = vmul.f32 %v6512_v39, %v6512_v39 }
 0x291   : > { %v5382_v47 = vadd.f32 %v5381_v33, %v5351_v41  ;;  %v5818_v28 = vpack.c.bf16 %v6515_v6, %v6509_v23  ;;  %v5313_v29 = vadd.f32 %v6515_v6, %v5312_v40  ;;  %v5352_v55 = vmul.f32 %v6515_v6, %v6515_v6 }
 0x292   : > { %5855 = vst [vmem:[%s8297_s26 + $0x58] sm:$0xff] %v5823_v21  }
 0x293   : > { %5854 = vst [vmem:[%s8297_s26 + $0x50] sm:$0xff] %v5818_v28   ;;  %v5314_v61 = vadd.f32 %v6506_v25, %v5313_v29  ;;  %v5383_v51 = vadd.f32 %v5382_v47, %v5352_v55 }
 0x295   : > { %v5384_v10 = vadd.f32 %v5383_v51, %v5353_v13  ;;  %v6232_v16 = vpop.f32.mrb[136].mxu0  ;;  %v5315_v4 = vadd.f32 %v6512_v39, %v5314_v61 }
 0x296   : > { %v6233_v60 = vpop.f32.mrb[137].mxu0 }
 0x297   : > { %v6234_v32 = vadd.f32 %v6233_v60, %v6232_v16  ;;  %v5385_v35 = vadd.f32 %v5384_v10, %v5354_v17  ;;  %v6235_v14 = vpop.f32.mrb[138].mxu0 }
 0x298   : > { %v6236_v1 = vpop.f32.mrb[139].mxu0 }
 0x299   : > { %v6237_v36 = vadd.f32 %v6236_v1, %v6235_v14  ;;  %v6532_v46 = vadd.f32 %v8229_v2, %v6234_v32 }
 0x29a   : > { %v6406_v26 = vpop.f32.mrb[8].mxu1 }
 0x29b   : > { %v6518_v24 = vadd.f32 %v6517_v12, %v6406_v26  ;;  %v5070_v58 = vpop.f32.mrb[9].mxu1  ;;  %v6538_v48 = vadd.f32 %v8234_v62, %v6237_v36 }
 0x29c   : > { %v6521_v37 = vadd.f32 %v8339_v63, %v5070_v58  ;;  %v6407_v31 = vpop.f32.mrb[10].mxu1 }
 0x29d   : > { %v6524_v11 = vadd.f32 %v6523_v59, %v6407_v31  ;;  %v5073_v44 = vpop.f32.mrb[11].mxu1  ;;  %v5357_v5 = vmul.f32 %v6518_v24, %v6518_v24 }
 0x29e   : > { %v5316_v43 = vadd.f32 %v6521_v37, %v5315_v4  ;;  %v5355_v38 = vmul.f32 %v6521_v37, %v6521_v37  ;;  %v6527_v49 = vadd.f32 %v8344_v52, %v5073_v44 }
 0x29f   : > { %v5833_v8 = vpack.c.bf16 %v6524_v11, %v6518_v24  ;;  %v5358_v18 = vmul.f32 %v6524_v11, %v6524_v11 }
 0x2a0   : > { %v5386_v20 = vadd.f32 %v5385_v35, %v5355_v38  ;;  %v5828_v19 = vpack.c.bf16 %v6527_v49, %v6521_v37  ;;  %v5317_v2 = vadd.f32 %v6527_v49, %v5316_v43  ;;  %v5356_v3 = vmul.f32 %v6527_v49, %v6527_v49 }
 0x2a1   : > { %5857 = vst [vmem:[%s8297_s26 + $0x68] sm:$0xff] %v5833_v8  }
 0x2a2   : > { %5856 = vst [vmem:[%s8297_s26 + $0x60] sm:$0xff] %v5828_v19   ;;  %v5318_v30 = vadd.f32 %v6518_v24, %v5317_v2  ;;  %v5387_v50 = vadd.f32 %v5386_v20, %v5356_v3 }
 0x2a3   : > { %v6238_v62 = vpop.f32.mrb[140].mxu0 }
 0x2a4   : > { %v5388_v63 = vadd.f32 %v5387_v50, %v5357_v5  ;;  %v6239_v9 = vpop.f32.mrb[141].mxu0  ;;  %v5319_v54 = vadd.f32 %v6524_v11, %v5318_v30 }
 0x2a5   : > { %v6240_v22 = vadd.f32 %v6239_v9, %v6238_v62  ;;  %v6241_v27 = vpop.f32.mrb[142].mxu0  ;;  %v6410_v33 = vpop.f32.mrb[12].mxu1 }
 0x2a6   : > { %v5389_v45 = vadd.f32 %v5388_v63, %v5358_v18  ;;  %v6242_v52 = vpop.f32.mrb[143].mxu0  ;;  %v5086_v57 = vpop.f32.mrb[13].mxu1 }
 0x2a7   : > { %v6529_v7 = vadd.f32 %v8241_v42, %v6240_v22  ;;  %v6243_v12 = vadd.f32 %v6242_v52, %v6241_v27  ;;  %v6533_v0 = vadd.f32 %v6532_v46, %v5086_v57  ;;  %v6411_v25 = vpop.f32.mrb[14].mxu1 }
 0x2a8   : > { %v5089_v23 = vpop.f32.mrb[15].mxu1 }
 0x2a9   : > { %v6530_v15 = vadd.f32 %v6529_v7, %v6410_v33  ;;  %v6535_v59 = vadd.f32 %v8248_v34, %v6243_v12  ;;  %v5320_v56 = vadd.f32 %v6533_v0, %v5319_v54  ;;  %v5359_v39 = vmul.f32 %v6533_v0, %v6533_v0 }
 0x2aa   : > { %v6539_v53 = vadd.f32 %v6538_v48, %v5089_v23 }
 0x2ab   : > { %v5361_v40 = vmul.f32 %v6530_v15, %v6530_v15  ;;  %v6536_v41 = vadd.f32 %v6535_v59, %v6411_v25  ;;  %v5390_v6 = vadd.f32 %v5389_v45, %v5359_v39 }
 0x2ac   : > { %v5838_v21 = vpack.c.bf16 %v6539_v53, %v6533_v0  ;;  %v5321_v47 = vadd.f32 %v6539_v53, %v5320_v56  ;;  %v5360_v42 = vmul.f32 %v6539_v53, %v6539_v53 }
 0x2ad   : > { %v5843_v28 = vpack.c.bf16 %v6536_v41, %v6530_v15  ;;  %v5362_v29 = vmul.f32 %v6536_v41, %v6536_v41 }
 0x2ae   : > { %5858 = vst [vmem:[%s8297_s26 + $0x70] sm:$0xff] %v5838_v21   ;;  %v5322_v55 = vadd.f32 %v6530_v15, %v5321_v47  ;;  %v5391_v13 = vadd.f32 %v5390_v6, %v5360_v42 }
 0x2af   : > { %5859 = vst [vmem:[%s8297_s26 + $0x78] sm:$0xff] %v5843_v28  }
 0x2b0   : > { %v5323_v61 = vadd.f32 %v6536_v41, %v5322_v55  ;;  %v5392_v34 = vadd.f32 %v5391_v13, %v5361_v40 }
 0x2b2   : > { %v5324_v51 = vrot.slane %v5323_v61, 4  ;;  %v5393_v17 = vadd.f32 %v5392_v34, %v5362_v29 }
 0x2b4   : > { %v5325_v10 = vadd.f32 %v5324_v51, %v5323_v61  ;;  %v5394_v16 = vrot.slane %v5393_v17, 4 }
 0x2b6   : > { %v5326_v4 = vrot.slane %v5325_v10, 2  ;;  %v5395_v60 = vadd.f32 %v5394_v16, %v5393_v17 }
 0x2b8   : > { %v5327_v32 = vadd.f32 %v5326_v4, %v5325_v10  ;;  %v5396_v35 = vrot.slane %v5395_v60, 2 }
 0x2ba   : > { %v5328_v14 = vrot.slane %v5327_v32, 1  ;;  %v5397_v1 = vadd.f32 %v5396_v35, %v5395_v60 }
 0x2bc   : > { %v5329_v36 = vadd.f32 %v5328_v14, %v5327_v32  ;;  %v5398_v46 = vrot.slane %v5397_v1, 1 }
 0x2be   : > { %5330 = vst [vmem:[%s214_s30] sm:$0xff] %v5329_v36  ;;  %v5399_v26 = vadd.f32 %v5398_v46, %v5397_v1 }
 0x2c0   : > { %5400 = vst [vmem:[%s218_s7] sm:$0xff] %v5399_v26 }
 0x2c1 PF: > { %s15_s15 = sadd.s32 1, %s6715_s15  }
 0x2c2   : > { %p12_p4 = scmp.ge.s32.totalorder %s15_s15, 4  }
 0x2c4   :  { %14 = sbr.rel (!%p12_p4) target bundleno = 1 (0x1), region = 86 }

// kernel: basic_block_forward.4
= control target key start
LH: loop header
LB: loop body
LE: loop exit
PB: predicated region body
PF: predicated region fallthrough
CT: control target
= control target key end

     0   :  { %s7035_s21 = smov 0   ;;  %s8648_s0 = inlined_call_operand.vmem [shape: bf16[2,16,16,128], index: 0, kind: input, shape index: {}]   ;;  %s8649_s1 = inlined_call_operand.vmem [shape: bf16[3,384,128], index: 1, kind: input, shape index: {}]   ;;  %s8650_s2 = inlined_call_operand.vmem [shape: f32[1,128], index: 2, kind: input, shape index: {}]   ;;  %s8651_s3 = inlined_call_operand.vmem [shape: f32[1,128], index: 3, kind: input, shape index: {}]   ;;  %s8652_s4 = inlined_call_operand.vmem [shape: bf16[2,16,16,128], index: 4, kind: output, shape index: {0}]   ;;  %s8653_s5 = inlined_call_operand.vmem [shape: f32[2,8,128], index: 5, kind: output, shape index: {1}]   ;;  %s8654_s6 = inlined_call_operand.vmem [shape: f32[2,8,128], index: 6, kind: output, shape index: {2}]  }
   0x1 LB: > { %s5714_s22 = sadd.s32 4294967295, %s6997_s21   ;;  %p5718_p0 = scmp.ge.s32.totalorder %s6997_s21, 1  ;;  %s6997_s21 = sphi %s7035_s21, %s17_s21  }
   0x2   : > { %p217_p1 = scmp.lt.s32.totalorder %s6997_s21, 3 }
   0x4   : > { %p218_p2 = pnand %p5718_p0, %p217_p1 }
   0x6   : > { %221 = sbr.rel (%p218_p2) target bundleno = 722 (0x2d2), region = 36 }
   0xd   : > { %v7046_v0 = vld [vmem:[%s8649_s1 + $0x140] sm:$0xff]   ;;  %v6999_v3 = vmov 0   ;;  %v7092_v4 = vld [vmem:[%s8649_s1 + $0x148] sm:$0xff]   ;;  %v7104_v7 = vld [vmem:[%s8649_s1 + $0x150] sm:$0xff]   ;;  %p255_p3 = scmp.lt.s32.totalorder %s5714_s22, 1  ;;  %vm886_vm2 = vcmask 1046528  }
   0xe   : > { %v6875_v1 = vld [vmem:[%s8649_s1 + $0x100] sm:$0xff]   ;;  %6689 = vmatprep.subr.bf16.mxu1 %v7046_v0  ;;  %292 = vst [vmem:[#allocation2 + $0x90] sm:$0xff] %v6999_v3  ;;  %293 = vst [vmem:[#allocation2 + $0x98] sm:$0xff] %v6999_v3  ;;  %v6878_v5 = vld [vmem:[%s8649_s1 + $0x108] sm:$0xff]   ;;  %v619_v12 = vrot.slane %v6999_v3, 1  ;;  %v7174_v23 = vrot.slane %v6999_v3, 3 }
   0xf   : > { %v6876_v2 = vld [vmem:[%s8649_s1 + $0xc0] sm:$0xff]   ;;  %274 = vst [vmem:[#allocation2] sm:$0xff] %v6999_v3  ;;  %276 = vst [vmem:[#allocation2 + $0x10] sm:$0xff] %v6999_v3  ;;  %6697 = vmatpush3.bf16.msra.mxu1 %v7046_v0  ;;  %6137 = vmatprep.subr.bf16.mxu0 %v6875_v1  ;;  %v6879_v6 = vld [vmem:[%s8649_s1 + $0xc8] sm:$0xff]   ;;  %s8806_s22 = smov (!%p255_p3, %s5714_s22), 1  ;;  %v7180_v25 = vrot.slane %v6999_v3, 4 }
  0x10   : > { %277 = vst [vmem:[#allocation2 + $0x18] sm:$0xff] %v6999_v3  ;;  %278 = vst [vmem:[#allocation2 + $0x20] sm:$0xff] %v6999_v3  ;;  %6138 = vmatpush3.bf16.msra.mxu0 %v6876_v2  ;;  %6690 = vmatprep.subr.bf16.mxu1 %v7092_v4  ;;  %v6881_v8 = vld [vmem:[%s8649_s1 + $0x110] sm:$0xff]   ;;  %v7119_v10 = vld [vmem:[%s8649_s1 + $0x158] sm:$0xff]   ;;  %s5929_s11 = sshll.u32 %s8806_s22, 7  ;;  %v952_v19 = vshrl.u32 %v619_v12, 16 }
  0x11   : > { %279 = vst [vmem:[#allocation2 + $0x28] sm:$0xff] %v6999_v3  ;;  %280 = vst [vmem:[#allocation2 + $0x30] sm:$0xff] %v6999_v3  ;;  %6139 = vmatprep.subr.bf16.mxu0 %v6878_v5  ;;  %v6882_v9 = vld [vmem:[%s8649_s1 + $0xd0] sm:$0xff]   ;;  %v6884_v11 = vld [vmem:[%s8649_s1 + $0x118] sm:$0xff]   ;;  %v955_v21 = vshll.u32 %v619_v12, 16  ;;  %s7171_s18 = scalar_lea.vmem %s8648_s0, %s5929_s11  ;;  %v938_v37 = vor.u32 %v7180_v25, %v7174_v23 }
  0x12   : > { %281 = vst [vmem:[#allocation2 + $0x38] sm:$0xff] %v6999_v3  ;;  %282 = vst [vmem:[#allocation2 + $0x40] sm:$0xff] %v6999_v3  ;;  %v6885_v13 = vld [vmem:[%s8649_s1 + $0xd8] sm:$0xff]   ;;  %v7133_v14 = vld [vmem:[%s8649_s1 + $0x160] sm:$0xff]   ;;  %v954_v30 = vrot.slane %v952_v19, 3 }
  0x13   : > { %283 = vst [vmem:[#allocation2 + $0x48] sm:$0xff] %v6999_v3  ;;  %284 = vst [vmem:[#allocation2 + $0x50] sm:$0xff] %v6999_v3  ;;  %6698 = vmatpush3.bf16.msra.mxu1 %v7092_v4  ;;  %v6887_v15 = vld [vmem:[%s8649_s1 + $0x120] sm:$0xff]   ;;  %v7150_v17 = vld [vmem:[%s8649_s1 + $0x168] sm:$0xff]   ;;  %v957_v31 = vrot.slane %v955_v21, 4 }
  0x14   : > { %285 = vst [vmem:[#allocation2 + $0x58] sm:$0xff] %v6999_v3  ;;  %286 = vst [vmem:[#allocation2 + $0x60] sm:$0xff] %v6999_v3  ;;  %6140 = vmatpush3.bf16.msra.mxu0 %v6879_v6  ;;  %6691 = vmatprep.subr.bf16.mxu1 %v7104_v7  ;;  %v6888_v16 = vld [vmem:[%s8649_s1 + $0xe0] sm:$0xff]   ;;  %v6890_v18 = vld [vmem:[%s8649_s1 + $0x128] sm:$0xff]   ;;  %vm613_vm0 = vsmask.f32 7424 }
  0x15   : > { %287 = vst [vmem:[#allocation2 + $0x68] sm:$0xff] %v6999_v3  ;;  %288 = vst [vmem:[#allocation2 + $0x70] sm:$0xff] %v6999_v3  ;;  %6141 = vmatprep.subr.bf16.mxu0 %v6881_v8  ;;  %v6891_v20 = vld [vmem:[%s8649_s1 + $0xe8] sm:$0xff]   ;;  %v7164_v22 = vld [vmem:[%s8649_s1 + $0x170] sm:$0xff]   ;;  %vm935_vm1 = vsmask.f32 4352  ;;  %v7216_v44 = vor.u32 %v957_v31, %v954_v30 }
  0x16   : > { %289 = vst [vmem:[#allocation2 + $0x78] sm:$0xff] %v6999_v3  ;;  %290 = vst [vmem:[#allocation2 + $0x80] sm:$0xff] %v6999_v3  ;;  %v6893_v24 = vld [vmem:[%s8649_s1 + $0x130] sm:$0xff]   ;;  %v7189_v27 = vld [vmem:[%s8649_s1 + $0x178] sm:$0xff]  }
  0x17   : > { %291 = vst [vmem:[#allocation2 + $0x88] sm:$0xff] %v6999_v3  ;;  %294 = vst [vmem:[#allocation2 + $0xa0] sm:$0xff] %v6999_v3  ;;  %6699 = vmatpush3.bf16.msra.mxu1 %v7104_v7  ;;  %v6894_v26 = vld [vmem:[%s8649_s1 + $0xf0] sm:$0xff]   ;;  %v6114_v28 = vld [vmem:[%s7171_s18 + $0x40] sm:$0xff]  }
  0x18   : > { %295 = vst [vmem:[#allocation2 + $0xa8] sm:$0xff] %v6999_v3  ;;  %296 = vst [vmem:[#allocation2 + $0xb0] sm:$0xff] %v6999_v3  ;;  %6142 = vmatpush3.bf16.msra.mxu0 %v6882_v9  ;;  %6692 = vmatprep.subr.bf16.mxu1 %v7119_v10  ;;  %v7195_v29 = vld [vmem:[%s8650_s2] ss:$0 sm:$0xff]  ;;  %v5997_v32 = vunpack.c.l.bf16 %v6114_v28  ;;  %v5998_v33 = vunpack.c.h.bf16 %v6114_v28  ;;  %v6896_v35 = vld [vmem:[%s8649_s1 + $0x138] sm:$0xff]  }
  0x19   : > { %297 = vst [vmem:[#allocation2 + $0xb8] sm:$0xff] %v6999_v3  ;;  %298 = vst [vmem:[#allocation2 + $0xc0] sm:$0xff] %v6999_v3  ;;  %6143 = vmatprep.subr.bf16.mxu0 %v6884_v11  ;;  %v7201_v34 = vld [vmem:[%s8651_s3] ss:$0 sm:$0xff]  ;;  %v6115_v36 = vld [vmem:[%s7171_s18 + $0x48] sm:$0xff]  }
  0x1a   : > { %299 = vst [vmem:[#allocation2 + $0xc8] sm:$0xff] %v6999_v3  ;;  %300 = vst [vmem:[#allocation2 + $0xd0] sm:$0xff] %v6999_v3  ;;  %v397_v38 = vmul.f32 %v5997_v32, %v7195_v29  ;;  %v398_v39 = vmul.f32 %v5998_v33, %v7195_v29  ;;  %v6001_v40 = vunpack.c.l.bf16 %v6115_v36  ;;  %v6002_v41 = vunpack.c.h.bf16 %v6115_v36  ;;  %v6897_v42 = vld [vmem:[%s8649_s1 + $0xf8] sm:$0xff]   ;;  %v5964_v43 = vld [vmem:[%s7171_s18] sm:$0xff]  }
  0x1b   : > { %301 = vst [vmem:[#allocation2 + $0xd8] sm:$0xff] %v6999_v3  ;;  %302 = vst [vmem:[#allocation2 + $0xe0] sm:$0xff] %v6999_v3  ;;  %6700 = vmatpush3.bf16.msra.mxu1 %v7119_v10  ;;  %v6898_v48 = vld [vmem:[%s8649_s1 + $0x40] sm:$0xff]   ;;  %v5965_v49 = vunpack.c.l.bf16 %v5964_v43  ;;  %v5966_v51 = vunpack.c.h.bf16 %v5964_v43  ;;  %v6116_v56 = vld [vmem:[%s7171_s18 + $0x50] sm:$0xff]  }
  0x1c   : > { %303 = vst [vmem:[#allocation2 + $0xe8] sm:$0xff] %v6999_v3  ;;  %304 = vst [vmem:[#allocation2 + $0xf0] sm:$0xff] %v6999_v3  ;;  %6144 = vmatpush3.bf16.msra.mxu0 %v6885_v13  ;;  %6693 = vmatprep.subr.bf16.mxu1 %v7133_v14  ;;  %v436_v45 = vadd.f32 %v7201_v34, %v397_v38  ;;  %v437_v46 = vadd.f32 %v7201_v34, %v398_v39  ;;  %v6117_v57 = vld [vmem:[%s7171_s18 + $0x58] sm:$0xff]   ;;  %v6005_v60 = vunpack.c.l.bf16 %v6116_v56  ;;  %v6107_v9 = vld [vmem:[%s7171_s18 + $0x8] sm:$0xff]  }
  0x1d   : > { %305 = vst [vmem:[#allocation2 + $0xf8] sm:$0xff] %v6999_v3  ;;  %306 = vst [vmem:[#allocation2 + $0x100] sm:$0xff] %v6999_v3  ;;  %6145 = vmatprep.subr.bf16.mxu0 %v6887_v15  ;;  %v399_v47 = vmul.f32 %v6001_v40, %v7195_v29  ;;  %v400_v50 = vmul.f32 %v6002_v41, %v7195_v29  ;;  %v381_v55 = vmul.f32 %v5965_v49, %v7195_v29  ;;  %v6118_v30 = vld [vmem:[%s7171_s18 + $0x60] sm:$0xff]   ;;  %v6119_v36 = vld [vmem:[%s7171_s18 + $0x68] sm:$0xff]  }
  0x1e   : > { %307 = vst [vmem:[#allocation2 + $0x108] sm:$0xff] %v6999_v3  ;;  %v468_v52 = vmax.f32 %v436_v45, 0.0  ;;  %v469_v53 = vmax.f32 %v437_v46, 0.0  ;;  %v382_v59 = vmul.f32 %v5966_v51, %v7195_v29  ;;  %v6006_v61 = vunpack.c.h.bf16 %v6116_v56  ;;  %v7252_v51 = vld [vmem:[%s7171_s18 + $0x10] sm:$0xff]  }
  0x1f   : > { %6701 = vmatpush3.bf16.msra.mxu1 %v7133_v14  ;;  %v438_v54 = vadd.f32 %v7201_v34, %v399_v47  ;;  %v439_v58 = vadd.f32 %v7201_v34, %v400_v50  ;;  %v420_v1 = vadd.f32 %v7201_v34, %v381_v55  ;;  %v6009_v2 = vunpack.c.l.bf16 %v6117_v57 }
  0x20   : > { %6146 = vmatpush3.bf16.msra.mxu0 %v6888_v16  ;;  %6694 = vmatprep.subr.bf16.mxu1 %v7150_v17  ;;  %v492_v62 = vpack.c.bf16 %v469_v53, %v468_v52  ;;  %v421_v5 = vadd.f32 %v7201_v34, %v382_v59  ;;  %v401_v6 = vmul.f32 %v6005_v60, %v7195_v29  ;;  %v6010_v13 = vunpack.c.h.bf16 %v6117_v57 }
  0x21   : > { %6147 = vmatprep.subr.bf16.mxu0 %v6890_v18  ;;  %v470_v63 = vmax.f32 %v438_v54, 0.0  ;;  %v471_v3 = vmax.f32 %v439_v58, 0.0  ;;  %v402_v8 = vmul.f32 %v6006_v61, %v7195_v29  ;;  %v452_v12 = vmax.f32 %v420_v1, 0.0 }
  0x22   : > { %v524_v11 = vrot.slane %v492_v62, 4  ;;  %v403_v15 = vmul.f32 %v6009_v2, %v7195_v29  ;;  %v453_v18 = vmax.f32 %v421_v5, 0.0  ;;  %v440_v19 = vadd.f32 %v7201_v34, %v401_v6 }
  0x23   : > { %6702 = vmatpush3.bf16.msra.mxu1 %v7150_v17  ;;  %v493_v16 = vpack.c.bf16 %v471_v3, %v470_v63  ;;  %v404_v21 = vmul.f32 %v6010_v13, %v7195_v29  ;;  %v5970_v28 = vunpack.c.h.bf16 %v6107_v9  ;;  %v6013_v45 = vunpack.c.l.bf16 %v6118_v30 }
  0x24   : > { %6148 = vmatpush3.bf16.msra.mxu0 %v6891_v20  ;;  %6695 = vmatprep.subr.bf16.mxu1 %v7164_v22  ;;  %v441_v20 = vadd.f32 %v7201_v34, %v402_v8  ;;  %565 = vst [vmem:[#allocation2 + $0x98] ss:$-4 sps:$4 sm:$0xff] %v524_v11   ;;  %v484_v32 = vpack.c.bf16 %v453_v18, %v452_v12  ;;  %v472_v33 = vmax.f32 %v440_v19, 0.0  ;;  %v6014_v46 = vunpack.c.h.bf16 %v6118_v30 }
  0x25   : > { %6149 = vmatprep.subr.bf16.mxu0 %v6893_v24  ;;  %v442_v24 = vadd.f32 %v7201_v34, %v403_v15  ;;  %v525_v31 = vrot.slane %v493_v16, 4  ;;  %v443_v38 = vadd.f32 %v7201_v34, %v404_v21  ;;  %v384_v41 = vmul.f32 %v5970_v28, %v7195_v29 }
  0x26   : > { %v6017_v50 = vunpack.c.l.bf16 %v6119_v36  ;;  %v405_v53 = vmul.f32 %v6013_v45, %v7195_v29  ;;  %v406_v54 = vmul.f32 %v6014_v46, %v7195_v29  ;;  %v6018_v55 = vunpack.c.h.bf16 %v6119_v36 }
  0x27   : > { %6703 = vmatpush3.bf16.msra.mxu1 %v7164_v22  ;;  %v474_v39 = vmax.f32 %v442_v24, 0.0  ;;  %567 = vst [vmem:[#allocation2 + $0xa8] ss:$-4 sps:$4 sm:$0xff] %v525_v31   ;;  %v475_v47 = vmax.f32 %v443_v38, 0.0  ;;  %v423_v49 = vadd.f32 %v7201_v34, %v384_v41  ;;  %v5973_v2 = vunpack.c.l.bf16 %v7252_v51 }
  0x28   : > { %6150 = vmatpush3.bf16.msra.mxu0 %v6894_v26  ;;  %6696 = vmatprep.subr.bf16.mxu1 %v7189_v27  ;;  %v5969_v26 = vunpack.c.l.bf16 %v6107_v9  ;;  %v407_v59 = vmul.f32 %v6017_v50, %v7195_v29  ;;  %v444_v62 = vadd.f32 %v7201_v34, %v405_v53  ;;  %v445_v63 = vadd.f32 %v7201_v34, %v406_v54 }
  0x29   : > { %6151 = vmatprep.subr.bf16.mxu0 %v6896_v35  ;;  %v473_v35 = vmax.f32 %v441_v20, 0.0  ;;  %v495_v56 = vpack.c.bf16 %v475_v47, %v474_v39  ;;  %v455_v58 = vmax.f32 %v423_v49, 0.0  ;;  %v408_v1 = vmul.f32 %v6018_v55, %v7195_v29 }
  0x2a   : > { %v383_v40 = vmul.f32 %v5969_v26, %v7195_v29  ;;  %v476_v11 = vmax.f32 %v444_v62, 0.0  ;;  %v477_v12 = vmax.f32 %v445_v63, 0.0  ;;  %v7269_v13 = vadd.f32 %v7201_v34, %v407_v59 }
  0x2b   : > { %6704 = vmatpush3.bf16.msra.mxu1 %v7189_v27  ;;  %v494_v43 = vpack.c.bf16 %v473_v35, %v472_v33  ;;  %v7257_v60 = vld [vmem:[#allocation2 + $0x90] sm:$0xff]  ;;  %v7259_v61 = vld [vmem:[#allocation2 + $0x98] sm:$0xff]  ;;  %v527_v8 = vrot.slane %v495_v56, 4  ;;  %v7275_v21 = vadd.f32 %v7201_v34, %v408_v1  ;;  %v6899_v56 = vld [vmem:[%s8649_s1] sm:$0xff]  }
  0x2c   : > { %6152 = vmatpush3.bf16.msra.mxu0 %v6897_v42  ;;  %6273 = vmatprep.subr.bf16.mxu1 %v6898_v48  ;;  %v516_v42 = vrot.slane %v484_v32, 4  ;;  %v422_v48 = vadd.f32 %v7201_v34, %v383_v40  ;;  %v1843_v3 = vshll.u32 %v7257_v60, 16  ;;  %v2016_v5 = vrot.slane %v7257_v60, 1 }
  0x2d   : > { %6545 = vmatprep.subr.bf16.mxu0 %v7046_v0  ;;  %v526_v52 = vrot.slane %v494_v43, 4  ;;  %v2017_v6 = vrot.slane %v7259_v61, 1  ;;  %571 = vst [vmem:[#allocation2 + $0xc8] ss:$-4 sps:$4 sm:$0xff] %v527_v8   ;;  %v7278_v36 = vpack.c.bf16 %v477_v12, %v476_v11 }
  0x2e   : > { %549 = vst [vmem:[#allocation2 + $0x18] ss:$-4 sps:$4 sm:$0xff] %v516_v42   ;;  %v454_v57 = vmax.f32 %v422_v48, 0.0  ;;  %v7272_v19 = vld [vmem:[#allocation2 + $0xa0] sm:$0xff]  ;;  %v1707_v20 = vld [vmem:[#allocation2 + $0xa8] sm:$0xff] }
  0x2f   : > { %569 = vst [vmem:[#allocation2 + $0xb8] ss:$-4 sps:$4 sm:$0xff] %v526_v52   ;;  %v2018_v15 = vsel %vm886_vm2, %v2016_v5, %v2017_v6  ;;  %v2401_v16 = vshrl.u32 %v2017_v6, 16  ;;  %v2404_v18 = vshll.u32 %v2017_v6, 16  ;;  %v2019_v28 = vrot.slane %v7272_v19, 1 }
  0x30   : > { %v485_v9 = vpack.c.bf16 %v455_v58, %v454_v57  ;;  %v2393_v24 = vshrl.u32 %v2018_v15, 16  ;;  %v2396_v26 = vshll.u32 %v2018_v15, 16  ;;  %v2020_v30 = vrot.slane %v1707_v20, 1 }
  0x31   : > { %v2403_v31 = vrot.slane %v2401_v16, 3  ;;  %v2406_v32 = vrot.slane %v2404_v18, 4 }
  0x32   : > { %v517_v35 = vrot.slane %v485_v9, 4  ;;  %v2395_v38 = vrot.slane %v2393_v24, 3  ;;  %v2398_v39 = vrot.slane %v2396_v26, 4  ;;  %v2021_v40 = vsel %vm886_vm2, %v2019_v28, %v2020_v30  ;;  %v6900_v24 = vld [vmem:[%s8649_s1 + $0x48] sm:$0xff]  }
  0x33   : > { %v2442_v41 = vshrl.u32 %v2020_v30, 16  ;;  %v2407_v43 = vor.u32 %v2406_v32, %v2403_v31  ;;  %v2434_v45 = vshrl.u32 %v2021_v40, 16  ;;  %v2437_v46 = vshll.u32 %v2021_v40, 16 }
  0x34   : > { %v2445_v47 = vshll.u32 %v2020_v30, 16  ;;  %551 = vst [vmem:[#allocation2 + $0x28] ss:$-4 sps:$4 sm:$0xff] %v517_v35   ;;  %v2399_v48 = vor.u32 %v2398_v39, %v2395_v38  ;;  %v1710_v6 = vld [vmem:[#allocation2 + $0xc0] sm:$0xff]  ;;  %v1711_v8 = vld [vmem:[#allocation2 + $0xc8] sm:$0xff] }
  0x35   : > { %v1688_v33 = vld [vmem:[#allocation2 + $0x10] sm:$0xff]  ;;  %v1689_v42 = vld [vmem:[#allocation2 + $0x18] sm:$0xff]  ;;  %v2444_v49 = vrot.slane %v2442_v41, 3  ;;  %v2436_v53 = vrot.slane %v2434_v45, 3  ;;  %v2439_v54 = vrot.slane %v2437_v46, 4  ;;  %v6901_v38 = vld [vmem:[%s8649_s1 + $0x8] sm:$0xff]  }
  0x36   : > { %v1721_v50 = vshrl.u32 %v1688_v33, 16  ;;  %v1723_v52 = vshll.u32 %v1688_v33, 16  ;;  %v2447_v55 = vrot.slane %v2445_v47, 4  ;;  %v1728_v57 = vshll.u32 %v1689_v42, 16  ;;  %v1708_v58 = vld [vmem:[#allocation2 + $0xb0] sm:$0xff]  ;;  %v1709_v5 = vld [vmem:[#allocation2 + $0xb8] sm:$0xff] }
  0x37   : > { %v2408_v59 = vsel %vm935_vm1, %v2399_v48, %v2407_v43  ;;  %v1732_v63 = vshrl.u32 %v1689_v42, 16  ;;  %v2440_v9 = vor.u32 %v2439_v54, %v2436_v53  ;;  %v2022_v26 = vrot.slane %v1708_v58, 1  ;;  %v6902_v41 = vld [vmem:[%s8649_s1 + $0x50] sm:$0xff]  }
  0x38   : > { %v1725_v62 = vrot.slane %v1723_v52, 1  ;;  %v2040_v1 = vrot.slane %v1721_v50, 3  ;;  %6577 = vmatprep.mubr.bf16.mxu1 %v2408_v59  ;;  %v2448_v11 = vor.u32 %v2447_v55, %v2444_v49  ;;  %v1730_v12 = vrot.slane %v1728_v57, 1 }
  0x39   : > { %v2041_v15 = vrot.slane %v1723_v52, 4  ;;  %v2043_v18 = vrot.slane %v1732_v63, 3  ;;  %v2044_v20 = vrot.slane %v1728_v57, 4  ;;  %v2023_v32 = vrot.slane %v1709_v5, 1 }
  0x3a   : > { %v1726_v16 = vor.u32 %v1725_v62, %v1721_v50  ;;  %v2449_v28 = vsel %vm935_vm1, %v2440_v9, %v2448_v11  ;;  %v1734_v30 = vor.u32 %v1732_v63, %v1730_v12  ;;  %v2025_v39 = vrot.slane %v1710_v6, 1  ;;  %v6904_v63 = vld [vmem:[%s8649_s1 + $0x58] sm:$0xff]  }
  0x3b   : > { %v2042_v31 = vor.u32 %v2041_v15, %v2040_v1  ;;  %6578 = vmatmul.mubr.bf16.vlgmr.msra.gmra.mrb[0].mxu1 %v2449_v28  ;;  %v2045_v35 = vor.u32 %v2044_v20, %v2043_v18  ;;  %v2026_v40 = vrot.slane %v1711_v8, 1  ;;  %v2024_v48 = vsel %vm886_vm2, %v2022_v26, %v2023_v32  ;;  %v1690_v9 = vld [vmem:[#allocation2 + $0x20] sm:$0xff]  ;;  %v1691_v18 = vld [vmem:[#allocation2 + $0x28] sm:$0xff] }
  0x3c   : > { %v1731_v33 = vsel %vm613_vm0, %v1726_v16, %v1730_v12  ;;  %6274 = vmatpush3.bf16.msra.mxu1 %v6899_v56  ;;  %v2056_v45 = vshrl.u32 %v1734_v30, 16  ;;  %v2059_v46 = vshll.u32 %v1734_v30, 16  ;;  %v2483_v49 = vshrl.u32 %v2023_v32, 16  ;;  %v6903_v56 = vld [vmem:[%s8649_s1 + $0x10] sm:$0xff]  }
  0x3d   : > { %v2048_v42 = vshrl.u32 %v1731_v33, 16  ;;  %v2051_v43 = vshll.u32 %v1731_v33, 16  ;;  %v7297_v47 = vsel %vm935_vm1, %v2042_v31, %v2045_v35  ;;  %6275 = vmatprep.subr.bf16.mxu1 %v6900_v24  ;;  %v2486_v50 = vshll.u32 %v2023_v32, 16  ;;  %v6905_v35 = vld [vmem:[%s8649_s1 + $0x18] sm:$0xff]  }
  0x3e   : > { %v2058_v54 = vrot.slane %v2056_v45, 3  ;;  %v2061_v55 = vrot.slane %v2059_v46, 4  ;;  %v2475_v57 = vshrl.u32 %v2024_v48, 16  ;;  %v2478_v58 = vshll.u32 %v2024_v48, 16  ;;  %v6906_v48 = vld [vmem:[%s8649_s1 + $0x60] sm:$0xff]  }
  0x3f   : > { %v2050_v52 = vrot.slane %v2048_v42, 3  ;;  %v2053_v53 = vrot.slane %v2051_v43, 4  ;;  %v2485_v59 = vrot.slane %v2483_v49, 3  ;;  %v2488_v62 = vrot.slane %v2486_v50, 4 }
  0x40   : > { %v2062_v5 = vor.u32 %v2061_v55, %v2058_v54  ;;  %6276 = vmatpush3.bf16.msra.mxu1 %v6901_v38  ;;  %v2027_v6 = vsel %vm886_vm2, %v2025_v39, %v2026_v40  ;;  %v2524_v8 = vshrl.u32 %v2026_v40, 16  ;;  %v2477_v11 = vrot.slane %v2475_v57, 3 }
  0x41   : > { %v2054_v1 = vor.u32 %v2053_v53, %v2050_v52  ;;  %v2480_v12 = vrot.slane %v2478_v58, 4  ;;  %v2489_v15 = vor.u32 %v2488_v62, %v2485_v59  ;;  %v2516_v16 = vshrl.u32 %v2027_v6, 16  ;;  %6277 = vmatprep.subr.bf16.mxu1 %v6902_v41  ;;  %v6908_v58 = vld [vmem:[%s8649_s1 + $0x68] sm:$0xff]  }
  0x42   : > { %v2519_v24 = vshll.u32 %v2027_v6, 16  ;;  %v2526_v26 = vrot.slane %v2524_v8, 3  ;;  %v2527_v28 = vshll.u32 %v2026_v40, 16  ;;  %v1736_v32 = vshrl.u32 %v1690_v9, 16 }
  0x43   : > { %v7308_v20 = vsel %vm935_vm1, %v2054_v1, %v2062_v5  ;;  %v2481_v30 = vor.u32 %v2480_v12, %v2477_v11  ;;  %v2518_v31 = vrot.slane %v2516_v16, 3  ;;  %v1738_v33 = vshll.u32 %v1690_v9, 16  ;;  %v6120_v5 = vld [vmem:[%s7171_s18 + $0x70] sm:$0xff]   ;;  %v6121_v16 = vld [vmem:[%s7171_s18 + $0x78] sm:$0xff]  }
  0x44   : > { %2969 = vmatprep.mubr.bf16.mxu0 %v7308_v20  ;;  %v2521_v38 = vrot.slane %v2519_v24, 4  ;;  %v2529_v39 = vrot.slane %v2527_v28, 4  ;;  %6278 = vmatpush3.bf16.msra.mxu1 %v6903_v56  ;;  %v1743_v41 = vshll.u32 %v1691_v18, 16  ;;  %v1747_v42 = vshrl.u32 %v1691_v18, 16  ;;  %v7343_v18 = vld [vmem:[%s7171_s18 + $0x18] sm:$0xff]  }
  0x45   : > { %2970 = vmatmul.mubr.bf16.vlgmr.msra.gmra.mrb[0].mxu0 %v7297_v47  ;;  %v2490_v40 = vsel %vm935_vm1, %v2481_v30, %v2489_v15  ;;  %v1740_v43 = vrot.slane %v1738_v33, 1  ;;  %v2081_v45 = vrot.slane %v1736_v32, 3  ;;  %v2082_v46 = vrot.slane %v1738_v33, 4  ;;  %6279 = vmatprep.subr.bf16.mxu1 %v6904_v63 }
  0x46   : > { %6546 = vmatpush3.bf16.msra.mxu0 %v7046_v0  ;;  %6581 = vmatprep.mubr.bf16.mxu1 %v2490_v40  ;;  %v2522_v49 = vor.u32 %v2521_v38, %v2518_v31  ;;  %v2530_v50 = vor.u32 %v2529_v39, %v2526_v26  ;;  %v1745_v52 = vrot.slane %v1743_v41, 1  ;;  %v2084_v53 = vrot.slane %v1747_v42, 3  ;;  %v6907_v0 = vld [vmem:[%s8649_s1 + $0x20] sm:$0xff]   ;;  %v6910_v39 = vld [vmem:[%s8649_s1 + $0x70] sm:$0xff]  }
  0x47   : > { %6547 = vmatprep.subr.bf16.mxu0 %v7092_v4  ;;  %v1741_v54 = vor.u32 %v1740_v43, %v1736_v32  ;;  %v2083_v55 = vor.u32 %v2082_v46, %v2081_v45  ;;  %v2085_v56 = vrot.slane %v1743_v41, 4  ;;  %v528_v57 = vrot.slane %v7278_v36, 4  ;;  %v6911_v45 = vld [vmem:[%s8649_s1 + $0x30] sm:$0xff]  }
  0x48   : > { %v2531_v59 = vsel %vm935_vm1, %v2522_v49, %v2530_v50  ;;  %v1749_v62 = vor.u32 %v1747_v42, %v1745_v52  ;;  %6280 = vmatpush3.bf16.msra.mxu1 %v6905_v35  ;;  %v478_v63 = vmax.f32 %v7269_v13, 0.0  ;;  %v479_v1 = vmax.f32 %v7275_v21, 0.0  ;;  %v6909_v21 = vld [vmem:[%s8649_s1 + $0x28] sm:$0xff]  }
  0x49   : > { %6582 = vmatmul.mubr.bf16.gmra.mrb[4].mxu1 %v2531_v59  ;;  %v1746_v6 = vsel %vm613_vm0, %v1741_v54, %v1745_v52  ;;  %v2086_v8 = vor.u32 %v2085_v56, %v2084_v53  ;;  %573 = vst [vmem:[#allocation2 + $0xd8] ss:$-4 sps:$4 sm:$0xff] %v528_v57   ;;  %6281 = vmatprep.subr.bf16.mxu1 %v6906_v48  ;;  %v5974_v36 = vunpack.c.h.bf16 %v7252_v51  ;;  %v6021_v38 = vunpack.c.l.bf16 %v6120_v5  ;;  %v6912_v52 = vld [vmem:[%s8649_s1 + $0x78] sm:$0xff]  }
  0x4a   : > { %v385_v9 = vmul.f32 %v5973_v2, %v7195_v29  ;;  %v2089_v11 = vshrl.u32 %v1746_v6, 16  ;;  %v2092_v12 = vshll.u32 %v1746_v6, 16  ;;  %v2097_v13 = vshrl.u32 %v1749_v62, 16  ;;  %6548 = vmatpush3.bf16.msra.mxu0 %v7092_v4 }
  0x4b   : > { %v2100_v15 = vshll.u32 %v1749_v62, 16  ;;  %v7346_v24 = vsel %vm935_vm1, %v2083_v55, %v2086_v8  ;;  %v497_v26 = vpack.c.bf16 %v479_v1, %v478_v63  ;;  %v386_v51 = vmul.f32 %v5974_v36, %v7195_v29  ;;  %6549 = vmatprep.subr.bf16.mxu0 %v7104_v7 }
  0x4c   : > { %v424_v2 = vadd.f32 %v7201_v34, %v385_v9  ;;  %v2091_v28 = vrot.slane %v2089_v11, 3  ;;  %v2094_v30 = vrot.slane %v2092_v12, 4  ;;  %v2099_v4 = vrot.slane %v2097_v13, 3  ;;  %6282 = vmatpush3.bf16.msra.mxu1 %v6907_v0  ;;  %v6913_v12 = vld [vmem:[%s8649_s1 + $0x38] sm:$0xff]  }
  0x4d   : > { %v2102_v31 = vrot.slane %v2100_v15, 4  ;;  %v529_v32 = vrot.slane %v497_v26, 4  ;;  %v425_v33 = vadd.f32 %v7201_v34, %v386_v51  ;;  %6283 = vmatprep.subr.bf16.mxu1 %v6908_v58  ;;  %v6022_v40 = vunpack.c.h.bf16 %v6120_v5 }
  0x4e   : > { %v456_v35 = vmax.f32 %v424_v2, 0.0  ;;  %v2095_v41 = vor.u32 %v2094_v30, %v2091_v28  ;;  %v6025_v43 = vunpack.c.l.bf16 %v6121_v16  ;;  %6550 = vmatpush3.bf16.msra.mxu0 %v7104_v7  ;;  %v409_v48 = vmul.f32 %v6021_v38, %v7195_v29  ;;  %v7388_v28 = vld [vmem:[%s8649_s1 + $0x80] sm:$0xff]  }
  0x4f   : > { %v2103_v42 = vor.u32 %v2102_v31, %v2099_v4  ;;  %575 = vst [vmem:[#allocation2 + $0xe8] ss:$-4 sps:$4 sm:$0xff] %v529_v32   ;;  %v457_v46 = vmax.f32 %v425_v33, 0.0  ;;  %v6026_v49 = vunpack.c.h.bf16 %v6121_v16  ;;  %v5977_v50 = vunpack.c.l.bf16 %v7343_v18  ;;  %6551 = vmatprep.subr.bf16.mxu0 %v7119_v10 }
  0x50   : > { %v1712_v0 = vld [vmem:[#allocation2 + $0xd0] sm:$0xff]  ;;  %v1713_v54 = vld [vmem:[#allocation2 + $0xd8] sm:$0xff]  ;;  %6284 = vmatpush3.bf16.msra.mxu1 %v6909_v21  ;;  %v410_v7 = vmul.f32 %v6022_v40, %v7195_v29  ;;  %v411_v55 = vmul.f32 %v6025_v43, %v7195_v29  ;;  %v5978_v56 = vunpack.c.h.bf16 %v7343_v18  ;;  %v448_v62 = vadd.f32 %v7201_v34, %v409_v48 }
  0x51   : > { %v7366_v53 = vsel %vm935_vm1, %v2095_v41, %v2103_v42  ;;  %v2028_v57 = vrot.slane %v1712_v0, 1  ;;  %v2029_v58 = vrot.slane %v1713_v54, 1  ;;  %v486_v59 = vpack.c.bf16 %v457_v46, %v456_v35  ;;  %6285 = vmatprep.subr.bf16.mxu1 %v6910_v39 }
  0x52   : > { %2977 = vmatprep.mubr.bf16.mxu0 %v7366_v53  ;;  %v449_v63 = vadd.f32 %v7201_v34, %v410_v7  ;;  %v412_v1 = vmul.f32 %v6026_v49, %v7195_v29  ;;  %v450_v5 = vadd.f32 %v7201_v34, %v411_v55  ;;  %v387_v6 = vmul.f32 %v5977_v50, %v7195_v29 }
  0x53   : > { %2978 = vmatmul.mubr.bf16.gmra.mrb[4].mxu0 %v7346_v24  ;;  %v2030_v8 = vsel %vm886_vm2, %v2028_v57, %v2029_v58  ;;  %v2565_v36 = vshrl.u32 %v2029_v58, 16  ;;  %v2568_v9 = vshll.u32 %v2029_v58, 16  ;;  %v518_v11 = vrot.slane %v486_v59, 4 }
  0x54   : > { %6552 = vmatpush3.bf16.msra.mxu0 %v7119_v10  ;;  %v2557_v13 = vshrl.u32 %v2030_v8, 16  ;;  %v2560_v15 = vshll.u32 %v2030_v8, 16  ;;  %v480_v21 = vmax.f32 %v448_v62, 0.0  ;;  %v481_v16 = vmax.f32 %v449_v63, 0.0  ;;  %6286 = vmatpush3.bf16.msra.mxu1 %v6911_v45 }
  0x55   : > { %6553 = vmatprep.subr.bf16.mxu0 %v7133_v14  ;;  %v2567_v18 = vrot.slane %v2565_v36, 3  ;;  %v2570_v26 = vrot.slane %v2568_v9, 4  ;;  %553 = vst [vmem:[#allocation2 + $0x38] ss:$-4 sps:$4 sm:$0xff] %v518_v11   ;;  %v451_v51 = vadd.f32 %v7201_v34, %v412_v1  ;;  %v482_v2 = vmax.f32 %v450_v5, 0.0  ;;  %6287 = vmatprep.subr.bf16.mxu1 %v6912_v52  ;;  %v7401_v9 = vld [vmem:[%s7171_s18 + $0x20] sm:$0xff]  }
  0x56   : > { %v2559_v10 = vrot.slane %v2557_v13, 3  ;;  %v2562_v30 = vrot.slane %v2560_v15, 4  ;;  %v1714_v4 = vld [vmem:[#allocation2 + $0xe0] sm:$0xff]  ;;  %v1715_v31 = vld [vmem:[#allocation2 + $0xe8] sm:$0xff]  ;;  %v498_v32 = vpack.c.bf16 %v481_v16, %v480_v21  ;;  %v388_v33 = vmul.f32 %v5978_v56, %v7195_v29 }
  0x57   : > { %v2571_v35 = vor.u32 %v2570_v26, %v2567_v18  ;;  %v2031_v38 = vrot.slane %v1714_v4, 1  ;;  %v2032_v39 = vrot.slane %v1715_v31, 1  ;;  %v483_v41 = vmax.f32 %v451_v51, 0.0 }
  0x58   : > { %6554 = vmatpush3.bf16.msra.mxu0 %v7133_v14  ;;  %v2563_v42 = vor.u32 %v2562_v30, %v2559_v10  ;;  %v530_v40 = vrot.slane %v498_v32, 4  ;;  %v426_v43 = vadd.f32 %v7201_v34, %v387_v6  ;;  %v427_v45 = vadd.f32 %v7201_v34, %v388_v33  ;;  %6288 = vmatpush3.bf16.msra.mxu1 %v6913_v12 }
  0x59   : > { %6555 = vmatprep.subr.bf16.mxu0 %v7150_v17  ;;  %v2033_v46 = vsel %vm886_vm2, %v2031_v38, %v2032_v39  ;;  %v2606_v48 = vshrl.u32 %v2032_v39, 16  ;;  %v2609_v49 = vshll.u32 %v2032_v39, 16  ;;  %v499_v29 = vpack.c.bf16 %v483_v41, %v482_v2  ;;  %6593 = vmatprep.subr.bf16.mxu1 %v7388_v28 }
  0x5a   : > { %v2572_v50 = vsel %vm935_vm1, %v2563_v42, %v2571_v35  ;;  %v2598_v52 = vshrl.u32 %v2033_v46, 16  ;;  %v2601_v14 = vshll.u32 %v2033_v46, 16  ;;  %577 = vst [vmem:[#allocation2 + $0xf8] ss:$-4 sps:$4 sm:$0xff] %v530_v40   ;;  %v458_v0 = vmax.f32 %v426_v43, 0.0 }
  0x5b   : > { %6585 = vmatprep.mubr.bf16.mxu1 %v2572_v50  ;;  %v2608_v54 = vrot.slane %v2606_v48, 3  ;;  %v2611_v7 = vrot.slane %v2609_v49, 4  ;;  %v531_v34 = vrot.slane %v499_v29, 4  ;;  %v459_v55 = vmax.f32 %v427_v45, 0.0 }
  0x5c   : > { %6556 = vmatpush3.bf16.msra.mxu0 %v7150_v17  ;;  %v2600_v56 = vrot.slane %v2598_v52, 3  ;;  %v2603_v57 = vrot.slane %v2601_v14, 4  ;;  %v1692_v58 = vld [vmem:[#allocation2 + $0x30] sm:$0xff]  ;;  %v1693_v59 = vld [vmem:[#allocation2 + $0x38] sm:$0xff]  ;;  %v5981_v33 = vunpack.c.l.bf16 %v7401_v9  ;;  %v7411_v39 = vsel %vm935_vm1, %v7216_v44, %v7216_v44 }
  0x5d   : > { %6557 = vmatprep.subr.bf16.mxu0 %v7164_v22  ;;  %v2612_v62 = vor.u32 %v2611_v7, %v2608_v54  ;;  %v1751_v63 = vshrl.u32 %v1692_v58, 16  ;;  %v1753_v1 = vshll.u32 %v1692_v58, 16  ;;  %v1758_v5 = vshll.u32 %v1693_v59, 16  ;;  %579 = vst [vmem:[#allocation2 + $0x108] ss:$-4 sps:$4 sm:$0xff] %v531_v34   ;;  %v7419_v54 = vld [vmem:[%s7171_s18 + $0x28] sm:$0xff]  }
  0x5e   : > { %v2604_v6 = vor.u32 %v2603_v57, %v2600_v56  ;;  %v1762_v8 = vshrl.u32 %v1693_v59, 16  ;;  %v487_v36 = vpack.c.bf16 %v459_v55, %v458_v0 }
  0x5f   : > { %v1755_v11 = vrot.slane %v1753_v1, 1  ;;  %v1760_v12 = vrot.slane %v1758_v5, 1  ;;  %v2122_v13 = vrot.slane %v1751_v63, 3  ;;  %v2123_v17 = vrot.slane %v1753_v1, 4 }
  0x60   : > { %6558 = vmatpush3.bf16.msra.mxu0 %v7164_v22  ;;  %v2613_v15 = vsel %vm935_vm1, %v2604_v6, %v2612_v62  ;;  %v2125_v21 = vrot.slane %v1762_v8, 3  ;;  %v2126_v16 = vrot.slane %v1758_v5, 4  ;;  %v519_v18 = vrot.slane %v487_v36, 4  ;;  %v7425_v6 = vld [vmem:[%s8650_s2] ss:$0 sm:$0xff] }
  0x61   : > { %6559 = vmatprep.subr.bf16.mxu0 %v7189_v27  ;;  %6586 = vmatmul.mubr.bf16.gmra.mrb[8].mxu1 %v2613_v15  ;;  %v1756_v26 = vor.u32 %v1755_v11, %v1751_v63  ;;  %v1764_v51 = vor.u32 %v1762_v8, %v1760_v12  ;;  %v2124_v2 = vor.u32 %v2123_v17, %v2122_v13  ;;  %v1716_v10 = vld [vmem:[#allocation2 + $0xf0] sm:$0xff]  ;;  %v1717_v30 = vld [vmem:[#allocation2 + $0xf8] sm:$0xff]  ;;  %v5982_v5 = vunpack.c.h.bf16 %v7401_v9 }
  0x62   : > { %v2127_v4 = vor.u32 %v2126_v16, %v2125_v21  ;;  %v2034_v31 = vrot.slane %v1716_v10, 1  ;;  %v2035_v32 = vrot.slane %v1717_v30, 1  ;;  %555 = vst [vmem:[#allocation2 + $0x48] ss:$-4 sps:$4 sm:$0xff] %v519_v18   ;;  %v389_v8 = vmul.f32 %v7425_v6, %v5981_v33 }
  0x63   : > { %v1761_v22 = vsel %vm613_vm0, %v1756_v26, %v1760_v12  ;;  %v2138_v35 = vshrl.u32 %v1764_v51, 16  ;;  %v2141_v38 = vshll.u32 %v1764_v51, 16  ;;  %v5985_v36 = vunpack.c.l.bf16 %v7419_v54 }
  0x64   : > { %6560 = vmatpush3.bf16.msra.mxu0 %v7189_v27  ;;  %v2130_v41 = vshrl.u32 %v1761_v22, 16  ;;  %v2133_v42 = vshll.u32 %v1761_v22, 16  ;;  %v7415_v40 = vsel %vm935_vm1, %v2124_v2, %v2127_v4  ;;  %v2036_v43 = vsel %vm886_vm2, %v2034_v31, %v2035_v32  ;;  %v1718_v45 = vld [vmem:[#allocation2 + $0x100] sm:$0xff]  ;;  %v1719_v46 = vld [vmem:[#allocation2 + $0x108] sm:$0xff] }
  0x65   : > { %v2140_v48 = vrot.slane %v2138_v35, 3  ;;  %v2143_v49 = vrot.slane %v2141_v38, 4  ;;  %v2639_v29 = vshrl.u32 %v2036_v43, 16  ;;  %v2642_v50 = vshll.u32 %v2036_v43, 16 }
  0x66   : > { %v2132_v52 = vrot.slane %v2130_v41, 3  ;;  %v2135_v14 = vrot.slane %v2133_v42, 4  ;;  %v2647_v44 = vshrl.u32 %v2035_v32, 16  ;;  %v2650_v0 = vshll.u32 %v2035_v32, 16 }
  0x67   : > { %v2144_v27 = vor.u32 %v2143_v49, %v2140_v48  ;;  %v2641_v7 = vrot.slane %v2639_v29, 3  ;;  %v2644_v34 = vrot.slane %v2642_v50, 4  ;;  %v2037_v55 = vrot.slane %v1718_v45, 1  ;;  %v6921_v29 = vld [vmem:[%s8649_s1 + $0x1c0] sm:$0xff]  }
  0x68   : > { %v2136_v56 = vor.u32 %v2135_v14, %v2132_v52  ;;  %v2649_v57 = vrot.slane %v2647_v44, 3  ;;  %v2652_v58 = vrot.slane %v2650_v0, 4  ;;  %v2038_v59 = vrot.slane %v1719_v46, 1  ;;  %v6947_v14 = vld [vmem:[%s8651_s3] ss:$0 sm:$0xff]  ;;  %6409 = vmatprep.subr.bf16.mxu0 %v6921_v29  ;;  %v6916_v29 = vld [vmem:[%s8649_s1 + $0x90] sm:$0xff]  }
  0x69   : > { %v2645_v62 = vor.u32 %v2644_v34, %v2641_v7  ;;  %v1694_v63 = vld [vmem:[#allocation2 + $0x40] sm:$0xff]  ;;  %v1695_v1 = vld [vmem:[#allocation2 + $0x48] sm:$0xff]  ;;  %v390_v49 = vmul.f32 %v7425_v6, %v5982_v5  ;;  %v428_v44 = vadd.f32 %v6947_v14, %v389_v8  ;;  %v5986_v0 = vunpack.c.h.bf16 %v7419_v54  ;;  %v6113_v8 = vld [vmem:[%s7171_s18 + $0x38] sm:$0xff]  }
  0x6a   : > { %v7430_v11 = vsel %vm935_vm1, %v2136_v56, %v2144_v27  ;;  %v2653_v12 = vor.u32 %v2652_v58, %v2649_v57  ;;  %v2039_v13 = vsel %vm886_vm2, %v2037_v55, %v2038_v59  ;;  %v2688_v17 = vshrl.u32 %v2038_v59, 16  ;;  %v6112_v56 = vld [vmem:[%s7171_s18 + $0x30] sm:$0xff]   ;;  %s8573_s18 = scalar_lea.vmem %s8652_s4, %s5929_s11  ;;  %s5723_s11 = sshll.u32 %s8806_s22, 3 }
  0x6b   : > { %2985 = vmatprep.mubr.bf16.mxu0 %v7430_v11  ;;  %v2680_v15 = vshrl.u32 %v2039_v13, 16  ;;  %v2683_v9 = vshll.u32 %v2039_v13, 16  ;;  %v2691_v21 = vshll.u32 %v2038_v59, 16  ;;  %v1766_v16 = vshrl.u32 %v1694_v63, 16  ;;  %s268_s15 = scalar_lea.vmem %s8653_s5, %s5723_s11  ;;  %s272_s19 = scalar_lea.vmem %s8654_s6, %s5723_s11 }
  0x6c   : > { %2986 = vmatmul.mubr.bf16.gmra.mrb[8].mxu0 %v7415_v40  ;;  %v2654_v18 = vsel %vm935_vm1, %v2645_v62, %v2653_v12  ;;  %v2690_v26 = vrot.slane %v2688_v17, 3  ;;  %v1768_v51 = vshll.u32 %v1694_v63, 16  ;;  %v1773_v2 = vshll.u32 %v1695_v1, 16 }
  0x6d   : > { %6589 = vmatprep.mubr.bf16.mxu1 %v2654_v18  ;;  %v2682_v10 = vrot.slane %v2680_v15, 3  ;;  %v2685_v30 = vrot.slane %v2683_v9, 4  ;;  %v2693_v4 = vrot.slane %v2691_v21, 4  ;;  %v1777_v31 = vshrl.u32 %v1695_v1, 16 }
  0x6e   : > { %v1770_v32 = vrot.slane %v1768_v51, 1  ;;  %v1775_v33 = vrot.slane %v1773_v2, 1  ;;  %v2163_v22 = vrot.slane %v1766_v16, 3  ;;  %v2164_v35 = vrot.slane %v1768_v51, 4 }
  0x6f   : > { %v2686_v38 = vor.u32 %v2685_v30, %v2682_v10  ;;  %v2694_v41 = vor.u32 %v2693_v4, %v2690_v26  ;;  %v2166_v42 = vrot.slane %v1777_v31, 3  ;;  %v2167_v43 = vrot.slane %v1773_v2, 4 }
  0x70   : > { %v1771_v45 = vor.u32 %v1770_v32, %v1766_v16  ;;  %v1779_v46 = vor.u32 %v1777_v31, %v1775_v33  ;;  %v2165_v48 = vor.u32 %v2164_v35, %v2163_v22  ;;  %v429_v55 = vadd.f32 %v6947_v14, %v390_v49 }
  0x71   : > { %v2695_v50 = vsel %vm935_vm1, %v2686_v38, %v2694_v41  ;;  %v2168_v52 = vor.u32 %v2167_v43, %v2166_v42  ;;  %v460_v62 = vmax.f32 %v428_v44, 0.0  ;;  %v391_v5 = vmul.f32 %v7425_v6, %v5985_v36  ;;  %v6915_v36 = vld [vmem:[%s8649_s1 + $0x88] sm:$0xff]  }
  0x72   : > { %6590 = vmatmul.mubr.bf16.gmra.mrb[12].mxu1 %v2695_v50  ;;  %v1776_v27 = vsel %vm613_vm0, %v1771_v45, %v1775_v33  ;;  %v2179_v7 = vshrl.u32 %v1779_v46, 16  ;;  %v2182_v34 = vshll.u32 %v1779_v46, 16  ;;  %v461_v54 = vmax.f32 %v429_v55, 0.0 }
  0x73   : > { %v2171_v57 = vshrl.u32 %v1776_v27, 16  ;;  %v2174_v58 = vshll.u32 %v1776_v27, 16  ;;  %v7448_v59 = vsel %vm935_vm1, %v2165_v48, %v2168_v52  ;;  %3435 = vmatprep.mubr.bf16.mxu1 %v7411_v39  ;;  %v392_v17 = vmul.f32 %v7425_v6, %v5986_v0 }
  0x74   : > { %v2181_v63 = vrot.slane %v2179_v7, 3  ;;  %v2184_v1 = vrot.slane %v2182_v34, 4  ;;  %v5989_v15 = vunpack.c.l.bf16 %v6112_v56  ;;  %v488_v21 = vpack.c.bf16 %v461_v54, %v460_v62 }
  0x75   : > { %v2173_v12 = vrot.slane %v2171_v57, 3  ;;  %v2176_v13 = vrot.slane %v2174_v58, 4  ;;  %v430_v16 = vadd.f32 %v6947_v14, %v391_v5  ;;  %v5990_v18 = vunpack.c.h.bf16 %v6112_v56 }
  0x76   : > { %v2185_v9 = vor.u32 %v2184_v1, %v2181_v63  ;;  %v431_v51 = vadd.f32 %v6947_v14, %v392_v17  ;;  %v393_v39 = vmul.f32 %v7425_v6, %v5989_v15  ;;  %v5993_v2 = vunpack.c.l.bf16 %v6113_v8  ;;  %v6917_v63 = vld [vmem:[%s8649_s1 + $0x98] sm:$0xff]  }
  0x77   : > { %v2177_v26 = vor.u32 %v2176_v13, %v2173_v12  ;;  %v520_v10 = vrot.slane %v488_v21, 4  ;;  %v462_v30 = vmax.f32 %v430_v16, 0.0  ;;  %v394_v4 = vmul.f32 %v7425_v6, %v5990_v18 }
  0x78   : > { %v5994_v31 = vunpack.c.h.bf16 %v6113_v8  ;;  %v463_v33 = vmax.f32 %v431_v51, 0.0  ;;  %v432_v22 = vadd.f32 %v6947_v14, %v393_v39  ;;  %v395_v35 = vmul.f32 %v7425_v6, %v5993_v2 }
  0x79   : > { %v7460_v32 = vsel %vm935_vm1, %v2177_v26, %v2185_v9  ;;  %557 = vst [vmem:[#allocation2 + $0x58] ss:$-4 sps:$4 sm:$0xff] %v520_v10   ;;  %v433_v38 = vadd.f32 %v6947_v14, %v394_v4  ;;  %v1841_v42 = vshrl.u32 %v7257_v60, 16  ;;  %v1845_v43 = vrot.slane %v1843_v3, 1 }
  0x7a   : > { %2993 = vmatprep.mubr.bf16.mxu0 %v7460_v32  ;;  %3436 = vmatmul.mubr.bf16.vlgmr.msra.gmra.mrb[16].mxu1 %v938_v37  ;;  %v396_v41 = vmul.f32 %v7425_v6, %v5994_v31  ;;  %v489_v45 = vpack.c.bf16 %v463_v33, %v462_v30  ;;  %v464_v46 = vmax.f32 %v432_v22, 0.0  ;;  %v434_v48 = vadd.f32 %v6947_v14, %v395_v35 }
  0x7b   : > { %2994 = vmatmul.mubr.bf16.gmra.mrb[12].mxu0 %v7448_v59  ;;  %6594 = vmatpush3.bf16.msra.mxu1 %v7388_v28  ;;  %v1848_v49 = vshll.u32 %v7259_v61, 16  ;;  %v465_v23 = vmax.f32 %v433_v38, 0.0  ;;  %v1846_v37 = vor.u32 %v1845_v43, %v1841_v42  ;;  %v1852_v6 = vshrl.u32 %v7259_v61, 16 }
  0x7c   : > { %3443 = vmatprep.mubr.bf16.mxu1 %v7308_v20  ;;  %6595 = vmatprep.subr.bf16.mxu1 %v6915_v36  ;;  %v435_v25 = vadd.f32 %v6947_v14, %v396_v41  ;;  %v521_v50 = vrot.slane %v489_v45, 4  ;;  %v466_v52 = vmax.f32 %v434_v48, 0.0  ;;  %v2368_v44 = vrot.slane %v1841_v42, 3 }
  0x7d   : > { %v1850_v28 = vrot.slane %v1848_v49, 1  ;;  %v490_v0 = vpack.c.bf16 %v465_v23, %v464_v46  ;;  %v2369_v7 = vrot.slane %v1843_v3, 4  ;;  %v2371_v20 = vrot.slane %v1852_v6, 3 }
  0x7e   : > { %v467_v27 = vmax.f32 %v435_v25, 0.0  ;;  %559 = vst [vmem:[#allocation2 + $0x68] ss:$-4 sps:$4 sm:$0xff] %v521_v50   ;;  %v2372_v61 = vrot.slane %v1848_v49, 4  ;;  %v1856_v55 = vshrl.u32 %v7272_v19, 16  ;;  %v6919_v25 = vld [vmem:[%s8649_s1 + $0xa8] sm:$0xff]  }
  0x7f   : > { %6596 = vmatpush3.bf16.msra.mxu1 %v6915_v36  ;;  %v1851_v14 = vsel %vm613_vm0, %v1846_v37, %v1850_v28  ;;  %v1854_v34 = vor.u32 %v1852_v6, %v1850_v28  ;;  %v522_v56 = vrot.slane %v490_v0, 4  ;;  %v2370_v5 = vor.u32 %v2369_v7, %v2368_v44 }
  0x80   : > { %v491_v57 = vpack.c.bf16 %v467_v27, %v466_v52  ;;  %v2376_v58 = vshrl.u32 %v1851_v14, 16  ;;  %v2379_v62 = vshll.u32 %v1851_v14, 16  ;;  %6597 = vmatprep.subr.bf16.mxu1 %v6916_v29  ;;  %v1696_v60 = vld [vmem:[#allocation2 + $0x50] sm:$0xff]  ;;  %v1697_v3 = vld [vmem:[#allocation2 + $0x58] sm:$0xff]  ;;  %v2373_v8 = vor.u32 %v2372_v61, %v2371_v20 }
  0x81   : > { %v2384_v1 = vshrl.u32 %v1854_v34, 16  ;;  %v2387_v54 = vshll.u32 %v1854_v34, 16  ;;  %v1781_v12 = vshrl.u32 %v1696_v60, 16  ;;  %v1783_v13 = vshll.u32 %v1696_v60, 16  ;;  %561 = vst [vmem:[#allocation2 + $0x78] ss:$-4 sps:$4 sm:$0xff] %v522_v56  }
  0x82   : > { %v1788_v17 = vshll.u32 %v1697_v3, 16  ;;  %v1792_v15 = vshrl.u32 %v1697_v3, 16  ;;  %3444 = vmatmul.mubr.bf16.gmra.mrb[20].mxu1 %v7297_v47  ;;  %v523_v9 = vrot.slane %v491_v57, 4  ;;  %v7488_v21 = vrot.slane %v2376_v58, 3  ;;  %v6918_v47 = vld [vmem:[%s8649_s1 + $0xa0] sm:$0xff]  }
  0x83   : > { %3451 = vmatprep.mubr.bf16.mxu1 %v7366_v53  ;;  %v7490_v16 = vrot.slane %v2379_v62, 4  ;;  %v7492_v18 = vrot.slane %v2384_v1, 3  ;;  %6598 = vmatpush3.bf16.msra.mxu1 %v6916_v29  ;;  %v1785_v26 = vrot.slane %v1783_v13, 1  ;;  %v2204_v39 = vrot.slane %v1781_v12, 3 }
  0x84   : > { %v1790_v51 = vrot.slane %v1788_v17, 1  ;;  %v2205_v2 = vrot.slane %v1783_v13, 4  ;;  %6599 = vmatprep.subr.bf16.mxu1 %v6917_v63  ;;  %v2207_v10 = vrot.slane %v1792_v15, 3  ;;  %v2208_v30 = vrot.slane %v1788_v17, 4  ;;  %563 = vst [vmem:[#allocation2 + $0x88] ss:$-4 sps:$4 sm:$0xff] %v523_v9  }
  0x85   : > { %v2382_v53 = vor.u32 %v7490_v16, %v7488_v21  ;;  %v7499_v4 = vrot.slane %v2387_v54, 4  ;;  %v1786_v36 = vor.u32 %v1785_v26, %v1781_v12  ;;  %v1698_v22 = vld [vmem:[#allocation2 + $0x60] sm:$0xff]  ;;  %v1699_v35 = vld [vmem:[#allocation2 + $0x68] sm:$0xff]  ;;  %v7502_v38 = vsel %vm935_vm1, %v2370_v5, %v2373_v8 }
  0x86   : > { %v1794_v31 = vor.u32 %v1792_v15, %v1790_v51  ;;  %v2206_v33 = vor.u32 %v2205_v2, %v2204_v39  ;;  %v2209_v41 = vor.u32 %v2208_v30, %v2207_v10  ;;  %v1796_v42 = vshrl.u32 %v1698_v22, 16  ;;  %v6929_v2 = vld [vmem:[%s8649_s1 + $0xb8] sm:$0xff]  }
  0x87   : > { %v1798_v43 = vshll.u32 %v1698_v22, 16  ;;  %v1803_v45 = vshll.u32 %v1699_v35, 16  ;;  %6600 = vmatpush3.bf16.msra.mxu1 %v6917_v63  ;;  %v1791_v46 = vsel %vm613_vm0, %v1786_v36, %v1790_v51  ;;  %v1807_v23 = vshrl.u32 %v1699_v35, 16  ;;  %v6920_v63 = vld [vmem:[%s8649_s1 + $0xb0] sm:$0xff]  }
  0x88   : > { %v2220_v48 = vshrl.u32 %v1794_v31, 16  ;;  %v2223_v49 = vshll.u32 %v1794_v31, 16  ;;  %6601 = vmatprep.subr.bf16.mxu1 %v6918_v47  ;;  %v2212_v37 = vshrl.u32 %v1791_v46, 16  ;;  %v2215_v6 = vshll.u32 %v1791_v46, 16  ;;  %v1700_v58 = vld [vmem:[#allocation2 + $0x70] sm:$0xff]  ;;  %v1701_v62 = vld [vmem:[#allocation2 + $0x78] sm:$0xff] }
  0x89   : > { %v7509_v29 = vsel %vm935_vm1, %v2206_v33, %v2209_v41  ;;  %v1800_v50 = vrot.slane %v1798_v43, 1  ;;  %v1805_v44 = vrot.slane %v1803_v45, 1  ;;  %v2245_v0 = vrot.slane %v1796_v42, 3 }
  0x8a   : > { %v2222_v52 = vrot.slane %v2220_v48, 3  ;;  %v2225_v28 = vrot.slane %v2223_v49, 4  ;;  %3452 = vmatmul.mubr.bf16.gmra.mrb[24].mxu1 %v7346_v24  ;;  %v2214_v27 = vrot.slane %v2212_v37, 3  ;;  %v2217_v7 = vrot.slane %v2215_v6, 4 }
  0x8b   : > { %v1801_v20 = vor.u32 %v1800_v50, %v1796_v42  ;;  %v2246_v14 = vrot.slane %v1798_v43, 4  ;;  %3459 = vmatprep.mubr.bf16.mxu1 %v7430_v11  ;;  %6602 = vmatpush3.bf16.msra.mxu1 %v6918_v47  ;;  %v1809_v61 = vor.u32 %v1807_v23, %v1805_v44  ;;  %v2248_v56 = vrot.slane %v1807_v23, 3  ;;  %v1702_v31 = vld [vmem:[#allocation2 + $0x80] sm:$0xff]  ;;  %v1703_v48 = vld [vmem:[#allocation2 + $0x88] sm:$0xff] }
  0x8c   : > { %v2226_v34 = vor.u32 %v2225_v28, %v2222_v52  ;;  %v2249_v57 = vrot.slane %v1803_v45, 4  ;;  %6603 = vmatprep.subr.bf16.mxu1 %v6919_v25  ;;  %v2218_v60 = vor.u32 %v2217_v7, %v2214_v27  ;;  %v1811_v1 = vshrl.u32 %v1700_v58, 16 }
  0x8d   : > { %v1806_v24 = vsel %vm613_vm0, %v1801_v20, %v1805_v44  ;;  %v2247_v3 = vor.u32 %v2246_v14, %v2245_v0  ;;  %v2261_v11 = vshrl.u32 %v1809_v61, 16  ;;  %v2264_v8 = vshll.u32 %v1809_v61, 16 }
  0x8e   : > { %v2253_v54 = vshrl.u32 %v1806_v24, 16  ;;  %v2256_v5 = vshll.u32 %v1806_v24, 16  ;;  %v7518_v12 = vsel %vm935_vm1, %v2218_v60, %v2226_v34  ;;  %v2250_v13 = vor.u32 %v2249_v57, %v2248_v56 }
  0x8f   : > { %v1813_v17 = vshll.u32 %v1700_v58, 16  ;;  %v1818_v15 = vshll.u32 %v1701_v62, 16  ;;  %6604 = vmatpush3.bf16.msra.mxu1 %v6919_v25  ;;  %3001 = vmatprep.mubr.bf16.mxu0 %v7518_v12  ;;  %v2263_v51 = vrot.slane %v2261_v11, 3  ;;  %v2266_v39 = vrot.slane %v2264_v8, 4 }
  0x90   : > { %v2255_v9 = vrot.slane %v2253_v54, 3  ;;  %v2258_v26 = vrot.slane %v2256_v5, 4  ;;  %6605 = vmatprep.subr.bf16.mxu1 %v6920_v63  ;;  %3002 = vmatmul.mubr.bf16.gmra.mrb[16].mxu0 %v7509_v29  ;;  %v7526_v47 = vsel %vm935_vm1, %v2247_v3, %v2250_v13  ;;  %v1822_v36 = vshrl.u32 %v1701_v62, 16 }
  0x91   : > { %v1815_v10 = vrot.slane %v1813_v17, 1  ;;  %v1820_v30 = vrot.slane %v1818_v15, 1  ;;  %v2267_v22 = vor.u32 %v2266_v39, %v2263_v51  ;;  %v2286_v35 = vrot.slane %v1811_v1, 3 }
  0x92   : > { %v2259_v33 = vor.u32 %v2258_v26, %v2255_v9  ;;  %v2287_v41 = vrot.slane %v1813_v17, 4  ;;  %3460 = vmatmul.mubr.bf16.gmra.mrb[28].mxu1 %v7415_v40  ;;  %v2289_v45 = vrot.slane %v1822_v36, 3  ;;  %v2290_v46 = vrot.slane %v1818_v15, 4 }
  0x93   : > { %v1816_v42 = vor.u32 %v1815_v10, %v1811_v1  ;;  %v1824_v43 = vor.u32 %v1822_v36, %v1820_v30  ;;  %3467 = vmatprep.mubr.bf16.mxu1 %v7460_v32  ;;  %6606 = vmatpush3.bf16.msra.mxu1 %v6920_v63  ;;  %v1826_v25 = vshrl.u32 %v1702_v31, 16  ;;  %v1828_v37 = vshll.u32 %v1702_v31, 16 }
  0x94   : > { %v7531_v49 = vsel %vm935_vm1, %v2259_v33, %v2267_v22  ;;  %v2288_v23 = vor.u32 %v2287_v41, %v2286_v35  ;;  %6607 = vmatprep.subr.bf16.mxu1 %v6929_v2  ;;  %v2291_v52 = vor.u32 %v2290_v46, %v2289_v45  ;;  %v1833_v27 = vshll.u32 %v1703_v48, 16  ;;  %v6950_v45 = vld [vmem:[#allocation2 + $0xb0] sm:$0xff] }
  0x95   : > { %3009 = vmatprep.mubr.bf16.mxu0 %v7531_v49  ;;  %v1821_v6 = vsel %vm613_vm0, %v1816_v42, %v1820_v30  ;;  %v2302_v40 = vshrl.u32 %v1824_v43, 16  ;;  %v2305_v50 = vshll.u32 %v1824_v43, 16  ;;  %v1830_v0 = vrot.slane %v1828_v37, 1  ;;  %v6949_v30 = vld [vmem:[#allocation2 + $0xa8] sm:$0xff] }
  0x96   : > { %v2294_v28 = vshrl.u32 %v1821_v6, 16  ;;  %v2297_v44 = vshll.u32 %v1821_v6, 16  ;;  %v7536_v20 = vsel %vm935_vm1, %v2288_v23, %v2291_v52  ;;  %v1837_v14 = vshrl.u32 %v1703_v48, 16  ;;  %v6951_v6 = vld [vmem:[#allocation2 + $0xb8] sm:$0xff] }
  0x97   : > { %v2304_v32 = vrot.slane %v2302_v40, 3  ;;  %v2307_v7 = vrot.slane %v2305_v50, 4  ;;  %6608 = vmatpush3.bf16.msra.mxu1 %v6929_v2  ;;  %v1831_v56 = vor.u32 %v1830_v0, %v1826_v25  ;;  %v1835_v57 = vrot.slane %v1833_v27, 1  ;;  %v6948_v2 = vld [vmem:[#allocation2 + $0xa0] sm:$0xff] }
  0x98   : > { %v2296_v34 = vrot.slane %v2294_v28, 3  ;;  %v2299_v61 = vrot.slane %v2297_v44, 4  ;;  %3010 = vmatmul.mubr.bf16.gmra.mrb[20].mxu0 %v7526_v47  ;;  %v2327_v62 = vrot.slane %v1826_v25, 3  ;;  %v2328_v63 = vrot.slane %v1828_v37, 4 }
  0x99   : > { %v2308_v58 = vor.u32 %v2307_v7, %v2304_v32  ;;  %v2330_v60 = vrot.slane %v1837_v14, 3  ;;  %v1836_v3 = vsel %vm613_vm0, %v1831_v56, %v1835_v57  ;;  %v1839_v1 = vor.u32 %v1837_v14, %v1835_v57 }
  0x9a   : > { %v2300_v24 = vor.u32 %v2299_v61, %v2296_v34  ;;  %v2331_v54 = vrot.slane %v1833_v27, 4  ;;  %3468 = vmatmul.mubr.bf16.gmra.mrb[32].mxu1 %v7448_v59  ;;  %v2335_v5 = vshrl.u32 %v1836_v3, 16  ;;  %v2338_v11 = vshll.u32 %v1836_v3, 16 }
  0x9b   : > { %v2329_v8 = vor.u32 %v2328_v63, %v2327_v62  ;;  %v2390_v13 = vor.u32 %v7499_v4, %v7492_v18  ;;  %3475 = vmatprep.mubr.bf16.mxu1 %v7518_v12  ;;  %v2343_v15 = vshrl.u32 %v1839_v1, 16  ;;  %v2346_v9 = vshll.u32 %v1839_v1, 16 }
  0x9c   : > { %v7545_v17 = vsel %vm935_vm1, %v2300_v24, %v2308_v58  ;;  %v2332_v26 = vor.u32 %v2331_v54, %v2330_v60  ;;  %v2337_v51 = vrot.slane %v2335_v5, 3  ;;  %v2340_v39 = vrot.slane %v2338_v11, 4  ;;  %v6938_v54 = vld [vmem:[%s8649_s1 + $0x200] sm:$0xff]  }
  0x9d   : > { %3017 = vmatprep.mubr.bf16.mxu0 %v7545_v17  ;;  %v2391_v59 = vsel %vm935_vm1, %v2382_v53, %v2390_v13  ;;  %v1858_v10 = vshll.u32 %v6948_v2, 16  ;;  %v2345_v18 = vrot.slane %v2343_v15, 3  ;;  %v2348_v4 = vrot.slane %v2346_v9, 4  ;;  %6641 = vmatprep.subr.bf16.mxu1 %v6938_v54 }
  0x9e   : > { %v7553_v12 = vsel %vm935_vm1, %v2329_v8, %v2332_v26  ;;  %v1863_v36 = vshll.u32 %v6949_v30, 16  ;;  %v2341_v31 = vor.u32 %v2340_v39, %v2337_v51  ;;  %v1867_v22 = vshrl.u32 %v6949_v30, 16  ;;  %v6952_v51 = vld [vmem:[#allocation2 + $0xc0] sm:$0xff] }
  0x9f   : > { %v1860_v33 = vrot.slane %v1858_v10, 1  ;;  %v2409_v35 = vrot.slane %v1856_v55, 3  ;;  %v2349_v41 = vor.u32 %v2348_v4, %v2345_v18  ;;  %v2410_v21 = vrot.slane %v1858_v10, 4 }
  0xa0   : > { %v1865_v42 = vrot.slane %v1863_v36, 1  ;;  %v2413_v16 = vrot.slane %v1863_v36, 4  ;;  %3018 = vmatmul.mubr.bf16.gmra.mrb[24].mxu0 %v7536_v20  ;;  %v2412_v43 = vrot.slane %v1867_v22, 3  ;;  %v1871_v46 = vshrl.u32 %v6950_v45, 16  ;;  %v6953_v36 = vld [vmem:[#allocation2 + $0xc8] sm:$0xff] }
  0xa1   : > { %v1861_v53 = vor.u32 %v1860_v33, %v1856_v55  ;;  %v1873_v48 = vshll.u32 %v6950_v45, 16  ;;  %v7561_v23 = vsel %vm935_vm1, %v2341_v31, %v2349_v41  ;;  %v2411_v37 = vor.u32 %v2410_v21, %v2409_v35 }
  0xa2   : > { %3476 = vmatmul.mubr.bf16.gmra.mrb[36].mxu1 %v7509_v29  ;;  %v1869_v25 = vor.u32 %v1867_v22, %v1865_v42  ;;  %v1878_v40 = vshll.u32 %v6951_v6, 16  ;;  %3025 = vmatprep.mubr.bf16.mxu0 %v7561_v23  ;;  %v2414_v52 = vor.u32 %v2413_v16, %v2412_v43  ;;  %v1882_v55 = vshrl.u32 %v6951_v6, 16  ;;  %v6955_v6 = vld [vmem:[#allocation2 + $0xd8] sm:$0xff] }
  0xa3   : > { %v1866_v50 = vsel %vm613_vm0, %v1861_v53, %v1865_v42  ;;  %3483 = vmatprep.mubr.bf16.mxu1 %v7531_v49  ;;  %v1875_v19 = vrot.slane %v1873_v48, 1  ;;  %v2450_v14 = vrot.slane %v1871_v46, 3  ;;  %v2451_v49 = vrot.slane %v1873_v48, 4  ;;  %v6954_v53 = vld [vmem:[#allocation2 + $0xd0] sm:$0xff] }
  0xa4   : > { %v2417_v28 = vshrl.u32 %v1866_v50, 16  ;;  %v2420_v44 = vshll.u32 %v1866_v50, 16  ;;  %v2425_v0 = vshrl.u32 %v1869_v25, 16  ;;  %v2428_v27 = vshll.u32 %v1869_v25, 16 }
  0xa5   : > { %v7568_v32 = vsel %vm935_vm1, %v2411_v37, %v2414_v52  ;;  %v1876_v29 = vor.u32 %v1875_v19, %v1871_v46  ;;  %v1880_v7 = vrot.slane %v1878_v40, 1  ;;  %v2453_v63 = vrot.slane %v1882_v55, 3 }
  0xa6   : > { %v2419_v34 = vrot.slane %v2417_v28, 3  ;;  %v2422_v61 = vrot.slane %v2420_v44, 4  ;;  %v2427_v56 = vrot.slane %v2425_v0, 3  ;;  %v2430_v57 = vrot.slane %v2428_v27, 4 }
  0xa7   : > { %v1881_v58 = vsel %vm613_vm0, %v1876_v29, %v1880_v7  ;;  %v1884_v62 = vor.u32 %v1882_v55, %v1880_v7  ;;  %v2452_v8 = vor.u32 %v2451_v49, %v2450_v14  ;;  %v2454_v13 = vrot.slane %v1878_v40, 4 }
  0xa8   : > { %v2423_v60 = vor.u32 %v2422_v61, %v2419_v34  ;;  %v2431_v24 = vor.u32 %v2430_v57, %v2427_v56  ;;  %v2458_v3 = vshrl.u32 %v1881_v58, 16  ;;  %v2461_v1 = vshll.u32 %v1881_v58, 16  ;;  %3026 = vmatmul.mubr.bf16.gmra.mrb[28].mxu0 %v7553_v12 }
  0xa9   : > { %v2466_v5 = vshrl.u32 %v1884_v62, 16  ;;  %v2469_v11 = vshll.u32 %v1884_v62, 16  ;;  %3033 = vmatprep.mubr.bf16.mxu0 %v2391_v59  ;;  %v1886_v39 = vshrl.u32 %v6952_v51, 16  ;;  %v2455_v18 = vor.u32 %v2454_v13, %v2453_v63 }
  0xaa   : > { %v2432_v15 = vsel %vm935_vm1, %v2423_v60, %v2431_v24  ;;  %3484 = vmatmul.mubr.bf16.gmra.mrb[40].mxu1 %v7526_v47  ;;  %v2460_v9 = vrot.slane %v2458_v3, 3  ;;  %v2463_v26 = vrot.slane %v2461_v1, 4  ;;  %v1888_v4 = vshll.u32 %v6952_v51, 16  ;;  %v599_v60 = vld [vmem:[#allocation2 + $0x90] sm:$0xff] }
  0xab   : > { %v2468_v2 = vrot.slane %v2466_v5, 3  ;;  %v2471_v10 = vrot.slane %v2469_v11, 4  ;;  %3491 = vmatprep.mubr.bf16.mxu1 %v7545_v17  ;;  %v1893_v31 = vshll.u32 %v6953_v36, 16  ;;  %v1897_v33 = vshrl.u32 %v6953_v36, 16  ;;  %v600_v5 = vld [vmem:[#allocation2 + $0x98] sm:$0xff] }
  0xac   : > { %v2464_v30 = vor.u32 %v2463_v26, %v2460_v9  ;;  %v2491_v59 = vrot.slane %v1886_v39, 3  ;;  %v7579_v35 = vsel %vm935_vm1, %v2452_v8, %v2455_v18  ;;  %v1890_v47 = vrot.slane %v1888_v4, 1 }
  0xad   : > { %v2472_v22 = vor.u32 %v2471_v10, %v2468_v2  ;;  %v2492_v41 = vrot.slane %v1888_v4, 4  ;;  %v1895_v42 = vrot.slane %v1893_v31, 1  ;;  %v2494_v21 = vrot.slane %v1897_v33, 3 }
  0xae   : > { %v2495_v16 = vrot.slane %v1893_v31, 4  ;;  %v1901_v43 = vshrl.u32 %v6954_v53, 16  ;;  %v1891_v45 = vor.u32 %v1890_v47, %v1886_v39  ;;  %v1903_v48 = vshll.u32 %v6954_v53, 16 }
  0xaf   : > { %v2473_v17 = vsel %vm935_vm1, %v2464_v30, %v2472_v22  ;;  %v2493_v46 = vor.u32 %v2492_v41, %v2491_v59  ;;  %v1899_v25 = vor.u32 %v1897_v33, %v1895_v42  ;;  %v1908_v40 = vshll.u32 %v6955_v6, 16 }
  0xb0   : > { %v2496_v37 = vor.u32 %v2495_v16, %v2494_v21  ;;  %v1912_v50 = vshrl.u32 %v6955_v6, 16  ;;  %3034 = vmatmul.mubr.bf16.gmra.mrb[32].mxu0 %v7502_v38  ;;  %v1896_v52 = vsel %vm613_vm0, %v1891_v45, %v1895_v42  ;;  %v1905_v19 = vrot.slane %v1903_v48, 1 }
  0xb1   : > { %v2532_v55 = vrot.slane %v1901_v43, 3  ;;  %v2533_v28 = vrot.slane %v1903_v48, 4  ;;  %3041 = vmatprep.mubr.bf16.mxu0 %v2432_v15  ;;  %v2499_v44 = vshrl.u32 %v1896_v52, 16  ;;  %v2502_v0 = vshll.u32 %v1896_v52, 16 }
  0xb2   : > { %3492 = vmatmul.mubr.bf16.gmra.mrb[44].mxu1 %v7536_v20  ;;  %v2507_v27 = vshrl.u32 %v1899_v25, 16  ;;  %v2510_v29 = vshll.u32 %v1899_v25, 16  ;;  %v7586_v7 = vsel %vm935_vm1, %v2493_v46, %v2496_v37  ;;  %v1906_v14 = vor.u32 %v1905_v19, %v1901_v43 }
  0xb3   : > { %3499 = vmatprep.mubr.bf16.mxu1 %v7561_v23  ;;  %v1910_v34 = vrot.slane %v1908_v40, 1  ;;  %v2534_v38 = vor.u32 %v2533_v28, %v2532_v55  ;;  %v2501_v61 = vrot.slane %v2499_v44, 3  ;;  %v2504_v56 = vrot.slane %v2502_v0, 4 }
  0xb4   : > { %v2509_v57 = vrot.slane %v2507_v27, 3  ;;  %v2512_v58 = vrot.slane %v2510_v29, 4  ;;  %v2535_v20 = vrot.slane %v1912_v50, 3  ;;  %v2536_v63 = vrot.slane %v1908_v40, 4 }
  0xb5   : > { %v1911_v62 = vsel %vm613_vm0, %v1906_v14, %v1910_v34  ;;  %v1914_v49 = vor.u32 %v1912_v50, %v1910_v34  ;;  %v2505_v24 = vor.u32 %v2504_v56, %v2501_v61  ;;  %v750_v13 = vshrl.u32 %v599_v60, 16 }
  0xb6   : > { %v2513_v3 = vor.u32 %v2512_v58, %v2509_v57  ;;  %v2540_v1 = vshrl.u32 %v1911_v62, 16  ;;  %v2543_v54 = vshll.u32 %v1911_v62, 16  ;;  %v2537_v8 = vor.u32 %v2536_v63, %v2535_v20  ;;  %v601_v20 = vld [vmem:[#allocation2 + $0xa0] sm:$0xff] }
  0xb7   : > { %v2548_v11 = vshrl.u32 %v1914_v49, 16  ;;  %v2551_v23 = vshll.u32 %v1914_v49, 16  ;;  %v752_v51 = vshll.u32 %v599_v60, 16  ;;  %v757_v18 = vshll.u32 %v600_v5, 16 }
  0xb8   : > { %v2514_v15 = vsel %vm935_vm1, %v2505_v24, %v2513_v3  ;;  %v2542_v9 = vrot.slane %v2540_v1, 3  ;;  %v2545_v26 = vrot.slane %v2543_v54, 4  ;;  %3042 = vmatmul.mubr.bf16.gmra.mrb[36].mxu0 %v7568_v32  ;;  %v7593_v10 = vsel %vm935_vm1, %v2534_v38, %v2537_v8  ;;  %v6956_v32 = vld [vmem:[#allocation2 + $0xe0] sm:$0xff] }
  0xb9   : > { %v2550_v39 = vrot.slane %v2548_v11, 3  ;;  %v2553_v2 = vrot.slane %v2551_v23, 4  ;;  %3049 = vmatprep.mubr.bf16.mxu0 %v2473_v17  ;;  %v754_v30 = vrot.slane %v752_v51, 1  ;;  %v761_v36 = vshrl.u32 %v600_v5, 16  ;;  %v6957_v17 = vld [vmem:[#allocation2 + $0xe8] sm:$0xff] }
  0xba   : > { %3500 = vmatmul.mubr.bf16.gmra.mrb[48].mxu1 %v7553_v12  ;;  %v2546_v4 = vor.u32 %v2545_v26, %v2542_v9  ;;  %v1305_v31 = vrot.slane %v750_v13, 3  ;;  %v759_v59 = vrot.slane %v757_v18, 1  ;;  %v1306_v22 = vrot.slane %v752_v51, 4 }
  0xbb   : > { %v2554_v33 = vor.u32 %v2553_v2, %v2550_v39  ;;  %v1309_v47 = vrot.slane %v757_v18, 4  ;;  %v755_v41 = vor.u32 %v754_v30, %v750_v13  ;;  %v1308_v42 = vrot.slane %v761_v36, 3 }
  0xbc   : > { %v1916_v21 = vshrl.u32 %v6956_v32, 16  ;;  %v1918_v16 = vshll.u32 %v6956_v32, 16  ;;  %v763_v43 = vor.u32 %v761_v36, %v759_v59  ;;  %v1307_v45 = vor.u32 %v1306_v22, %v1305_v31 }
  0xbd   : > { %v2555_v53 = vsel %vm935_vm1, %v2546_v4, %v2554_v33  ;;  %v1923_v46 = vshll.u32 %v6957_v17, 16  ;;  %v760_v12 = vsel %vm613_vm0, %v755_v41, %v759_v59  ;;  %v1310_v48 = vor.u32 %v1309_v47, %v1308_v42  ;;  %v6958_v59 = vld [vmem:[#allocation2 + $0xf0] sm:$0xff] }
  0xbe   : > { %v1920_v25 = vrot.slane %v1918_v16, 1  ;;  %v1927_v37 = vshrl.u32 %v6957_v17, 16  ;;  %v1313_v6 = vshrl.u32 %v760_v12, 16  ;;  %v1316_v40 = vshll.u32 %v760_v12, 16 }
  0xbf   : > { %v1321_v50 = vshrl.u32 %v763_v43, 16  ;;  %v1324_v52 = vshll.u32 %v763_v43, 16  ;;  %v1311_v19 = vsel %vm935_vm1, %v1307_v45, %v1310_v48  ;;  %v1925_v28 = vrot.slane %v1923_v46, 1  ;;  %v6959_v43 = vld [vmem:[#allocation2 + $0xf8] sm:$0xff] }
  0xc0   : > { %v1921_v55 = vor.u32 %v1920_v25, %v1916_v21  ;;  %v2573_v44 = vrot.slane %v1916_v21, 3  ;;  %3050 = vmatmul.mubr.bf16.gmra.mrb[40].mxu0 %v7579_v35  ;;  %v1315_v0 = vrot.slane %v1313_v6, 3  ;;  %v1318_v27 = vrot.slane %v1316_v40, 4  ;;  %v602_v35 = vld [vmem:[#allocation2 + $0xa8] sm:$0xff] }
  0xc1   : > { %v1323_v29 = vrot.slane %v1321_v50, 3  ;;  %v1326_v14 = vrot.slane %v1324_v52, 4  ;;  %3057 = vmatprep.mubr.bf16.mxu0 %v2514_v15  ;;  %v1929_v38 = vor.u32 %v1927_v37, %v1925_v28  ;;  %v2574_v61 = vrot.slane %v1918_v16, 4 }
  0xc2   : > { %v1926_v34 = vsel %vm613_vm0, %v1921_v55, %v1925_v28  ;;  %v2576_v56 = vrot.slane %v1927_v37, 3  ;;  %v1319_v57 = vor.u32 %v1318_v27, %v1315_v0  ;;  %v2577_v3 = vrot.slane %v1923_v46, 4 }
  0xc3   : > { %v1327_v58 = vor.u32 %v1326_v14, %v1323_v29  ;;  %v2581_v62 = vshrl.u32 %v1926_v34, 16  ;;  %v2584_v49 = vshll.u32 %v1926_v34, 16  ;;  %v2589_v63 = vshrl.u32 %v1929_v38, 16 }
  0xc4   : > { %v2592_v60 = vshll.u32 %v1929_v38, 16  ;;  %v2575_v24 = vor.u32 %v2574_v61, %v2573_v44  ;;  %v765_v11 = vshrl.u32 %v601_v20, 16  ;;  %v2578_v13 = vor.u32 %v2577_v3, %v2576_v56  ;;  %v603_v38 = vld [vmem:[#allocation2 + $0xb0] sm:$0xff] }
  0xc5   : > { %v1328_v1 = vsel %vm935_vm1, %v1319_v57, %v1327_v58  ;;  %v2583_v54 = vrot.slane %v2581_v62, 3  ;;  %v2586_v5 = vrot.slane %v2584_v49, 4  ;;  %v2591_v23 = vrot.slane %v2589_v63, 3  ;;  %v604_v62 = vld [vmem:[#allocation2 + $0xb8] sm:$0xff] }
  0xc6   : > { %3507 = vmatprep.mubr.bf16.mxu1 %v1328_v1  ;;  %v2594_v8 = vrot.slane %v2592_v60, 4  ;;  %v767_v15 = vshll.u32 %v601_v20, 16  ;;  %v772_v26 = vshll.u32 %v602_v35, 16  ;;  %v776_v51 = vshrl.u32 %v602_v35, 16 }
  0xc7   : > { %3508 = vmatmul.mubr.bf16.gmra.mrb[52].mxu1 %v1311_v19  ;;  %v2587_v9 = vor.u32 %v2586_v5, %v2583_v54  ;;  %v1346_v39 = vrot.slane %v765_v11, 3  ;;  %v7603_v18 = vsel %vm935_vm1, %v2575_v24, %v2578_v13  ;;  %v1931_v22 = vshrl.u32 %v6958_v59, 16 }
  0xc8   : > { %v2595_v2 = vor.u32 %v2594_v8, %v2591_v23  ;;  %v769_v4 = vrot.slane %v767_v15, 1  ;;  %v1347_v30 = vrot.slane %v767_v15, 4  ;;  %3058 = vmatmul.mubr.bf16.gmra.mrb[44].mxu0 %v7586_v7  ;;  %v774_v36 = vrot.slane %v772_v26, 1 }
  0xc9   : > { %v1349_v31 = vrot.slane %v776_v51, 3  ;;  %v1350_v33 = vrot.slane %v772_v26, 4  ;;  %3065 = vmatprep.mubr.bf16.mxu0 %v2555_v53  ;;  %v1933_v32 = vshll.u32 %v6958_v59, 16  ;;  %v1938_v45 = vshll.u32 %v6959_v43, 16 }
  0xca   : > { %v2596_v47 = vsel %vm935_vm1, %v2587_v9, %v2595_v2  ;;  %v770_v41 = vor.u32 %v769_v4, %v765_v11  ;;  %v1348_v42 = vor.u32 %v1347_v30, %v1346_v39  ;;  %v778_v21 = vor.u32 %v776_v51, %v774_v36  ;;  %v6960_v30 = vld [vmem:[#allocation2 + $0x100] sm:$0xff] }
  0xcb   : > { %v1351_v16 = vor.u32 %v1350_v33, %v1349_v31  ;;  %v1942_v17 = vshrl.u32 %v6959_v43, 16  ;;  %v1935_v12 = vrot.slane %v1933_v32, 1  ;;  %v2614_v7 = vrot.slane %v1931_v22, 3 }
  0xcc   : > { %v775_v46 = vsel %vm613_vm0, %v770_v41, %v774_v36  ;;  %v2615_v48 = vrot.slane %v1933_v32, 4  ;;  %v1362_v6 = vshrl.u32 %v778_v21, 16  ;;  %v1365_v40 = vshll.u32 %v778_v21, 16 }
  0xcd   : > { %v1354_v25 = vshrl.u32 %v775_v46, 16  ;;  %v1357_v37 = vshll.u32 %v775_v46, 16  ;;  %v1352_v53 = vsel %vm935_vm1, %v1348_v42, %v1351_v16  ;;  %v1936_v50 = vor.u32 %v1935_v12, %v1931_v22 }
  0xce   : > { %v1940_v52 = vrot.slane %v1938_v45, 1  ;;  %v2616_v19 = vor.u32 %v2615_v48, %v2614_v7  ;;  %v1364_v44 = vrot.slane %v1362_v6, 3  ;;  %v1367_v0 = vrot.slane %v1365_v40, 4 }
  0xcf   : > { %v1356_v55 = vrot.slane %v1354_v25, 3  ;;  %v1359_v28 = vrot.slane %v1357_v37, 4  ;;  %v2617_v14 = vrot.slane %v1942_v17, 3  ;;  %v2618_v34 = vrot.slane %v1938_v45, 4 }
  0xd0   : > { %v1941_v27 = vsel %vm613_vm0, %v1936_v50, %v1940_v52  ;;  %v1944_v29 = vor.u32 %v1942_v17, %v1940_v52  ;;  %3066 = vmatmul.mubr.bf16.gmra.mrb[48].mxu0 %v7593_v10  ;;  %v1368_v56 = vor.u32 %v1367_v0, %v1364_v44  ;;  %v780_v60 = vshrl.u32 %v603_v38, 16 }
  0xd1   : > { %v1360_v61 = vor.u32 %v1359_v28, %v1356_v55  ;;  %v2622_v57 = vshrl.u32 %v1941_v27, 16  ;;  %v2625_v58 = vshll.u32 %v1941_v27, 16  ;;  %3073 = vmatprep.mubr.bf16.mxu0 %v2596_v47  ;;  %v2619_v63 = vor.u32 %v2618_v34, %v2617_v14  ;;  %v6961_v47 = vld [vmem:[#allocation2 + $0x108] sm:$0xff]  ;;  %v605_v27 = vld [vmem:[#allocation2 + $0xc0] sm:$0xff] }
  0xd2   : > { %v2630_v49 = vshrl.u32 %v1944_v29, 16  ;;  %v2633_v20 = vshll.u32 %v1944_v29, 16  ;;  %v782_v1 = vshll.u32 %v603_v38, 16  ;;  %v787_v11 = vshll.u32 %v604_v62, 16 }
  0xd3   : > { %v1369_v24 = vsel %vm935_vm1, %v1360_v61, %v1368_v56  ;;  %v2624_v3 = vrot.slane %v2622_v57, 3  ;;  %v2627_v35 = vrot.slane %v2625_v58, 4  ;;  %v2620_v10 = vsel %vm935_vm1, %v2616_v19, %v2619_v63  ;;  %v606_v61 = vld [vmem:[#allocation2 + $0xc8] sm:$0xff] }
  0xd4   : > { %3515 = vmatprep.mubr.bf16.mxu1 %v1369_v24  ;;  %v2632_v54 = vrot.slane %v2630_v49, 3  ;;  %v2635_v5 = vrot.slane %v2633_v20, 4  ;;  %v784_v8 = vrot.slane %v782_v1, 1  ;;  %v791_v13 = vshrl.u32 %v604_v62, 16 }
  0xd5   : > { %3516 = vmatmul.mubr.bf16.gmra.mrb[56].mxu1 %v1352_v53  ;;  %v2628_v23 = vor.u32 %v2627_v35, %v2624_v3  ;;  %v1387_v15 = vrot.slane %v780_v60, 3  ;;  %v789_v26 = vrot.slane %v787_v11, 1  ;;  %v1388_v51 = vrot.slane %v782_v1, 4 }
  0xd6   : > { %v2636_v9 = vor.u32 %v2635_v5, %v2632_v54  ;;  %v1391_v39 = vrot.slane %v787_v11, 4  ;;  %v785_v2 = vor.u32 %v784_v8, %v780_v60  ;;  %v1390_v4 = vrot.slane %v791_v13, 3 }
  0xd7   : > { %v1946_v36 = vshrl.u32 %v6960_v30, 16  ;;  %v1948_v31 = vshll.u32 %v6960_v30, 16  ;;  %v793_v59 = vor.u32 %v791_v13, %v789_v26  ;;  %v1389_v22 = vor.u32 %v1388_v51, %v1387_v15 }
  0xd8   : > { %v2637_v33 = vsel %vm935_vm1, %v2628_v23, %v2636_v9  ;;  %v1953_v41 = vshll.u32 %v6961_v47, 16  ;;  %3074 = vmatmul.mubr.bf16.gmra.mrb[52].mxu0 %v7603_v18  ;;  %v790_v42 = vsel %vm613_vm0, %v785_v2, %v789_v26  ;;  %v1392_v32 = vor.u32 %v1391_v39, %v1390_v4  ;;  %v6962_v9 = vld [vmem:[#allocation2 + $0x10] sm:$0xff]  ;;  %v6963_v2 = vld [vmem:[#allocation2 + $0x18] sm:$0xff] }
  0xd9   : > { %v1950_v21 = vrot.slane %v1948_v31, 1  ;;  %v1957_v16 = vshrl.u32 %v6961_v47, 16  ;;  %3081 = vmatprep.mubr.bf16.mxu0 %v2637_v33  ;;  %v1395_v43 = vshrl.u32 %v790_v42, 16  ;;  %v1398_v45 = vshll.u32 %v790_v42, 16 }
  0xda   : > { %v1403_v17 = vshrl.u32 %v793_v59, 16  ;;  %v1406_v46 = vshll.u32 %v793_v59, 16  ;;  %v1393_v12 = vsel %vm935_vm1, %v1389_v22, %v1392_v32  ;;  %v1955_v48 = vrot.slane %v1953_v41, 1  ;;  %v6965_v59 = vld [vmem:[#allocation2 + $0x28] sm:$0xff] }
  0xdb   : > { %v1951_v7 = vor.u32 %v1950_v21, %v1946_v36  ;;  %v2655_v25 = vrot.slane %v1946_v36, 3  ;;  %v1397_v37 = vrot.slane %v1395_v43, 3  ;;  %v1400_v6 = vrot.slane %v1398_v45, 4 }
  0xdc   : > { %v1405_v40 = vrot.slane %v1403_v17, 3  ;;  %v1408_v53 = vrot.slane %v1406_v46, 4  ;;  %v1959_v50 = vor.u32 %v1957_v16, %v1955_v48  ;;  %v2656_v52 = vrot.slane %v1948_v31, 4  ;;  %v6964_v31 = vld [vmem:[#allocation2 + $0x20] sm:$0xff] }
  0xdd   : > { %v1956_v18 = vsel %vm613_vm0, %v1951_v7, %v1955_v48  ;;  %v2658_v19 = vrot.slane %v1957_v16, 3  ;;  %v1401_v55 = vor.u32 %v1400_v6, %v1397_v37  ;;  %v2659_v38 = vrot.slane %v1953_v41, 4 }
  0xde   : > { %v1409_v28 = vor.u32 %v1408_v53, %v1405_v40  ;;  %v2663_v44 = vshrl.u32 %v1956_v18, 16  ;;  %v2666_v0 = vshll.u32 %v1956_v18, 16  ;;  %v2671_v29 = vshrl.u32 %v1959_v50, 16 }
  0xdf   : > { %v2674_v14 = vshll.u32 %v1959_v50, 16  ;;  %v2657_v34 = vor.u32 %v2656_v52, %v2655_v25  ;;  %v795_v62 = vshrl.u32 %v605_v27, 16  ;;  %v2660_v63 = vor.u32 %v2659_v38, %v2658_v19 }
  0xe0   : > { %v1410_v56 = vsel %vm935_vm1, %v1401_v55, %v1409_v28  ;;  %v2665_v57 = vrot.slane %v2663_v44, 3  ;;  %v2668_v58 = vrot.slane %v2666_v0, 4  ;;  %3082 = vmatmul.mubr.bf16.gmra.mrb[56].mxu0 %v2620_v10  ;;  %v2673_v49 = vrot.slane %v2671_v29, 3  ;;  %v7625_v44 = vld [vmem:[#allocation2 + $0xd0] sm:$0xff] }
  0xe1   : > { %3523 = vmatprep.mubr.bf16.mxu1 %v1410_v56  ;;  %v2676_v20 = vrot.slane %v2674_v14, 4  ;;  %v797_v60 = vshll.u32 %v605_v27, 16  ;;  %v802_v3 = vshll.u32 %v606_v61, 16  ;;  %v806_v35 = vshrl.u32 %v606_v61, 16 }
  0xe2   : > { %3524 = vmatmul.mubr.bf16.gmra.mrb[60].mxu1 %v1393_v12  ;;  %v2669_v24 = vor.u32 %v2668_v58, %v2665_v57  ;;  %v1428_v1 = vrot.slane %v795_v62, 3  ;;  %v2661_v5 = vsel %vm935_vm1, %v2657_v34, %v2660_v63  ;;  %v1992_v10 = vrot.slane %v6962_v9, 1  ;;  %v7627_v34 = vld [vmem:[#allocation2 + $0xd8] sm:$0xff] }
  0xe3   : > { %v2677_v54 = vor.u32 %v2676_v20, %v2673_v49  ;;  %v799_v11 = vrot.slane %v797_v60, 1  ;;  %v1429_v23 = vrot.slane %v797_v60, 4  ;;  %v804_v8 = vrot.slane %v802_v3, 1 }
  0xe4   : > { %v1431_v13 = vrot.slane %v806_v35, 3  ;;  %v1432_v15 = vrot.slane %v802_v3, 4  ;;  %v1993_v4 = vrot.slane %v6963_v2, 1  ;;  %v1995_v33 = vrot.slane %v6964_v31, 1 }
  0xe5   : > { %v2678_v26 = vsel %vm935_vm1, %v2669_v24, %v2677_v54  ;;  %v800_v51 = vor.u32 %v799_v11, %v795_v62  ;;  %v1430_v39 = vor.u32 %v1429_v23, %v1428_v1  ;;  %v808_v30 = vor.u32 %v806_v35, %v804_v8  ;;  %v6922_v1 = vld [vmem:[%s8649_s1 + $0x180] sm:$0xff]   ;;  %v6966_v11 = vld [vmem:[#allocation2 + $0x30] sm:$0xff] }
  0xe6   : > { %3089 = vmatprep.mubr.bf16.mxu0 %v2678_v26  ;;  %v1433_v36 = vor.u32 %v1432_v15, %v1431_v13  ;;  %v1996_v22 = vrot.slane %v6965_v59, 1  ;;  %v1994_v41 = vsel %vm886_vm2, %v1992_v10, %v1993_v4  ;;  %v2073_v42 = vshrl.u32 %v1993_v4, 16  ;;  %v6923_v13 = vld [vmem:[%s8649_s1 + $0x1c8] sm:$0xff]   ;;  %v6967_v10 = vld [vmem:[#allocation2 + $0x38] sm:$0xff] }
  0xe7   : > { %v805_v47 = vsel %vm613_vm0, %v800_v51, %v804_v8  ;;  %v2076_v32 = vshll.u32 %v1993_v4, 16  ;;  %v1444_v43 = vshrl.u32 %v808_v30, 16  ;;  %v1447_v45 = vshll.u32 %v808_v30, 16  ;;  %v6968_v4 = vld [vmem:[#allocation2 + $0x40] sm:$0xff] }
  0xe8   : > { %v1436_v21 = vshrl.u32 %v805_v47, 16  ;;  %v1439_v16 = vshll.u32 %v805_v47, 16  ;;  %3090 = vmatmul.mubr.bf16.gmra.mrb[60].mxu0 %v2661_v5  ;;  %v1434_v17 = vsel %vm935_vm1, %v1430_v39, %v1433_v36  ;;  %v2065_v46 = vshrl.u32 %v1994_v41, 16  ;;  %v6924_v47 = vld [vmem:[%s8649_s1 + $0x188] sm:$0xff]  }
  0xe9   : > { %v2068_v12 = vshll.u32 %v1994_v41, 16  ;;  %v2075_v7 = vrot.slane %v2073_v42, 3  ;;  %v1446_v37 = vrot.slane %v1444_v43, 3  ;;  %v1449_v6 = vrot.slane %v1447_v45, 4 }
  0xea   : > { %v1438_v48 = vrot.slane %v1436_v21, 3  ;;  %v1441_v25 = vrot.slane %v1439_v16, 4  ;;  %v2067_v40 = vrot.slane %v2065_v46, 3  ;;  %v2078_v18 = vrot.slane %v2076_v32, 4 }
  0xeb   : > { %v2070_v53 = vrot.slane %v2068_v12, 4  ;;  %v1997_v50 = vsel %vm886_vm2, %v1995_v33, %v1996_v22  ;;  %v1450_v19 = vor.u32 %v1449_v6, %v1446_v37  ;;  %v2114_v29 = vshrl.u32 %v1996_v22, 16  ;;  %v610_v37 = vld [vmem:[#allocation2 + $0xe8] sm:$0xff] }
  0xec   : > { %v1442_v52 = vor.u32 %v1441_v25, %v1438_v48  ;;  %v2106_v55 = vshrl.u32 %v1997_v50, 16  ;;  %v2109_v28 = vshll.u32 %v1997_v50, 16  ;;  %v2079_v27 = vor.u32 %v2078_v18, %v2075_v7  ;;  %v609_v25 = vld [vmem:[#allocation2 + $0xe0] sm:$0xff] }
  0xed   : > { %v2071_v0 = vor.u32 %v2070_v53, %v2067_v40  ;;  %v2117_v14 = vshll.u32 %v1996_v22, 16  ;;  %v810_v57 = vshrl.u32 %v7625_v44, 16  ;;  %v2116_v62 = vrot.slane %v2114_v29, 3 }
  0xee   : > { %v1451_v38 = vsel %vm935_vm1, %v1442_v52, %v1450_v19  ;;  %v2108_v61 = vrot.slane %v2106_v55, 3  ;;  %v2111_v56 = vrot.slane %v2109_v28, 4  ;;  %v812_v20 = vshll.u32 %v7625_v44, 16  ;;  %v6969_v19 = vld [vmem:[#allocation2 + $0x48] sm:$0xff]  ;;  %v6926_v28 = vld [vmem:[%s8649_s1 + $0x190] sm:$0xff]  }
  0xef   : > { %3531 = vmatprep.mubr.bf16.mxu1 %v1451_v38  ;;  %v7632_v58 = vsel %vm935_vm1, %v2071_v0, %v2079_v27  ;;  %v2119_v49 = vrot.slane %v2117_v14, 4  ;;  %v817_v60 = vshll.u32 %v7627_v34, 16  ;;  %v821_v24 = vshrl.u32 %v7627_v34, 16 }
  0xf0   : > { %3532 = vmatmul.mubr.bf16.gmra.mrb[64].mxu1 %v1434_v17  ;;  %6561 = vmatprep.mubr.bf16.mxu0 %v7632_v58  ;;  %v2112_v63 = vor.u32 %v2111_v56, %v2108_v61  ;;  %v1469_v3 = vrot.slane %v810_v57, 3  ;;  %v814_v54 = vrot.slane %v812_v20, 1  ;;  %v1470_v5 = vrot.slane %v812_v20, 4  ;;  %v6925_v17 = vld [vmem:[%s8649_s1 + $0x1d0] sm:$0xff]  }
  0xf1   : > { %v2120_v35 = vor.u32 %v2119_v49, %v2116_v62  ;;  %v1998_v23 = vrot.slane %v6966_v11, 1  ;;  %v819_v8 = vrot.slane %v817_v60, 1  ;;  %v1472_v15 = vrot.slane %v821_v24, 3  ;;  %v6927_v49 = vld [vmem:[%s8649_s1 + $0x1d8] sm:$0xff]  }
  0xf2   : > { %v1473_v9 = vrot.slane %v817_v60, 4  ;;  %v1999_v26 = vrot.slane %v6967_v10, 1  ;;  %v815_v39 = vor.u32 %v814_v54, %v810_v57  ;;  %v1471_v2 = vor.u32 %v1470_v5, %v1469_v3  ;;  %v6928_v5 = vld [vmem:[%s8649_s1 + $0x198] sm:$0xff]  }
  0xf3   : > { %v7645_v51 = vsel %vm935_vm1, %v2112_v63, %v2120_v35  ;;  %v2001_v30 = vrot.slane %v6968_v4, 1  ;;  %v823_v36 = vor.u32 %v821_v24, %v819_v8  ;;  %v2002_v55 = vrot.slane %v6969_v19, 1 }
  0xf4   : > { %6562 = vmatmul.mubr.bf16.vlgmr.msra.gmra.mrb[64].mxu0 %v7645_v51  ;;  %v1474_v31 = vor.u32 %v1473_v9, %v1472_v15  ;;  %v2000_v33 = vsel %vm886_vm2, %v1998_v23, %v1999_v26  ;;  %v2155_v59 = vshrl.u32 %v1999_v26, 16  ;;  %v820_v22 = vsel %vm613_vm0, %v815_v39, %v819_v8  ;;  %v6930_v15 = vld [vmem:[%s8649_s1 + $0x1e0] sm:$0xff]  }
  0xf5   : > { %6410 = vmatpush3.bf16.msra.mxu0 %v6922_v1  ;;  %v2147_v41 = vshrl.u32 %v2000_v33, 16  ;;  %v2150_v42 = vshll.u32 %v2000_v33, 16  ;;  %v2158_v32 = vshll.u32 %v1999_v26, 16  ;;  %v1477_v21 = vshrl.u32 %v820_v22, 16 }
  0xf6   : > { %v1480_v16 = vshll.u32 %v820_v22, 16  ;;  %v1485_v43 = vshrl.u32 %v823_v36, 16  ;;  %v1488_v45 = vshll.u32 %v823_v36, 16  ;;  %6411 = vmatprep.subr.bf16.mxu0 %v6923_v13  ;;  %v1475_v46 = vsel %vm935_vm1, %v1471_v2, %v1474_v31  ;;  %v6970_v22 = vld [vmem:[#allocation2 + $0x50] sm:$0xff] }
  0xf7   : > { %v2149_v12 = vrot.slane %v2147_v41, 3  ;;  %v2152_v7 = vrot.slane %v2150_v42, 4  ;;  %v2157_v48 = vrot.slane %v2155_v59, 3  ;;  %v1479_v6 = vrot.slane %v1477_v21, 3  ;;  %v6931_v41 = vld [vmem:[%s8649_s1 + $0x1a0] sm:$0xff]  }
  0xf8   : > { %v1482_v40 = vrot.slane %v1480_v16, 4  ;;  %v1487_v53 = vrot.slane %v1485_v43, 3  ;;  %v1490_v18 = vrot.slane %v1488_v45, 4  ;;  %v2160_v52 = vrot.slane %v2158_v32, 4  ;;  %v6932_v43 = vld [vmem:[%s8649_s1 + $0x1e8] sm:$0xff]  }
  0xf9   : > { %6412 = vmatpush3.bf16.msra.mxu0 %v6924_v47  ;;  %v2153_v50 = vor.u32 %v2152_v7, %v2149_v12  ;;  %v825_v0 = vshrl.u32 %v609_v25, 16  ;;  %v827_v14 = vshll.u32 %v609_v25, 16  ;;  %v832_v38 = vshll.u32 %v610_v37, 16  ;;  %v6972_v7 = vld [vmem:[#allocation2 + $0x60] sm:$0xff] }
  0xfa   : > { %v1483_v27 = vor.u32 %v1482_v40, %v1479_v6  ;;  %v1491_v29 = vor.u32 %v1490_v18, %v1487_v53  ;;  %6413 = vmatprep.subr.bf16.mxu0 %v6925_v17  ;;  %v2161_v61 = vor.u32 %v2160_v52, %v2157_v48  ;;  %v2003_v56 = vsel %vm886_vm2, %v2001_v30, %v2002_v55  ;;  %v6973_v40 = vld [vmem:[#allocation2 + $0x68] sm:$0xff] }
  0xfb   : > { %v2196_v57 = vshrl.u32 %v2002_v55, 16  ;;  %v2199_v62 = vshll.u32 %v2002_v55, 16  ;;  %v2188_v63 = vshrl.u32 %v2003_v56, 16  ;;  %v2191_v60 = vshll.u32 %v2003_v56, 16  ;;  %v6933_v55 = vld [vmem:[%s8649_s1 + $0x1a8] sm:$0xff]  }
  0xfc   : > { %v1492_v20 = vsel %vm935_vm1, %v1483_v27, %v1491_v29  ;;  %v829_v24 = vrot.slane %v827_v14, 1  ;;  %v7666_v3 = vsel %vm935_vm1, %v2153_v50, %v2161_v61  ;;  %v834_v54 = vrot.slane %v832_v38, 1 }
  0xfd   : > { %3539 = vmatprep.mubr.bf16.mxu1 %v1492_v20  ;;  %v2198_v35 = vrot.slane %v2196_v57, 3  ;;  %v2201_v1 = vrot.slane %v2199_v62, 4  ;;  %6414 = vmatpush3.bf16.msra.mxu0 %v6926_v28  ;;  %v2190_v11 = vrot.slane %v2188_v63, 3  ;;  %v2193_v23 = vrot.slane %v2191_v60, 4  ;;  %v7695_v62 = vld [vmem:[#allocation2 + $0xf0] sm:$0xff] }
  0xfe   : > { %3540 = vmatmul.mubr.bf16.gmra.mrb[68].mxu1 %v1475_v46  ;;  %6565 = vmatprep.mubr.bf16.mxu0 %v7666_v3  ;;  %v830_v8 = vor.u32 %v829_v24, %v825_v0  ;;  %v836_v13 = vshrl.u32 %v610_v37, 16  ;;  %v1510_v10 = vrot.slane %v825_v0, 3  ;;  %v1511_v26 = vrot.slane %v827_v14, 4  ;;  %v6971_v46 = vld [vmem:[#allocation2 + $0x58] sm:$0xff]  ;;  %v6934_v14 = vld [vmem:[%s8649_s1 + $0x1f0] sm:$0xff]  }
  0xff   : > { %v2202_v9 = vor.u32 %v2201_v1, %v2198_v35  ;;  %6415 = vmatprep.subr.bf16.mxu0 %v6927_v49  ;;  %v1514_v39 = vrot.slane %v832_v38, 4  ;;  %v2194_v2 = vor.u32 %v2193_v23, %v2190_v11  ;;  %v2004_v47 = vrot.slane %v6970_v22, 1  ;;  %v7698_v24 = vld [vmem:[#allocation2 + $0xf8] sm:$0xff]  ;;  %v6935_v11 = vld [vmem:[%s8649_s1 + $0x1b0] sm:$0xff]  }
 0x100   : > { %v835_v4 = vsel %vm613_vm0, %v830_v8, %v834_v54  ;;  %v838_v30 = vor.u32 %v836_v13, %v834_v54  ;;  %v1513_v36 = vrot.slane %v836_v13, 3  ;;  %v1512_v59 = vor.u32 %v1511_v26, %v1510_v10 }
 0x101   : > { %v1518_v31 = vshrl.u32 %v835_v4, 16  ;;  %v1521_v33 = vshll.u32 %v835_v4, 16  ;;  %6416 = vmatpush3.bf16.msra.mxu0 %v6928_v5  ;;  %v7680_v42 = vsel %vm935_vm1, %v2194_v2, %v2202_v9  ;;  %v2005_v12 = vrot.slane %v6971_v46, 1  ;;  %v6936_v9 = vld [vmem:[%s8649_s1 + $0x1f8] sm:$0xff]  }
 0x102   : > { %v1526_v32 = vshrl.u32 %v838_v30, 16  ;;  %v1529_v21 = vshll.u32 %v838_v30, 16  ;;  %v1515_v16 = vor.u32 %v1514_v39, %v1513_v36  ;;  %6417 = vmatprep.subr.bf16.mxu0 %v6930_v15  ;;  %6566 = vmatmul.mubr.bf16.gmra.mrb[68].mxu0 %v7680_v42  ;;  %v2007_v48 = vrot.slane %v6972_v7, 1 }
 0x103   : > { %v1520_v45 = vrot.slane %v1518_v31, 3  ;;  %v1523_v17 = vrot.slane %v1521_v33, 4  ;;  %v2008_v53 = vrot.slane %v6973_v40, 1  ;;  %v2006_v50 = vsel %vm886_vm2, %v2004_v47, %v2005_v12 }
 0x104   : > { %v1528_v25 = vrot.slane %v1526_v32, 3  ;;  %v1531_v37 = vrot.slane %v1529_v21, 4  ;;  %v1516_v6 = vsel %vm935_vm1, %v1512_v59, %v1515_v16  ;;  %v2237_v52 = vshrl.u32 %v2005_v12, 16  ;;  %v6974_v16 = vld [vmem:[#allocation2 + $0x70] sm:$0xff] }
 0x105   : > { %v1524_v18 = vor.u32 %v1523_v17, %v1520_v45  ;;  %v2240_v19 = vshll.u32 %v2005_v12, 16  ;;  %6418 = vmatpush3.bf16.msra.mxu0 %v6931_v41  ;;  %v2229_v0 = vshrl.u32 %v2006_v50, 16  ;;  %v2232_v27 = vshll.u32 %v2006_v50, 16  ;;  %v6937_v41 = vld [vmem:[%s8649_s1 + $0x1b8] sm:$0xff]  }
 0x106   : > { %v1532_v28 = vor.u32 %v1531_v37, %v1528_v25  ;;  %v2009_v29 = vsel %vm886_vm2, %v2007_v48, %v2008_v53  ;;  %6419 = vmatprep.subr.bf16.mxu0 %v6932_v43  ;;  %v2239_v38 = vrot.slane %v2237_v52, 3  ;;  %v2278_v60 = vshrl.u32 %v2008_v53, 16  ;;  %v6975_v45 = vld [vmem:[#allocation2 + $0x78] sm:$0xff]  ;;  %v6976_v48 = vld [vmem:[#allocation2 + $0x80] sm:$0xff] }
 0x107   : > { %v2242_v61 = vrot.slane %v2240_v19, 4  ;;  %v2270_v56 = vshrl.u32 %v2009_v29, 16  ;;  %v2273_v57 = vshll.u32 %v2009_v29, 16  ;;  %v2231_v20 = vrot.slane %v2229_v0, 3 }
 0x108   : > { %v1533_v49 = vsel %vm935_vm1, %v1524_v18, %v1532_v28  ;;  %v2234_v63 = vrot.slane %v2232_v27, 4  ;;  %v2281_v5 = vshll.u32 %v2008_v53, 16  ;;  %v2280_v8 = vrot.slane %v2278_v60, 3  ;;  %v7724_v60 = vld [vmem:[#allocation2 + $0x20] sm:$0xff] }
 0x109   : > { %3547 = vmatprep.mubr.bf16.mxu1 %v1533_v49  ;;  %v2243_v35 = vor.u32 %v2242_v61, %v2239_v38  ;;  %v2272_v1 = vrot.slane %v2270_v56, 3  ;;  %v2275_v54 = vrot.slane %v2273_v57, 4  ;;  %6420 = vmatpush3.bf16.msra.mxu0 %v6933_v55  ;;  %v840_v13 = vshrl.u32 %v7695_v62, 16 }
 0x10a   : > { %3548 = vmatmul.mubr.bf16.gmra.mrb[72].mxu1 %v1516_v6  ;;  %v2235_v23 = vor.u32 %v2234_v63, %v2231_v20  ;;  %v842_v15 = vshll.u32 %v7695_v62, 16  ;;  %6421 = vmatprep.subr.bf16.mxu0 %v6934_v14  ;;  %v2283_v26 = vrot.slane %v2281_v5, 4  ;;  %v847_v39 = vshll.u32 %v7698_v24, 16  ;;  %v6977_v20 = vld [vmem:[#allocation2 + $0x88] sm:$0xff] }
 0x10b   : > { %v2276_v10 = vor.u32 %v2275_v54, %v2272_v1  ;;  %v851_v2 = vshrl.u32 %v7698_v24, 16  ;;  %v1551_v36 = vrot.slane %v840_v13, 3  ;;  %v2010_v43 = vrot.slane %v6974_v16, 1  ;;  %v6978_v54 = vld [vmem:[#allocation2] sm:$0xff] }
 0x10c   : > { %v7711_v4 = vsel %vm935_vm1, %v2235_v23, %v2243_v35  ;;  %v844_v30 = vrot.slane %v842_v15, 1  ;;  %v1552_v31 = vrot.slane %v842_v15, 4  ;;  %v2284_v33 = vor.u32 %v2283_v26, %v2280_v8 }
 0x10d   : > { %6569 = vmatprep.mubr.bf16.mxu0 %v7711_v4  ;;  %v849_v59 = vrot.slane %v847_v39, 1  ;;  %v1554_v22 = vrot.slane %v851_v2, 3  ;;  %v1555_v47 = vrot.slane %v847_v39, 4  ;;  %6422 = vmatpush3.bf16.msra.mxu0 %v6935_v11  ;;  %v2011_v17 = vrot.slane %v6975_v45, 1 }
 0x10e   : > { %v845_v32 = vor.u32 %v844_v30, %v840_v13  ;;  %v1553_v21 = vor.u32 %v1552_v31, %v1551_v36  ;;  %6423 = vmatprep.subr.bf16.mxu0 %v6936_v9  ;;  %v7718_v46 = vsel %vm935_vm1, %v2276_v10, %v2284_v33  ;;  %v2013_v25 = vrot.slane %v6976_v48, 1  ;;  %v7734_v33 = vld [vmem:[#allocation2 + $0x28] sm:$0xff] }
 0x10f   : > { %v853_v12 = vor.u32 %v851_v2, %v849_v59  ;;  %v1556_v7 = vor.u32 %v1555_v47, %v1554_v22  ;;  %6570 = vmatmul.mubr.bf16.gmra.mrb[72].mxu0 %v7718_v46  ;;  %v2012_v6 = vsel %vm886_vm2, %v2010_v43, %v2011_v17  ;;  %v2319_v40 = vshrl.u32 %v2011_v17, 16 }
 0x110   : > { %v850_v37 = vsel %vm613_vm0, %v845_v32, %v849_v59  ;;  %v2322_v53 = vshll.u32 %v2011_v17, 16  ;;  %v2311_v28 = vshrl.u32 %v2012_v6, 16  ;;  %v2314_v0 = vshll.u32 %v2012_v6, 16 }
 0x111   : > { %v1559_v18 = vshrl.u32 %v850_v37, 16  ;;  %v1562_v50 = vshll.u32 %v850_v37, 16  ;;  %v1567_v52 = vshrl.u32 %v853_v12, 16  ;;  %v1570_v19 = vshll.u32 %v853_v12, 16  ;;  %6424 = vmatpush3.bf16.msra.mxu0 %v6937_v41 }
 0x112   : > { %v1557_v55 = vsel %vm935_vm1, %v1553_v21, %v1556_v7  ;;  %v2321_v27 = vrot.slane %v2319_v40, 3  ;;  %v2313_v56 = vrot.slane %v2311_v28, 3  ;;  %v2316_v57 = vrot.slane %v2314_v0, 4 }
 0x113   : > { %v1561_v29 = vrot.slane %v1559_v18, 3  ;;  %v1564_v14 = vrot.slane %v1562_v50, 4  ;;  %v1569_v38 = vrot.slane %v1567_v52, 3  ;;  %v1572_v61 = vrot.slane %v1570_v19, 4  ;;  %v7749_v50 = vld [vmem:[#allocation2 + $0x30] sm:$0xff]  ;;  %v7751_v52 = vld [vmem:[#allocation2 + $0x38] sm:$0xff] }
 0x114   : > { %v2324_v49 = vrot.slane %v2322_v53, 4  ;;  %v2014_v63 = vrot.slane %v6977_v20, 1  ;;  %v887_v5 = vrot.slane %v6978_v54, 1  ;;  %v3759_v11 = vshrl.u32 %v7724_v60, 16 }
 0x115   : > { %v1565_v35 = vor.u32 %v1564_v14, %v1561_v29  ;;  %v1573_v1 = vor.u32 %v1572_v61, %v1569_v38  ;;  %v2317_v23 = vor.u32 %v2316_v57, %v2313_v56  ;;  %v3761_v43 = vshll.u32 %v7724_v60, 16 }
 0x116   : > { %v2325_v8 = vor.u32 %v2324_v49, %v2321_v27  ;;  %v2015_v13 = vsel %vm886_vm2, %v2013_v25, %v2014_v63  ;;  %v2360_v15 = vshrl.u32 %v2014_v63, 16  ;;  %v2363_v39 = vshll.u32 %v2014_v63, 16  ;;  %v6939_v49 = vld [vmem:[%s8649_s1 + $0x208] sm:$0xff]  }
 0x117   : > { %v1574_v9 = vsel %vm935_vm1, %v1565_v35, %v1573_v1  ;;  %v2352_v10 = vshrl.u32 %v2015_v13, 16  ;;  %v2355_v26 = vshll.u32 %v2015_v13, 16  ;;  %v969_v31 = vshrl.u32 %v887_v5, 16 }
 0x118   : > { %v7729_v2 = vpop.f32.mrb[0].mxu0  ;;  %3555 = vmatprep.mubr.bf16.mxu1 %v1574_v9  ;;  %v7732_v30 = vsel %vm935_vm1, %v2317_v23, %v2325_v8  ;;  %v2362_v36 = vrot.slane %v2360_v15, 3  ;;  %v2365_v41 = vrot.slane %v2363_v39, 4  ;;  %v964_v21 = vshll.u32 %v887_v5, 16 }
 0x119   : > { %v7736_v59 = vpop.f32.mrb[1].mxu0  ;;  %3556 = vmatmul.mubr.bf16.gmra.mrb[76].mxu1 %v1557_v55  ;;  %6573 = vmatprep.mubr.bf16.mxu0 %v7732_v30  ;;  %v2354_v22 = vrot.slane %v2352_v10, 3  ;;  %v2357_v47 = vrot.slane %v2355_v26, 4  ;;  %v971_v16 = vrot.slane %v969_v31, 3  ;;  %v3766_v7 = vshll.u32 %v7734_v33, 16  ;;  %v6979_v10 = vld [vmem:[%s8649_s1 + $0x200] sm:$0xff]  }
 0x11a   : > { %v7739_v32 = vpop.f32.mrb[2].mxu0  ;;  %v2366_v12 = vor.u32 %v2365_v41, %v2362_v36  ;;  %v966_v48 = vrot.slane %v964_v21, 4  ;;  %v3763_v25 = vrot.slane %v3761_v43, 1  ;;  %v3770_v37 = vshrl.u32 %v7734_v33, 16  ;;  %v6940_v31 = vld [vmem:[%s8649_s1 + $0x210] sm:$0xff]  }
 0x11b   : > { %v7742_v45 = vpop.f32.mrb[3].mxu0  ;;  %v2358_v17 = vor.u32 %v2357_v47, %v2354_v22  ;;  %v3768_v40 = vrot.slane %v3766_v7, 1  ;;  %v4078_v53 = vrot.slane %v3759_v11, 3  ;;  %v4079_v18 = vrot.slane %v3761_v43, 4 }
 0x11c   : > { %v967_v19 = vor.u32 %v971_v16, %v966_v48  ;;  %v3764_v55 = vor.u32 %v3763_v25, %v3759_v11  ;;  %v4081_v28 = vrot.slane %v3770_v37, 3  ;;  %v4082_v29 = vrot.slane %v3766_v7, 4  ;;  %v7775_v7 = vld [vmem:[#allocation2 + $0x40] sm:$0xff]  ;;  %v7777_v48 = vld [vmem:[#allocation2 + $0x48] sm:$0xff] }
 0x11d   : > { %v7747_v6 = vsel %vm935_vm1, %v2358_v17, %v2366_v12  ;;  %v3772_v0 = vor.u32 %v3770_v37, %v3768_v40  ;;  %v4080_v27 = vor.u32 %v4079_v18, %v4078_v53  ;;  %v3774_v14 = vshrl.u32 %v7749_v50, 16 }
 0x11e   : > { %6574 = vmatmul.mubr.bf16.gmra.mrb[76].mxu0 %v7747_v6  ;;  %v976_v38 = vsel %vm935_vm1, %v967_v19, %v967_v19  ;;  %v3769_v61 = vsel %vm613_vm0, %v3764_v55, %v3768_v40  ;;  %v3776_v56 = vshll.u32 %v7749_v50, 16  ;;  %v3781_v57 = vshll.u32 %v7751_v52, 16 }
 0x11f   : > { %6609 = vmatprep.mubr.bf16.mxu1 %v976_v38  ;;  %v4086_v20 = vshrl.u32 %v3769_v61, 16  ;;  %v4089_v63 = vshll.u32 %v3769_v61, 16  ;;  %v4094_v35 = vshrl.u32 %v3772_v0, 16  ;;  %v4097_v1 = vshll.u32 %v3772_v0, 16 }
 0x120   : > { %v4083_v54 = vor.u32 %v4082_v29, %v4081_v28  ;;  %v3778_v5 = vrot.slane %v3776_v56, 1  ;;  %v3783_v11 = vrot.slane %v3781_v57, 1  ;;  %v3785_v23 = vshrl.u32 %v7751_v52, 16  ;;  %v6941_v29 = vld [vmem:[%s8649_s1 + $0x218] sm:$0xff]  }
 0x121   : > { %6610 = vmatmul.mubr.bf16.vlgmr.msra.gmra.mrb[80].mxu1 %v7632_v58  ;;  %v4088_v8 = vrot.slane %v4086_v20, 3  ;;  %v4091_v13 = vrot.slane %v4089_v63, 4  ;;  %v4096_v15 = vrot.slane %v4094_v35, 3  ;;  %v4099_v9 = vrot.slane %v4097_v1, 4 }
 0x122   : > { %6642 = vmatpush3.bf16.msra.mxu1 %v6979_v10  ;;  %6613 = vmatprep.mubr.bf16.mxu1 %v7645_v51  ;;  %v4084_v26 = vsel %vm935_vm1, %v4080_v27, %v4083_v54  ;;  %v3779_v39 = vor.u32 %v3778_v5, %v3774_v14  ;;  %v3787_v58 = vor.u32 %v3785_v23, %v3783_v11  ;;  %v4119_v36 = vrot.slane %v3774_v14, 3  ;;  %v6942_v10 = vld [vmem:[%s8649_s1 + $0x220] sm:$0xff]  }
 0x123   : > { %6643 = vmatprep.subr.bf16.mxu1 %v6939_v49  ;;  %v4092_v22 = vor.u32 %v4091_v13, %v4088_v8  ;;  %v4100_v47 = vor.u32 %v4099_v9, %v4096_v15  ;;  %v4120_v41 = vrot.slane %v3776_v56, 4  ;;  %v4122_v21 = vrot.slane %v3785_v23, 3  ;;  %v7798_v8 = vld [vmem:[#allocation2 + $0x58] sm:$0xff] }
 0x124   : > { %v3784_v43 = vsel %vm613_vm0, %v3779_v39, %v3783_v11  ;;  %v4135_v17 = vshrl.u32 %v3787_v58, 16  ;;  %v4138_v51 = vshll.u32 %v3787_v58, 16  ;;  %v4123_v12 = vrot.slane %v3781_v57, 4 }
 0x125   : > { %v4101_v37 = vsel %vm935_vm1, %v4092_v22, %v4100_v47  ;;  %v4127_v40 = vshrl.u32 %v3784_v43, 16  ;;  %v4130_v53 = vshll.u32 %v3784_v43, 16  ;;  %v4121_v18 = vor.u32 %v4120_v41, %v4119_v36 }
 0x126   : > { %v7772_v16 = vpop.f32.mrb[4].mxu0  ;;  %6644 = vmatpush3.bf16.msra.mxu1 %v6939_v49  ;;  %5007 = vmatprep.mubr.bf16.mxu0 %v4101_v37  ;;  %v4137_v55 = vrot.slane %v4135_v17, 3  ;;  %v4140_v28 = vrot.slane %v4138_v51, 4  ;;  %v4124_v0 = vor.u32 %v4123_v12, %v4122_v21  ;;  %v3789_v27 = vshrl.u32 %v7775_v7, 16  ;;  %v7792_v49 = vld [vmem:[#allocation2 + $0x50] sm:$0xff] }
 0x127   : > { %v7779_v25 = vpop.f32.mrb[5].mxu0  ;;  %6645 = vmatprep.subr.bf16.mxu1 %v6940_v31  ;;  %5008 = vmatmul.mubr.bf16.vlgmr.msra.gmra.mrb[80].mxu0 %v4084_v26  ;;  %v4129_v38 = vrot.slane %v4127_v40, 3  ;;  %v4132_v61 = vrot.slane %v4130_v53, 4  ;;  %v3791_v56 = vshll.u32 %v7775_v7, 16  ;;  %v3796_v57 = vshll.u32 %v7777_v48, 16 }
 0x128   : > { %v7782_v19 = vpop.f32.mrb[6].mxu0  ;;  %v4141_v20 = vor.u32 %v4140_v28, %v4137_v55  ;;  %v4125_v63 = vsel %vm935_vm1, %v4121_v18, %v4124_v0  ;;  %v3800_v35 = vshrl.u32 %v7777_v48, 16  ;;  %v4160_v1 = vrot.slane %v3789_v27, 3  ;;  %v6943_v0 = vld [vmem:[%s8649_s1 + $0x228] sm:$0xff]  }
 0x129   : > { %v7788_v14 = vpop.f32.mrb[7].mxu0  ;;  %6614 = vmatmul.mubr.bf16.gmra.mrb[84].mxu1 %v7666_v3  ;;  %v4133_v54 = vor.u32 %v4132_v61, %v4129_v38  ;;  %v3793_v5 = vrot.slane %v3791_v56, 1  ;;  %v3798_v11 = vrot.slane %v3796_v57, 1  ;;  %v4161_v23 = vrot.slane %v3791_v56, 4 }
 0x12a   : > { %6617 = vmatprep.mubr.bf16.mxu1 %v7680_v42  ;;  %6646 = vmatpush3.bf16.msra.mxu1 %v6940_v31  ;;  %v4163_v13 = vrot.slane %v3800_v35, 3  ;;  %v4164_v15 = vrot.slane %v3796_v57, 4  ;;  %v3804_v9 = vshrl.u32 %v7792_v49, 16  ;;  %v3806_v3 = vshll.u32 %v7792_v49, 16 }
 0x12b   : > { %6647 = vmatprep.subr.bf16.mxu1 %v6941_v29  ;;  %v4142_v26 = vsel %vm935_vm1, %v4133_v54, %v4141_v20  ;;  %v3794_v42 = vor.u32 %v3793_v5, %v3789_v27  ;;  %v3802_v39 = vor.u32 %v3800_v35, %v3798_v11  ;;  %v4162_v58 = vor.u32 %v4161_v23, %v4160_v1 }
 0x12c   : > { %5015 = vmatprep.mubr.bf16.mxu0 %v4142_v26  ;;  %v4165_v36 = vor.u32 %v4164_v15, %v4163_v13  ;;  %v3808_v31 = vrot.slane %v3806_v3, 1  ;;  %v3811_v22 = vshll.u32 %v7798_v8, 16  ;;  %v3815_v47 = vshrl.u32 %v7798_v8, 16  ;;  %v6980_v13 = vld [vmem:[#allocation2 + $0x90] sm:$0xff]  ;;  %v6981_v15 = vld [vmem:[#allocation2 + $0x98] sm:$0xff] }
 0x12d   : > { %v3799_v41 = vsel %vm613_vm0, %v3794_v42, %v3798_v11  ;;  %v4176_v21 = vshrl.u32 %v3802_v39, 16  ;;  %v4179_v43 = vshll.u32 %v3802_v39, 16  ;;  %v4201_v17 = vrot.slane %v3804_v9, 3 }
 0x12e   : > { %6648 = vmatpush3.bf16.msra.mxu1 %v6941_v29  ;;  %v4168_v51 = vshrl.u32 %v3799_v41, 16  ;;  %v4171_v12 = vshll.u32 %v3799_v41, 16  ;;  %v4166_v37 = vsel %vm935_vm1, %v4162_v58, %v4165_v36  ;;  %v3809_v40 = vor.u32 %v3808_v31, %v3804_v9  ;;  %v7821_v58 = vld [vmem:[#allocation2 + $0x60] sm:$0xff] }
 0x12f   : > { %6649 = vmatprep.subr.bf16.mxu1 %v6942_v10  ;;  %5016 = vmatmul.mubr.bf16.gmra.mrb[84].mxu0 %v4125_v63  ;;  %v4178_v53 = vrot.slane %v4176_v21, 3  ;;  %v4181_v18 = vrot.slane %v4179_v43, 4  ;;  %v3813_v55 = vrot.slane %v3811_v22, 1  ;;  %v4202_v28 = vrot.slane %v3806_v3, 4 }
 0x130   : > { %v4170_v27 = vrot.slane %v4168_v51, 3  ;;  %v4173_v38 = vrot.slane %v4171_v12, 4  ;;  %v4204_v29 = vrot.slane %v3815_v47, 3  ;;  %v4205_v61 = vrot.slane %v3811_v22, 4 }
 0x131   : > { %6618 = vmatmul.mubr.bf16.gmra.mrb[88].mxu1 %v7711_v4  ;;  %v4182_v56 = vor.u32 %v4181_v18, %v4178_v53  ;;  %v3814_v57 = vsel %vm613_vm0, %v3809_v40, %v3813_v55  ;;  %v3817_v20 = vor.u32 %v3815_v47, %v3813_v55  ;;  %v4203_v63 = vor.u32 %v4202_v28, %v4201_v17  ;;  %v7824_v47 = vld [vmem:[#allocation2 + $0x68] sm:$0xff]  ;;  %v6945_v18 = vld [vmem:[%s8649_s1 + $0x238] sm:$0xff]  }
 0x132   : > { %6621 = vmatprep.mubr.bf16.mxu1 %v7718_v46  ;;  %v4174_v35 = vor.u32 %v4173_v38, %v4170_v27  ;;  %v4209_v1 = vshrl.u32 %v3814_v57, 16  ;;  %v4212_v54 = vshll.u32 %v3814_v57, 16  ;;  %v4206_v5 = vor.u32 %v4205_v61, %v4204_v29  ;;  %6650 = vmatpush3.bf16.msra.mxu1 %v6942_v10  ;;  %v6944_v46 = vld [vmem:[%s8649_s1 + $0x230] sm:$0xff]  }
 0x133   : > { %v4217_v11 = vshrl.u32 %v3817_v20, 16  ;;  %v4220_v23 = vshll.u32 %v3817_v20, 16  ;;  %v914_v4 = vrot.slane %v6980_v13, 1  ;;  %v915_v9 = vrot.slane %v6981_v15, 1  ;;  %6651 = vmatprep.subr.bf16.mxu1 %v6943_v0  ;;  %v6983_v13 = vld [vmem:[#allocation2 + $0xa8] sm:$0xff] }
 0x134   : > { %v4183_v3 = vsel %vm935_vm1, %v4174_v35, %v4182_v56  ;;  %v4211_v26 = vrot.slane %v4209_v1, 3  ;;  %v4214_v42 = vrot.slane %v4212_v54, 4  ;;  %v4207_v39 = vsel %vm935_vm1, %v4203_v63, %v4206_v5  ;;  %v6982_v54 = vld [vmem:[#allocation2 + $0xa0] sm:$0xff] }
 0x135   : > { %5023 = vmatprep.mubr.bf16.mxu0 %v4183_v3  ;;  %v4219_v10 = vrot.slane %v4217_v11, 3  ;;  %v4222_v36 = vrot.slane %v4220_v23, 4  ;;  %v916_v31 = vsel %vm886_vm2, %v914_v4, %v915_v9  ;;  %v1338_v22 = vshrl.u32 %v915_v9, 16  ;;  %v6984_v3 = vld [vmem:[#allocation2 + $0xb0] sm:$0xff] }
 0x136   : > { %v4215_v41 = vor.u32 %v4214_v42, %v4211_v26  ;;  %v1330_v21 = vshrl.u32 %v916_v31, 16  ;;  %v1333_v43 = vshll.u32 %v916_v31, 16  ;;  %v1341_v17 = vshll.u32 %v915_v9, 16  ;;  %6652 = vmatpush3.bf16.msra.mxu1 %v6943_v0  ;;  %v6985_v42 = vld [vmem:[#allocation2 + $0xb8] sm:$0xff] }
 0x137   : > { %5024 = vmatmul.mubr.bf16.gmra.mrb[88].mxu0 %v4166_v37  ;;  %v4223_v51 = vor.u32 %v4222_v36, %v4219_v10  ;;  %v1340_v12 = vrot.slane %v1338_v22, 3  ;;  %v3819_v40 = vshrl.u32 %v7821_v58, 16  ;;  %v3821_v53 = vshll.u32 %v7821_v58, 16  ;;  %6653 = vmatprep.subr.bf16.mxu1 %v6944_v46 }
 0x138   : > { %v1332_v55 = vrot.slane %v1330_v21, 3  ;;  %v1335_v28 = vrot.slane %v1333_v43, 4  ;;  %v1343_v27 = vrot.slane %v1341_v17, 4  ;;  %v3826_v38 = vshll.u32 %v7824_v47, 16 }
 0x139   : > { %6622 = vmatmul.mubr.bf16.gmra.mrb[92].mxu1 %v7732_v30  ;;  %v4224_v37 = vsel %vm935_vm1, %v4215_v41, %v4223_v51  ;;  %v3823_v0 = vrot.slane %v3821_v53, 1  ;;  %v3830_v29 = vshrl.u32 %v7824_v47, 16  ;;  %v4242_v61 = vrot.slane %v3819_v40, 3 }
 0x13a   : > { %6625 = vmatprep.mubr.bf16.mxu1 %v7747_v6  ;;  %5031 = vmatprep.mubr.bf16.mxu0 %v4224_v37  ;;  %v1336_v56 = vor.u32 %v1335_v28, %v1332_v55  ;;  %v1344_v57 = vor.u32 %v1343_v27, %v1340_v12  ;;  %v3828_v20 = vrot.slane %v3826_v38, 1  ;;  %v4243_v63 = vrot.slane %v3821_v53, 4 }
 0x13b   : > { %6654 = vmatpush3.bf16.msra.mxu1 %v6944_v46  ;;  %v3824_v30 = vor.u32 %v3823_v0, %v3819_v40  ;;  %v4245_v35 = vrot.slane %v3830_v29, 3  ;;  %v4246_v1 = vrot.slane %v3826_v38, 4  ;;  %v917_v5 = vrot.slane %v6982_v54, 1  ;;  %v7851_v54 = vld [vmem:[#allocation2 + $0x78] sm:$0xff] }
 0x13c   : > { %6655 = vmatprep.subr.bf16.mxu1 %v6945_v18  ;;  %v1345_v11 = vsel %vm935_vm1, %v1336_v56, %v1344_v57  ;;  %v3832_v23 = vor.u32 %v3830_v29, %v3828_v20  ;;  %v4244_v6 = vor.u32 %v4243_v63, %v4242_v61  ;;  %v918_v4 = vrot.slane %v6983_v13, 1 }
 0x13d   : > { %v3829_v15 = vsel %vm613_vm0, %v3824_v30, %v3828_v20  ;;  %v4247_v9 = vor.u32 %v4246_v1, %v4245_v35  ;;  %v920_v26 = vrot.slane %v6984_v3, 1  ;;  %v921_v10 = vrot.slane %v6985_v42, 1  ;;  %v7849_v20 = vld [vmem:[#allocation2 + $0x70] sm:$0xff] }
 0x13e   : > { %v4250_v36 = vshrl.u32 %v3829_v15, 16  ;;  %v4253_v31 = vshll.u32 %v3829_v15, 16  ;;  %v4258_v22 = vshrl.u32 %v3832_v23, 16  ;;  %v4261_v41 = vshll.u32 %v3832_v23, 16 }
 0x13f   : > { %v7838_v46 = vpop.f32.mrb[8].mxu0  ;;  %6656 = vmatpush3.bf16.msra.mxu1 %v6945_v18  ;;  %5032 = vmatmul.mubr.bf16.gmra.mrb[92].mxu0 %v4207_v39  ;;  %v4248_v43 = vsel %vm935_vm1, %v4244_v6, %v4247_v9  ;;  %v919_v17 = vsel %vm886_vm2, %v917_v5, %v918_v4  ;;  %v1379_v51 = vshrl.u32 %v918_v4, 16  ;;  %v1382_v12 = vshll.u32 %v918_v4, 16 }
 0x140   : > { %v7840_v21 = vpop.f32.mrb[9].mxu0  ;;  %v4252_v53 = vrot.slane %v4250_v36, 3  ;;  %v4255_v55 = vrot.slane %v4253_v31, 4  ;;  %v4260_v28 = vrot.slane %v4258_v22, 3  ;;  %v4263_v27 = vrot.slane %v4261_v41, 4 }
 0x141   : > { %v7844_v40 = vpop.f32.mrb[10].mxu0  ;;  %6626 = vmatmul.mubr.bf16.gmra.mrb[0].mxu1 %v1345_v11  ;;  %v1371_v37 = vshrl.u32 %v919_v17, 16  ;;  %v1374_v18 = vshll.u32 %v919_v17, 16  ;;  %v1381_v0 = vrot.slane %v1379_v51, 3  ;;  %v1384_v29 = vrot.slane %v1382_v12, 4 }
 0x142   : > { %v7846_v38 = vpop.f32.mrb[11].mxu0  ;;  %v4256_v39 = vor.u32 %v4255_v55, %v4252_v53  ;;  %v4264_v61 = vor.u32 %v4263_v27, %v4260_v28  ;;  %v922_v56 = vsel %vm886_vm2, %v920_v26, %v921_v10  ;;  %v1420_v57 = vshrl.u32 %v921_v10, 16 }
 0x143   : > { %v1373_v63 = vrot.slane %v1371_v37, 3  ;;  %v1376_v30 = vrot.slane %v1374_v18, 4  ;;  %v1385_v35 = vor.u32 %v1384_v29, %v1381_v0  ;;  %v1412_v1 = vshrl.u32 %v922_v56, 16  ;;  %v6986_v37 = vld [vmem:[#allocation2 + $0xc0] sm:$0xff] }
 0x144   : > { %v4265_v5 = vsel %vm935_vm1, %v4256_v39, %v4264_v61  ;;  %v1415_v11 = vshll.u32 %v922_v56, 16  ;;  %v1422_v23 = vrot.slane %v1420_v57, 3  ;;  %v1423_v6 = vshll.u32 %v921_v10, 16  ;;  %v6987_v39 = vld [vmem:[#allocation2 + $0xc8] sm:$0xff]  ;;  %v7861_v56 = vld [vmem:[#allocation2 + $0x80] sm:$0xff] }
 0x145   : > { %5039 = vmatprep.mubr.bf16.mxu0 %v4265_v5  ;;  %v1377_v13 = vor.u32 %v1376_v30, %v1373_v63  ;;  %v1414_v4 = vrot.slane %v1412_v1, 3  ;;  %v3834_v15 = vshrl.u32 %v7849_v20, 16  ;;  %v3836_v9 = vshll.u32 %v7849_v20, 16 }
 0x146   : > { %v1417_v3 = vrot.slane %v1415_v11, 4  ;;  %v1425_v26 = vrot.slane %v1423_v6, 4  ;;  %v3841_v42 = vshll.u32 %v7851_v54, 16  ;;  %v3845_v36 = vshrl.u32 %v7851_v54, 16 }
 0x147   : > { %5040 = vmatmul.mubr.bf16.gmra.mrb[96].mxu0 %v4248_v43  ;;  %v1386_v31 = vsel %vm935_vm1, %v1377_v13, %v1385_v35  ;;  %v3838_v22 = vrot.slane %v3836_v9, 1  ;;  %v4283_v41 = vrot.slane %v3834_v15, 3  ;;  %v4284_v17 = vrot.slane %v3836_v9, 4 }
 0x148   : > { %6629 = vmatprep.mubr.bf16.mxu1 %v1386_v31  ;;  %v1418_v10 = vor.u32 %v1417_v3, %v1414_v4  ;;  %v1426_v51 = vor.u32 %v1425_v26, %v1422_v23  ;;  %v3843_v12 = vrot.slane %v3841_v42, 1  ;;  %v4286_v53 = vrot.slane %v3845_v36, 3 }
 0x149   : > { %v3839_v55 = vor.u32 %v3838_v22, %v3834_v15  ;;  %v4285_v28 = vor.u32 %v4284_v17, %v4283_v41  ;;  %v4287_v27 = vrot.slane %v3841_v42, 4  ;;  %v923_v18 = vrot.slane %v6986_v37, 1 }
 0x14a   : > { %v1427_v0 = vsel %vm935_vm1, %v1418_v10, %v1426_v51  ;;  %v3847_v29 = vor.u32 %v3845_v36, %v3843_v12  ;;  %v924_v43 = vrot.slane %v6987_v39, 1  ;;  %v926_v61 = vrot.slane %v7625_v44, 1 }
 0x14b   : > { %6630 = vmatmul.mubr.bf16.gmra.mrb[4].mxu1 %v1427_v0  ;;  %v3844_v57 = vsel %vm613_vm0, %v3839_v55, %v3843_v12  ;;  %v4288_v63 = vor.u32 %v4287_v27, %v4286_v53  ;;  %v927_v30 = vrot.slane %v7627_v34, 1  ;;  %v3849_v35 = vshrl.u32 %v7861_v56, 16  ;;  %v7885_v0 = vld [vmem:[#allocation2 + $0x88] sm:$0xff] }
 0x14c   : > { %v4291_v5 = vshrl.u32 %v3844_v57, 16  ;;  %v4294_v11 = vshll.u32 %v3844_v57, 16  ;;  %v4299_v23 = vshrl.u32 %v3847_v29, 16  ;;  %v4302_v6 = vshll.u32 %v3847_v29, 16 }
 0x14d   : > { %v7866_v1 = vpop.f32.mrb[16].mxu1  ;;  %v4289_v44 = vsel %vm935_vm1, %v4285_v28, %v4288_v63  ;;  %v925_v15 = vsel %vm886_vm2, %v923_v18, %v924_v43  ;;  %v1461_v9 = vshrl.u32 %v924_v43, 16  ;;  %v1464_v3 = vshll.u32 %v924_v43, 16 }
 0x14e   : > { %v7868_v13 = vpop.f32.mrb[12].mxu0  ;;  %v7870_v4 = vpop.f32.mrb[17].mxu1  ;;  %v4293_v42 = vrot.slane %v4291_v5, 3  ;;  %v4296_v36 = vrot.slane %v4294_v11, 4  ;;  %v4301_v31 = vrot.slane %v4299_v23, 3  ;;  %v4304_v22 = vrot.slane %v4302_v6, 4 }
 0x14f   : > { %v7874_v26 = vpop.f32.mrb[13].mxu0  ;;  %v7876_v34 = vpop.f32.mrb[18].mxu1  ;;  %v1453_v10 = vshrl.u32 %v925_v15, 16  ;;  %v1456_v51 = vshll.u32 %v925_v15, 16  ;;  %v1463_v12 = vrot.slane %v1461_v9, 3  ;;  %v1466_v53 = vrot.slane %v1464_v3, 4 }
 0x150   : > { %v7878_v41 = vpop.f32.mrb[14].mxu0  ;;  %v7880_v17 = vpop.f32.mrb[19].mxu1  ;;  %v4297_v28 = vor.u32 %v4296_v36, %v4293_v42  ;;  %v4305_v27 = vor.u32 %v4304_v22, %v4301_v31  ;;  %v928_v37 = vsel %vm886_vm2, %v926_v61, %v927_v30  ;;  %v1502_v18 = vshrl.u32 %v927_v30, 16 }
 0x151   : > { %v7882_v55 = vpop.f32.mrb[15].mxu0  ;;  %v1455_v29 = vrot.slane %v1453_v10, 3  ;;  %v1458_v39 = vrot.slane %v1456_v51, 4  ;;  %v1467_v43 = vor.u32 %v1466_v53, %v1463_v12  ;;  %v1494_v57 = vshrl.u32 %v928_v37, 16 }
 0x152   : > { %v4306_v63 = vsel %vm935_vm1, %v4297_v28, %v4305_v27  ;;  %v1497_v5 = vshll.u32 %v928_v37, 16  ;;  %v1504_v11 = vrot.slane %v1502_v18, 3  ;;  %v1505_v23 = vshll.u32 %v927_v30, 16 }
 0x153   : > { %5047 = vmatprep.mubr.bf16.mxu0 %v4306_v63  ;;  %v1459_v6 = vor.u32 %v1458_v39, %v1455_v29  ;;  %v1496_v15 = vrot.slane %v1494_v57, 3  ;;  %v3851_v9 = vshll.u32 %v7861_v56, 16  ;;  %v3856_v3 = vshll.u32 %v7885_v0, 16 }
 0x154   : > { %5048 = vmatmul.mubr.bf16.gmra.mrb[100].mxu0 %v4289_v44  ;;  %v1499_v42 = vrot.slane %v1497_v5, 4  ;;  %v1507_v36 = vrot.slane %v1505_v23, 4  ;;  %v3860_v31 = vshrl.u32 %v7885_v0, 16  ;;  %v4324_v22 = vrot.slane %v3849_v35, 3  ;;  %v6988_v5 = vld [vmem:[#allocation2 + $0xe0] sm:$0xff] }
 0x155   : > { %v7890_v61 = vpop.f32.mrb[20].mxu1  ;;  %v1468_v51 = vsel %vm935_vm1, %v1459_v6, %v1467_v43  ;;  %v3853_v30 = vrot.slane %v3851_v9, 1  ;;  %v3858_v12 = vrot.slane %v3856_v3, 1  ;;  %v4325_v53 = vrot.slane %v3851_v9, 4  ;;  %v6989_v6 = vld [vmem:[#allocation2 + $0xe8] sm:$0xff] }
 0x156   : > { %8655 = vst [vmem:[#allocation3_spill] sm:$0xff] %v7890_v61  ;;  %v7893_v10 = vpop.f32.mrb[21].mxu1  ;;  %6633 = vmatprep.mubr.bf16.mxu1 %v1468_v51  ;;  %v1500_v27 = vor.u32 %v1499_v42, %v1496_v15  ;;  %v1508_v37 = vor.u32 %v1507_v36, %v1504_v11  ;;  %v4327_v18 = vrot.slane %v3860_v31, 3  ;;  %v4328_v29 = vrot.slane %v3856_v3, 4 }
 0x157   : > { %8656 = vst [vmem:[#allocation4_spill] sm:$0xff] %v7893_v10  ;;  %v7896_v28 = vpop.f32.mrb[22].mxu1  ;;  %v3854_v39 = vor.u32 %v3853_v30, %v3849_v35  ;;  %v3862_v57 = vor.u32 %v3860_v31, %v3858_v12  ;;  %v4326_v63 = vor.u32 %v4325_v53, %v4324_v22  ;;  %v929_v23 = vrot.slane %v6988_v5, 1 }
 0x158   : > { %v7898_v44 = vpop.f32.mrb[23].mxu1  ;;  %v1509_v10 = vsel %vm935_vm1, %v1500_v27, %v1508_v37  ;;  %v4329_v43 = vor.u32 %v4328_v29, %v4327_v18  ;;  %v930_v61 = vrot.slane %v6989_v6, 1  ;;  %v7903_v9 = vadd.f32 %v7736_v59, %v7729_v2 }
 0x159   : > { %6634 = vmatmul.mubr.bf16.gmra.mrb[8].mxu1 %v1509_v10  ;;  %v3859_v11 = vsel %vm613_vm0, %v3854_v39, %v3858_v12  ;;  %v4340_v15 = vshrl.u32 %v3862_v57, 16  ;;  %v4343_v3 = vshll.u32 %v3862_v57, 16  ;;  %v932_v35 = vrot.slane %v7695_v62, 1 }
 0x15a   : > { %8657 = vst [vmem:[#allocation5_spill] sm:$0xff] %v7903_v9  ;;  %v4332_v42 = vshrl.u32 %v3859_v11, 16  ;;  %v4335_v36 = vshll.u32 %v3859_v11, 16  ;;  %v4330_v31 = vsel %vm935_vm1, %v4326_v63, %v4329_v43  ;;  %v931_v22 = vsel %vm886_vm2, %v929_v23, %v930_v61  ;;  %v7920_v11 = vld [vmem:[#allocation2 + $0x90] sm:$0xff] }
 0x15b   : > { %v4342_v51 = vrot.slane %v4340_v15, 3  ;;  %v4345_v30 = vrot.slane %v4343_v3, 4  ;;  %v1535_v53 = vshrl.u32 %v931_v22, 16  ;;  %v1538_v27 = vshll.u32 %v931_v22, 16  ;;  %v7925_v22 = vld [vmem:[#allocation2 + $0x98] sm:$0xff] }
 0x15c   : > { %v4334_v2 = vrot.slane %v4332_v42, 3  ;;  %v4337_v59 = vrot.slane %v4335_v36, 4  ;;  %v1543_v10 = vshrl.u32 %v930_v61, 16  ;;  %v1546_v12 = vshll.u32 %v930_v61, 16 }
 0x15d   : > { %v7909_v37 = vpop.f32.mrb[24].mxu1  ;;  %v4346_v29 = vor.u32 %v4345_v30, %v4342_v51  ;;  %v1537_v62 = vrot.slane %v1535_v53, 3  ;;  %v1540_v39 = vrot.slane %v1538_v27, 4  ;;  %v933_v57 = vrot.slane %v7698_v24, 1 }
 0x15e   : > { %v7911_v18 = vpop.f32.mrb[25].mxu1  ;;  %v4338_v5 = vor.u32 %v4337_v59, %v4334_v2  ;;  %v1545_v23 = vrot.slane %v1543_v10, 3  ;;  %v1548_v43 = vrot.slane %v1546_v12, 4  ;;  %v7918_v6 = vadd.f32 %v7742_v45, %v7739_v32 }
 0x15f   : > { %v7914_v63 = vpop.f32.mrb[26].mxu1  ;;  %v1541_v61 = vor.u32 %v1540_v39, %v1537_v62  ;;  %v934_v3 = vsel %vm886_vm2, %v932_v35, %v933_v57  ;;  %v1584_v42 = vshrl.u32 %v933_v57, 16  ;;  %v1587_v36 = vshll.u32 %v933_v57, 16 }
 0x160   : > { %8658 = vst [vmem:[#allocation6_spill] sm:$0xff] %v7914_v63  ;;  %8659 = vst [vmem:[#allocation7_spill] sm:$0xff] %v7918_v6  ;;  %v7922_v15 = vpop.f32.mrb[27].mxu1  ;;  %v4347_v24 = vsel %vm935_vm1, %v4338_v5, %v4346_v29  ;;  %v1549_v51 = vor.u32 %v1548_v43, %v1545_v23  ;;  %v1576_v30 = vshrl.u32 %v934_v3, 16  ;;  %v1579_v53 = vshll.u32 %v934_v3, 16 }
 0x161   : > { %8660 = vst [vmem:[#allocation8_spill] sm:$0xff] %v7922_v15  ;;  %5055 = vmatprep.mubr.bf16.mxu0 %v4347_v24  ;;  %v1586_v27 = vrot.slane %v1584_v42, 3  ;;  %v1589_v32 = vrot.slane %v1587_v36, 4  ;;  %v3864_v45 = vshrl.u32 %v7920_v11, 16  ;;  %v3866_v2 = vshll.u32 %v7920_v11, 16 }
 0x162   : > { %5056 = vmatmul.mubr.bf16.gmra.mrb[104].mxu0 %v4330_v31  ;;  %v1550_v59 = vsel %vm935_vm1, %v1541_v61, %v1549_v51  ;;  %v1578_v35 = vrot.slane %v1576_v30, 3  ;;  %v1581_v10 = vrot.slane %v1579_v53, 4  ;;  %v3871_v12 = vshll.u32 %v7925_v22, 16 }
 0x163   : > { %v7932_v62 = vpop.f32.mrb[16].mxu0  ;;  %6637 = vmatprep.mubr.bf16.mxu1 %v1550_v59  ;;  %v1590_v29 = vor.u32 %v1589_v32, %v1586_v27  ;;  %v3868_v39 = vrot.slane %v3866_v2, 1  ;;  %v3875_v57 = vshrl.u32 %v7925_v22, 16  ;;  %v4365_v5 = vrot.slane %v3864_v45, 3 }
 0x164   : > { %v7935_v23 = vpop.f32.mrb[17].mxu0  ;;  %v1582_v3 = vor.u32 %v1581_v10, %v1578_v35  ;;  %v3873_v31 = vrot.slane %v3871_v12, 1  ;;  %v4366_v42 = vrot.slane %v3866_v2, 4  ;;  %v4369_v61 = vrot.slane %v3871_v12, 4 }
 0x165   : > { %v7937_v43 = vpop.f32.mrb[28].mxu1  ;;  %v7939_v36 = vpop.f32.mrb[18].mxu0  ;;  %v3869_v51 = vor.u32 %v3868_v39, %v3864_v45  ;;  %v4368_v30 = vrot.slane %v3875_v57, 3  ;;  %v4030_v53 = vrot.slane %v7724_v60, 1  ;;  %v4031_v27 = vrot.slane %v7734_v33, 1 }
 0x166   : > { %8661 = vst [vmem:[#allocation9_spill] sm:$0xff] %v7937_v43  ;;  %v7941_v24 = vpop.f32.mrb[29].mxu1  ;;  %v7945_v32 = vpop.f32.mrb[19].mxu0  ;;  %v1591_v6 = vsel %vm935_vm1, %v1582_v3, %v1590_v29  ;;  %v3877_v35 = vor.u32 %v3875_v57, %v3873_v31  ;;  %v4367_v10 = vor.u32 %v4366_v42, %v4365_v5  ;;  %v7952_v2 = vadd.f32 %v7779_v25, %v7772_v16 }
 0x167   : > { %8662 = vst [vmem:[#allocation10_spill] sm:$0xff] %v7941_v24  ;;  %v7947_v59 = vpop.f32.mrb[30].mxu1  ;;  %6638 = vmatmul.mubr.bf16.gmra.mrb[12].mxu1 %v1591_v6  ;;  %v3874_v45 = vsel %vm613_vm0, %v3869_v51, %v3873_v31  ;;  %v4370_v60 = vor.u32 %v4369_v61, %v4368_v30  ;;  %v4032_v33 = vsel %vm886_vm2, %v4030_v53, %v4031_v27  ;;  %v4111_v39 = vshrl.u32 %v4031_v27, 16  ;;  %v7959_v6 = vld [vmem:[#allocation2 + $0xa0] sm:$0xff] }
 0x168   : > { %8663 = vst [vmem:[#allocation11_spill] sm:$0xff] %v7947_v59  ;;  %8664 = vst [vmem:[#allocation12_spill] sm:$0xff] %v7952_v2  ;;  %v7954_v12 = vpop.f32.mrb[31].mxu1  ;;  %v4373_v9 = vshrl.u32 %v3874_v45, 16  ;;  %v4376_v24 = vshll.u32 %v3874_v45, 16  ;;  %v4381_v59 = vshrl.u32 %v3877_v35, 16 }
 0x169   : > { %8665 = vst [vmem:[#allocation13_spill] sm:$0xff] %v7954_v12  ;;  %v4384_v43 = vshll.u32 %v3877_v35, 16  ;;  %v4371_v29 = vsel %vm935_vm1, %v4367_v10, %v4370_v60  ;;  %v4103_v57 = vshrl.u32 %v4032_v33, 16  ;;  %v4106_v5 = vshll.u32 %v4032_v33, 16 }
 0x16a   : > { %v4113_v3 = vrot.slane %v4111_v39, 3  ;;  %v4375_v16 = vrot.slane %v4373_v9, 3  ;;  %v4378_v25 = vrot.slane %v4376_v24, 4  ;;  %v4383_v42 = vrot.slane %v4381_v59, 3  ;;  %v7977_v39 = vld [vmem:[#allocation2 + $0xa8] sm:$0xff] }
 0x16b   : > { %v4386_v2 = vrot.slane %v4384_v43, 4  ;;  %v7961_v31 = vpop.f32.mrb[20].mxu0  ;;  %v4105_v61 = vrot.slane %v4103_v57, 3  ;;  %v4108_v51 = vrot.slane %v4106_v5, 4  ;;  %v4114_v30 = vshll.u32 %v4031_v27, 16 }
 0x16c   : > { %v4033_v53 = vrot.slane %v7749_v50, 1  ;;  %v7964_v45 = vpop.f32.mrb[21].mxu0  ;;  %v4379_v10 = vor.u32 %v4378_v25, %v4375_v16  ;;  %v4034_v9 = vrot.slane %v7751_v52, 1  ;;  %v7971_v43 = vadd.f32 %v7788_v14, %v7782_v19 }
 0x16d   : > { %v7966_v35 = vpop.f32.mrb[32].mxu1  ;;  %v4387_v60 = vor.u32 %v4386_v2, %v4383_v42  ;;  %v7973_v24 = vpop.f32.mrb[22].mxu0  ;;  %v4109_v33 = vor.u32 %v4108_v51, %v4105_v61  ;;  %v4116_v27 = vrot.slane %v4114_v30, 4  ;;  %v3879_v50 = vshrl.u32 %v7959_v6, 16 }
 0x16e   : > { %8666 = vst [vmem:[#allocation14_spill] sm:$0xff] %v7966_v35  ;;  %8667 = vst [vmem:[#allocation15_spill] sm:$0xff] %v7971_v43  ;;  %v7975_v59 = vpop.f32.mrb[33].mxu1  ;;  %v3881_v57 = vshll.u32 %v7959_v6, 16  ;;  %v7981_v5 = vpop.f32.mrb[23].mxu0  ;;  %v4035_v19 = vsel %vm886_vm2, %v4033_v53, %v4034_v9  ;;  %v4152_v14 = vshrl.u32 %v4034_v9, 16 }
 0x16f   : > { %8668 = vst [vmem:[#allocation16_spill] sm:$0xff] %v7975_v59  ;;  %v7983_v2 = vpop.f32.mrb[34].mxu1  ;;  %v4388_v52 = vsel %vm935_vm1, %v4379_v10, %v4387_v60  ;;  %v4155_v16 = vshll.u32 %v4034_v9, 16  ;;  %v4117_v42 = vor.u32 %v4116_v27, %v4113_v3  ;;  %v4144_v61 = vshrl.u32 %v4035_v19, 16 }
 0x170   : > { %8669 = vst [vmem:[#allocation17_spill] sm:$0xff] %v7983_v2  ;;  %v7987_v25 = vpop.f32.mrb[35].mxu1  ;;  %5063 = vmatprep.mubr.bf16.mxu0 %v4388_v52  ;;  %v4147_v51 = vshll.u32 %v4035_v19, 16  ;;  %v3883_v30 = vrot.slane %v3881_v57, 1  ;;  %v4154_v43 = vrot.slane %v4152_v14, 3  ;;  %v3886_v35 = vshll.u32 %v7977_v39, 16 }
 0x171   : > { %8670 = vst [vmem:[#allocation18_spill] sm:$0xff] %v7987_v25  ;;  %5064 = vmatmul.mubr.bf16.gmra.mrb[108].mxu0 %v4371_v29  ;;  %v4157_v59 = vrot.slane %v4155_v16, 4  ;;  %v3890_v2 = vshrl.u32 %v7977_v39, 16  ;;  %v4118_v10 = vsel %vm935_vm1, %v4109_v33, %v4117_v42  ;;  %v4146_v60 = vrot.slane %v4144_v61, 3 }
 0x172   : > { %v4149_v53 = vrot.slane %v4147_v51, 4  ;;  %v3884_v12 = vor.u32 %v3883_v30, %v3879_v50  ;;  %6657 = vmatprep.mubr.bf16.mxu1 %v4118_v10  ;;  %v3888_v25 = vrot.slane %v3886_v35, 1  ;;  %v4406_v52 = vrot.slane %v3879_v50, 3 }
 0x173   : > { %v4158_v9 = vor.u32 %v4157_v59, %v4154_v43  ;;  %v4407_v3 = vrot.slane %v3881_v57, 4  ;;  %v7992_v27 = vpop.f32.mrb[24].mxu0  ;;  %v4409_v29 = vrot.slane %v3890_v2, 3  ;;  %v4410_v14 = vrot.slane %v3886_v35, 4 }
 0x174   : > { %v4150_v19 = vor.u32 %v4149_v53, %v4146_v60  ;;  %v4036_v16 = vrot.slane %v7775_v7, 1  ;;  %v7995_v15 = vpop.f32.mrb[25].mxu0  ;;  %v3889_v33 = vsel %vm613_vm0, %v3884_v12, %v3888_v25  ;;  %v3892_v42 = vor.u32 %v3890_v2, %v3888_v25 }
 0x175   : > { %v7997_v63 = vpop.f32.mrb[36].mxu1  ;;  %v4408_v61 = vor.u32 %v4407_v3, %v4406_v52  ;;  %v4037_v43 = vrot.slane %v7777_v48, 1  ;;  %v8001_v59 = vpop.f32.mrb[26].mxu0  ;;  %v4414_v51 = vshrl.u32 %v3889_v33, 16  ;;  %v4417_v35 = vshll.u32 %v3889_v33, 16 }
 0x176   : > { %8671 = vst [vmem:[#allocation19_spill] sm:$0xff] %v7997_v63  ;;  %v8003_v50 = vpop.f32.mrb[37].mxu1  ;;  %v4159_v57 = vsel %vm935_vm1, %v4150_v19, %v4158_v9  ;;  %v4411_v30 = vor.u32 %v4410_v14, %v4409_v29  ;;  %v8006_v7 = vpop.f32.mrb[27].mxu0  ;;  %v4422_v60 = vshrl.u32 %v3892_v42, 16  ;;  %v4425_v12 = vshll.u32 %v3892_v42, 16 }
 0x177   : > { %8672 = vst [vmem:[#allocation20_spill] sm:$0xff] %v8003_v50  ;;  %v8008_v10 = vpop.f32.mrb[38].mxu1  ;;  %6658 = vmatmul.mubr.bf16.vlgmr.msra.gmra.mrb[80].mxu1 %v4159_v57  ;;  %v4038_v2 = vsel %vm886_vm2, %v4036_v16, %v4037_v43  ;;  %v4193_v25 = vshrl.u32 %v4037_v43, 16  ;;  %v4416_v53 = vrot.slane %v4414_v51, 3  ;;  %v4419_v52 = vrot.slane %v4417_v35, 4  ;;  %v8014_v50 = vld [vmem:[#allocation2 + $0xb0] sm:$0xff] }
 0x178   : > { %8673 = vst [vmem:[#allocation21_spill] sm:$0xff] %v8008_v10  ;;  %v8011_v48 = vpop.f32.mrb[39].mxu1  ;;  %v4412_v3 = vsel %vm935_vm1, %v4408_v61, %v4411_v30  ;;  %v4185_v9 = vshrl.u32 %v4038_v2, 16  ;;  %v4424_v19 = vrot.slane %v4422_v60, 3  ;;  %v4427_v33 = vrot.slane %v4425_v12, 4  ;;  %v8028_v12 = vld [vmem:[#allocation2 + $0xb8] sm:$0xff] }
 0x179   : > { %8674 = vst [vmem:[#allocation22_spill] sm:$0xff] %v8011_v48  ;;  %v4188_v29 = vshll.u32 %v4038_v2, 16  ;;  %v4195_v14 = vrot.slane %v4193_v25, 3  ;;  %v4420_v10 = vor.u32 %v4419_v52, %v4416_v53  ;;  %v4196_v63 = vshll.u32 %v4037_v43, 16 }
 0x17a   : > { %v4187_v57 = vrot.slane %v4185_v9, 3  ;;  %v8018_v16 = vadd.f32 %v7840_v21, %v7838_v46  ;;  %v4428_v42 = vor.u32 %v4427_v33, %v4424_v19  ;;  %v4039_v51 = vrot.slane %v7792_v49, 1 }
 0x17b   : > { %v4190_v48 = vrot.slane %v4188_v29, 4  ;;  %v4040_v61 = vrot.slane %v7798_v8, 1  ;;  %v8022_v35 = vpop.f32.mrb[28].mxu0  ;;  %v4198_v30 = vrot.slane %v4196_v63, 4  ;;  %v8026_v60 = vadd.f32 %v7846_v38, %v7844_v40 }
 0x17c   : > { %8675 = vst [vmem:[#allocation23_spill] sm:$0xff] %v8018_v16  ;;  %8676 = vst [vmem:[#allocation24_spill] sm:$0xff] %v8022_v35  ;;  %v3894_v43 = vshrl.u32 %v8014_v50, 16  ;;  %v3896_v46 = vshll.u32 %v8014_v50, 16  ;;  %v8032_v21 = vpop.f32.mrb[29].mxu0  ;;  %v4429_v49 = vsel %vm935_vm1, %v4420_v10, %v4428_v42 }
 0x17d   : > { %8677 = vst [vmem:[#allocation25_spill] sm:$0xff] %v8026_v60  ;;  %8678 = vst [vmem:[#allocation26_spill] sm:$0xff] %v8032_v21  ;;  %v8034_v2 = vpop.f32.mrb[40].mxu1  ;;  %v4191_v8 = vor.u32 %v4190_v48, %v4187_v57  ;;  %v4041_v25 = vsel %vm886_vm2, %v4039_v51, %v4040_v61  ;;  %v4234_v63 = vshrl.u32 %v4040_v61, 16  ;;  %v8038_v53 = vpop.f32.mrb[30].mxu0  ;;  %5071 = vmatprep.mubr.bf16.mxu0 %v4429_v49  ;;  %v4237_v19 = vshll.u32 %v4040_v61, 16 }
 0x17e   : > { %8679 = vst [vmem:[#allocation27_spill] sm:$0xff] %v8034_v2  ;;  %8680 = vst [vmem:[#allocation28_spill] sm:$0xff] %v8038_v53  ;;  %v8040_v40 = vpop.f32.mrb[41].mxu1  ;;  %v4199_v38 = vor.u32 %v4198_v30, %v4195_v14  ;;  %v4226_v52 = vshrl.u32 %v4041_v25, 16  ;;  %v4229_v9 = vshll.u32 %v4041_v25, 16  ;;  %v8042_v33 = vpop.f32.mrb[31].mxu0  ;;  %5072 = vmatmul.mubr.bf16.gmra.mrb[112].mxu0 %v4412_v3 }
 0x17f   : > { %8681 = vst [vmem:[#allocation29_spill] sm:$0xff] %v8040_v40  ;;  %8682 = vst [vmem:[#allocation30_spill] sm:$0xff] %v8042_v33  ;;  %v8044_v29 = vpop.f32.mrb[42].mxu1  ;;  %v4236_v60 = vrot.slane %v4234_v63, 3  ;;  %v3898_v10 = vrot.slane %v3896_v46, 1  ;;  %v3901_v48 = vshll.u32 %v8028_v12, 16 }
 0x180   : > { %8683 = vst [vmem:[#allocation31_spill] sm:$0xff] %v8044_v29  ;;  %v3905_v57 = vshrl.u32 %v8028_v12, 16  ;;  %v8048_v42 = vpop.f32.mrb[43].mxu1  ;;  %v4200_v51 = vsel %vm935_vm1, %v4191_v8, %v4199_v38  ;;  %v4228_v49 = vrot.slane %v4226_v52, 3  ;;  %v4231_v14 = vrot.slane %v4229_v9, 4 }
 0x181   : > { %8684 = vst [vmem:[#allocation32_spill] sm:$0xff] %v8048_v42  ;;  %v4239_v30 = vrot.slane %v4237_v19, 4  ;;  %6661 = vmatprep.mubr.bf16.mxu1 %v4200_v51  ;;  %v3899_v61 = vor.u32 %v3898_v10, %v3894_v43  ;;  %v3903_v25 = vrot.slane %v3901_v48, 1  ;;  %v4447_v16 = vrot.slane %v3894_v43, 3 }
 0x182   : > { %v4448_v40 = vrot.slane %v3896_v46, 4  ;;  %v4232_v29 = vor.u32 %v4231_v14, %v4228_v49  ;;  %v4450_v63 = vrot.slane %v3905_v57, 3  ;;  %v4451_v2 = vrot.slane %v3901_v48, 4 }
 0x183   : > { %v4240_v3 = vor.u32 %v4239_v30, %v4236_v60  ;;  %v3904_v33 = vsel %vm613_vm0, %v3899_v61, %v3903_v25  ;;  %v3907_v53 = vor.u32 %v3905_v57, %v3903_v25  ;;  %v4042_v42 = vrot.slane %v7821_v58, 1  ;;  %v8053_v35 = vpop.f32.mrb[32].mxu0 }
 0x184   : > { %v4449_v21 = vor.u32 %v4448_v40, %v4447_v16  ;;  %v4455_v38 = vshrl.u32 %v3904_v33, 16  ;;  %v4458_v52 = vshll.u32 %v3904_v33, 16  ;;  %v4452_v9 = vor.u32 %v4451_v2, %v4450_v63  ;;  %v8056_v19 = vpop.f32.mrb[33].mxu0 }
 0x185   : > { %v4241_v8 = vsel %vm935_vm1, %v4232_v29, %v4240_v3  ;;  %v8058_v43 = vpop.f32.mrb[44].mxu1  ;;  %v4463_v60 = vshrl.u32 %v3907_v53, 16  ;;  %v4466_v46 = vshll.u32 %v3907_v53, 16  ;;  %v4043_v10 = vrot.slane %v7824_v47, 1  ;;  %v8065_v58 = vpop.f32.mrb[34].mxu0 }
 0x186   : > { %6662 = vmatmul.mubr.bf16.gmra.mrb[84].mxu1 %v4241_v8  ;;  %v8063_v16 = vadd.f32 %v7874_v26, %v7868_v13  ;;  %v8067_v40 = vpop.f32.mrb[45].mxu1  ;;  %v4457_v29 = vrot.slane %v4455_v38, 3  ;;  %v4460_v33 = vrot.slane %v4458_v52, 4  ;;  %v4453_v2 = vsel %vm935_vm1, %v4449_v21, %v4452_v9  ;;  %v8071_v57 = vpop.f32.mrb[35].mxu0  ;;  %v8083_v8 = vld [vmem:[#allocation2 + $0xc0] sm:$0xff]  ;;  %v8085_v9 = vld [vmem:[#allocation2 + $0xc8] sm:$0xff] }
 0x187   : > { %v4045_v48 = vrot.slane %v7849_v20, 1  ;;  %v8073_v51 = vpop.f32.mrb[46].mxu1  ;;  %v4465_v53 = vrot.slane %v4463_v60, 3  ;;  %v4468_v47 = vrot.slane %v4466_v46, 4  ;;  %v4044_v49 = vsel %vm886_vm2, %v4042_v42, %v4043_v10 }
 0x188   : > { %8685 = vst [vmem:[#allocation33_spill] sm:$0xff] %v8063_v16  ;;  %v4275_v13 = vshrl.u32 %v4043_v10, 16  ;;  %v8076_v26 = vpop.f32.mrb[47].mxu1  ;;  %v4461_v14 = vor.u32 %v4460_v33, %v4457_v29  ;;  %v4267_v30 = vshrl.u32 %v4044_v49, 16  ;;  %v4270_v61 = vshll.u32 %v4044_v49, 16 }
 0x189   : > { %8686 = vst [vmem:[#allocation34_spill] sm:$0xff] %v8076_v26  ;;  %v4278_v25 = vshll.u32 %v4043_v10, 16  ;;  %v4469_v3 = vor.u32 %v4468_v47, %v4465_v53  ;;  %v4046_v21 = vrot.slane %v7851_v54, 1  ;;  %v8081_v20 = vadd.f32 %v7882_v55, %v7878_v41 }
 0x18a   : > { %v4277_v63 = vrot.slane %v4275_v13, 3  ;;  %v4269_v38 = vrot.slane %v4267_v30, 3  ;;  %v4272_v52 = vrot.slane %v4270_v61, 4  ;;  %v3909_v60 = vshrl.u32 %v8083_v8, 16 }
 0x18b   : > { %8687 = vst [vmem:[#allocation35_spill] sm:$0xff] %v8081_v20  ;;  %v4280_v42 = vrot.slane %v4278_v25, 4  ;;  %v4470_v46 = vsel %vm935_vm1, %v4461_v14, %v4469_v3  ;;  %v4047_v10 = vsel %vm886_vm2, %v4045_v48, %v4046_v21  ;;  %v4316_v29 = vshrl.u32 %v4046_v21, 16  ;;  %v8090_v54 = vpop.f32.mrb[36].mxu0 }
 0x18c   : > { %v4319_v33 = vshll.u32 %v4046_v21, 16  ;;  %5079 = vmatprep.mubr.bf16.mxu0 %v4470_v46  ;;  %v4273_v41 = vor.u32 %v4272_v52, %v4269_v38  ;;  %v4308_v53 = vshrl.u32 %v4047_v10, 16  ;;  %v4311_v47 = vshll.u32 %v4047_v10, 16  ;;  %v8092_v49 = vpop.f32.mrb[37].mxu0 }
 0x18d   : > { %v4281_v55 = vor.u32 %v4280_v42, %v4277_v63  ;;  %v8094_v13 = vpop.f32.mrb[48].mxu1  ;;  %5080 = vmatmul.mubr.bf16.gmra.mrb[116].mxu0 %v4453_v2  ;;  %v4318_v30 = vrot.slane %v4316_v29, 3  ;;  %v3911_v14 = vshll.u32 %v8083_v8, 16  ;;  %v3916_v48 = vshll.u32 %v8085_v9, 16  ;;  %v8098_v25 = vpop.f32.mrb[38].mxu0 }
 0x18e   : > { %8688 = vst [vmem:[#allocation36_spill] sm:$0xff] %v8094_v13  ;;  %v4321_v61 = vrot.slane %v4319_v33, 4  ;;  %v8100_v3 = vpop.f32.mrb[49].mxu1  ;;  %v4310_v63 = vrot.slane %v4308_v53, 3  ;;  %v4313_v38 = vrot.slane %v4311_v47, 4  ;;  %v3920_v52 = vshrl.u32 %v8085_v9, 16 }
 0x18f   : > { %8689 = vst [vmem:[#allocation37_spill] sm:$0xff] %v8100_v3  ;;  %v4282_v21 = vsel %vm935_vm1, %v4273_v41, %v4281_v55  ;;  %v8104_v42 = vpop.f32.mrb[39].mxu0  ;;  %v8106_v46 = vpop.f32.mrb[50].mxu1  ;;  %v3913_v10 = vrot.slane %v3911_v14, 1  ;;  %v3918_v29 = vrot.slane %v3916_v48, 1  ;;  %v4488_v33 = vrot.slane %v3909_v60, 3 }
 0x190   : > { %8690 = vst [vmem:[#allocation38_spill] sm:$0xff] %v8106_v46  ;;  %6665 = vmatprep.mubr.bf16.mxu1 %v4282_v21  ;;  %v4322_v2 = vor.u32 %v4321_v61, %v4318_v30  ;;  %v8108_v20 = vpop.f32.mrb[51].mxu1  ;;  %v4314_v16 = vor.u32 %v4313_v38, %v4310_v63  ;;  %v4489_v13 = vrot.slane %v3911_v14, 4  ;;  %v4491_v3 = vrot.slane %v3920_v52, 3 }
 0x191   : > { %8691 = vst [vmem:[#allocation39_spill] sm:$0xff] %v8108_v20  ;;  %v4492_v26 = vrot.slane %v3916_v48, 4  ;;  %v3914_v41 = vor.u32 %v3913_v10, %v3909_v60  ;;  %v3922_v55 = vor.u32 %v3920_v52, %v3918_v29  ;;  %v8112_v53 = vadd.f32 %v7870_v4, %v7866_v1 }
 0x192   : > { %v8116_v47 = vadd.f32 %v7880_v17, %v7876_v34  ;;  %v4323_v30 = vsel %vm935_vm1, %v4314_v16, %v4322_v2  ;;  %v4490_v61 = vor.u32 %v4489_v13, %v4488_v33  ;;  %v4048_v20 = vrot.slane %v7861_v56, 1  ;;  %v8134_v33 = vld [vmem:[#allocation2 + $0xd0] sm:$0xff] }
 0x193   : > { %8692 = vst [vmem:[#allocation40_spill] sm:$0xff] %v8112_v53  ;;  %v4493_v21 = vor.u32 %v4492_v26, %v4491_v3  ;;  %6666 = vmatmul.mubr.bf16.gmra.mrb[88].mxu1 %v4323_v30  ;;  %v3919_v14 = vsel %vm613_vm0, %v3914_v41, %v3918_v29  ;;  %v4504_v48 = vshrl.u32 %v3922_v55, 16  ;;  %v4507_v60 = vshll.u32 %v3922_v55, 16  ;;  %v8122_v38 = vpop.f32.mrb[40].mxu0 }
 0x194   : > { %8693 = vst [vmem:[#allocation41_spill] sm:$0xff] %v8116_v47  ;;  %v4049_v63 = vrot.slane %v7885_v0, 1  ;;  %v4496_v1 = vshrl.u32 %v3919_v14, 16  ;;  %v4499_v4 = vshll.u32 %v3919_v14, 16  ;;  %v8127_v17 = vadd.f32 %v7935_v23, %v7932_v62  ;;  %v8129_v16 = vpop.f32.mrb[41].mxu0 }
 0x195   : > { %v4494_v34 = vsel %vm935_vm1, %v4490_v61, %v4493_v21  ;;  %v4506_v56 = vrot.slane %v4504_v48, 3  ;;  %v4509_v26 = vrot.slane %v4507_v60, 4  ;;  %v8132_v52 = vpop.f32.mrb[42].mxu0  ;;  %v4051_v30 = vrot.slane %v7920_v11, 1 }
 0x196   : > { %8694 = vst [vmem:[#allocation42_spill] sm:$0xff] %v8127_v17  ;;  %v4050_v13 = vsel %vm886_vm2, %v4048_v20, %v4049_v63  ;;  %v4357_v3 = vshrl.u32 %v4049_v63, 16  ;;  %v4498_v0 = vrot.slane %v4496_v1, 3  ;;  %v4501_v2 = vrot.slane %v4499_v4, 4  ;;  %v8136_v41 = vpop.f32.mrb[43].mxu0  ;;  %v8144_v1 = vld [vmem:[#allocation2 + $0xd8] sm:$0xff] }
 0x197   : > { %v4349_v10 = vshrl.u32 %v4050_v13, 16  ;;  %v4352_v29 = vshll.u32 %v4050_v13, 16  ;;  %v4510_v55 = vor.u32 %v4509_v26, %v4506_v56  ;;  %v4360_v23 = vshll.u32 %v4049_v63, 16 }
 0x198   : > { %v4359_v62 = vrot.slane %v4357_v3, 3  ;;  %v4502_v61 = vor.u32 %v4501_v2, %v4498_v0  ;;  %v4052_v20 = vrot.slane %v7925_v22, 1  ;;  %v8142_v60 = vadd.f32 %v7945_v32, %v7939_v36 }
 0x199   : > { %v4351_v21 = vrot.slane %v4349_v10, 3  ;;  %v4354_v14 = vrot.slane %v4352_v29, 4  ;;  %v4362_v48 = vrot.slane %v4360_v23, 4  ;;  %v3924_v4 = vshrl.u32 %v8134_v33, 16 }
 0x19a   : > { %8695 = vst [vmem:[#allocation43_spill] sm:$0xff] %v8142_v60  ;;  %v3926_v56 = vshll.u32 %v8134_v33, 16  ;;  %v8148_v26 = vpop.f32.mrb[52].mxu1  ;;  %v4511_v11 = vsel %vm935_vm1, %v4502_v61, %v4510_v55  ;;  %v4053_v13 = vsel %vm886_vm2, %v4051_v30, %v4052_v20  ;;  %v4398_v3 = vshrl.u32 %v4052_v20, 16 }
 0x19b   : > { %8696 = vst [vmem:[#allocation44_spill] sm:$0xff] %v8148_v26  ;;  %v4355_v63 = vor.u32 %v4354_v14, %v4351_v21  ;;  %v8152_v22 = vpop.f32.mrb[53].mxu1  ;;  %5087 = vmatprep.mubr.bf16.mxu0 %v4511_v11  ;;  %v4363_v0 = vor.u32 %v4362_v48, %v4359_v62  ;;  %v4390_v36 = vshrl.u32 %v4053_v13, 16  ;;  %v4393_v32 = vshll.u32 %v4053_v13, 16  ;;  %v8154_v10 = vpop.f32.mrb[44].mxu0 }
 0x19c   : > { %8697 = vst [vmem:[#allocation45_spill] sm:$0xff] %v8152_v22  ;;  %v4401_v2 = vshll.u32 %v4052_v20, 16  ;;  %v8156_v29 = vpop.f32.mrb[54].mxu1  ;;  %5088 = vmatmul.mubr.bf16.gmra.mrb[120].mxu0 %v4494_v34  ;;  %v4400_v23 = vrot.slane %v4398_v3, 3  ;;  %v3928_v60 = vrot.slane %v3926_v56, 1  ;;  %v3931_v55 = vshll.u32 %v8144_v1, 16 }
 0x19d   : > { %8698 = vst [vmem:[#allocation46_spill] sm:$0xff] %v8156_v29  ;;  %v3935_v61 = vshrl.u32 %v8144_v1, 16  ;;  %v8160_v30 = vpop.f32.mrb[45].mxu0  ;;  %v8162_v21 = vpop.f32.mrb[55].mxu1  ;;  %v4364_v62 = vsel %vm935_vm1, %v4355_v63, %v4363_v0  ;;  %v4392_v14 = vrot.slane %v4390_v36, 3  ;;  %v4395_v48 = vrot.slane %v4393_v32, 4 }
 0x19e   : > { %8699 = vst [vmem:[#allocation47_spill] sm:$0xff] %v8162_v21  ;;  %v4403_v20 = vrot.slane %v4401_v2, 4  ;;  %v8165_v11 = vpop.f32.mrb[46].mxu0  ;;  %6669 = vmatprep.mubr.bf16.mxu1 %v4364_v62  ;;  %v3929_v13 = vor.u32 %v3928_v60, %v3924_v4  ;;  %v3933_v34 = vrot.slane %v3931_v55, 1  ;;  %v4529_v3 = vrot.slane %v3924_v4, 3  ;;  %v8701_v0 = vld [vmem:[#allocation3_spill] sm:$0xff] }
 0x19f   : > { %v4530_v17 = vrot.slane %v3926_v56, 4  ;;  %v8167_v47 = vpop.f32.mrb[47].mxu0  ;;  %v4396_v53 = vor.u32 %v4395_v48, %v4392_v14  ;;  %v4532_v22 = vrot.slane %v3935_v61, 3  ;;  %v4533_v26 = vrot.slane %v3931_v55, 4  ;;  %v8702_v36 = vld [vmem:[#allocation4_spill] sm:$0xff] }
 0x1a0   : > { %8700 = vst [vmem:[#allocation48_spill] sm:$0xff] %v8167_v47  ;;  %v4404_v29 = vor.u32 %v4403_v20, %v4400_v23  ;;  %v3934_v21 = vsel %vm613_vm0, %v3929_v13, %v3933_v34  ;;  %v3937_v46 = vor.u32 %v3935_v61, %v3933_v34  ;;  %v8172_v32 = vadd.f32 %v8702_v36, %v8701_v0  ;;  %v8203_v36 = vld [vmem:[#allocation2 + $0xe8] sm:$0xff] }
 0x1a1   : > { %v4531_v63 = vor.u32 %v4530_v17, %v4529_v3  ;;  %v4537_v60 = vshrl.u32 %v3934_v21, 16  ;;  %v4540_v62 = vshll.u32 %v3934_v21, 16  ;;  %v4534_v4 = vor.u32 %v4533_v26, %v4532_v22 }
 0x1a2   : > { %8703 = vst [vmem:[#allocation3_spill] sm:$0xff] %v8172_v32  ;;  %v4405_v2 = vsel %vm935_vm1, %v4396_v53, %v4404_v29  ;;  %v4545_v56 = vshrl.u32 %v3937_v46, 16  ;;  %v4548_v47 = vshll.u32 %v3937_v46, 16  ;;  %v8177_v23 = vadd.f32 %v7898_v44, %v7896_v28 }
 0x1a3   : > { %6670 = vmatmul.mubr.bf16.gmra.mrb[92].mxu1 %v4405_v2  ;;  %v4054_v55 = vrot.slane %v7959_v6, 1  ;;  %v4539_v61 = vrot.slane %v4537_v60, 3  ;;  %v4542_v17 = vrot.slane %v4540_v62, 4  ;;  %v4535_v14 = vsel %vm935_vm1, %v4531_v63, %v4534_v4  ;;  %v8182_v20 = vpop.f32.mrb[48].mxu0  ;;  %v8195_v63 = vld [vmem:[#allocation2 + $0xe0] sm:$0xff] }
 0x1a4   : > { %8704 = vst [vmem:[#allocation4_spill] sm:$0xff] %v8177_v23  ;;  %v4055_v48 = vrot.slane %v7977_v39, 1  ;;  %v4547_v53 = vrot.slane %v4545_v56, 3  ;;  %v4550_v29 = vrot.slane %v4548_v47, 4  ;;  %v8186_v26 = vadd.f32 %v7964_v45, %v7961_v31  ;;  %v8189_v28 = vpop.f32.mrb[49].mxu0 }
 0x1a5   : > { %v4057_v46 = vrot.slane %v8014_v50, 1  ;;  %v4543_v44 = vor.u32 %v4542_v17, %v4539_v61  ;;  %v8192_v13 = vpop.f32.mrb[50].mxu0  ;;  %v4058_v47 = vrot.slane %v8028_v12, 1  ;;  %v8201_v0 = vadd.f32 %v7981_v5, %v7973_v24 }
 0x1a6   : > { %8705 = vst [vmem:[#allocation49_spill] sm:$0xff] %v8186_v26  ;;  %v4056_v6 = vsel %vm886_vm2, %v4054_v55, %v4055_v48  ;;  %v4439_v22 = vshrl.u32 %v4055_v48, 16  ;;  %v4442_v21 = vshll.u32 %v4055_v48, 16  ;;  %v4551_v39 = vor.u32 %v4550_v29, %v4547_v53  ;;  %v8197_v31 = vpop.f32.mrb[51].mxu0 }
 0x1a7   : > { %v4431_v34 = vshrl.u32 %v4056_v6, 16  ;;  %v4434_v3 = vshll.u32 %v4056_v6, 16  ;;  %8706 = vst [vmem:[#allocation50_spill] sm:$0xff] %v8201_v0  ;;  %v3939_v2 = vshrl.u32 %v8195_v63, 16  ;;  %v4059_v56 = vsel %vm886_vm2, %v4057_v46, %v4058_v47 }
 0x1a8   : > { %v4441_v45 = vrot.slane %v4439_v22, 3  ;;  %v4444_v50 = vrot.slane %v4442_v21, 4  ;;  %v8206_v60 = vpop.f32.mrb[56].mxu1  ;;  %v4552_v62 = vsel %vm935_vm1, %v4543_v44, %v4551_v39  ;;  %v4472_v17 = vshrl.u32 %v4059_v56, 16 }
 0x1a9   : > { %v4433_v4 = vrot.slane %v4431_v34, 3  ;;  %v4436_v12 = vrot.slane %v4434_v3, 4  ;;  %v8210_v55 = vpop.f32.mrb[57].mxu1  ;;  %5095 = vmatprep.mubr.bf16.mxu0 %v4552_v62  ;;  %v4475_v48 = vshll.u32 %v4059_v56, 16  ;;  %v4480_v24 = vshrl.u32 %v4058_v47, 16 }
 0x1aa   : > { %v4445_v61 = vor.u32 %v4444_v50, %v4441_v45  ;;  %v8212_v5 = vpop.f32.mrb[58].mxu1  ;;  %5096 = vmatmul.mubr.bf16.gmra.mrb[124].mxu0 %v4535_v14  ;;  %v4483_v29 = vshll.u32 %v4058_v47, 16  ;;  %v3941_v6 = vshll.u32 %v8195_v63, 16  ;;  %v3946_v44 = vshll.u32 %v8203_v36, 16 }
 0x1ab   : > { %v4437_v53 = vor.u32 %v4436_v12, %v4433_v4  ;;  %v8216_v22 = vpop.f32.mrb[59].mxu1  ;;  %v4474_v21 = vrot.slane %v4472_v17, 3  ;;  %v4477_v46 = vrot.slane %v4475_v48, 4  ;;  %v4482_v39 = vrot.slane %v4480_v24, 3  ;;  %v8219_v3 = vpop.f32.mrb[52].mxu0 }
 0x1ac   : > { %8707 = vst [vmem:[#allocation51_spill] sm:$0xff] %v8216_v22  ;;  %v3950_v34 = vshrl.u32 %v8203_v36, 16  ;;  %v4485_v50 = vrot.slane %v4483_v29, 4  ;;  %v3943_v62 = vrot.slane %v3941_v6, 1  ;;  %v3948_v14 = vrot.slane %v3946_v44, 1  ;;  %v8222_v4 = vpop.f32.mrb[53].mxu0 }
 0x1ad   : > { %v4446_v45 = vsel %vm935_vm1, %v4437_v53, %v4445_v61  ;;  %v4478_v47 = vor.u32 %v4477_v46, %v4474_v21  ;;  %v4570_v12 = vrot.slane %v3939_v2, 3  ;;  %v4571_v56 = vrot.slane %v3941_v6, 4  ;;  %v8224_v26 = vpop.f32.mrb[54].mxu0  ;;  %v8709_v53 = vld [vmem:[#allocation6_spill] sm:$0xff]  ;;  %v8710_v29 = vld [vmem:[#allocation8_spill] sm:$0xff] }
 0x1ae   : > { %6673 = vmatprep.mubr.bf16.mxu1 %v4446_v45  ;;  %v4573_v0 = vrot.slane %v3950_v34, 3  ;;  %v4486_v17 = vor.u32 %v4485_v50, %v4482_v39  ;;  %v3944_v48 = vor.u32 %v3943_v62, %v3939_v2  ;;  %v3952_v24 = vor.u32 %v3950_v34, %v3948_v14  ;;  %v8226_v32 = vpop.f32.mrb[55].mxu0 }
 0x1af   : > { %v4574_v23 = vrot.slane %v3946_v44, 4  ;;  %v4572_v22 = vor.u32 %v4571_v56, %v4570_v12  ;;  %v8230_v61 = vadd.f32 %v7911_v18, %v7909_v37  ;;  %v8234_v45 = vadd.f32 %v8710_v29, %v8709_v53 }
 0x1b0   : > { %v4060_v6 = vrot.slane %v8083_v8, 1  ;;  %v4487_v21 = vsel %vm935_vm1, %v4478_v47, %v4486_v17  ;;  %v3949_v46 = vsel %vm613_vm0, %v3944_v48, %v3948_v14  ;;  %v4586_v2 = vshrl.u32 %v3952_v24, 16 }
 0x1b1   : > { %8708 = vst [vmem:[#allocation52_spill] sm:$0xff] %v8230_v61  ;;  %8711 = vst [vmem:[#allocation6_spill] sm:$0xff] %v8234_v45  ;;  %v4589_v39 = vshll.u32 %v3952_v24, 16  ;;  %6674 = vmatmul.mubr.bf16.gmra.mrb[0].mxu1 %v4487_v21  ;;  %v4578_v44 = vshrl.u32 %v3949_v46, 16  ;;  %v4581_v34 = vshll.u32 %v3949_v46, 16  ;;  %v4575_v50 = vor.u32 %v4574_v23, %v4573_v0 }
 0x1b2   : > { %v4061_v62 = vrot.slane %v8085_v9, 1  ;;  %v4588_v37 = vrot.slane %v4586_v2, 3  ;;  %v8242_v12 = vadd.f32 %v7995_v15, %v7992_v27  ;;  %v4063_v8 = vrot.slane %v8134_v33, 1 }
 0x1b3   : > { %v4591_v18 = vrot.slane %v4589_v39, 4  ;;  %v4580_v56 = vrot.slane %v4578_v44, 3  ;;  %v4583_v47 = vrot.slane %v4581_v34, 4  ;;  %v4576_v14 = vsel %vm935_vm1, %v4572_v22, %v4575_v50  ;;  %v8247_v48 = vpop.f32.mrb[56].mxu0  ;;  %v8258_v22 = vld [vmem:[#allocation2 + $0xf0] sm:$0xff] }
 0x1b4   : > { %8712 = vst [vmem:[#allocation8_spill] sm:$0xff] %v8242_v12  ;;  %v4062_v17 = vsel %vm886_vm2, %v4060_v6, %v4061_v62  ;;  %v4521_v9 = vshrl.u32 %v4061_v62, 16  ;;  %v8249_v53 = vpop.f32.mrb[57].mxu0  ;;  %v4524_v27 = vshll.u32 %v4061_v62, 16  ;;  %v4064_v33 = vrot.slane %v8144_v1, 1  ;;  %v8260_v6 = vld [vmem:[#allocation2 + $0xf8] sm:$0xff] }
 0x1b5   : > { %v4592_v24 = vor.u32 %v4591_v18, %v4588_v37  ;;  %v4513_v23 = vshrl.u32 %v4062_v17, 16  ;;  %v4516_v0 = vshll.u32 %v4062_v17, 16  ;;  %v8251_v29 = vpop.f32.mrb[60].mxu1  ;;  %v4584_v15 = vor.u32 %v4583_v47, %v4580_v56  ;;  %v8262_v46 = vpop.f32.mrb[58].mxu0 }
 0x1b6   : > { %8713 = vst [vmem:[#allocation53_spill] sm:$0xff] %v8251_v29  ;;  %v8256_v21 = vadd.f32 %v8006_v7, %v8001_v59  ;;  %v8264_v2 = vpop.f32.mrb[61].mxu1  ;;  %v4523_v34 = vrot.slane %v4521_v9, 3  ;;  %v3954_v50 = vshrl.u32 %v8258_v22, 16  ;;  %v8267_v62 = vpop.f32.mrb[59].mxu0  ;;  %v4526_v7 = vrot.slane %v4524_v27, 4 }
 0x1b7   : > { %8715 = vst [vmem:[#allocation55_spill] sm:$0xff] %v8264_v2  ;;  %v4515_v39 = vrot.slane %v4513_v23, 3  ;;  %v4518_v44 = vrot.slane %v4516_v0, 4  ;;  %v8269_v1 = vpop.f32.mrb[62].mxu1  ;;  %v4593_v59 = vsel %vm935_vm1, %v4584_v15, %v4592_v24  ;;  %v4065_v37 = vsel %vm886_vm2, %v4063_v8, %v4064_v33 }
 0x1b8   : > { %8714 = vst [vmem:[#allocation54_spill] sm:$0xff] %v8256_v21  ;;  %8716 = vst [vmem:[#allocation56_spill] sm:$0xff] %v8269_v1  ;;  %v4562_v18 = vshrl.u32 %v4064_v33, 16  ;;  %v8273_v56 = vpop.f32.mrb[63].mxu1  ;;  %5103 = vmatprep.mubr.bf16.mxu0 %v4593_v59  ;;  %v4554_v17 = vshrl.u32 %v4065_v37, 16  ;;  %v4557_v23 = vshll.u32 %v4065_v37, 16  ;;  %v4527_v9 = vor.u32 %v4526_v7, %v4523_v34 }
 0x1b9   : > { %8717 = vst [vmem:[#allocation57_spill] sm:$0xff] %v8273_v56  ;;  %v4519_v47 = vor.u32 %v4518_v44, %v4515_v39  ;;  %v4565_v0 = vshll.u32 %v4064_v33, 16  ;;  %5104 = vmatmul.mubr.bf16.gmra.mrb[128].mxu0 %v4576_v14  ;;  %v3956_v12 = vshll.u32 %v8258_v22, 16  ;;  %v3961_v45 = vshll.u32 %v8260_v6, 16  ;;  %v8720_v1 = vld [vmem:[#allocation10_spill] sm:$0xff] }
 0x1ba   : > { %v4564_v21 = vrot.slane %v4562_v18, 3  ;;  %v4556_v61 = vrot.slane %v4554_v17, 3  ;;  %v4559_v24 = vrot.slane %v4557_v23, 4  ;;  %v3965_v8 = vshrl.u32 %v8260_v6, 16 }
 0x1bb   : > { %v4567_v15 = vrot.slane %v4565_v0, 4  ;;  %v4528_v27 = vsel %vm935_vm1, %v4519_v47, %v4527_v9  ;;  %v3958_v56 = vrot.slane %v3956_v12, 1  ;;  %v3963_v59 = vrot.slane %v3961_v45, 1  ;;  %v8279_v44 = vpop.f32.mrb[60].mxu0  ;;  %v8719_v0 = vld [vmem:[#allocation9_spill] sm:$0xff] }
 0x1bc   : > { %v4611_v39 = vrot.slane %v3954_v50, 3  ;;  %8718 = vst [vmem:[#allocation58_spill] sm:$0xff] %v8279_v44  ;;  %6677 = vmatprep.mubr.bf16.mxu1 %v4528_v27  ;;  %v4560_v14 = vor.u32 %v4559_v24, %v4556_v61  ;;  %v4612_v34 = vrot.slane %v3956_v12, 4  ;;  %v4614_v7 = vrot.slane %v3965_v8, 3  ;;  %v8281_v37 = vpop.f32.mrb[61].mxu0  ;;  %v8722_v44 = vld [vmem:[#allocation11_spill] sm:$0xff] }
 0x1bd   : > { %v4568_v33 = vor.u32 %v4567_v15, %v4564_v21  ;;  %v3959_v18 = vor.u32 %v3958_v56, %v3954_v50  ;;  %v3967_v17 = vor.u32 %v3965_v8, %v3963_v59  ;;  %v4615_v23 = vrot.slane %v3961_v45, 4  ;;  %v8287_v47 = vpop.f32.mrb[62].mxu0  ;;  %v8723_v27 = vld [vmem:[#allocation13_spill] sm:$0xff] }
 0x1be   : > { %v8285_v2 = vadd.f32 %v8720_v1, %v8719_v0  ;;  %v4613_v29 = vor.u32 %v4612_v34, %v4611_v39  ;;  %v8292_v61 = vadd.f32 %v8723_v27, %v8722_v44  ;;  %v4066_v12 = vrot.slane %v8195_v63, 1  ;;  %v8295_v21 = vpop.f32.mrb[63].mxu0  ;;  %v8727_v39 = vld [vmem:[#allocation26_spill] sm:$0xff] }
 0x1bf   : > { %v4569_v9 = vsel %vm935_vm1, %v4560_v14, %v4568_v33  ;;  %8725 = vst [vmem:[#allocation11_spill] sm:$0xff] %v8295_v21  ;;  %v3964_v45 = vsel %vm613_vm0, %v3959_v18, %v3963_v59  ;;  %v4627_v50 = vshrl.u32 %v3967_v17, 16  ;;  %v4630_v56 = vshll.u32 %v3967_v17, 16  ;;  %v8726_v14 = vld [vmem:[#allocation24_spill] sm:$0xff] }
 0x1c0   : > { %8721 = vst [vmem:[#allocation9_spill] sm:$0xff] %v8285_v2  ;;  %8724 = vst [vmem:[#allocation10_spill] sm:$0xff] %v8292_v61  ;;  %6678 = vmatmul.mubr.bf16.gmra.mrb[4].mxu1 %v4569_v9  ;;  %v4616_v1 = vor.u32 %v4615_v23, %v4614_v7  ;;  %v4619_v24 = vshrl.u32 %v3964_v45, 16  ;;  %v4622_v15 = vshll.u32 %v3964_v45, 16  ;;  %v4067_v8 = vrot.slane %v8203_v36, 1 }
 0x1c1   : > { %v8301_v33 = vadd.f32 %v8727_v39, %v8726_v14  ;;  %v4629_v44 = vrot.slane %v4627_v50, 3  ;;  %v4632_v34 = vrot.slane %v4630_v56, 4  ;;  %v4069_v0 = vrot.slane %v8258_v22, 1 }
 0x1c2   : > { %v4617_v63 = vsel %vm935_vm1, %v4613_v29, %v4616_v1  ;;  %v4621_v9 = vrot.slane %v4619_v24, 3  ;;  %v4624_v27 = vrot.slane %v4622_v15, 4  ;;  %v4068_v59 = vsel %vm886_vm2, %v4066_v12, %v4067_v8  ;;  %v8731_v29 = vld [vmem:[#allocation28_spill] sm:$0xff]  ;;  %v8732_v1 = vld [vmem:[#allocation30_spill] sm:$0xff]  ;;  %v3754_v24 = vld [vmem:[#allocation2 + $0x100] sm:$0xff] }
 0x1c3   : > { %8728 = vst [vmem:[#allocation13_spill] sm:$0xff] %v8301_v33  ;;  %v4603_v18 = vshrl.u32 %v4067_v8, 16  ;;  %v8306_v7 = vpop.f32.mrb[64].mxu1  ;;  %v4633_v17 = vor.u32 %v4632_v34, %v4629_v44  ;;  %v4595_v23 = vshrl.u32 %v4068_v59, 16  ;;  %v4598_v36 = vshll.u32 %v4068_v59, 16  ;;  %v3755_v44 = vld [vmem:[#allocation2 + $0x108] sm:$0xff] }
 0x1c4   : > { %8729 = vst [vmem:[#allocation24_spill] sm:$0xff] %v8306_v7  ;;  %v4606_v45 = vshll.u32 %v4067_v8, 16  ;;  %v8308_v61 = vpop.f32.mrb[65].mxu1  ;;  %v4625_v14 = vor.u32 %v4624_v27, %v4621_v9  ;;  %v4070_v56 = vrot.slane %v8260_v6, 1  ;;  %v8313_v22 = vadd.f32 %v8732_v1, %v8731_v29  ;;  %v8739_v7 = vld [vmem:[#allocation14_spill] sm:$0xff] }
 0x1c5   : > { %8730 = vst [vmem:[#allocation26_spill] sm:$0xff] %v8308_v61  ;;  %v4605_v50 = vrot.slane %v4603_v18, 3  ;;  %v8315_v15 = vpop.f32.mrb[66].mxu1  ;;  %v4597_v12 = vrot.slane %v4595_v23, 3  ;;  %v4600_v39 = vrot.slane %v4598_v36, 4  ;;  %v3969_v34 = vshrl.u32 %v3754_v24, 16 }
 0x1c6   : > { %8733 = vst [vmem:[#allocation28_spill] sm:$0xff] %v8313_v22  ;;  %8734 = vst [vmem:[#allocation30_spill] sm:$0xff] %v8315_v15  ;;  %v4608_v33 = vrot.slane %v4606_v45, 4  ;;  %v8317_v59 = vpop.f32.mrb[67].mxu1  ;;  %v4634_v8 = vsel %vm935_vm1, %v4625_v14, %v4633_v17  ;;  %v4071_v9 = vsel %vm886_vm2, %v4069_v0, %v4070_v56  ;;  %v4644_v27 = vshrl.u32 %v4070_v56, 16 }
 0x1c7   : > { %8735 = vst [vmem:[#allocation59_spill] sm:$0xff] %v8317_v59  ;;  %v4647_v6 = vshll.u32 %v4070_v56, 16  ;;  %v8321_v18 = vpop.f32.mrb[64].mxu0  ;;  %5111 = vmatprep.mubr.bf16.mxu0 %v4634_v8  ;;  %v4601_v29 = vor.u32 %v4600_v39, %v4597_v12  ;;  %v4636_v22 = vshrl.u32 %v4071_v9, 16  ;;  %v4639_v2 = vshll.u32 %v4071_v9, 16 }
 0x1c8   : > { %8736 = vst [vmem:[#allocation60_spill] sm:$0xff] %v8321_v18  ;;  %v4609_v1 = vor.u32 %v4608_v33, %v4605_v50  ;;  %v8323_v23 = vpop.f32.mrb[65].mxu0  ;;  %5112 = vmatmul.mubr.bf16.gmra.mrb[132].mxu0 %v4617_v63  ;;  %v4646_v36 = vrot.slane %v4644_v27, 3  ;;  %v3971_v15 = vshll.u32 %v3754_v24, 16  ;;  %v3976_v59 = vshll.u32 %v3755_v44, 16 }
 0x1c9   : > { %8737 = vst [vmem:[#allocation61_spill] sm:$0xff] %v8323_v23  ;;  %v4649_v45 = vrot.slane %v4647_v6, 4  ;;  %v8325_v61 = vpop.f32.mrb[66].mxu0  ;;  %v4638_v17 = vrot.slane %v4636_v22, 3  ;;  %v4641_v14 = vrot.slane %v4639_v2, 4  ;;  %v3980_v56 = vshrl.u32 %v3755_v44, 16 }
 0x1ca   : > { %8738 = vst [vmem:[#allocation62_spill] sm:$0xff] %v8325_v61  ;;  %v4610_v0 = vsel %vm935_vm1, %v4601_v29, %v4609_v1  ;;  %v8328_v18 = vpop.f32.mrb[67].mxu0  ;;  %v3973_v50 = vrot.slane %v3971_v15, 1  ;;  %v3978_v12 = vrot.slane %v3976_v59, 1  ;;  %v4652_v39 = vrot.slane %v3969_v34, 3  ;;  %v8740_v61 = vld [vmem:[#allocation16_spill] sm:$0xff] }
 0x1cb   : > { %6681 = vmatprep.mubr.bf16.mxu1 %v4610_v0  ;;  %v4650_v33 = vor.u32 %v4649_v45, %v4646_v36  ;;  %v4642_v8 = vor.u32 %v4641_v14, %v4638_v17  ;;  %v4653_v63 = vrot.slane %v3971_v15, 4  ;;  %v4655_v9 = vrot.slane %v3980_v56, 3  ;;  %v8741_v22 = vld [vmem:[#allocation17_spill] sm:$0xff]  ;;  %v8742_v2 = vld [vmem:[#allocation18_spill] sm:$0xff] }
 0x1cc   : > { %v4656_v27 = vrot.slane %v3976_v59, 4  ;;  %v3974_v6 = vor.u32 %v3973_v50, %v3969_v34  ;;  %v3982_v23 = vor.u32 %v3980_v56, %v3978_v12  ;;  %v8332_v21 = vadd.f32 %v8740_v61, %v8739_v7 }
 0x1cd   : > { %v8336_v29 = vadd.f32 %v8742_v2, %v8741_v22  ;;  %v4651_v1 = vsel %vm935_vm1, %v4642_v8, %v4650_v33  ;;  %v4654_v36 = vor.u32 %v4653_v63, %v4652_v39  ;;  %v4072_v0 = vrot.slane %v3754_v24, 1  ;;  %v6990_v2 = vld [vmem:[#allocation2] sm:$0xff] }
 0x1ce   : > { %v4657_v45 = vor.u32 %v4656_v27, %v4655_v9  ;;  %6682 = vmatmul.mubr.bf16.gmra.mrb[8].mxu1 %v4651_v1  ;;  %v3979_v15 = vsel %vm613_vm0, %v3974_v6, %v3978_v12  ;;  %v4668_v17 = vshrl.u32 %v3982_v23, 16  ;;  %v4671_v59 = vshll.u32 %v3982_v23, 16 }
 0x1cf   : > { %v4073_v34 = vrot.slane %v3755_v44, 1  ;;  %v4660_v14 = vshrl.u32 %v3979_v15, 16  ;;  %v4663_v56 = vshll.u32 %v3979_v15, 16  ;;  %v8343_v7 = vadd.f32 %v8056_v19, %v8053_v35 }
 0x1d0   : > { %v4658_v61 = vsel %vm935_vm1, %v4654_v36, %v4657_v45  ;;  %v4670_v50 = vrot.slane %v4668_v17, 3  ;;  %v4673_v22 = vrot.slane %v4671_v59, 4  ;;  %v4075_v1 = vrot.slane %v6990_v2, 1 }
 0x1d1   : > { %v4074_v33 = vsel %vm886_vm2, %v4072_v0, %v4073_v34  ;;  %v4685_v39 = vshrl.u32 %v4073_v34, 16  ;;  %v8346_v24 = vpop.f32.mrb[68].mxu1  ;;  %v4662_v8 = vrot.slane %v4660_v14, 3  ;;  %v4665_v12 = vrot.slane %v4663_v56, 4 }
 0x1d2   : > { %v4677_v63 = vshrl.u32 %v4074_v33, 16  ;;  %v4680_v23 = vshll.u32 %v4074_v33, 16  ;;  %v8348_v44 = vpop.f32.mrb[69].mxu1  ;;  %v4674_v9 = vor.u32 %v4673_v22, %v4670_v50  ;;  %v4688_v6 = vshll.u32 %v4073_v34, 16 }
 0x1d3   : > { %v4687_v27 = vrot.slane %v4685_v39, 3  ;;  %v8350_v35 = vpop.f32.mrb[70].mxu1  ;;  %v4666_v19 = vor.u32 %v4665_v12, %v4662_v8  ;;  %v6206_v0 = vadd.f32 %v8071_v57, %v8065_v58  ;;  %v4726_v59 = vshrl.u32 %v4075_v1, 16  ;;  %v8743_v58 = vld [vmem:[#allocation19_spill] sm:$0xff]  ;;  %v8744_v57 = vld [vmem:[#allocation20_spill] sm:$0xff] }
 0x1d4   : > { %v4679_v36 = vrot.slane %v4677_v63, 3  ;;  %v4682_v45 = vrot.slane %v4680_v23, 4  ;;  %v8354_v15 = vpop.f32.mrb[71].mxu1  ;;  %v4690_v17 = vrot.slane %v4688_v6, 4  ;;  %v4729_v14 = vshll.u32 %v4075_v1, 16 }
 0x1d5   : > { %v4675_v56 = vsel %vm935_vm1, %v4666_v19, %v4674_v9  ;;  %v8357_v22 = vpop.f32.mrb[68].mxu0  ;;  %v4728_v33 = vrot.slane %v4726_v59, 3  ;;  %v3984_v8 = vshrl.u32 %v6990_v2, 16  ;;  %v3986_v63 = vshll.u32 %v6990_v2, 16 }
 0x1d6   : > { %v4683_v50 = vor.u32 %v4682_v45, %v4679_v36  ;;  %5119 = vmatprep.mubr.bf16.mxu0 %v4675_v56  ;;  %v4691_v34 = vor.u32 %v4690_v17, %v4687_v27  ;;  %v4731_v39 = vrot.slane %v4729_v14, 4  ;;  %v8359_v12 = vpop.f32.mrb[69].mxu0  ;;  %v8363_v23 = vadd.f32 %v8744_v57, %v8743_v58  ;;  %v8745_v36 = vld [vmem:[#allocation21_spill] sm:$0xff]  ;;  %v8746_v27 = vld [vmem:[#allocation22_spill] sm:$0xff]  ;;  %v8747_v56 = vld [vmem:[#allocation27_spill] sm:$0xff] }
 0x1d7   : > { %5120 = vmatmul.mubr.bf16.gmra.mrb[136].mxu0 %v4658_v61  ;;  %v8365_v6 = vpop.f32.mrb[70].mxu0  ;;  %v8368_v19 = vrot.slane %v3984_v8, 3  ;;  %v8372_v45 = vadd.f32 %v8746_v27, %v8745_v36  ;;  %v3988_v61 = vrot.slane %v3986_v63, 1  ;;  %v4694_v2 = vrot.slane %v3986_v63, 4 }
 0x1d8   : > { %v4692_v9 = vsel %vm935_vm1, %v4683_v50, %v4691_v34  ;;  %v4732_v1 = vor.u32 %v4731_v39, %v4728_v33  ;;  %v8374_v17 = vpop.f32.mrb[71].mxu0  ;;  %v6209_v59 = vadd.f32 %v8092_v49, %v8090_v54  ;;  %v6212_v14 = vadd.f32 %v8104_v42, %v8098_v25  ;;  %v8748_v50 = vld [vmem:[#allocation29_spill] sm:$0xff]  ;;  %v8750_v33 = vld [vmem:[#allocation31_spill] sm:$0xff]  ;;  %v8751_v39 = vld [vmem:[#allocation32_spill] sm:$0xff] }
 0x1d9   : > { %6685 = vmatprep.mubr.bf16.mxu1 %v4692_v9  ;;  %v8382_v34 = vadd.f32 %v8748_v50, %v8747_v56  ;;  %v8386_v58 = vadd.f32 %v8751_v39, %v8750_v33  ;;  %v6215_v57 = vadd.f32 %v8129_v16, %v8122_v38  ;;  %v3989_v63 = vor.u32 %v3988_v61, %v3984_v8  ;;  %v8753_v25 = vld [vmem:[#allocation34_spill] sm:$0xff]  ;;  %v8757_v56 = vld [vmem:[#allocation37_spill] sm:$0xff] }
 0x1da   : > { %v4733_v9 = vsel %vm935_vm1, %v4732_v1, %v4732_v1  ;;  %v4695_v36 = vor.u32 %v4694_v2, %v8368_v19  ;;  %v6218_v54 = vadd.f32 %v8136_v41, %v8132_v52  ;;  %v8396_v49 = vadd.f32 %v8067_v40, %v8058_v43  ;;  %v8755_v43 = vld [vmem:[#allocation48_spill] sm:$0xff] }
 0x1db   : > { %8749 = vst [vmem:[#allocation14_spill] sm:$0xff] %v8382_v34  ;;  %8752 = vst [vmem:[#allocation16_spill] sm:$0xff] %v8386_v58  ;;  %6686 = vmatmul.mubr.bf16.gmra.mrb[12].mxu1 %v4733_v9  ;;  %v8400_v42 = vadd.f32 %v8753_v25, %v8073_v51  ;;  %v6221_v38 = vadd.f32 %v8160_v30, %v8154_v10  ;;  %v3994_v8 = vsel %vm613_vm0, %v3989_v63, %v3988_v61  ;;  %v8756_v2 = vld [vmem:[#allocation36_spill] sm:$0xff]  ;;  %v8758_v10 = vld [vmem:[#allocation38_spill] sm:$0xff] }
 0x1dc   : > { %v4709_v1 = vshrl.u32 %v3989_v63, 16  ;;  %v4712_v19 = vshll.u32 %v3989_v63, 16  ;;  %v4701_v52 = vshrl.u32 %v3994_v8, 16  ;;  %v4704_v41 = vshll.u32 %v3994_v8, 16  ;;  %v8759_v30 = vld [vmem:[#allocation39_spill] sm:$0xff] }
 0x1dd   : > { %8754 = vst [vmem:[#allocation17_spill] sm:$0xff] %v8400_v42  ;;  %v8404_v16 = vpop.f32.mrb[72].mxu1  ;;  %v6224_v40 = vadd.f32 %v8755_v43, %v8165_v11  ;;  %v6339_v51 = vadd.f32 %v8757_v56, %v8756_v2  ;;  %v6342_v9 = vadd.f32 %v8759_v30, %v8758_v10  ;;  %v6227_v61 = vadd.f32 %v8189_v28, %v8182_v20  ;;  %v8762_v42 = vld [vmem:[#allocation46_spill] sm:$0xff]  ;;  %v8763_v10 = vld [vmem:[#allocation47_spill] sm:$0xff] }
 0x1de   : > { %v8407_v27 = vpop.f32.mrb[73].mxu1  ;;  %v4711_v33 = vrot.slane %v4709_v1, 3  ;;  %v4714_v39 = vrot.slane %v4712_v19, 4  ;;  %v4703_v25 = vrot.slane %v4701_v52, 3  ;;  %v4706_v58 = vrot.slane %v4704_v41, 4  ;;  %v8760_v1 = vld [vmem:[#allocation44_spill] sm:$0xff] }
 0x1df   : > { %v6376_v50 = vpop.f32.mrb[74].mxu1  ;;  %v8418_v8 = vadd.f32 %v6339_v51, %v8343_v7  ;;  %v6230_v11 = vadd.f32 %v8197_v31, %v8192_v13  ;;  %v8422_v2 = vadd.f32 %v6342_v9, %v6206_v0  ;;  %v8761_v19 = vld [vmem:[#allocation45_spill] sm:$0xff]  ;;  %v6348_v30 = vadd.f32 %v8763_v10, %v8762_v42  ;;  %v8764_v52 = vld [vmem:[#allocation51_spill] sm:$0xff]  ;;  %v8767_v51 = vld [vmem:[#allocation56_spill] sm:$0xff] }
 0x1e0   : > { %v6377_v63 = vpop.f32.mrb[75].mxu1  ;;  %v4715_v43 = vor.u32 %v4714_v39, %v4711_v33  ;;  %v6345_v56 = vadd.f32 %v8761_v19, %v8760_v1  ;;  %v4707_v34 = vor.u32 %v4706_v58, %v4703_v25  ;;  %v6233_v20 = vadd.f32 %v8222_v4, %v8219_v3  ;;  %v8769_v39 = vld [vmem:[#allocation58_spill] sm:$0xff]  ;;  %v8774_v1 = vld [vmem:[#allocation59_spill] sm:$0xff]  ;;  %v8775_v19 = vld [vmem:[#allocation12_spill] sm:$0xff] }
 0x1e1   : > { %v6236_v28 = vadd.f32 %v8226_v32, %v8224_v26  ;;  %v6351_v7 = vadd.f32 %v8210_v55, %v8206_v60  ;;  %v8436_v0 = vadd.f32 %v6348_v30, %v6212_v14  ;;  %v6354_v41 = vadd.f32 %v8764_v52, %v8212_v5  ;;  %v8765_v26 = vld [vmem:[#allocation53_spill] sm:$0xff]  ;;  %v8766_v60 = vld [vmem:[#allocation55_spill] sm:$0xff] }
 0x1e2   : > { %v6571_v13 = vpop.f32.mrb[72].mxu0  ;;  %v8434_v31 = vadd.f32 %v6345_v56, %v6209_v59  ;;  %v6239_v58 = vadd.f32 %v8249_v53, %v8247_v48  ;;  %v4716_v3 = vsel %vm935_vm1, %v4707_v34, %v4715_v43  ;;  %v6242_v32 = vadd.f32 %v8267_v62, %v8262_v46  ;;  %v8768_v5 = vld [vmem:[#allocation57_spill] sm:$0xff]  ;;  %v8770_v53 = vld [vmem:[#allocation11_spill] sm:$0xff]  ;;  %v8771_v46 = vld [vmem:[#allocation24_spill] sm:$0xff] }
 0x1e3   : > { %v3164_v42 = vpop.f32.mrb[73].mxu0  ;;  %v8443_v4 = vadd.f32 %v6351_v7, %v6215_v57  ;;  %v6357_v55 = vadd.f32 %v8766_v60, %v8765_v26  ;;  %5127 = vmatprep.mubr.bf16.mxu0 %v4716_v3  ;;  %v8449_v14 = vadd.f32 %v6354_v41, %v6218_v54  ;;  %v6360_v33 = vadd.f32 %v8768_v5, %v8767_v51  ;;  %v8772_v62 = vld [vmem:[#allocation26_spill] sm:$0xff]  ;;  %v8776_v56 = vld [vmem:[#allocation60_spill] sm:$0xff]  ;;  %v8777_v7 = vld [vmem:[#allocation61_spill] sm:$0xff] }
 0x1e4   : > { %v6572_v59 = vpop.f32.mrb[74].mxu0  ;;  %v6245_v48 = vadd.f32 %v8281_v37, %v8769_v39  ;;  %v6248_v34 = vadd.f32 %v8770_v53, %v8287_v47  ;;  %5128 = vmatmul.mubr.bf16.gmra.mrb[140].mxu0 %v4695_v36  ;;  %v6363_v25 = vadd.f32 %v8772_v62, %v8771_v46  ;;  %v8773_v43 = vld [vmem:[#allocation30_spill] sm:$0xff]  ;;  %v3141_v10 = vadd.f32 %v8776_v56, %v8775_v19  ;;  %v8778_v37 = vld [vmem:[#allocation5_spill] sm:$0xff]  ;;  %v8779_v41 = vld [vmem:[#allocation15_spill] sm:$0xff] }
 0x1e5   : > { %v3167_v57 = vpop.f32.mrb[75].mxu0  ;;  %v8457_v9 = vadd.f32 %v6357_v55, %v6221_v38  ;;  %v6366_v54 = vadd.f32 %v8774_v1, %v8773_v43  ;;  %v8465_v30 = vadd.f32 %v6360_v33, %v6224_v40  ;;  %v3133_v52 = vadd.f32 %v8778_v37, %v8777_v7  ;;  %v8780_v47 = vld [vmem:[#allocation62_spill] sm:$0xff]  ;;  %v8781_v36 = vld [vmem:[#allocation7_spill] sm:$0xff]  ;;  %v8783_v40 = vld [vmem:[#allocation40_spill] sm:$0xff] }
 0x1e6   : > { %v3144_v3 = vadd.f32 %v8780_v47, %v8779_v41  ;;  %v3136_v38 = vadd.f32 %v8781_v36, %v8328_v18  ;;  %v8473_v26 = vadd.f32 %v6363_v25, %v6227_v61  ;;  %v8782_v55 = vld [vmem:[#allocation3_spill] sm:$0xff]  ;;  %v6369_v5 = vadd.f32 %v8348_v44, %v8346_v24  ;;  %v8784_v39 = vld [vmem:[#allocation4_spill] sm:$0xff]  ;;  %v8785_v46 = vld [vmem:[#allocation41_spill] sm:$0xff] }
 0x1e7   : > { %v8475_v60 = vadd.f32 %v6366_v54, %v6230_v11  ;;  %v3446_v51 = vadd.f32 %v8782_v55, %v3141_v10  ;;  %v3438_v33 = vadd.f32 %v8783_v40, %v3133_v52  ;;  %v6372_v43 = vadd.f32 %v8354_v15, %v8350_v35  ;;  %v8786_v18 = vld [vmem:[#allocation33_spill] sm:$0xff]  ;;  %v8787_v11 = vld [vmem:[#allocation23_spill] sm:$0xff]  ;;  %v8792_v52 = vld [vmem:[#allocation10_spill] sm:$0xff] }
 0x1e8   : > { %v3449_v53 = vadd.f32 %v8784_v39, %v3144_v3  ;;  %v3441_v62 = vadd.f32 %v8785_v46, %v3136_v38  ;;  %v8485_v1 = vadd.f32 %v6369_v5, %v6233_v20  ;;  %v3157_v61 = vadd.f32 %v8357_v22, %v8786_v18  ;;  %v8788_v54 = vld [vmem:[#allocation35_spill] sm:$0xff]  ;;  %v8789_v19 = vld [vmem:[#allocation25_spill] sm:$0xff]  ;;  %v8791_v22 = vld [vmem:[#allocation52_spill] sm:$0xff] }
 0x1e9   : > { %v3149_v25 = vadd.f32 %v8787_v11, %v8359_v12  ;;  %v3160_v24 = vadd.f32 %v8365_v6, %v8788_v54  ;;  %v8493_v44 = vadd.f32 %v6372_v43, %v6236_v28  ;;  %v3152_v56 = vadd.f32 %v8789_v19, %v8374_v17  ;;  %v8790_v20 = vld [vmem:[#allocation9_spill] sm:$0xff]  ;;  %v8794_v28 = vld [vmem:[#allocation6_spill] sm:$0xff]  ;;  %v8797_v5 = vld [vmem:[#allocation43_spill] sm:$0xff] }
 0x1ea   : > { %v6375_v10 = vadd.f32 %v8407_v27, %v8404_v16  ;;  %v6378_v35 = vadd.f32 %v6377_v63, %v6376_v50  ;;  %v8500_v7 = vadd.f32 %v8790_v20, %v3157_v61  ;;  %v8793_v41 = vld [vmem:[#allocation49_spill] sm:$0xff]  ;;  %v8795_v38 = vld [vmem:[#allocation42_spill] sm:$0xff]  ;;  %v3168_v40 = vadd.f32 %v8797_v5, %v3167_v57 }
 0x1eb   : > { %v3454_v37 = vadd.f32 %v8791_v22, %v3149_v25  ;;  %v3465_v12 = vadd.f32 %v8792_v52, %v3160_v24  ;;  %v3173_v47 = vadd.f32 %v6571_v13, %v8793_v41  ;;  %v3457_v3 = vadd.f32 %v8794_v28, %v3152_v56  ;;  %v8796_v63 = vld [vmem:[#allocation50_spill] sm:$0xff]  ;;  %v8799_v25 = vld [vmem:[#allocation8_spill] sm:$0xff] }
 0x1ec   : > { %v6379_v15 = vpop.f32.mrb[76].mxu1  ;;  %v8506_v36 = vadd.f32 %v6375_v10, %v6239_v58  ;;  %v8508_v17 = vadd.f32 %v6378_v35, %v6242_v32  ;;  %v3165_v16 = vadd.f32 %v8795_v38, %v3164_v42  ;;  %v3176_v55 = vadd.f32 %v6572_v59, %v8796_v63  ;;  %v8801_v56 = vld [vmem:[#allocation14_spill] sm:$0xff]  ;;  %v8803_v35 = vld [vmem:[#allocation17_spill] sm:$0xff] }
 0x1ed   : > { %v6380_v6 = vpop.f32.mrb[77].mxu1  ;;  %v8512_v50 = vadd.f32 %v8363_v23, %v3173_v47  ;;  %v3473_v32 = vadd.f32 %v8336_v29, %v3168_v40  ;;  %v8798_v23 = vld [vmem:[#allocation13_spill] sm:$0xff]  ;;  %v8802_v29 = vld [vmem:[#allocation54_spill] sm:$0xff] }
 0x1ee   : > { %v6382_v27 = vpop.f32.mrb[78].mxu1  ;;  %v6381_v39 = vadd.f32 %v6380_v6, %v6379_v15  ;;  %v3470_v13 = vadd.f32 %v8332_v21, %v3165_v16  ;;  %v8518_v58 = vadd.f32 %v8372_v45, %v3176_v55  ;;  %v8800_v21 = vld [vmem:[#allocation28_spill] sm:$0xff] }
 0x1ef   : > { %v6383_v46 = vpop.f32.mrb[79].mxu1 }
 0x1f0   : > { %v6384_v43 = vadd.f32 %v6383_v46, %v6382_v27  ;;  %v8521_v18 = vadd.f32 %v6381_v39, %v6245_v48 }
 0x1f1   : > { %v6575_v42 = vpop.f32.mrb[76].mxu0 }
 0x1f2   : > { %v8523_v61 = vadd.f32 %v6384_v43, %v6248_v34  ;;  %v3189_v11 = vadd.f32 %v6575_v42, %v8798_v23  ;;  %v3180_v59 = vpop.f32.mrb[77].mxu0  ;;  %v8804_v34 = vld [vmem:[#allocation16_spill] sm:$0xff] }
 0x1f3   : > { %v3181_v57 = vadd.f32 %v8799_v25, %v3180_v59  ;;  %v6576_v54 = vpop.f32.mrb[78].mxu0 }
 0x1f4   : > { %v8528_v24 = vadd.f32 %v8396_v49, %v3189_v11  ;;  %v3192_v19 = vadd.f32 %v6576_v54, %v8800_v21  ;;  %v3183_v45 = vpop.f32.mrb[79].mxu0 }
 0x1f5   : > { %v3486_v10 = vadd.f32 %v8801_v56, %v3181_v57  ;;  %v3184_v48 = vadd.f32 %v8802_v29, %v3183_v45 }
 0x1f6   : > { %v8534_v15 = vadd.f32 %v8803_v35, %v3192_v19 }
 0x1f7   : > { %v3489_v20 = vadd.f32 %v8804_v34, %v3184_v48 }
 0x1fa   : > { %v6425_v22 = vpop.f32.mrb[80].mxu0 }
 0x1fb   : > { %v6426_v52 = vpop.f32.mrb[81].mxu0 }
 0x1fc   : > { %v6427_v41 = vadd.f32 %v6426_v52, %v6425_v22  ;;  %v6428_v47 = vpop.f32.mrb[82].mxu0 }
 0x1fd   : > { %v6429_v6 = vpop.f32.mrb[83].mxu0 }
 0x1fe   : > { %v6430_v28 = vadd.f32 %v6429_v6, %v6428_v47  ;;  %v6711_v49 = vadd.f32 %v6427_v41, %v3438_v33 }
 0x200   : > { %v8537_v38 = vadd.f32 %v6430_v28, %v3441_v62 }
 0x202   : > { %v6431_v16 = vpop.f32.mrb[84].mxu0 }
 0x203   : > { %v6432_v27 = vpop.f32.mrb[85].mxu0 }
 0x204   : > { %v6433_v63 = vadd.f32 %v6432_v27, %v6431_v16  ;;  %v6434_v55 = vpop.f32.mrb[86].mxu0 }
 0x205   : > { %v6435_v5 = vpop.f32.mrb[87].mxu0 }
 0x206   : > { %v6436_v40 = vadd.f32 %v6435_v5, %v6434_v55  ;;  %v6707_v39 = vadd.f32 %v6433_v63, %v3446_v51 }
 0x208   : > { %v6715_v46 = vadd.f32 %v6436_v40, %v3449_v53 }
 0x20a   : > { %v6437_v43 = vpop.f32.mrb[88].mxu0 }
 0x20b   : > { %v6438_v42 = vpop.f32.mrb[89].mxu0 }
 0x20c   : > { %v6439_v23 = vadd.f32 %v6438_v42, %v6437_v43  ;;  %v6440_v11 = vpop.f32.mrb[90].mxu0 }
 0x20d   : > { %v6441_v59 = vpop.f32.mrb[91].mxu0 }
 0x20e   : > { %v6442_v25 = vadd.f32 %v6441_v59, %v6440_v11  ;;  %v8539_v57 = vadd.f32 %v6439_v23, %v3454_v37 }
 0x210   : > { %v8541_v54 = vadd.f32 %v6442_v25, %v3457_v3 }
 0x212   : > { %v6443_v33 = vpop.f32.mrb[92].mxu0 }
 0x213   : > { %v6444_v62 = vpop.f32.mrb[93].mxu0 }
 0x214   : > { %v6445_v21 = vadd.f32 %v6444_v62, %v6443_v33  ;;  %v6446_v19 = vpop.f32.mrb[94].mxu0 }
 0x215   : > { %v6447_v45 = vpop.f32.mrb[95].mxu0 }
 0x216   : > { %v6448_v56 = vadd.f32 %v6447_v45, %v6446_v19  ;;  %v8544_v29 = vadd.f32 %v6445_v21, %v8500_v7 }
 0x218   : > { %v8546_v51 = vadd.f32 %v6448_v56, %v3465_v12 }
 0x21a   : > { %v6449_v53 = vpop.f32.mrb[96].mxu0 }
 0x21b   : > { %v6450_v48 = vpop.f32.mrb[97].mxu0 }
 0x21c   : > { %v6451_v35 = vadd.f32 %v6450_v48, %v6449_v53  ;;  %v6452_v34 = vpop.f32.mrb[98].mxu0 }
 0x21d   : > { %v6453_v22 = vpop.f32.mrb[99].mxu0 }
 0x21e   : > { %v6454_v37 = vadd.f32 %v6453_v22, %v6452_v34  ;;  %v8548_v52 = vadd.f32 %v6451_v35, %v3470_v13 }
 0x220   : > { %v8550_v3 = vadd.f32 %v6454_v37, %v3473_v32 }
 0x227   : > { %v6455_v41 = vpop.f32.mrb[100].mxu0 }
 0x228   : > { %v6456_v47 = vpop.f32.mrb[101].mxu0 }
 0x229   : > { %v6457_v6 = vadd.f32 %v6456_v47, %v6455_v41  ;;  %v6458_v28 = vpop.f32.mrb[102].mxu0 }
 0x22a   : > { %v6459_v16 = vpop.f32.mrb[103].mxu0 }
 0x22b   : > { %v6460_v27 = vadd.f32 %v6459_v16, %v6458_v28  ;;  %v8553_v7 = vadd.f32 %v6457_v6, %v8512_v50 }
 0x22d   : > { %v8556_v12 = vadd.f32 %v6460_v27, %v8518_v58 }
 0x235   : > { %v6461_v63 = vpop.f32.mrb[104].mxu0 }
 0x236   : > { %v6462_v55 = vpop.f32.mrb[105].mxu0 }
 0x237   : > { %v6463_v5 = vadd.f32 %v6462_v55, %v6461_v63  ;;  %v6464_v40 = vpop.f32.mrb[106].mxu0 }
 0x238   : > { %v6465_v13 = vpop.f32.mrb[107].mxu0 }
 0x239   : > { %v6466_v43 = vadd.f32 %v6465_v13, %v6464_v40  ;;  %v8558_v32 = vadd.f32 %v6463_v5, %v3486_v10 }
 0x23b   : > { %v8560_v42 = vadd.f32 %v6466_v43, %v3489_v20 }
 0x244   : > { %v6467_v23 = vpop.f32.mrb[108].mxu0 }
 0x245   : > { %v6468_v11 = vpop.f32.mrb[109].mxu0 }
 0x246   : > { %v6469_v59 = vadd.f32 %v6468_v11, %v6467_v23  ;;  %v6470_v25 = vpop.f32.mrb[110].mxu0 }
 0x247   : > { %v6471_v50 = vpop.f32.mrb[111].mxu0 }
 0x248   : > { %v6472_v33 = vadd.f32 %v6471_v50, %v6470_v25  ;;  %v8563_v58 = vadd.f32 %v6469_v59, %v8528_v24 }
 0x24a   : > { %v6659_v62 = vpop.f32.mrb[80].mxu1  ;;  %v8566_v21 = vadd.f32 %v6472_v33, %v8534_v15 }
 0x24b   : > { %v6708_v19 = vadd.f32 %v6707_v39, %v6659_v62  ;;  %v5170_v45 = vpop.f32.mrb[81].mxu1 }
 0x24c   : > { %v6712_v10 = vadd.f32 %v6711_v49, %v5170_v45  ;;  %v6660_v56 = vpop.f32.mrb[82].mxu1 }
 0x24d   : > { %v6716_v20 = vadd.f32 %v6715_v46, %v6660_v56  ;;  %v5173_v53 = vpop.f32.mrb[83].mxu1  ;;  %v5529_v49 = vmul.f32 %v6708_v19, %v6708_v19 }
 0x24e   : > { %v6720_v24 = vadd.f32 %v8537_v38, %v5173_v53  ;;  %v5527_v35 = vmul.f32 %v6712_v10, %v6712_v10 }
 0x24f   : > { %v6035_v48 = vpack.c.bf16 %v6716_v20, %v6708_v19  ;;  %v5530_v47 = vmul.f32 %v6716_v20, %v6716_v20 }
 0x250   : > { %v6030_v15 = vpack.c.bf16 %v6720_v24, %v6712_v10  ;;  %v5489_v34 = vadd.f32 %v6720_v24, %v6712_v10  ;;  %v5528_v39 = vmul.f32 %v6720_v24, %v6720_v24 }
 0x251   : > { %6122 = vst [vmem:[%s8573_s18 + $0x8] sm:$0xff] %v6035_v48   ;;  %v6473_v37 = vpop.f32.mrb[112].mxu0 }
 0x252   : > { %6031 = vst [vmem:[%s8573_s18] sm:$0xff] %v6030_v15   ;;  %v5490_v46 = vadd.f32 %v6708_v19, %v5489_v34  ;;  %v5559_v22 = vadd.f32 %v5528_v39, %v5527_v35  ;;  %v6474_v41 = vpop.f32.mrb[113].mxu0 }
 0x253   : > { %v6475_v28 = vadd.f32 %v6474_v41, %v6473_v37  ;;  %v6476_v16 = vpop.f32.mrb[114].mxu0 }
 0x254   : > { %v5560_v6 = vadd.f32 %v5559_v22, %v5529_v49  ;;  %v5491_v27 = vadd.f32 %v6716_v20, %v5490_v46  ;;  %v6477_v63 = vpop.f32.mrb[115].mxu0 }
 0x255   : > { %v6478_v55 = vadd.f32 %v6477_v63, %v6476_v16  ;;  %v8579_v5 = vadd.f32 %v8418_v8, %v6475_v28 }
 0x256   : > { %v5561_v38 = vadd.f32 %v5560_v6, %v5530_v47 }
 0x257   : > { %v8582_v13 = vadd.f32 %v8422_v2, %v6478_v55 }
 0x259   : > { %v6663_v40 = vpop.f32.mrb[84].mxu1 }
 0x25a   : > { %v6724_v43 = vadd.f32 %v8544_v29, %v6663_v40  ;;  %v5186_v23 = vpop.f32.mrb[85].mxu1 }
 0x25b   : > { %v6728_v11 = vadd.f32 %v8539_v57, %v5186_v23  ;;  %v6664_v59 = vpop.f32.mrb[86].mxu1 }
 0x25c   : > { %v6732_v25 = vadd.f32 %v8546_v51, %v6664_v59  ;;  %v5189_v50 = vpop.f32.mrb[87].mxu1  ;;  %v5533_v20 = vmul.f32 %v6724_v43, %v6724_v43 }
 0x25d   : > { %v5492_v33 = vadd.f32 %v6728_v11, %v5491_v27  ;;  %v5531_v62 = vmul.f32 %v6728_v11, %v6728_v11  ;;  %v6736_v8 = vadd.f32 %v8541_v54, %v5189_v50 }
 0x25e   : > { %v6045_v19 = vpack.c.bf16 %v6732_v25, %v6724_v43  ;;  %v5534_v48 = vmul.f32 %v6732_v25, %v6732_v25 }
 0x25f   : > { %v5562_v45 = vadd.f32 %v5561_v38, %v5531_v62  ;;  %v6040_v10 = vpack.c.bf16 %v6736_v8, %v6728_v11  ;;  %v5493_v56 = vadd.f32 %v6736_v8, %v5492_v33  ;;  %v5532_v2 = vmul.f32 %v6736_v8, %v6736_v8 }
 0x260   : > { %6124 = vst [vmem:[%s8573_s18 + $0x18] sm:$0xff] %v6045_v19   ;;  %v6479_v24 = vpop.f32.mrb[116].mxu0 }
 0x261   : > { %6123 = vst [vmem:[%s8573_s18 + $0x10] sm:$0xff] %v6040_v10   ;;  %v5494_v29 = vadd.f32 %v6724_v43, %v5493_v56  ;;  %v5563_v53 = vadd.f32 %v5562_v45, %v5532_v2  ;;  %v6480_v57 = vpop.f32.mrb[117].mxu0 }
 0x262   : > { %v6481_v51 = vadd.f32 %v6480_v57, %v6479_v24  ;;  %v6482_v15 = vpop.f32.mrb[118].mxu0 }
 0x263   : > { %v5564_v35 = vadd.f32 %v5563_v53, %v5533_v20  ;;  %v5495_v34 = vadd.f32 %v6732_v25, %v5494_v29  ;;  %v6483_v39 = vpop.f32.mrb[119].mxu0 }
 0x264   : > { %v6484_v49 = vadd.f32 %v6483_v39, %v6482_v15  ;;  %v8591_v46 = vadd.f32 %v8434_v31, %v6481_v51 }
 0x265   : > { %v5565_v54 = vadd.f32 %v5564_v35, %v5534_v48 }
 0x266   : > { %v6667_v22 = vpop.f32.mrb[88].mxu1  ;;  %v8594_v37 = vadd.f32 %v8436_v0, %v6484_v49 }
 0x267   : > { %v6740_v41 = vadd.f32 %v8553_v7, %v6667_v22  ;;  %v5202_v47 = vpop.f32.mrb[89].mxu1 }
 0x268   : > { %v6744_v6 = vadd.f32 %v8548_v52, %v5202_v47  ;;  %v6668_v28 = vpop.f32.mrb[90].mxu1 }
 0x269   : > { %v6748_v16 = vadd.f32 %v8556_v12, %v6668_v28  ;;  %v5205_v27 = vpop.f32.mrb[91].mxu1  ;;  %v5537_v11 = vmul.f32 %v6740_v41, %v6740_v41 }
 0x26a   : > { %v5496_v63 = vadd.f32 %v6744_v6, %v5495_v34  ;;  %v5535_v55 = vmul.f32 %v6744_v6, %v6744_v6  ;;  %v6752_v31 = vadd.f32 %v8550_v3, %v5205_v27 }
 0x26b   : > { %v6055_v38 = vpack.c.bf16 %v6748_v16, %v6740_v41  ;;  %v5538_v52 = vmul.f32 %v6748_v16, %v6748_v16 }
 0x26c   : > { %v5566_v40 = vadd.f32 %v5565_v54, %v5535_v55  ;;  %v6050_v43 = vpack.c.bf16 %v6752_v31, %v6744_v6  ;;  %v5497_v23 = vadd.f32 %v6752_v31, %v5496_v63  ;;  %v5536_v0 = vmul.f32 %v6752_v31, %v6752_v31 }
 0x26d   : > { %6126 = vst [vmem:[%s8573_s18 + $0x28] sm:$0xff] %v6055_v38  }
 0x26e   : > { %6125 = vst [vmem:[%s8573_s18 + $0x20] sm:$0xff] %v6050_v43   ;;  %v5498_v7 = vadd.f32 %v6740_v41, %v5497_v23  ;;  %v5567_v59 = vadd.f32 %v5566_v40, %v5536_v0 }
 0x26f   : > { %v6485_v25 = vpop.f32.mrb[120].mxu0 }
 0x270   : > { %v5568_v50 = vadd.f32 %v5567_v59, %v5537_v11  ;;  %v6486_v33 = vpop.f32.mrb[121].mxu0  ;;  %v5499_v12 = vadd.f32 %v6748_v16, %v5498_v7 }
 0x271   : > { %v6487_v62 = vadd.f32 %v6486_v33, %v6485_v25  ;;  %v6488_v8 = vpop.f32.mrb[122].mxu0 }
 0x272   : > { %v6489_v19 = vpop.f32.mrb[123].mxu0  ;;  %v5569_v45 = vadd.f32 %v5568_v50, %v5538_v52 }
 0x273   : > { %v6490_v3 = vadd.f32 %v6489_v19, %v6488_v8  ;;  %v8603_v10 = vadd.f32 %v8443_v4, %v6487_v62 }
 0x275   : > { %v8606_v2 = vadd.f32 %v8449_v14, %v6490_v3 }
 0x276   : > { %v6671_v56 = vpop.f32.mrb[92].mxu1 }
 0x277   : > { %v6756_v20 = vadd.f32 %v8563_v58, %v6671_v56  ;;  %v5218_v29 = vpop.f32.mrb[93].mxu1 }
 0x278   : > { %v6760_v53 = vadd.f32 %v8558_v32, %v5218_v29  ;;  %v6672_v24 = vpop.f32.mrb[94].mxu1 }
 0x279   : > { %v6764_v57 = vadd.f32 %v8566_v21, %v6672_v24  ;;  %v5221_v48 = vpop.f32.mrb[95].mxu1  ;;  %v5541_v54 = vmul.f32 %v6756_v20, %v6756_v20 }
 0x27a   : > { %v5500_v35 = vadd.f32 %v6760_v53, %v5499_v12  ;;  %v5539_v51 = vmul.f32 %v6760_v53, %v6760_v53  ;;  %v6768_v4 = vadd.f32 %v8560_v42, %v5221_v48 }
 0x27b   : > { %v6065_v15 = vpack.c.bf16 %v6764_v57, %v6756_v20  ;;  %v5542_v47 = vmul.f32 %v6764_v57, %v6764_v57 }
 0x27c   : > { %v5570_v34 = vadd.f32 %v5569_v45, %v5539_v51  ;;  %v6060_v39 = vpack.c.bf16 %v6768_v4, %v6760_v53  ;;  %v5501_v49 = vadd.f32 %v6768_v4, %v5500_v35  ;;  %v5540_v14 = vmul.f32 %v6768_v4, %v6768_v4 }
 0x27d   : > { %6128 = vst [vmem:[%s8573_s18 + $0x38] sm:$0xff] %v6065_v15   ;;  %v6491_v41 = vpop.f32.mrb[124].mxu0 }
 0x27e   : > { %6127 = vst [vmem:[%s8573_s18 + $0x30] sm:$0xff] %v6060_v39   ;;  %v5502_v58 = vadd.f32 %v6756_v20, %v5501_v49  ;;  %v5571_v22 = vadd.f32 %v5570_v34, %v5540_v14  ;;  %v6492_v32 = vpop.f32.mrb[125].mxu0 }
 0x27f   : > { %v6493_v21 = vadd.f32 %v6492_v32, %v6491_v41  ;;  %v6494_v28 = vpop.f32.mrb[126].mxu0 }
 0x280   : > { %v5572_v6 = vadd.f32 %v5571_v22, %v5541_v54  ;;  %v5503_v16 = vadd.f32 %v6764_v57, %v5502_v58  ;;  %v6495_v27 = vpop.f32.mrb[127].mxu0 }
 0x281   : > { %v6496_v63 = vadd.f32 %v6495_v27, %v6494_v28  ;;  %v6782_v55 = vadd.f32 %v8457_v9, %v6493_v21 }
 0x282   : > { %v5573_v42 = vadd.f32 %v5572_v6, %v5542_v47 }
 0x283   : > { %v6788_v31 = vadd.f32 %v8465_v30, %v6496_v63 }
 0x284   : > { %v6675_v38 = vpop.f32.mrb[0].mxu1 }
 0x285   : > { %v6771_v40 = vadd.f32 %v8591_v46, %v6675_v38  ;;  %v5234_v43 = vpop.f32.mrb[1].mxu1 }
 0x286   : > { %v6774_v23 = vadd.f32 %v8579_v5, %v5234_v43  ;;  %v6676_v0 = vpop.f32.mrb[2].mxu1 }
 0x287   : > { %v6777_v11 = vadd.f32 %v8594_v37, %v6676_v0  ;;  %v5237_v7 = vpop.f32.mrb[3].mxu1  ;;  %v5545_v62 = vmul.f32 %v6771_v40, %v6771_v40 }
 0x288   : > { %v5504_v59 = vadd.f32 %v6774_v23, %v5503_v16  ;;  %v5543_v25 = vmul.f32 %v6774_v23, %v6774_v23  ;;  %v6780_v52 = vadd.f32 %v8582_v13, %v5237_v7 }
 0x289   : > { %v6075_v50 = vpack.c.bf16 %v6777_v11, %v6771_v40  ;;  %v5546_v45 = vmul.f32 %v6777_v11, %v6777_v11 }
 0x28a   : > { %v5574_v9 = vadd.f32 %v5573_v42, %v5543_v25  ;;  %v6070_v33 = vpack.c.bf16 %v6780_v52, %v6774_v23  ;;  %v5505_v30 = vadd.f32 %v6780_v52, %v5504_v59  ;;  %v5544_v12 = vmul.f32 %v6780_v52, %v6780_v52 }
 0x28b   : > { %6130 = vst [vmem:[%s8573_s18 + $0x48] sm:$0xff] %v6075_v50  }
 0x28c   : > { %6129 = vst [vmem:[%s8573_s18 + $0x40] sm:$0xff] %v6070_v33   ;;  %v5506_v46 = vadd.f32 %v6771_v40, %v5505_v30  ;;  %v5575_v8 = vadd.f32 %v5574_v9, %v5544_v12  ;;  %v6497_v19 = vpop.f32.mrb[128].mxu0 }
 0x28d   : > { %v6498_v5 = vpop.f32.mrb[129].mxu0 }
 0x28e   : > { %v5576_v3 = vadd.f32 %v5575_v8, %v5545_v62  ;;  %v6499_v37 = vadd.f32 %v6498_v5, %v6497_v19  ;;  %v6500_v56 = vpop.f32.mrb[130].mxu0  ;;  %v5507_v20 = vadd.f32 %v6777_v11, %v5506_v46 }
 0x28f   : > { %v6501_v29 = vpop.f32.mrb[131].mxu0 }
 0x290   : > { %v6502_v53 = vadd.f32 %v6501_v29, %v6500_v56  ;;  %v5577_v13 = vadd.f32 %v5576_v3, %v5546_v45  ;;  %v6797_v24 = vadd.f32 %v8473_v26, %v6499_v37 }
 0x292   : > { %v6803_v48 = vadd.f32 %v8475_v60, %v6502_v53 }
 0x293   : > { %v6679_v57 = vpop.f32.mrb[4].mxu1 }
 0x294   : > { %v6783_v35 = vadd.f32 %v6782_v55, %v6679_v57  ;;  %v5250_v51 = vpop.f32.mrb[5].mxu1 }
 0x295   : > { %v6786_v4 = vadd.f32 %v8603_v10, %v5250_v51  ;;  %v6680_v15 = vpop.f32.mrb[6].mxu1 }
 0x296   : > { %v6789_v34 = vadd.f32 %v6788_v31, %v6680_v15  ;;  %v5253_v39 = vpop.f32.mrb[7].mxu1  ;;  %v5549_v47 = vmul.f32 %v6783_v35, %v6783_v35 }
 0x297   : > { %v5508_v49 = vadd.f32 %v6786_v4, %v5507_v20  ;;  %v5547_v14 = vmul.f32 %v6786_v4, %v6786_v4  ;;  %v6792_v54 = vadd.f32 %v8606_v2, %v5253_v39 }
 0x298   : > { %v6085_v58 = vpack.c.bf16 %v6789_v34, %v6783_v35  ;;  %v5550_v28 = vmul.f32 %v6789_v34, %v6789_v34 }
 0x299   : > { %v5578_v22 = vadd.f32 %v5577_v13, %v5547_v14  ;;  %v6080_v41 = vpack.c.bf16 %v6792_v54, %v6786_v4  ;;  %v5509_v26 = vadd.f32 %v6792_v54, %v5508_v49  ;;  %v5548_v32 = vmul.f32 %v6792_v54, %v6792_v54 }
 0x29a   : > { %6132 = vst [vmem:[%s8573_s18 + $0x58] sm:$0xff] %v6085_v58  }
 0x29b   : > { %6131 = vst [vmem:[%s8573_s18 + $0x50] sm:$0xff] %v6080_v41   ;;  %v5510_v60 = vadd.f32 %v6783_v35, %v5509_v26  ;;  %v5579_v6 = vadd.f32 %v5578_v22, %v5548_v32  ;;  %v6503_v21 = vpop.f32.mrb[132].mxu0 }
 0x29c   : > { %v6504_v16 = vpop.f32.mrb[133].mxu0 }
 0x29d   : > { %v5580_v10 = vadd.f32 %v5579_v6, %v5549_v47  ;;  %v5511_v27 = vadd.f32 %v6789_v34, %v5510_v60  ;;  %v6505_v63 = vadd.f32 %v6504_v16, %v6503_v21  ;;  %v6506_v42 = vpop.f32.mrb[134].mxu0 }
 0x29e   : > { %v6507_v55 = vpop.f32.mrb[135].mxu0 }
 0x29f   : > { %v5581_v31 = vadd.f32 %v5580_v10, %v5550_v28  ;;  %v6508_v2 = vadd.f32 %v6507_v55, %v6506_v42  ;;  %v6794_v38 = vadd.f32 %v8485_v1, %v6505_v63 }
 0x2a1   : > { %v6683_v40 = vpop.f32.mrb[8].mxu1  ;;  %v6800_v43 = vadd.f32 %v8493_v44, %v6508_v2 }
 0x2a2   : > { %v6795_v23 = vadd.f32 %v6794_v38, %v6683_v40  ;;  %v5266_v0 = vpop.f32.mrb[9].mxu1 }
 0x2a3   : > { %v6798_v11 = vadd.f32 %v6797_v24, %v5266_v0  ;;  %v6684_v7 = vpop.f32.mrb[10].mxu1 }
 0x2a4   : > { %v6801_v59 = vadd.f32 %v6800_v43, %v6684_v7  ;;  %v5269_v25 = vpop.f32.mrb[11].mxu1  ;;  %v5553_v1 = vmul.f32 %v6795_v23, %v6795_v23 }
 0x2a5   : > { %v5512_v52 = vadd.f32 %v6798_v11, %v5511_v27  ;;  %v5551_v50 = vmul.f32 %v6798_v11, %v6798_v11  ;;  %v6804_v9 = vadd.f32 %v6803_v48, %v5269_v25 }
 0x2a6   : > { %v6095_v33 = vpack.c.bf16 %v6801_v59, %v6795_v23  ;;  %v5554_v5 = vmul.f32 %v6801_v59, %v6801_v59 }
 0x2a7   : > { %v5582_v30 = vadd.f32 %v5581_v31, %v5551_v50  ;;  %v6090_v12 = vpack.c.bf16 %v6804_v9, %v6798_v11  ;;  %v5513_v62 = vadd.f32 %v6804_v9, %v5512_v52  ;;  %v5552_v46 = vmul.f32 %v6804_v9, %v6804_v9 }
 0x2a8   : > { %6134 = vst [vmem:[%s8573_s18 + $0x68] sm:$0xff] %v6095_v33  }
 0x2a9   : > { %6133 = vst [vmem:[%s8573_s18 + $0x60] sm:$0xff] %v6090_v12   ;;  %v5514_v8 = vadd.f32 %v6795_v23, %v5513_v62  ;;  %v5583_v44 = vadd.f32 %v5582_v30, %v5552_v46 }
 0x2aa   : > { %v6509_v19 = vpop.f32.mrb[136].mxu0 }
 0x2ab   : > { %v5584_v45 = vadd.f32 %v5583_v44, %v5553_v1  ;;  %v6510_v3 = vpop.f32.mrb[137].mxu0  ;;  %v5515_v37 = vadd.f32 %v6801_v59, %v5514_v8 }
 0x2ac   : > { %v6511_v56 = vadd.f32 %v6510_v3, %v6509_v19  ;;  %v6512_v20 = vpop.f32.mrb[138].mxu0 }
 0x2ad   : > { %v6513_v29 = vpop.f32.mrb[139].mxu0  ;;  %v5585_v53 = vadd.f32 %v5584_v45, %v5554_v5 }
 0x2ae   : > { %v6514_v13 = vadd.f32 %v6513_v29, %v6512_v20  ;;  %v6809_v24 = vadd.f32 %v8506_v36, %v6511_v56  ;;  %v6687_v57 = vpop.f32.mrb[12].mxu1 }
 0x2af   : > { %v5282_v48 = vpop.f32.mrb[13].mxu1 }
 0x2b0   : > { %v6815_v35 = vadd.f32 %v8508_v17, %v6514_v13  ;;  %v6810_v51 = vadd.f32 %v6809_v24, %v5282_v48  ;;  %v6688_v4 = vpop.f32.mrb[14].mxu1 }
 0x2b1   : > { %v5285_v15 = vpop.f32.mrb[15].mxu1 }
 0x2b2   : > { %v5516_v34 = vadd.f32 %v6810_v51, %v5515_v37  ;;  %v5555_v39 = vmul.f32 %v6810_v51, %v6810_v51  ;;  %v6816_v49 = vadd.f32 %v6815_v35, %v5285_v15 }
 0x2b4   : > { %v5586_v14 = vadd.f32 %v5585_v53, %v5555_v39  ;;  %v6100_v54 = vpack.c.bf16 %v6816_v49, %v6810_v51  ;;  %v5517_v58 = vadd.f32 %v6816_v49, %v5516_v34  ;;  %v5556_v22 = vmul.f32 %v6816_v49, %v6816_v49 }
 0x2b6   : > { %6135 = vst [vmem:[%s8573_s18 + $0x70] sm:$0xff] %v6100_v54   ;;  %v5587_v41 = vadd.f32 %v5586_v14, %v5556_v22 }
 0x2b7   : > { %v6515_v26 = vpop.f32.mrb[140].mxu0 }
 0x2b8   : > { %v6516_v32 = vpop.f32.mrb[141].mxu0 }
 0x2b9   : > { %v6517_v36 = vadd.f32 %v6516_v32, %v6515_v26  ;;  %v6518_v47 = vpop.f32.mrb[142].mxu0 }
 0x2ba   : > { %v6519_v60 = vpop.f32.mrb[143].mxu0 }
 0x2bb   : > { %v6806_v17 = vadd.f32 %v8521_v18, %v6517_v36  ;;  %v6520_v6 = vadd.f32 %v6519_v60, %v6518_v47 }
 0x2bd   : > { %v6807_v21 = vadd.f32 %v6806_v17, %v6687_v57  ;;  %v6812_v28 = vadd.f32 %v8523_v61, %v6520_v6 }
 0x2bf   : > { %v5518_v10 = vadd.f32 %v6807_v21, %v5517_v58  ;;  %v5557_v16 = vmul.f32 %v6807_v21, %v6807_v21  ;;  %v6813_v27 = vadd.f32 %v6812_v28, %v6688_v4 }
 0x2c1   : > { %v5588_v63 = vadd.f32 %v5587_v41, %v5557_v16  ;;  %v6105_v42 = vpack.c.bf16 %v6813_v27, %v6807_v21  ;;  %v5519_v55 = vadd.f32 %v6813_v27, %v5518_v10  ;;  %v5558_v31 = vmul.f32 %v6813_v27, %v6813_v27 }
 0x2c3   : > { %6136 = vst [vmem:[%s8573_s18 + $0x78] sm:$0xff] %v6105_v42   ;;  %v5520_v2 = vrot.slane %v5519_v55, 4  ;;  %v5589_v38 = vadd.f32 %v5588_v63, %v5558_v31 }
 0x2c5   : > { %v5521_v40 = vadd.f32 %v5520_v2, %v5519_v55  ;;  %v5590_v43 = vrot.slane %v5589_v38, 4 }
 0x2c7   : > { %v5522_v23 = vrot.slane %v5521_v40, 2  ;;  %v5591_v0 = vadd.f32 %v5590_v43, %v5589_v38 }
 0x2c9   : > { %v5523_v18 = vadd.f32 %v5522_v23, %v5521_v40  ;;  %v5592_v11 = vrot.slane %v5591_v0, 2 }
 0x2cb   : > { %v5524_v7 = vrot.slane %v5523_v18, 1  ;;  %v5593_v59 = vadd.f32 %v5592_v11, %v5591_v0 }
 0x2cd   : > { %v5525_v61 = vadd.f32 %v5524_v7, %v5523_v18  ;;  %v5594_v25 = vrot.slane %v5593_v59, 1 }
 0x2cf   : > { %5526 = vst [vmem:[%s268_s15] sm:$0xff] %v5525_v61  ;;  %v5595_v52 = vadd.f32 %v5594_v25, %v5593_v59 }
 0x2d1   : > { %5596 = vst [vmem:[%s272_s19] sm:$0xff] %v5595_v52 }
 0x2d2 PF: > { %s17_s21 = sadd.s32 1, %s6997_s21  }
 0x2d3   : > { %p14_p4 = scmp.ge.s32.totalorder %s17_s21, 4  }
 0x2d5   :  { %16 = sbr.rel (!%p14_p4) target bundleno = 1 (0x1), region = 94 }

</bundles_post_ra>
